<compile_context>
chip_gen: v6e
topology: v6e:2x2x1
jax: 0.10.0
libtpu: 0.0.40
codegen_flags: <defaults>
</compile_context>

<pallas_src>
import jax
import jax.numpy as jnp
import numpy as np
from jax.experimental import pallas as pl
from jax.experimental.pallas import tpu as pltpu


# ---------------------------------------------------------------------------
# in-kernel activation helpers (run in compute_dtype: bf16 on v6e/v7x, f32 otherwise)
# ---------------------------------------------------------------------------
def _erf_approx(x):
    # Abramowitz & Stegun 7.1.26 polynomial (|err| < 1.5e-7 in f32).
    p = 0.3275911
    a1, a2, a3, a4, a5 = 0.254829592, -0.284496736, 1.421413741, -1.453152027, 1.061405429
    ax = jnp.abs(x)
    t = 1.0 / (1.0 + p * ax)
    poly = ((((a5 * t + a4) * t + a3) * t + a2) * t + a1) * t
    y = 1.0 - poly * jnp.exp(-ax * ax)
    return jnp.where(x >= 0, y, -y)


def _apply_activation(x, name):
    if name == "relu":
        return jnp.maximum(x, 0.0)
    if name == "leaky_relu":                       # nn.LeakyReLU default slope 0.01
        return jnp.where(x >= 0, x, 0.01 * x)
    if name == "tanh":
        return jnp.tanh(x)                         # EUP op
    if name == "gelu":                             # exact GELU (nn.GELU default)
        return 0.5 * x * (1.0 + _erf_approx(x * 0.7071067811865476))
    raise ValueError(f"Unknown activation: {name}")


def _round_up(x, m):
    return (x + m - 1) // m * m


# ---------------------------------------------------------------------------
# fused MLP kernel: full layer stack over one (TR, in_dim) slab of rows
# ---------------------------------------------------------------------------
def _make_mlp_kernel(layer_has_act, activation, matmul_dtype, compute_dtype):
    n_layers = len(layer_has_act)

    def kernel(x_ref, *args):
        o_ref = args[-1]
        wrefs = args[:-1]                           # (w0, b0, w1, b1, ...)
        h = x_ref[...].astype(matmul_dtype)         # (TR, in_dim)
        for i in range(n_layers):
            w = wrefs[2 * i][...]                   # (in_p, out_p), pre-transposed, matmul_dtype
            b = wrefs[2 * i + 1][...]               # (1, out_p), compute_dtype
            y = jnp.dot(h, w, preferred_element_type=jnp.float32)   # MXU, f32 acc
            y = y.astype(compute_dtype) + b         # bias add (+ act) in compute dtype
            if layer_has_act[i]:
                y = _apply_activation(y, activation)
            h = y.astype(matmul_dtype) if i + 1 < n_layers else y
        o_ref[...] = h.astype(o_ref.dtype)

    return kernel


# ---------------------------------------------------------------------------
# parameter preparation: cast + width-pad ONCE (not per forward call)
# ---------------------------------------------------------------------------
def prepare_params(params, activation="gelu", *, matmul_dtype=jnp.bfloat16,
                   compute_dtype=None, pad_width_to=128):
    """params: list of (w, b, apply_act) with w shaped (in, out) [pre-transposed
    vs. nn.Linear's (out, in)] and b shaped (1, out).

    Pads every layer's output width (and the next layer's input rows) with
    zeros up to a multiple of `pad_width_to` for lane-dense stores / full MXU
    fill.  Exact for relu / leaky_relu / gelu / tanh since act(0) == 0.
    """
    if activation not in ("relu", "leaky_relu", "gelu", "tanh"):
        raise ValueError(f"Unknown activation: {activation}")
    if compute_dtype is None:
        # bf16 bias-add/activation is the fast path on v6e/v7x;
        # pass compute_dtype=jnp.float32 explicitly on v5e (no bf16 VPU/EUP).
        compute_dtype = matmul_dtype if matmul_dtype == jnp.bfloat16 else jnp.float32

    in_dim = params[0][0].shape[0]
    true_out = params[-1][0].shape[1]

    flat, has_act = [], []
    prev_p = in_dim                      # input features not padded (would need an HBM copy of X)
    for (w, b, act) in params:
        d_in, d_out = w.shape
        d_out_p = _round_up(d_out, pad_width_to)
        w_p = jnp.zeros((prev_p, d_out_p), matmul_dtype)
        w_p = w_p.at[:d_in, :d_out].set(w.astype(matmul_dtype))
        b_p = jnp.zeros((1, d_out_p), compute_dtype)
        b_p = b_p.at[:, :d_out].set(b.reshape(1, d_out).astype(compute_dtype))
        flat += [w_p, b_p]
        has_act.append(bool(act))
        prev_p = d_out_p

    return dict(flat_weights=flat, layer_has_act=tuple(has_act),
                activation=activation, matmul_dtype=matmul_dtype,
                compute_dtype=compute_dtype, in_dim=in_dim,
                out_dim=true_out, padded_out_dim=prev_p)


# ---------------------------------------------------------------------------
# tiling / VMEM budget helpers
# ---------------------------------------------------------------------------
def _choose_row_tile(n_rows, block_rows, min_grid):
    if n_rows <= 8:
        return n_rows                           # one tiny block (== full dim)
    tr = min(block_rows, n_rows)
    # Keep >= min_grid grid steps when there is enough work so the "parallel"
    # row axis can shard across v7x's two TensorCores.
    if min_grid > 1 and n_rows > 8 * min_grid:
        tr = min(tr, pl.cdiv(n_rows, min_grid))
    return max(8, (tr // 8) * 8)                # sublane multiple, never > n_rows


def _vmem_limit_bytes(tr, in_dim, out_p, widths, x_itemsize, out_itemsize,
                      weights_bytes):
    est = (2 * tr * in_dim * x_itemsize         # double-buffered input slab
           + 2 * tr * out_p * out_itemsize      # double-buffered output slab
           + weights_bytes                      # resident (single-buffered) weights
           + 2 * tr * max(widths) * 4)          # live f32 accumulator / intermediates
    est = 2 * est + (8 << 20)                   # compiler scratch + slack
    # >= the 32 MiB scoped default (v6e/v7x), <= ~48 MiB so we stay inside
    # v7x's 64 MiB physical VMEM (v5e/v6e have 128 MiB so also fine).
    return int(min(max(est, 32 << 20), 48 << 20))


# ---------------------------------------------------------------------------
# wrapper
# ---------------------------------------------------------------------------
def mlp_forward(x, prep, *, block_rows=512, min_grid=2, out_dtype=None):
    """Fused MLP forward.  `prep` comes from prepare_params (weights already
    cast/padded, so no per-call HBM pass over the weights)."""
    *lead, in_dim = x.shape
    assert in_dim == prep["in_dim"], "input feature dim mismatch"
    out_dtype = x.dtype if out_dtype is None else out_dtype

    n_rows = 1
    for d in lead:
        n_rows *= d
    x2 = x.reshape(n_rows, in_dim)

    tr = _choose_row_tile(n_rows, block_rows, min_grid)
    grid = (pl.cdiv(n_rows, tr),)               # partial last block handled by Pallas masking

    flat = prep["flat_weights"]
    out_p = prep["padded_out_dim"]
    kernel = _make_mlp_kernel(prep["layer_has_act"], prep["activation"],
                              prep["matmul_dtype"], prep["compute_dtype"])

    widths = [in_dim] + [w.shape[1] for w in flat[0::2]]
    weights_bytes = sum(int(t.size) * t.dtype.itemsize for t in flat)
    vmem_limit = _vmem_limit_bytes(tr, in_dim, out_p, widths,
                                   x.dtype.itemsize,
                                   np.dtype(out_dtype).itemsize,
                                   weights_bytes)

    def _weight_spec(shape, single_buffer):
        # Constant block index -> DMA'd once, resident across the grid.
        if single_buffer:
            return pl.BlockSpec(shape, lambda r: (0, 0),
                                pipeline_mode=pl.Buffered(1))
        return pl.BlockSpec(shape, lambda r: (0, 0))

    def _run(single_buffer_weights):
        in_specs = [pl.BlockSpec((tr, in_dim), lambda r: (r, 0))]
        for t in flat:
            in_specs.append(_weight_spec(t.shape, single_buffer_weights))
        return pl.pallas_call(
            kernel,
            out_shape=jax.ShapeDtypeStruct((n_rows, out_p), out_dtype),
            grid=grid,
            in_specs=in_specs,
            out_specs=pl.BlockSpec((tr, out_p), lambda r: (r, 0)),
            compiler_params=pltpu.CompilerParams(
                dimension_semantics=("parallel",),   # shards rows across v7x's 2 TCs
                vmem_limit_bytes=vmem_limit),
        )(x2, *flat)

    try:
        out2 = _run(True)
    except Exception:
        # Fallback if this jax version rejects pl.Buffered(1): default
        # double-buffered weights (VMEM cost only, not correctness).
        out2 = _run(False)

    if prep["out_dim"] != out_p:
        out2 = out2[:, :prep["out_dim"]]        # drop lane-padding columns
    return out2.reshape(*lead, prep["out_dim"])


# ---------------------------------------------------------------------------
# parameter init (PyTorch nn.Linear-style U(-1/sqrt(in), 1/sqrt(in)))
# weights generated directly in the pre-transposed (in, out) layout
# ---------------------------------------------------------------------------
def init_mlp_params(key, in_dim, hidden_dims=(256, 256, 256), out_dim=None,
                    bias=True):
    n_linear = len(hidden_dims) + (1 if out_dim is not None else 0)
    keys = jax.random.split(key, 2 * n_linear)
    layers = []
    prev = in_dim
    ki = 0
    for h in hidden_dims:
        k = 1.0 / (prev ** 0.5)
        w = jax.random.uniform(keys[ki], (prev, h), jnp.float32, -k, k); ki += 1
        b = (jax.random.uniform(keys[ki], (1, h), jnp.float32, -k, k)
             if bias else jnp.zeros((1, h), jnp.float32)); ki += 1
        layers.append((w, b, True))                 # hidden layer: has activation
        prev = h
    if out_dim is not None:
        k = 1.0 / (prev ** 0.5)
        w = jax.random.uniform(keys[ki], (prev, out_dim), jnp.float32, -k, k); ki += 1
        b = (jax.random.uniform(keys[ki], (1, out_dim), jnp.float32, -k, k)
             if bias else jnp.zeros((1, out_dim), jnp.float32)); ki += 1
        layers.append((w, b, False))                # final projection: no activation
    return layers


# ---------------------------------------------------------------------------
# pure-JAX reference (mirrors PyTorch semantics), full-precision matmuls
# ---------------------------------------------------------------------------
def mlp_ref(x, params, activation="gelu"):
    acts = {
        "relu": jax.nn.relu,
        "gelu": lambda v: jax.nn.gelu(v, approximate=False),
        "leaky_relu": lambda v: jnp.where(v >= 0, v, 0.01 * v),
        "tanh": jnp.tanh,
    }
    act = acts[activation]
    h = x
    for (w, b, has_act) in params:
        h = jnp.einsum("...i,io->...o", h, w,
                       precision=jax.lax.Precision.HIGHEST) + b[0]
        if has_act:
            h = act(h)
    return h


if __name__ == "__main__":
    key = jax.random.PRNGKey(0)
    kx, kp = jax.random.split(key)

    # Small shapes consistent with the module: X of shape (..., in_dim).
    # HIDDEN=192 exercises the hidden-width pad-to-128 path; OUT=100 exercises
    # the final-layer column padding (lane-dense store) + post-slice path.
    B, S, IN = 4, 64, 32                 # 256 rows -> 2 grid steps (row tile 128)
    HIDDEN = [256, 192, 256]
    OUT = 100
    ACT = "gelu"

    x = jax.random.normal(kx, (B, S, IN), jnp.float32)
    params = init_mlp_params(kp, IN, hidden_dims=HIDDEN, out_dim=OUT, bias=True)

    # fast path: bf16 matmuls + bf16 intermediates, f32 accumulation
    prep_bf16 = prepare_params(params, ACT, matmul_dtype=jnp.bfloat16)
    # verification path: all-f32 (tight structural check incl. padding logic)
    prep_f32 = prepare_params(params, ACT, matmul_dtype=jnp.float32)

    out_bf16 = jax.block_until_ready(mlp_forward(x, prep_bf16))
    out_f32 = jax.block_until_ready(mlp_forward(x, prep_f32))

    ref = mlp_ref(x, params, ACT)

    assert out_bf16.shape == (B, S, OUT)
    assert out_f32.shape == (B, S, OUT)
    assert bool(jnp.all(jnp.isfinite(out_bf16)))
    assert bool(jnp.allclose(out_f32, ref, atol=1e-3, rtol=1e-2)), "f32 path mismatch"
    # bf16 intermediates re-quantize activations each layer; error compounds
    # with depth, hence the looser tolerance for the 4-layer demo.
    assert bool(jnp.allclose(out_bf16, ref, atol=2e-2, rtol=5e-2)), "bf16 path mismatch"

    print("KERNEL_OK")
</pallas_src>

<mosaic_0001>
module attributes {stable_mosaic.version = 11 : i64} {
  func.func @kernel(%arg0: i32, %arg1: memref<128x32xf32, #tpu.memory_space<vmem>>, %arg2: memref<32x256xbf16, #tpu.memory_space<vmem>>, %arg3: memref<1x256xbf16, #tpu.memory_space<vmem>>, %arg4: memref<256x256xbf16, #tpu.memory_space<vmem>>, %arg5: memref<1x256xbf16, #tpu.memory_space<vmem>>, %arg6: memref<256x256xbf16, #tpu.memory_space<vmem>>, %arg7: memref<1x256xbf16, #tpu.memory_space<vmem>>, %arg8: memref<256x128xbf16, #tpu.memory_space<vmem>>, %arg9: memref<1x128xbf16, #tpu.memory_space<vmem>>, %arg10: memref<128x128xf32, #tpu.memory_space<vmem>>) attributes {dimension_semantics = [#tpu.dimension_semantics<parallel>], iteration_bounds = array<i64: 2>, scalar_prefetch = 0 : i64, scratch_operands = 0 : i64, tpu.core_type = #tpu.core_type<tc>, window_params = [{transform_indices = @transform_0, window_bounds = array<i64: 128, 32>}, {pipeline_mode = #tpu.pipeline_mode<synchronous>, transform_indices = @transform_1, window_bounds = array<i64: 32, 256>}, {pipeline_mode = #tpu.pipeline_mode<synchronous>, transform_indices = @transform_2, window_bounds = array<i64: 1, 256>}, {pipeline_mode = #tpu.pipeline_mode<synchronous>, transform_indices = @transform_3, window_bounds = array<i64: 256, 256>}, {pipeline_mode = #tpu.pipeline_mode<synchronous>, transform_indices = @transform_4, window_bounds = array<i64: 1, 256>}, {pipeline_mode = #tpu.pipeline_mode<synchronous>, transform_indices = @transform_5, window_bounds = array<i64: 256, 256>}, {pipeline_mode = #tpu.pipeline_mode<synchronous>, transform_indices = @transform_6, window_bounds = array<i64: 1, 256>}, {pipeline_mode = #tpu.pipeline_mode<synchronous>, transform_indices = @transform_7, window_bounds = array<i64: 256, 128>}, {pipeline_mode = #tpu.pipeline_mode<synchronous>, transform_indices = @transform_8, window_bounds = array<i64: 1, 128>}, {transform_indices = @transform_9, window_bounds = array<i64: 128, 128>}]} {
    %c0 = arith.constant 0 : index
    %c0_0 = arith.constant 0 : index
    %0 = vector.load %arg1[%c0, %c0_0] : memref<128x32xf32, #tpu.memory_space<vmem>>, vector<128x32xf32>
    %1 = arith.truncf %0 : vector<128x32xf32> to vector<128x32xbf16>
    %c0_1 = arith.constant 0 : index
    %c0_2 = arith.constant 0 : index
    %2 = vector.load %arg2[%c0_1, %c0_2] : memref<32x256xbf16, #tpu.memory_space<vmem>>, vector<32x256xbf16>
    %c0_3 = arith.constant 0 : index
    %c0_4 = arith.constant 0 : index
    %3 = vector.load %arg3[%c0_3, %c0_4] : memref<1x256xbf16, #tpu.memory_space<vmem>>, vector<1x256xbf16>
    %cst = arith.constant dense<0.000000e+00> : vector<128x256xf32>
    %4 = tpu.matmul %1, %2, %cst {dimension_numbers = #tpu.dot_dimension_numbers<[1], [0], [0], [1], [0, 0, 1, 1], [], []>} : vector<128x32xbf16>, vector<32x256xbf16>, vector<128x256xf32> -> vector<128x256xf32>
    %5 = arith.truncf %4 : vector<128x256xf32> to vector<128x256xbf16>
    %6 = vector.broadcast %3 : vector<1x256xbf16> to vector<128x256xbf16>
    %7 = arith.addf %5, %6 : vector<128x256xbf16>
    %cst_5 = arith.constant 5.000000e-01 : bf16
    %8 = vector.broadcast %cst_5 : bf16 to vector<128x256xbf16>
    %9 = arith.mulf %8, %7 : vector<128x256xbf16>
    %cst_6 = arith.constant 7.070310e-01 : bf16
    %10 = vector.broadcast %cst_6 : bf16 to vector<128x256xbf16>
    %11 = arith.mulf %7, %10 : vector<128x256xbf16>
    %12 = math.absf %11 : vector<128x256xbf16>
    %cst_7 = arith.constant 3.281250e-01 : bf16
    %13 = vector.broadcast %cst_7 : bf16 to vector<128x256xbf16>
    %14 = arith.mulf %13, %12 : vector<128x256xbf16>
    %cst_8 = arith.constant 1.000000e+00 : bf16
    %15 = vector.broadcast %cst_8 : bf16 to vector<128x256xbf16>
    %16 = arith.addf %15, %14 : vector<128x256xbf16>
    %cst_9 = arith.constant 1.000000e+00 : bf16
    %17 = vector.broadcast %cst_9 : bf16 to vector<128x256xbf16>
    %18 = arith.divf %17, %16 : vector<128x256xbf16>
    %cst_10 = arith.constant 1.062500e+00 : bf16
    %19 = vector.broadcast %cst_10 : bf16 to vector<128x256xbf16>
    %20 = arith.mulf %19, %18 : vector<128x256xbf16>
    %cst_11 = arith.constant -1.453130e+00 : bf16
    %21 = vector.broadcast %cst_11 : bf16 to vector<128x256xbf16>
    %22 = arith.addf %20, %21 : vector<128x256xbf16>
    %23 = arith.mulf %22, %18 : vector<128x256xbf16>
    %cst_12 = arith.constant 1.421880e+00 : bf16
    %24 = vector.broadcast %cst_12 : bf16 to vector<128x256xbf16>
    %25 = arith.addf %23, %24 : vector<128x256xbf16>
    %26 = arith.mulf %25, %18 : vector<128x256xbf16>
    %cst_13 = arith.constant -2.851560e-01 : bf16
    %27 = vector.broadcast %cst_13 : bf16 to vector<128x256xbf16>
    %28 = arith.addf %26, %27 : vector<128x256xbf16>
    %29 = arith.mulf %28, %18 : vector<128x256xbf16>
    %cst_14 = arith.constant 2.539060e-01 : bf16
    %30 = vector.broadcast %cst_14 : bf16 to vector<128x256xbf16>
    %31 = arith.addf %29, %30 : vector<128x256xbf16>
    %32 = arith.mulf %31, %18 : vector<128x256xbf16>
    %cst_15 = arith.constant 0.000000e+00 : bf16
    %33 = vector.broadcast %cst_15 : bf16 to vector<128x256xbf16>
    %34 = arith.subf %33, %12 : vector<128x256xbf16>
    %35 = arith.mulf %34, %12 : vector<128x256xbf16>
    %36 = math.exp %35 : vector<128x256xbf16>
    %37 = arith.mulf %32, %36 : vector<128x256xbf16>
    %cst_16 = arith.constant 1.000000e+00 : bf16
    %38 = vector.broadcast %cst_16 : bf16 to vector<128x256xbf16>
    %39 = arith.subf %38, %37 : vector<128x256xbf16>
    %cst_17 = arith.constant 0.000000e+00 : bf16
    %40 = vector.broadcast %cst_17 : bf16 to vector<128x256xbf16>
    %41 = arith.cmpf oge, %11, %40 : vector<128x256xbf16>
    %cst_18 = arith.constant 0.000000e+00 : bf16
    %42 = vector.broadcast %cst_18 : bf16 to vector<128x256xbf16>
    %43 = arith.subf %42, %39 : vector<128x256xbf16>
    %44 = arith.select %41, %39, %43 : vector<128x256xi1>, vector<128x256xbf16>
    %cst_19 = arith.constant 1.000000e+00 : bf16
    %45 = vector.broadcast %cst_19 : bf16 to vector<128x256xbf16>
    %46 = arith.addf %45, %44 : vector<128x256xbf16>
    %47 = arith.mulf %9, %46 : vector<128x256xbf16>
    %c0_20 = arith.constant 0 : index
    %c0_21 = arith.constant 0 : index
    %48 = vector.load %arg4[%c0_20, %c0_21] : memref<256x256xbf16, #tpu.memory_space<vmem>>, vector<256x256xbf16>
    %c0_22 = arith.constant 0 : index
    %c0_23 = arith.constant 0 : index
    %49 = vector.load %arg5[%c0_22, %c0_23] : memref<1x256xbf16, #tpu.memory_space<vmem>>, vector<1x256xbf16>
    %cst_24 = arith.constant dense<0.000000e+00> : vector<128x256xf32>
    %50 = tpu.matmul %47, %48, %cst_24 {dimension_numbers = #tpu.dot_dimension_numbers<[1], [0], [0], [1], [0, 0, 1, 1], [], []>} : vector<128x256xbf16>, vector<256x256xbf16>, vector<128x256xf32> -> vector<128x256xf32>
    %51 = arith.truncf %50 : vector<128x256xf32> to vector<128x256xbf16>
    %52 = vector.broadcast %49 : vector<1x256xbf16> to vector<128x256xbf16>
    %53 = arith.addf %51, %52 : vector<128x256xbf16>
    %cst_25 = arith.constant 5.000000e-01 : bf16
    %54 = vector.broadcast %cst_25 : bf16 to vector<128x256xbf16>
    %55 = arith.mulf %54, %53 : vector<128x256xbf16>
    %cst_26 = arith.constant 7.070310e-01 : bf16
    %56 = vector.broadcast %cst_26 : bf16 to vector<128x256xbf16>
    %57 = arith.mulf %53, %56 : vector<128x256xbf16>
    %58 = math.absf %57 : vector<128x256xbf16>
    %cst_27 = arith.constant 3.281250e-01 : bf16
    %59 = vector.broadcast %cst_27 : bf16 to vector<128x256xbf16>
    %60 = arith.mulf %59, %58 : vector<128x256xbf16>
    %cst_28 = arith.constant 1.000000e+00 : bf16
    %61 = vector.broadcast %cst_28 : bf16 to vector<128x256xbf16>
    %62 = arith.addf %61, %60 : vector<128x256xbf16>
    %cst_29 = arith.constant 1.000000e+00 : bf16
    %63 = vector.broadcast %cst_29 : bf16 to vector<128x256xbf16>
    %64 = arith.divf %63, %62 : vector<128x256xbf16>
    %cst_30 = arith.constant 1.062500e+00 : bf16
    %65 = vector.broadcast %cst_30 : bf16 to vector<128x256xbf16>
    %66 = arith.mulf %65, %64 : vector<128x256xbf16>
    %cst_31 = arith.constant -1.453130e+00 : bf16
    %67 = vector.broadcast %cst_31 : bf16 to vector<128x256xbf16>
    %68 = arith.addf %66, %67 : vector<128x256xbf16>
    %69 = arith.mulf %68, %64 : vector<128x256xbf16>
    %cst_32 = arith.constant 1.421880e+00 : bf16
    %70 = vector.broadcast %cst_32 : bf16 to vector<128x256xbf16>
    %71 = arith.addf %69, %70 : vector<128x256xbf16>
    %72 = arith.mulf %71, %64 : vector<128x256xbf16>
    %cst_33 = arith.constant -2.851560e-01 : bf16
    %73 = vector.broadcast %cst_33 : bf16 to vector<128x256xbf16>
    %74 = arith.addf %72, %73 : vector<128x256xbf16>
    %75 = arith.mulf %74, %64 : vector<128x256xbf16>
    %cst_34 = arith.constant 2.539060e-01 : bf16
    %76 = vector.broadcast %cst_34 : bf16 to vector<128x256xbf16>
    %77 = arith.addf %75, %76 : vector<128x256xbf16>
    %78 = arith.mulf %77, %64 : vector<128x256xbf16>
    %cst_35 = arith.constant 0.000000e+00 : bf16
    %79 = vector.broadcast %cst_35 : bf16 to vector<128x256xbf16>
    %80 = arith.subf %79, %58 : vector<128x256xbf16>
    %81 = arith.mulf %80, %58 : vector<128x256xbf16>
    %82 = math.exp %81 : vector<128x256xbf16>
    %83 = arith.mulf %78, %82 : vector<128x256xbf16>
    %cst_36 = arith.constant 1.000000e+00 : bf16
    %84 = vector.broadcast %cst_36 : bf16 to vector<128x256xbf16>
    %85 = arith.subf %84, %83 : vector<128x256xbf16>
    %cst_37 = arith.constant 0.000000e+00 : bf16
    %86 = vector.broadcast %cst_37 : bf16 to vector<128x256xbf16>
    %87 = arith.cmpf oge, %57, %86 : vector<128x256xbf16>
    %cst_38 = arith.constant 0.000000e+00 : bf16
    %88 = vector.broadcast %cst_38 : bf16 to vector<128x256xbf16>
    %89 = arith.subf %88, %85 : vector<128x256xbf16>
    %90 = arith.select %87, %85, %89 : vector<128x256xi1>, vector<128x256xbf16>
    %cst_39 = arith.constant 1.000000e+00 : bf16
    %91 = vector.broadcast %cst_39 : bf16 to vector<128x256xbf16>
    %92 = arith.addf %91, %90 : vector<128x256xbf16>
    %93 = arith.mulf %55, %92 : vector<128x256xbf16>
    %c0_40 = arith.constant 0 : index
    %c0_41 = arith.constant 0 : index
    %94 = vector.load %arg6[%c0_40, %c0_41] : memref<256x256xbf16, #tpu.memory_space<vmem>>, vector<256x256xbf16>
    %c0_42 = arith.constant 0 : index
    %c0_43 = arith.constant 0 : index
    %95 = vector.load %arg7[%c0_42, %c0_43] : memref<1x256xbf16, #tpu.memory_space<vmem>>, vector<1x256xbf16>
    %cst_44 = arith.constant dense<0.000000e+00> : vector<128x256xf32>
    %96 = tpu.matmul %93, %94, %cst_44 {dimension_numbers = #tpu.dot_dimension_numbers<[1], [0], [0], [1], [0, 0, 1, 1], [], []>} : vector<128x256xbf16>, vector<256x256xbf16>, vector<128x256xf32> -> vector<128x256xf32>
    %97 = arith.truncf %96 : vector<128x256xf32> to vector<128x256xbf16>
    %98 = vector.broadcast %95 : vector<1x256xbf16> to vector<128x256xbf16>
    %99 = arith.addf %97, %98 : vector<128x256xbf16>
    %cst_45 = arith.constant 5.000000e-01 : bf16
    %100 = vector.broadcast %cst_45 : bf16 to vector<128x256xbf16>
    %101 = arith.mulf %100, %99 : vector<128x256xbf16>
    %cst_46 = arith.constant 7.070310e-01 : bf16
    %102 = vector.broadcast %cst_46 : bf16 to vector<128x256xbf16>
    %103 = arith.mulf %99, %102 : vector<128x256xbf16>
    %104 = math.absf %103 : vector<128x256xbf16>
    %cst_47 = arith.constant 3.281250e-01 : bf16
    %105 = vector.broadcast %cst_47 : bf16 to vector<128x256xbf16>
    %106 = arith.mulf %105, %104 : vector<128x256xbf16>
    %cst_48 = arith.constant 1.000000e+00 : bf16
    %107 = vector.broadcast %cst_48 : bf16 to vector<128x256xbf16>
    %108 = arith.addf %107, %106 : vector<128x256xbf16>
    %cst_49 = arith.constant 1.000000e+00 : bf16
    %109 = vector.broadcast %cst_49 : bf16 to vector<128x256xbf16>
    %110 = arith.divf %109, %108 : vector<128x256xbf16>
    %cst_50 = arith.constant 1.062500e+00 : bf16
    %111 = vector.broadcast %cst_50 : bf16 to vector<128x256xbf16>
    %112 = arith.mulf %111, %110 : vector<128x256xbf16>
    %cst_51 = arith.constant -1.453130e+00 : bf16
    %113 = vector.broadcast %cst_51 : bf16 to vector<128x256xbf16>
    %114 = arith.addf %112, %113 : vector<128x256xbf16>
    %115 = arith.mulf %114, %110 : vector<128x256xbf16>
    %cst_52 = arith.constant 1.421880e+00 : bf16
    %116 = vector.broadcast %cst_52 : bf16 to vector<128x256xbf16>
    %117 = arith.addf %115, %116 : vector<128x256xbf16>
    %118 = arith.mulf %117, %110 : vector<128x256xbf16>
    %cst_53 = arith.constant -2.851560e-01 : bf16
    %119 = vector.broadcast %cst_53 : bf16 to vector<128x256xbf16>
    %120 = arith.addf %118, %119 : vector<128x256xbf16>
    %121 = arith.mulf %120, %110 : vector<128x256xbf16>
    %cst_54 = arith.constant 2.539060e-01 : bf16
    %122 = vector.broadcast %cst_54 : bf16 to vector<128x256xbf16>
    %123 = arith.addf %121, %122 : vector<128x256xbf16>
    %124 = arith.mulf %123, %110 : vector<128x256xbf16>
    %cst_55 = arith.constant 0.000000e+00 : bf16
    %125 = vector.broadcast %cst_55 : bf16 to vector<128x256xbf16>
    %126 = arith.subf %125, %104 : vector<128x256xbf16>
    %127 = arith.mulf %126, %104 : vector<128x256xbf16>
    %128 = math.exp %127 : vector<128x256xbf16>
    %129 = arith.mulf %124, %128 : vector<128x256xbf16>
    %cst_56 = arith.constant 1.000000e+00 : bf16
    %130 = vector.broadcast %cst_56 : bf16 to vector<128x256xbf16>
    %131 = arith.subf %130, %129 : vector<128x256xbf16>
    %cst_57 = arith.constant 0.000000e+00 : bf16
    %132 = vector.broadcast %cst_57 : bf16 to vector<128x256xbf16>
    %133 = arith.cmpf oge, %103, %132 : vector<128x256xbf16>
    %cst_58 = arith.constant 0.000000e+00 : bf16
    %134 = vector.broadcast %cst_58 : bf16 to vector<128x256xbf16>
    %135 = arith.subf %134, %131 : vector<128x256xbf16>
    %136 = arith.select %133, %131, %135 : vector<128x256xi1>, vector<128x256xbf16>
    %cst_59 = arith.constant 1.000000e+00 : bf16
    %137 = vector.broadcast %cst_59 : bf16 to vector<128x256xbf16>
    %138 = arith.addf %137, %136 : vector<128x256xbf16>
    %139 = arith.mulf %101, %138 : vector<128x256xbf16>
    %c0_60 = arith.constant 0 : index
    %c0_61 = arith.constant 0 : index
    %140 = vector.load %arg8[%c0_60, %c0_61] : memref<256x128xbf16, #tpu.memory_space<vmem>>, vector<256x128xbf16>
    %c0_62 = arith.constant 0 : index
    %c0_63 = arith.constant 0 : index
    %141 = vector.load %arg9[%c0_62, %c0_63] : memref<1x128xbf16, #tpu.memory_space<vmem>>, vector<1x128xbf16>
    %cst_64 = arith.constant dense<0.000000e+00> : vector<128x128xf32>
    %142 = tpu.matmul %139, %140, %cst_64 {dimension_numbers = #tpu.dot_dimension_numbers<[1], [0], [0], [1], [0, 0, 1, 1], [], []>} : vector<128x256xbf16>, vector<256x128xbf16>, vector<128x128xf32> -> vector<128x128xf32>
    %143 = arith.truncf %142 : vector<128x128xf32> to vector<128x128xbf16>
    %144 = vector.broadcast %141 : vector<1x128xbf16> to vector<128x128xbf16>
    %145 = arith.addf %143, %144 : vector<128x128xbf16>
    %146 = arith.extf %145 : vector<128x128xbf16> to vector<128x128xf32>
    %c0_65 = arith.constant 0 : index
    %c0_66 = arith.constant 0 : index
    %147 = vector.load %arg10[%c0_65, %c0_66] : memref<128x128xf32, #tpu.memory_space<vmem>>, vector<128x128xf32>
    tpu.vector_store %arg10[%c0_65, %c0_66], %146 {strides = array<i32>} : memref<128x128xf32, #tpu.memory_space<vmem>>, vector<128x128xf32>,
    return
  }
  func.func @transform_0(%arg0: i32) -> (i32, i32) {
    %c0_i32 = arith.constant 0 : i32
    %c0_i32_0 = arith.constant 0 : i32
    return %arg0, %c0_i32 : i32, i32
  }
  func.func @transform_1(%arg0: i32) -> (i32, i32) {
    %c0_i32 = arith.constant 0 : i32
    %c0_i32_0 = arith.constant 0 : i32
    %c0_i32_1 = arith.constant 0 : i32
    return %c0_i32, %c0_i32_0 : i32, i32
  }
  func.func @transform_2(%arg0: i32) -> (i32, i32) {
    %c0_i32 = arith.constant 0 : i32
    %c0_i32_0 = arith.constant 0 : i32
    %c0_i32_1 = arith.constant 0 : i32
    return %c0_i32, %c0_i32_0 : i32, i32
  }
  func.func @transform_3(%arg0: i32) -> (i32, i32) {
    %c0_i32 = arith.constant 0 : i32
    %c0_i32_0 = arith.constant 0 : i32
    %c0_i32_1 = arith.constant 0 : i32
    return %c0_i32, %c0_i32_0 : i32, i32
  }
  func.func @transform_4(%arg0: i32) -> (i32, i32) {
    %c0_i32 = arith.constant 0 : i32
    %c0_i32_0 = arith.constant 0 : i32
    %c0_i32_1 = arith.constant 0 : i32
    return %c0_i32, %c0_i32_0 : i32, i32
  }
  func.func @transform_5(%arg0: i32) -> (i32, i32) {
    %c0_i32 = arith.constant 0 : i32
    %c0_i32_0 = arith.constant 0 : i32
    %c0_i32_1 = arith.constant 0 : i32
    return %c0_i32, %c0_i32_0 : i32, i32
  }
  func.func @transform_6(%arg0: i32) -> (i32, i32) {
    %c0_i32 = arith.constant 0 : i32
    %c0_i32_0 = arith.constant 0 : i32
    %c0_i32_1 = arith.constant 0 : i32
    return %c0_i32, %c0_i32_0 : i32, i32
  }
  func.func @transform_7(%arg0: i32) -> (i32, i32) {
    %c0_i32 = arith.constant 0 : i32
    %c0_i32_0 = arith.constant 0 : i32
    %c0_i32_1 = arith.constant 0 : i32
    return %c0_i32, %c0_i32_0 : i32, i32
  }
  func.func @transform_8(%arg0: i32) -> (i32, i32) {
    %c0_i32 = arith.constant 0 : i32
    %c0_i32_0 = arith.constant 0 : i32
    %c0_i32_1 = arith.constant 0 : i32
    return %c0_i32, %c0_i32_0 : i32, i32
  }
  func.func @transform_9(%arg0: i32) -> (i32, i32) {
    %c0_i32 = arith.constant 0 : i32
    %c0_i32_0 = arith.constant 0 : i32
    return %arg0, %c0_i32 : i32, i32
  }
}

module attributes {stable_mosaic.version = 11 : i64} {
  func.func @kernel(%arg0: i32, %arg1: memref<128x32xf32, #tpu.memory_space<vmem>>, %arg2: memref<32x256xbf16, #tpu.memory_space<vmem>>, %arg3: memref<1x256xbf16, #tpu.memory_space<vmem>>, %arg4: memref<256x256xbf16, #tpu.memory_space<vmem>>, %arg5: memref<1x256xbf16, #tpu.memory_space<vmem>>, %arg6: memref<256x256xbf16, #tpu.memory_space<vmem>>, %arg7: memref<1x256xbf16, #tpu.memory_space<vmem>>, %arg8: memref<256x128xbf16, #tpu.memory_space<vmem>>, %arg9: memref<1x128xbf16, #tpu.memory_space<vmem>>, %arg10: memref<128x128xf32, #tpu.memory_space<vmem>>) attributes {dimension_semantics = [#tpu.dimension_semantics<parallel>], iteration_bounds = array<i64: 2>, scalar_prefetch = 0 : i64, scratch_operands = 0 : i64, tpu.core_type = #tpu.core_type<tc>, window_params = [{transform_indices = @transform_0, window_bounds = array<i64: 128, 32>}, {pipeline_mode = #tpu.pipeline_mode<synchronous>, transform_indices = @transform_1, window_bounds = array<i64: 32, 256>}, {pipeline_mode = #tpu.pipeline_mode<synchronous>, transform_indices = @transform_2, window_bounds = array<i64: 1, 256>}, {pipeline_mode = #tpu.pipeline_mode<synchronous>, transform_indices = @transform_3, window_bounds = array<i64: 256, 256>}, {pipeline_mode = #tpu.pipeline_mode<synchronous>, transform_indices = @transform_4, window_bounds = array<i64: 1, 256>}, {pipeline_mode = #tpu.pipeline_mode<synchronous>, transform_indices = @transform_5, window_bounds = array<i64: 256, 256>}, {pipeline_mode = #tpu.pipeline_mode<synchronous>, transform_indices = @transform_6, window_bounds = array<i64: 1, 256>}, {pipeline_mode = #tpu.pipeline_mode<synchronous>, transform_indices = @transform_7, window_bounds = array<i64: 256, 128>}, {pipeline_mode = #tpu.pipeline_mode<synchronous>, transform_indices = @transform_8, window_bounds = array<i64: 1, 128>}, {transform_indices = @transform_9, window_bounds = array<i64: 128, 128>}]} {
    %c0 = arith.constant 0 : index
    %c0_0 = arith.constant 0 : index
    %0 = vector.load %arg1[%c0, %c0_0] : memref<128x32xf32, #tpu.memory_space<vmem>>, vector<128x32xf32>
    %1 = arith.truncf %0 : vector<128x32xf32> to vector<128x32xbf16>
    %c0_1 = arith.constant 0 : index
    %c0_2 = arith.constant 0 : index
    %2 = vector.load %arg2[%c0_1, %c0_2] : memref<32x256xbf16, #tpu.memory_space<vmem>>, vector<32x256xbf16>
    %c0_3 = arith.constant 0 : index
    %c0_4 = arith.constant 0 : index
    %3 = vector.load %arg3[%c0_3, %c0_4] : memref<1x256xbf16, #tpu.memory_space<vmem>>, vector<1x256xbf16>
    %cst = arith.constant dense<0.000000e+00> : vector<128x256xf32>
    %4 = tpu.matmul %1, %2, %cst {dimension_numbers = #tpu.dot_dimension_numbers<[1], [0], [0], [1], [0, 0, 1, 1], [], []>} : vector<128x32xbf16>, vector<32x256xbf16>, vector<128x256xf32> -> vector<128x256xf32>
    %5 = arith.truncf %4 : vector<128x256xf32> to vector<128x256xbf16>
    %6 = vector.broadcast %3 : vector<1x256xbf16> to vector<128x256xbf16>
    %7 = arith.addf %5, %6 : vector<128x256xbf16>
    %cst_5 = arith.constant 5.000000e-01 : bf16
    %8 = vector.broadcast %cst_5 : bf16 to vector<128x256xbf16>
    %9 = arith.mulf %8, %7 : vector<128x256xbf16>
    %cst_6 = arith.constant 7.070310e-01 : bf16
    %10 = vector.broadcast %cst_6 : bf16 to vector<128x256xbf16>
    %11 = arith.mulf %7, %10 : vector<128x256xbf16>
    %12 = math.absf %11 : vector<128x256xbf16>
    %cst_7 = arith.constant 3.281250e-01 : bf16
    %13 = vector.broadcast %cst_7 : bf16 to vector<128x256xbf16>
    %14 = arith.mulf %13, %12 : vector<128x256xbf16>
    %cst_8 = arith.constant 1.000000e+00 : bf16
    %15 = vector.broadcast %cst_8 : bf16 to vector<128x256xbf16>
    %16 = arith.addf %15, %14 : vector<128x256xbf16>
    %cst_9 = arith.constant 1.000000e+00 : bf16
    %17 = vector.broadcast %cst_9 : bf16 to vector<128x256xbf16>
    %18 = arith.divf %17, %16 : vector<128x256xbf16>
    %cst_10 = arith.constant 1.062500e+00 : bf16
    %19 = vector.broadcast %cst_10 : bf16 to vector<128x256xbf16>
    %20 = arith.mulf %19, %18 : vector<128x256xbf16>
    %cst_11 = arith.constant -1.453130e+00 : bf16
    %21 = vector.broadcast %cst_11 : bf16 to vector<128x256xbf16>
    %22 = arith.addf %20, %21 : vector<128x256xbf16>
    %23 = arith.mulf %22, %18 : vector<128x256xbf16>
    %cst_12 = arith.constant 1.421880e+00 : bf16
    %24 = vector.broadcast %cst_12 : bf16 to vector<128x256xbf16>
    %25 = arith.addf %23, %24 : vector<128x256xbf16>
    %26 = arith.mulf %25, %18 : vector<128x256xbf16>
    %cst_13 = arith.constant -2.851560e-01 : bf16
    %27 = vector.broadcast %cst_13 : bf16 to vector<128x256xbf16>
    %28 = arith.addf %26, %27 : vector<128x256xbf16>
    %29 = arith.mulf %28, %18 : vector<128x256xbf16>
    %cst_14 = arith.constant 2.539060e-01 : bf16
    %30 = vector.broadcast %cst_14 : bf16 to vector<128x256xbf16>
    %31 = arith.addf %29, %30 : vector<128x256xbf16>
    %32 = arith.mulf %31, %18 : vector<128x256xbf16>
    %cst_15 = arith.constant 0.000000e+00 : bf16
    %33 = vector.broadcast %cst_15 : bf16 to vector<128x256xbf16>
    %34 = arith.subf %33, %12 : vector<128x256xbf16>
    %35 = arith.mulf %34, %12 : vector<128x256xbf16>
    %36 = math.exp %35 : vector<128x256xbf16>
    %37 = arith.mulf %32, %36 : vector<128x256xbf16>
    %cst_16 = arith.constant 1.000000e+00 : bf16
    %38 = vector.broadcast %cst_16 : bf16 to vector<128x256xbf16>
    %39 = arith.subf %38, %37 : vector<128x256xbf16>
    %cst_17 = arith.constant 0.000000e+00 : bf16
    %40 = vector.broadcast %cst_17 : bf16 to vector<128x256xbf16>
    %41 = arith.cmpf oge, %11, %40 : vector<128x256xbf16>
    %cst_18 = arith.constant 0.000000e+00 : bf16
    %42 = vector.broadcast %cst_18 : bf16 to vector<128x256xbf16>
    %43 = arith.subf %42, %39 : vector<128x256xbf16>
    %44 = arith.select %41, %39, %43 : vector<128x256xi1>, vector<128x256xbf16>
    %cst_19 = arith.constant 1.000000e+00 : bf16
    %45 = vector.broadcast %cst_19 : bf16 to vector<128x256xbf16>
    %46 = arith.addf %45, %44 : vector<128x256xbf16>
    %47 = arith.mulf %9, %46 : vector<128x256xbf16>
    %c0_20 = arith.constant 0 : index
    %c0_21 = arith.constant 0 : index
    %48 = vector.load %arg4[%c0_20, %c0_21] : memref<256x256xbf16, #tpu.memory_space<vmem>>, vector<256x256xbf16>
    %c0_22 = arith.constant 0 : index
    %c0_23 = arith.constant 0 : index
    %49 = vector.load %arg5[%c0_22, %c0_23] : memref<1x256xbf16, #tpu.memory_space<vmem>>, vector<1x256xbf16>
    %cst_24 = arith.constant dense<0.000000e+00> : vector<128x256xf32>
    %50 = tpu.matmul %47, %48, %cst_24 {dimension_numbers = #tpu.dot_dimension_numbers<[1], [0], [0], [1], [0, 0, 1, 1], [], []>} : vector<128x256xbf16>, vector<256x256xbf16>, vector<128x256xf32> -> vector<128x256xf32>
    %51 = arith.truncf %50 : vector<128x256xf32> to vector<128x256xbf16>
    %52 = vector.broadcast %49 : vector<1x256xbf16> to vector<128x256xbf16>
    %53 = arith.addf %51, %52 : vector<128x256xbf16>
    %cst_25 = arith.constant 5.000000e-01 : bf16
    %54 = vector.broadcast %cst_25 : bf16 to vector<128x256xbf16>
    %55 = arith.mulf %54, %53 : vector<128x256xbf16>
    %cst_26 = arith.constant 7.070310e-01 : bf16
    %56 = vector.broadcast %cst_26 : bf16 to vector<128x256xbf16>
    %57 = arith.mulf %53, %56 : vector<128x256xbf16>
    %58 = math.absf %57 : vector<128x256xbf16>
    %cst_27 = arith.constant 3.281250e-01 : bf16
    %59 = vector.broadcast %cst_27 : bf16 to vector<128x256xbf16>
    %60 = arith.mulf %59, %58 : vector<128x256xbf16>
    %cst_28 = arith.constant 1.000000e+00 : bf16
    %61 = vector.broadcast %cst_28 : bf16 to vector<128x256xbf16>
    %62 = arith.addf %61, %60 : vector<128x256xbf16>
    %cst_29 = arith.constant 1.000000e+00 : bf16
    %63 = vector.broadcast %cst_29 : bf16 to vector<128x256xbf16>
    %64 = arith.divf %63, %62 : vector<128x256xbf16>
    %cst_30 = arith.constant 1.062500e+00 : bf16
    %65 = vector.broadcast %cst_30 : bf16 to vector<128x256xbf16>
    %66 = arith.mulf %65, %64 : vector<128x256xbf16>
    %cst_31 = arith.constant -1.453130e+00 : bf16
    %67 = vector.broadcast %cst_31 : bf16 to vector<128x256xbf16>
    %68 = arith.addf %66, %67 : vector<128x256xbf16>
    %69 = arith.mulf %68, %64 : vector<128x256xbf16>
    %cst_32 = arith.constant 1.421880e+00 : bf16
    %70 = vector.broadcast %cst_32 : bf16 to vector<128x256xbf16>
    %71 = arith.addf %69, %70 : vector<128x256xbf16>
    %72 = arith.mulf %71, %64 : vector<128x256xbf16>
    %cst_33 = arith.constant -2.851560e-01 : bf16
    %73 = vector.broadcast %cst_33 : bf16 to vector<128x256xbf16>
    %74 = arith.addf %72, %73 : vector<128x256xbf16>
    %75 = arith.mulf %74, %64 : vector<128x256xbf16>
    %cst_34 = arith.constant 2.539060e-01 : bf16
    %76 = vector.broadcast %cst_34 : bf16 to vector<128x256xbf16>
    %77 = arith.addf %75, %76 : vector<128x256xbf16>
    %78 = arith.mulf %77, %64 : vector<128x256xbf16>
    %cst_35 = arith.constant 0.000000e+00 : bf16
    %79 = vector.broadcast %cst_35 : bf16 to vector<128x256xbf16>
    %80 = arith.subf %79, %58 : vector<128x256xbf16>
    %81 = arith.mulf %80, %58 : vector<128x256xbf16>
    %82 = math.exp %81 : vector<128x256xbf16>
    %83 = arith.mulf %78, %82 : vector<128x256xbf16>
    %cst_36 = arith.constant 1.000000e+00 : bf16
    %84 = vector.broadcast %cst_36 : bf16 to vector<128x256xbf16>
    %85 = arith.subf %84, %83 : vector<128x256xbf16>
    %cst_37 = arith.constant 0.000000e+00 : bf16
    %86 = vector.broadcast %cst_37 : bf16 to vector<128x256xbf16>
    %87 = arith.cmpf oge, %57, %86 : vector<128x256xbf16>
    %cst_38 = arith.constant 0.000000e+00 : bf16
    %88 = vector.broadcast %cst_38 : bf16 to vector<128x256xbf16>
    %89 = arith.subf %88, %85 : vector<128x256xbf16>
    %90 = arith.select %87, %85, %89 : vector<128x256xi1>, vector<128x256xbf16>
    %cst_39 = arith.constant 1.000000e+00 : bf16
    %91 = vector.broadcast %cst_39 : bf16 to vector<128x256xbf16>
    %92 = arith.addf %91, %90 : vector<128x256xbf16>
    %93 = arith.mulf %55, %92 : vector<128x256xbf16>
    %c0_40 = arith.constant 0 : index
    %c0_41 = arith.constant 0 : index
    %94 = vector.load %arg6[%c0_40, %c0_41] : memref<256x256xbf16, #tpu.memory_space<vmem>>, vector<256x256xbf16>
    %c0_42 = arith.constant 0 : index
    %c0_43 = arith.constant 0 : index
    %95 = vector.load %arg7[%c0_42, %c0_43] : memref<1x256xbf16, #tpu.memory_space<vmem>>, vector<1x256xbf16>
    %cst_44 = arith.constant dense<0.000000e+00> : vector<128x256xf32>
    %96 = tpu.matmul %93, %94, %cst_44 {dimension_numbers = #tpu.dot_dimension_numbers<[1], [0], [0], [1], [0, 0, 1, 1], [], []>} : vector<128x256xbf16>, vector<256x256xbf16>, vector<128x256xf32> -> vector<128x256xf32>
    %97 = arith.truncf %96 : vector<128x256xf32> to vector<128x256xbf16>
    %98 = vector.broadcast %95 : vector<1x256xbf16> to vector<128x256xbf16>
    %99 = arith.addf %97, %98 : vector<128x256xbf16>
    %cst_45 = arith.constant 5.000000e-01 : bf16
    %100 = vector.broadcast %cst_45 : bf16 to vector<128x256xbf16>
    %101 = arith.mulf %100, %99 : vector<128x256xbf16>
    %cst_46 = arith.constant 7.070310e-01 : bf16
    %102 = vector.broadcast %cst_46 : bf16 to vector<128x256xbf16>
    %103 = arith.mulf %99, %102 : vector<128x256xbf16>
    %104 = math.absf %103 : vector<128x256xbf16>
    %cst_47 = arith.constant 3.281250e-01 : bf16
    %105 = vector.broadcast %cst_47 : bf16 to vector<128x256xbf16>
    %106 = arith.mulf %105, %104 : vector<128x256xbf16>
    %cst_48 = arith.constant 1.000000e+00 : bf16
    %107 = vector.broadcast %cst_48 : bf16 to vector<128x256xbf16>
    %108 = arith.addf %107, %106 : vector<128x256xbf16>
    %cst_49 = arith.constant 1.000000e+00 : bf16
    %109 = vector.broadcast %cst_49 : bf16 to vector<128x256xbf16>
    %110 = arith.divf %109, %108 : vector<128x256xbf16>
    %cst_50 = arith.constant 1.062500e+00 : bf16
    %111 = vector.broadcast %cst_50 : bf16 to vector<128x256xbf16>
    %112 = arith.mulf %111, %110 : vector<128x256xbf16>
    %cst_51 = arith.constant -1.453130e+00 : bf16
    %113 = vector.broadcast %cst_51 : bf16 to vector<128x256xbf16>
    %114 = arith.addf %112, %113 : vector<128x256xbf16>
    %115 = arith.mulf %114, %110 : vector<128x256xbf16>
    %cst_52 = arith.constant 1.421880e+00 : bf16
    %116 = vector.broadcast %cst_52 : bf16 to vector<128x256xbf16>
    %117 = arith.addf %115, %116 : vector<128x256xbf16>
    %118 = arith.mulf %117, %110 : vector<128x256xbf16>
    %cst_53 = arith.constant -2.851560e-01 : bf16
    %119 = vector.broadcast %cst_53 : bf16 to vector<128x256xbf16>
    %120 = arith.addf %118, %119 : vector<128x256xbf16>
    %121 = arith.mulf %120, %110 : vector<128x256xbf16>
    %cst_54 = arith.constant 2.539060e-01 : bf16
    %122 = vector.broadcast %cst_54 : bf16 to vector<128x256xbf16>
    %123 = arith.addf %121, %122 : vector<128x256xbf16>
    %124 = arith.mulf %123, %110 : vector<128x256xbf16>
    %cst_55 = arith.constant 0.000000e+00 : bf16
    %125 = vector.broadcast %cst_55 : bf16 to vector<128x256xbf16>
    %126 = arith.subf %125, %104 : vector<128x256xbf16>
    %127 = arith.mulf %126, %104 : vector<128x256xbf16>
    %128 = math.exp %127 : vector<128x256xbf16>
    %129 = arith.mulf %124, %128 : vector<128x256xbf16>
    %cst_56 = arith.constant 1.000000e+00 : bf16
    %130 = vector.broadcast %cst_56 : bf16 to vector<128x256xbf16>
    %131 = arith.subf %130, %129 : vector<128x256xbf16>
    %cst_57 = arith.constant 0.000000e+00 : bf16
    %132 = vector.broadcast %cst_57 : bf16 to vector<128x256xbf16>
    %133 = arith.cmpf oge, %103, %132 : vector<128x256xbf16>
    %cst_58 = arith.constant 0.000000e+00 : bf16
    %134 = vector.broadcast %cst_58 : bf16 to vector<128x256xbf16>
    %135 = arith.subf %134, %131 : vector<128x256xbf16>
    %136 = arith.select %133, %131, %135 : vector<128x256xi1>, vector<128x256xbf16>
    %cst_59 = arith.constant 1.000000e+00 : bf16
    %137 = vector.broadcast %cst_59 : bf16 to vector<128x256xbf16>
    %138 = arith.addf %137, %136 : vector<128x256xbf16>
    %139 = arith.mulf %101, %138 : vector<128x256xbf16>
    %c0_60 = arith.constant 0 : index
    %c0_61 = arith.constant 0 : index
    %140 = vector.load %arg8[%c0_60, %c0_61] : memref<256x128xbf16, #tpu.memory_space<vmem>>, vector<256x128xbf16>
    %c0_62 = arith.constant 0 : index
    %c0_63 = arith.constant 0 : index
    %141 = vector.load %arg9[%c0_62, %c0_63] : memref<1x128xbf16, #tpu.memory_space<vmem>>, vector<1x128xbf16>
    %cst_64 = arith.constant dense<0.000000e+00> : vector<128x128xf32>
    %142 = tpu.matmul %139, %140, %cst_64 {dimension_numbers = #tpu.dot_dimension_numbers<[1], [0], [0], [1], [0, 0, 1, 1], [], []>} : vector<128x256xbf16>, vector<256x128xbf16>, vector<128x128xf32> -> vector<128x128xf32>
    %143 = arith.truncf %142 : vector<128x128xf32> to vector<128x128xbf16>
    %144 = vector.broadcast %141 : vector<1x128xbf16> to vector<128x128xbf16>
    %145 = arith.addf %143, %144 : vector<128x128xbf16>
    %146 = arith.extf %145 : vector<128x128xbf16> to vector<128x128xf32>
    %c0_65 = arith.constant 0 : index
    %c0_66 = arith.constant 0 : index
    %147 = vector.load %arg10[%c0_65, %c0_66] : memref<128x128xf32, #tpu.memory_space<vmem>>, vector<128x128xf32>
    tpu.vector_store %arg10[%c0_65, %c0_66], %146 {strides = array<i32>} : memref<128x128xf32, #tpu.memory_space<vmem>>, vector<128x128xf32>,
    return
  }
  func.func @transform_0(%arg0: i32) -> (i32, i32) {
    %c0_i32 = arith.constant 0 : i32
    %c0_i32_0 = arith.constant 0 : i32
    return %arg0, %c0_i32 : i32, i32
  }
  func.func @transform_1(%arg0: i32) -> (i32, i32) {
    %c0_i32 = arith.constant 0 : i32
    %c0_i32_0 = arith.constant 0 : i32
    %c0_i32_1 = arith.constant 0 : i32
    return %c0_i32, %c0_i32_0 : i32, i32
  }
  func.func @transform_2(%arg0: i32) -> (i32, i32) {
    %c0_i32 = arith.constant 0 : i32
    %c0_i32_0 = arith.constant 0 : i32
    %c0_i32_1 = arith.constant 0 : i32
    return %c0_i32, %c0_i32_0 : i32, i32
  }
  func.func @transform_3(%arg0: i32) -> (i32, i32) {
    %c0_i32 = arith.constant 0 : i32
    %c0_i32_0 = arith.constant 0 : i32
    %c0_i32_1 = arith.constant 0 : i32
    return %c0_i32, %c0_i32_0 : i32, i32
  }
  func.func @transform_4(%arg0: i32) -> (i32, i32) {
    %c0_i32 = arith.constant 0 : i32
    %c0_i32_0 = arith.constant 0 : i32
    %c0_i32_1 = arith.constant 0 : i32
    return %c0_i32, %c0_i32_0 : i32, i32
  }
  func.func @transform_5(%arg0: i32) -> (i32, i32) {
    %c0_i32 = arith.constant 0 : i32
    %c0_i32_0 = arith.constant 0 : i32
    %c0_i32_1 = arith.constant 0 : i32
    return %c0_i32, %c0_i32_0 : i32, i32
  }
  func.func @transform_6(%arg0: i32) -> (i32, i32) {
    %c0_i32 = arith.constant 0 : i32
    %c0_i32_0 = arith.constant 0 : i32
    %c0_i32_1 = arith.constant 0 : i32
    return %c0_i32, %c0_i32_0 : i32, i32
  }
  func.func @transform_7(%arg0: i32) -> (i32, i32) {
    %c0_i32 = arith.constant 0 : i32
    %c0_i32_0 = arith.constant 0 : i32
    %c0_i32_1 = arith.constant 0 : i32
    return %c0_i32, %c0_i32_0 : i32, i32
  }
  func.func @transform_8(%arg0: i32) -> (i32, i32) {
    %c0_i32 = arith.constant 0 : i32
    %c0_i32_0 = arith.constant 0 : i32
    %c0_i32_1 = arith.constant 0 : i32
    return %c0_i32, %c0_i32_0 : i32, i32
  }
  func.func @transform_9(%arg0: i32) -> (i32, i32) {
    %c0_i32 = arith.constant 0 : i32
    %c0_i32_0 = arith.constant 0 : i32
    return %arg0, %c0_i32 : i32, i32
  }
}

</mosaic_0001>

<bundles_post_ra>
// kernel: tpu_custom_call.1
= control target key start
LH: loop header
LB: loop body
LE: loop exit
PB: predicated region body
PF: predicated region fallthrough
CT: control target
= control target key end

     0   :  { %14 = vsyncpa [#allocation3], 0  ;;  %s5392_s0 = inlined_call_operand.vmem [shape: f32[256,32], index: 0, kind: input, shape index: {}]   ;;  %s5393_s1 = inlined_call_operand.vmem [shape: bf16[32,256], index: 1, kind: input, shape index: {}]   ;;  %s5394_s2 = inlined_call_operand.vmem [shape: bf16[1,256], index: 2, kind: input, shape index: {}]   ;;  %s5395_s3 = inlined_call_operand.vmem [shape: bf16[256,256], index: 3, kind: input, shape index: {}]   ;;  %s5396_s4 = inlined_call_operand.vmem [shape: bf16[1,256], index: 4, kind: input, shape index: {}]   ;;  %s5397_s5 = inlined_call_operand.hbm [shape: bf16[256,256], index: 5, kind: input, shape index: {}]   ;;  %s5398_s6 = inlined_call_operand.vmem [shape: bf16[1,256], index: 6, kind: input, shape index: {}]   ;;  %s5399_s7 = inlined_call_operand.hbm [shape: bf16[256,128], index: 7, kind: input, shape index: {}]   ;;  %s5400_s8 = inlined_call_operand.vmem [shape: bf16[1,128], index: 8, kind: input, shape index: {}]   ;;  %s5401_s9 = inlined_call_operand.hbm [shape: f32[256,128], index: 9, kind: output, shape index: {}]  }
   0x1   :  { %15 = vsyncpa [#allocation6], 0 }
   0x2   :  { %16 = vsyncpa [#allocation4], 0 }
   0x3   :  { %18 = vsyncpa [#allocation4 + $0x1], 0  ;;  %s3856_s30 = smov 0   ;;  %s3858_s10 = smov 0  }
   0x4   :  { %s3860_s11 = smov 0   ;;  %s3862_s12 = smov 0  }
   0x5 LB: > { %s3877_s13 = sadd.s32 4294967295, %s3793_s12   ;;  %s3103_s14 = sadd.s32 4294967294, %s3793_s12   ;;  %s3793_s12 = sphi %s3862_s12, %s5568_s12   ;;  %s3789_s11 = sphi %s3860_s11, %s5567_s11   ;;  %s3785_s10 = sphi %s3858_s10, %s5566_s10   ;;  %s3781_s30 = sphi %s3856_s30, %s5565_s30  }
   0x6   : > { %s3881_s15 = sadd.s32 1, %s3793_s12   ;;  %s225_s16 = sadd.s32 1, %s3789_s11 }
   0x7   : > { %s222_s17 = ssub.s32 %s3793_s12, %s3881_s15  ;;  %p235_p0 = scmp.ne.s32.totalorder %s3789_s11, %s3785_s10 }
   0x8   : > { %p223_p1 = scmp.eq.s32.totalorder %s222_s17, 0  ;;  %p236_p2 = scmp.eq.s32.totalorder %s3877_s13, 1 }
   0x9   : > { %p241_p3 = scmp.ne.s32.totalorder %s3785_s10, %s3781_s30  ;;  %p242_p4 = scmp.eq.s32.totalorder %s3103_s14, 1 }
   0xa   : > { %s3892_s18 = scalar_select %p223_p1, %s3789_s11, %s225_s16  }
   0xb   : > { %p3894_p5 = por %p236_p2, %p235_p0  ;;  %p3898_p6 = por %p242_p4, %p241_p3 }
   0xc   : > { %5433 = sst [smem:[#allocation11_spill]] %s3892_s18  ;;  %p3104_p7 = scmp.ge.s32.totalorder %s3793_s12, 1 }
   0xd   : > { %s5435_s20 = scalar_select %p3898_p6, 1, 0 }
   0xe   : > { %p249_p8 = scmp.lt.s32.totalorder %s3793_s12, 3  ;;  %p5402_p9 = scmp.eq.s32.totalorder %s3877_s13, 0 }
   0xf   : > { %s3795_s22 = smov [#allocation2]   ;;  %s3796_s25 = smov [#allocation5]  }
  0x10   : > { %p3905_p10 = pnand %p3104_p7, %p249_p8  ;;  %s273_s23 = sshll.u32 %s3795_s22, 4  ;;  %s274_s23 = int_to_ptr.vmem [resolvable:$true] %s273_s23 }
  0x11   : > { %s289_s26 = sshll.u32 %s3796_s25, 4  ;;  %s3684_s27 = scalar_lea.vmem %s274_s23, 4096  ;;  %s290_s26 = int_to_ptr.vmem [resolvable:$true] %s289_s26 }
  0x12   : > { %p3305_p11 = pneg %p3905_p10  ;;  %p3685_p0 = scmp.ne.s32.totalorder %s274_s23, %s3684_s27 }
  0x13   : > { %p3692_p3 = scmp.lt.s32.totalorder %s274_s23, %s274_s23  ;;  %p3693_p4 = scmp.lt.s32.totalorder %s3684_s27, %s3684_s27 }
  0x14   : > { %p3913_p12 = pnand %p5402_p9, %p3305_p11 }
  0x15   : > { %p3694_p7 = por %p3693_p4, %p3692_p3 }
  0x16   : > { %p3675_p13 = pneg %p3913_p12 }
  0x18   : > { %p3687_p1 = pnand %p3685_p0, %p3675_p13 }
  0x1a   : > { %p3688_p2 = pneg %p3687_p1 }
  0x1c   : > { %p3695_p8 = pnand %p3694_p7, %p3688_p2 }
  0x1e   : > { %3698 = shalt.err (!%p3695_p8)
}
  0x1f   : > { %s3797_s28 = smov 128   ;;  %s3798_s29 = smov 8  }
  0x20   : > { %3308 = dma.hbm_to_vmem [thread:$0]  (!%p3913_p12), %s5397_s5, 4096, %s274_s23, [#allocation3], %s3797_s28, %s3797_s28, %s3798_s29  }
  0x21   : > { %s3710_s17 = scalar_lea.vmem %s290_s26, 2048  ;;  %p3718_p9 = scmp.lt.s32.totalorder %s290_s26, %s290_s26 }
  0x22   : > { %p3711_p11 = scmp.ne.s32.totalorder %s290_s26, %s3710_s17  ;;  %p3719_p6 = scmp.lt.s32.totalorder %s3710_s17, %s3710_s17 }
  0x24   : > { %p3713_p0 = pnand %p3711_p11, %p3675_p13  ;;  %p3720_p3 = por %p3719_p6, %p3718_p9 }
  0x26   : > { %p3714_p1 = pneg %p3713_p0 }
  0x28   : > { %p3721_p2 = pnand %p3720_p3, %p3714_p1 }
  0x2a   : > { %3724 = shalt.err (!%p3721_p2)
}
  0x2b   : > { %s3799_s22 = smov 64   ;;  %s3800_s25 = smov 4  }
  0x2c   : > { %3311 = dma.hbm_to_vmem [thread:$0]  (!%p3913_p12), %s5399_s7, 2048, %s290_s26, [#allocation6], %s3799_s22, %s3799_s22, %s3800_s25  }
  0x2d   : > { %317 = sbr.rel (%p3905_p10) target bundleno = 1204 (0x4b4), region = 56 }
  0x32   : > { %p5438_p4 = scmp.eq.s32.totalorder %s3877_s13, 0 }
  0x34   : > { %3768 = dma.done.wait (%p5438_p4), [#allocation3], 4096   ;;  %p5439_p13 = pmov %p5438_p4 }
  0x35   : > { %p5440_p6 = pmov %p5438_p4 }
  0x36   : > { %3770 = vsyncadd (%p5439_p13), [#allocation3], 4294963200 }
  0x37   : > { %3772 = dma.done.wait (%p5440_p6), [#allocation6], 2048   ;;  %p5441_p9 = pmov %p5438_p4 }
  0x38   : > { %s3112_s23 = sshll.u32 %s3877_s13, 4  ;;  %v3801_v0 = vmov 0   ;;  %v3363_v1 = vld [vmem:[%s5393_s1 + $0x14] ss:$8 sps:$4 sm:$0xff]   ;;  %v3365_v2 = vld [vmem:[%s5393_s1 + $0x10] ss:$8 sps:$4 sm:$0xff]   ;;  %v589_v63 = vlaneseq }
  0x39   : > { %3774 = vsyncadd (%p5441_p9), [#allocation6], 4294965248  ;;  %480 = vmatprep.mubr.bf16.mxu0 %v3801_v0  ;;  %p358_p12 = scmp.lt.s32.totalorder %s3112_s23, 31  ;;  %460 = vmatprep.subr.bf16.mxu0 %v3363_v1  ;;  %v3366_v3 = vld [vmem:[%s5393_s1 + $0x4] ss:$8 sps:$4 sm:$0xff]   ;;  %vm423_vm0 = vcmask 261120  }
  0x3a   : > { %461 = vmatpush1.bf16.msra.mxu0 %v3365_v2  ;;  %v3368_v4 = vld [vmem:[%s5393_s1] ss:$8 sps:$4 sm:$0xff]   ;;  %v3369_v29 = vld [vmem:[%s5395_s3 + $0x74] ss:$8 sps:$4 sm:$0xff]   ;;  %v3371_v30 = vld [vmem:[%s5395_s3 + $0x70] ss:$8 sps:$4 sm:$0xff]  }
  0x3b   : > { %s5570_s23 = smov (!%p358_p12, %s3112_s23), 31  ;;  %462 = vmatprep.subr.bf16.mxu0 %v3366_v3  ;;  %1271 = vmatprep.subr.bf16.mxu1 %v3369_v29  ;;  %v3372_v31 = vld [vmem:[%s5395_s3 + $0x64] ss:$8 sps:$4 sm:$0xff]   ;;  %v3374_v32 = vld [vmem:[%s5395_s3 + $0x60] ss:$8 sps:$4 sm:$0xff]   ;;  %v590_v1 = vshrl.u32 %v589_v63, 7 }
  0x3c   : > { %s3113_s18 = sshll.u32 %s5570_s23, 3  ;;  %1272 = vmatpush1.bf16.msra.mxu1 %v3371_v30  ;;  %v3375_v33 = vld [vmem:[%s5395_s3 + $0x54] ss:$8 sps:$4 sm:$0xff]   ;;  %v3377_v34 = vld [vmem:[%s5395_s3 + $0x50] ss:$8 sps:$4 sm:$0xff]   ;;  %s354_s16 = sand.u32 1, %s3785_s10  }
  0x3d   : > { %s3952_s29 = scalar_lea.vmem %s5392_s0, %s3113_s18  ;;  %1273 = vmatprep.subr.bf16.mxu1 %v3372_v31  ;;  %v3378_v35 = vld [vmem:[%s5395_s3 + $0x44] ss:$8 sps:$4 sm:$0xff]   ;;  %v3380_v36 = vld [vmem:[%s5395_s3 + $0x40] ss:$8 sps:$4 sm:$0xff]   ;;  %v3381_v37 = vld [vmem:[%s5395_s3 + $0x34] ss:$8 sps:$4 sm:$0xff]  }
  0x3e   : > { %v374_v5 = vld [vmem:[%s3952_s29] sm:$0xff]  ;;  %v375_v6 = vld [vmem:[%s3952_s29 + $0x8] sm:$0xff]  ;;  %463 = vmatpush1.bf16.msra.mxu0 %v3368_v4  ;;  %v376_v8 = vld [vmem:[%s3952_s29 + $0x10] sm:$0xff]  ;;  %v3802_v61 = vmov 1966171168   ;;  %s3214_s22 = sshll.u32 %s3877_s13, 11 }
  0x3f   : > { %v390_v7 = vpack.c.bf16 %v375_v6, %v374_v5  ;;  %v377_v9 = vld [vmem:[%s3952_s29 + $0x18] sm:$0xff]  ;;  %v378_v11 = vld [vmem:[%s3952_s29 + $0x20] sm:$0xff]  ;;  %v379_v12 = vld [vmem:[%s3952_s29 + $0x28] sm:$0xff]  ;;  %v587_v62 = vunpack.c.l.s4 %v3802_v61  ;;  %s5344_s18 = scalar_lea.hbm %s5401_s9, %s3214_s22  ;;  %s5352_s21 = scalar_lea.sflag [#allocation4], %s354_s16 }
  0x40   : > { %v391_v10 = vpack.c.bf16 %v377_v9, %v376_v8  ;;  %v392_v13 = vpack.c.bf16 %v379_v12, %v378_v11  ;;  %v380_v14 = vld [vmem:[%s3952_s29 + $0x30] sm:$0xff]  ;;  %v381_v15 = vld [vmem:[%s3952_s29 + $0x38] sm:$0xff]  ;;  %v382_v17 = vld [vmem:[%s3952_s29 + $0x40] sm:$0xff]  ;;  %1274 = vmatpush1.bf16.msra.mxu1 %v3374_v32  ;;  %v4090_v8 = vsub.s32 0, %v590_v1  ;;  %s3803_s24 = smov [#allocation7]  }
  0x41   : > { %3118 = vmatmul.mubr.msk.bf16.vlgmr.msra.gmra.mxu0 %vm423_vm0, %v390_v7  ;;  %v393_v16 = vpack.c.bf16 %v381_v15, %v380_v14  ;;  %v383_v18 = vld [vmem:[%s3952_s29 + $0x48] sm:$0xff]  ;;  %v384_v20 = vld [vmem:[%s3952_s29 + $0x50] sm:$0xff]  ;;  %v385_v21 = vld [vmem:[%s3952_s29 + $0x58] sm:$0xff]  ;;  %1275 = vmatprep.subr.bf16.mxu1 %v3375_v33  ;;  %s3729_s26 = sshll.u32 %s3803_s24, 4  ;;  %s3730_s26 = int_to_ptr.vmem [resolvable:$false] %s3729_s26 }
  0x42   : > { %490 = vmatprep.mubr.bf16.mxu0 %v3801_v0  ;;  %v394_v19 = vpack.c.bf16 %v383_v18, %v382_v17  ;;  %v395_v22 = vpack.c.bf16 %v385_v21, %v384_v20  ;;  %v386_v23 = vld [vmem:[%s3952_s29 + $0x60] sm:$0xff]  ;;  %v387_v24 = vld [vmem:[%s3952_s29 + $0x68] sm:$0xff]  ;;  %v388_v26 = vld [vmem:[%s3952_s29 + $0x70] sm:$0xff]  ;;  %5442 = vst [vmem:[#allocation12_spill] sm:$0xff] %v4090_v8  ;;  %s3731_s28 = scalar_lea.vmem %s3730_s26, 4096 }
  0x43   : > { %v396_v25 = vpack.c.bf16 %v387_v24, %v386_v23  ;;  %v389_v27 = vld [vmem:[%s3952_s29 + $0x78] sm:$0xff]  ;;  %v3384_v39 = vld [vmem:[%s5395_s3 + $0x24] ss:$8 sps:$4 sm:$0xff]   ;;  %v3386_v40 = vld [vmem:[%s5395_s3 + $0x20] ss:$8 sps:$4 sm:$0xff]   ;;  %s3111_s29 = sshll.u32 %s354_s16, 7 }
  0x44   : > { %v397_v28 = vpack.c.bf16 %v389_v27, %v388_v26  ;;  %1276 = vmatpush1.bf16.msra.mxu1 %v3377_v34  ;;  %v3383_v38 = vld [vmem:[%s5395_s3 + $0x30] ss:$8 sps:$4 sm:$0xff]   ;;  %v3387_v41 = vld [vmem:[%s5395_s3 + $0x14] ss:$8 sps:$4 sm:$0xff]   ;;  %v3390_v43 = vld [vmem:[%s5395_s3 + $0x4] ss:$8 sps:$4 sm:$0xff]  }
  0x45   : > { %1277 = vmatprep.subr.bf16.mxu1 %v3378_v35  ;;  %v3389_v42 = vld [vmem:[%s5395_s3 + $0x10] ss:$8 sps:$4 sm:$0xff]   ;;  %v3392_v44 = vld [vmem:[%s5395_s3] ss:$8 sps:$4 sm:$0xff]   ;;  %v3393_v45 = vld [vmem:[%s5395_s3 + $0xf4] ss:$8 sps:$4 sm:$0xff]  }
  0x46   : > { %v3395_v46 = vld [vmem:[%s5395_s3 + $0xf0] ss:$8 sps:$4 sm:$0xff]   ;;  %v3396_v47 = vld [vmem:[%s5395_s3 + $0xe4] ss:$8 sps:$4 sm:$0xff]   ;;  %v3398_v48 = vld [vmem:[%s5395_s3 + $0xe0] ss:$8 sps:$4 sm:$0xff]  }
  0x47   : > { %v3399_v49 = vld [vmem:[%s5395_s3 + $0xd4] ss:$8 sps:$4 sm:$0xff]   ;;  %v3401_v50 = vld [vmem:[%s5395_s3 + $0xd0] ss:$8 sps:$4 sm:$0xff]   ;;  %v3402_v51 = vld [vmem:[%s5395_s3 + $0xc4] ss:$8 sps:$4 sm:$0xff]  }
  0x48   : > { %1278 = vmatpush1.bf16.msra.mxu1 %v3380_v36  ;;  %v3404_v52 = vld [vmem:[%s5395_s3 + $0xc0] ss:$8 sps:$4 sm:$0xff]   ;;  %v3405_v53 = vld [vmem:[%s5395_s3 + $0xb4] ss:$8 sps:$4 sm:$0xff]   ;;  %v3407_v54 = vld [vmem:[%s5395_s3 + $0xb0] ss:$8 sps:$4 sm:$0xff]  }
  0x49   : > { %3119 = vmatmul.mubr.msk.bf16.gmra.mxu0 %vm423_vm0, %v391_v10  ;;  %1279 = vmatprep.subr.bf16.mxu1 %v3381_v37  ;;  %v3408_v55 = vld [vmem:[%s5395_s3 + $0xa4] ss:$8 sps:$4 sm:$0xff]   ;;  %v3410_v56 = vld [vmem:[%s5395_s3 + $0xa0] ss:$8 sps:$4 sm:$0xff]   ;;  %v3411_v57 = vld [vmem:[%s5395_s3 + $0x94] ss:$8 sps:$4 sm:$0xff]  }
  0x4a   : > { %500 = vmatprep.mubr.bf16.mxu0 %v3801_v0  ;;  %v3413_v58 = vld [vmem:[%s5395_s3 + $0x90] ss:$8 sps:$4 sm:$0xff]   ;;  %v3414_v59 = vld [vmem:[%s5395_s3 + $0x84] ss:$8 sps:$4 sm:$0xff]   ;;  %v3416_v60 = vld [vmem:[%s5395_s3 + $0x80] ss:$8 sps:$4 sm:$0xff]  }
  0x4b   : > { %v3126_v2 = vld.sshfl [vmem:[%s5394_s2] sm:$0x11 pattern:$0x75316420]  ;;  %s5316_s17 = scalar_lea.vmem [#allocation7], %s3111_s29 }
  0x4c   : > { %1280 = vmatpush1.bf16.msra.mxu1 %v3383_v38  ;;  %v585_v4 = vcombine.high %v3126_v2, %v3126_v2  ;;  %s3019_s25 = sshll.u32 %s5316_s17, 4  ;;  %s5346_s25 = int_to_ptr.vmem [resolvable:$true] %s3019_s25 }
  0x4d   : > { %1281 = vmatprep.subr.bf16.mxu1 %v3384_v39  ;;  %s3725_s13 = scalar_lea.vmem %s5346_s25, 2048  ;;  %p3732_p11 = scmp.lt.s32.totalorder %s5346_s25, %s3730_s26 }
  0x4e   : > { %p3726_p10 = scmp.ne.s32.totalorder %s5346_s25, %s3725_s13  ;;  %p3733_p0 = scmp.lt.s32.totalorder %s3731_s28, %s3725_s13 }
  0x50   : > { %1282 = vmatpush1.bf16.msra.mxu1 %v3386_v40  ;;  %p3727_p7 = pnand %p3726_p10, %p3894_p5  ;;  %p3734_p1 = por %p3733_p0, %p3732_p11 }
  0x51   : > { %3120 = vmatmul.mubr.msk.bf16.gmra.mxu0 %vm423_vm0, %v392_v13  ;;  %1283 = vmatprep.subr.bf16.mxu1 %v3387_v41 }
  0x52   : > { %510 = vmatprep.mubr.bf16.mxu0 %v3801_v0  ;;  %p3728_p8 = pneg %p3727_p7 }
  0x54   : > { %1284 = vmatpush1.bf16.msra.mxu1 %v3389_v42  ;;  %p3735_p3 = pnand %p3734_p1, %p3728_p8 }
  0x55   : > { %1285 = vmatprep.subr.bf16.mxu1 %v3390_v43 }
  0x58   : > { %1286 = vmatpush1.bf16.msra.mxu1 %v3392_v44 }
  0x59   : > { %3121 = vmatmul.mubr.msk.bf16.gmra.mxu0 %vm423_vm0, %v393_v16  ;;  %1287 = vmatprep.subr.bf16.mxu1 %v3393_v45 }
  0x5a   : > { %520 = vmatprep.mubr.bf16.mxu0 %v3801_v0 }
  0x5c   : > { %1288 = vmatpush2.bf16.msra.mxu1 %v3395_v46 }
  0x5d   : > { %1289 = vmatprep.subr.bf16.mxu1 %v3396_v47 }
  0x60   : > { %1290 = vmatpush2.bf16.msra.mxu1 %v3398_v48 }
  0x61   : > { %3122 = vmatmul.mubr.msk.bf16.gmra.mxu0 %vm423_vm0, %v394_v19  ;;  %1291 = vmatprep.subr.bf16.mxu1 %v3399_v49 }
  0x62   : > { %530 = vmatprep.mubr.bf16.mxu0 %v3801_v0 }
  0x64   : > { %1292 = vmatpush2.bf16.msra.mxu1 %v3401_v50 }
  0x65   : > { %1293 = vmatprep.subr.bf16.mxu1 %v3402_v51 }
  0x68   : > { %1294 = vmatpush2.bf16.msra.mxu1 %v3404_v52 }
  0x69   : > { %3123 = vmatmul.mubr.msk.bf16.gmra.mxu0 %vm423_vm0, %v395_v22  ;;  %1295 = vmatprep.subr.bf16.mxu1 %v3405_v53 }
  0x6a   : > { %540 = vmatprep.mubr.bf16.mxu0 %v3801_v0 }
  0x6c   : > { %1296 = vmatpush2.bf16.msra.mxu1 %v3407_v54 }
  0x6d   : > { %1297 = vmatprep.subr.bf16.mxu1 %v3408_v55 }
  0x70   : > { %1298 = vmatpush2.bf16.msra.mxu1 %v3410_v56 }
  0x71   : > { %3124 = vmatmul.mubr.msk.bf16.gmra.mxu0 %vm423_vm0, %v396_v25  ;;  %1299 = vmatprep.subr.bf16.mxu1 %v3411_v57 }
  0x72   : > { %550 = vmatprep.mubr.bf16.mxu0 %v3801_v0  ;;  %v588_v0 = vunpack.c.0.s8 %v587_v62 }
  0x74   : > { %1300 = vmatpush2.bf16.msra.mxu1 %v3413_v58  ;;  %v4086_v3 = vsub.s32 %v588_v0, %v590_v1 }
  0x75   : > { %1301 = vmatprep.subr.bf16.mxu1 %v3414_v59 }
  0x76   : > { %v592_v5 = vrot.slane %v3126_v2, %v4086_v3  ;;  %v599_v6 = vrot.slane %v585_v4, %v4086_v3 }
  0x78   : > { %1302 = vmatpush2.bf16.msra.mxu1 %v3416_v60  ;;  %v601_v7 = vpack.i.b16 %v592_v5, %v592_v5  ;;  %v608_v10 = vpack.i.b16 %v599_v6, %v599_v6 }
  0x79   : > { %3125 = vmatmul.mubr.msk.bf16.gmra.mxu0 %vm423_vm0, %v397_v28 }
  0x7a   : > { %v4093_v12 = vrot.slane %v601_v7, %v4090_v8  ;;  %v4096_v15 = vrot.slane %v608_v10, %v4090_v8 }
 0x101   : > { %v482_v9 = vpop.f32.mrf.mxu0 }
 0x103   : > { %v484_v11 = vpop.f32.mrf.mxu0 }
 0x105   : > { %v486_v13 = vpop.f32.mrf.mxu0 }
 0x106   : > { %v561_v14 = vpack.c.bf16 %v486_v13, %v482_v9 }
 0x107   : > { %v488_v16 = vpop.f32.mrf.mxu0 }
 0x108   : > { %v4099_v17 = vadd.bf16 %v4093_v12, %v561_v14  ;;  %v562_v18 = vpack.c.bf16 %v488_v16, %v484_v11 }
 0x109   : > { %v492_v19 = vpop.f32.mrf.mxu0 }
 0x10a   : > { %v646_v20 = vmul.bf16 1060454197, %v4099_v17  ;;  %v4103_v21 = vadd.bf16 %v4096_v15, %v562_v18  ;;  %v630_v5 = vmul.bf16 1056980736, %v4099_v17 }
 0x10b   : > { %v494_v22 = vpop.f32.mrf.mxu0 }
 0x10c   : > { %v647_v23 = vmul.bf16 1060454197, %v4103_v21  ;;  %v662_v24 = vand.u32 2147450879, %v646_v20  ;;  %v631_v9 = vmul.bf16 1056980736, %v4103_v21 }
 0x10d   : > { %v496_v25 = vpop.f32.mrf.mxu0  ;;  %vm4265_vm2 = vcmp.ge.bf16.partialorder %v646_v20, 0 }
 0x10e   : > { %v663_v26 = vand.u32 2147450879, %v647_v23  ;;  %v563_v27 = vpack.c.bf16 %v496_v25, %v492_v19  ;;  %v678_v30 = vmul.bf16 1051213480, %v662_v24  ;;  %v886_v45 = vsub.bf16 0, %v662_v24 }
 0x10f   : > { %v498_v28 = vpop.f32.mrf.mxu0  ;;  %vm4233_vm1 = vcmp.ge.bf16.partialorder %v647_v23, 0 }
 0x110   : > { %v679_v29 = vmul.bf16 1051213480, %v663_v26  ;;  %v4111_v31 = vadd.bf16 %v4093_v12, %v563_v27  ;;  %v564_v32 = vpack.c.bf16 %v498_v28, %v494_v22  ;;  %v694_v38 = vadd.bf16 1065369472, %v678_v30 }
 0x111   : > { %v502_v33 = vpop.f32.mrf.mxu0  ;;  %v887_v48 = vsub.bf16 0, %v663_v26  ;;  %v902_v53 = vmul.bf16 %v886_v45, %v662_v24 }
 0x112   : > { %v695_v34 = vadd.bf16 1065369472, %v679_v29  ;;  %v4114_v35 = vadd.bf16 %v4096_v15, %v564_v32  ;;  %v648_v37 = vmul.bf16 1060454197, %v4111_v31 }
 0x113   : > { %v504_v36 = vpop.f32.mrf.mxu0  ;;  %v903_v56 = vmul.bf16 %v887_v48, %v663_v26  ;;  %v919_v0 = vmul.bf16 1069105081, %v902_v53 }
 0x114   : > { %3481 = vrcp.bf16 %v695_v34  ;;  %v649_v41 = vmul.bf16 1060454197, %v4114_v35  ;;  %v664_v43 = vand.u32 2147450879, %v648_v37  ;;  %vm4339_vm4 = vcmp.ge.bf16.partialorder %v648_v37, 0 }
 0x115   : > { %v506_v39 = vpop.f32.mrf.mxu0  ;;  %3483 = vrcp.bf16 %v694_v38  ;;  %v922_v6 = vmul.bf16 1069105081, %v903_v56 }
 0x116   : > { %v565_v40 = vpack.c.bf16 %v506_v39, %v502_v33  ;;  %v665_v49 = vand.u32 2147450879, %v649_v41  ;;  %v888_v51 = vsub.bf16 0, %v664_v43  ;;  %v680_v57 = vmul.bf16 1051213480, %v664_v43 }
 0x117   : > { %v508_v42 = vpop.f32.mrf.mxu0  ;;  %3485 = vpow.bf16 %v919_v0  ;;  %vm4314_vm3 = vcmp.ge.bf16.partialorder %v649_v41, 0 }
 0x118   : > { %v566_v44 = vpack.c.bf16 %v508_v42, %v504_v36  ;;  %v4121_v46 = vadd.bf16 %v4093_v12, %v565_v40  ;;  %v889_v58 = vsub.bf16 0, %v665_v49  ;;  %v904_v61 = vmul.bf16 %v888_v51, %v664_v43 }
 0x119   : > { %v512_v47 = vpop.f32.mrf.mxu0  ;;  %v696_v11 = vadd.bf16 1065369472, %v680_v57  ;;  %v681_v13 = vmul.bf16 1051213480, %v665_v49  ;;  %3487 = vpow.bf16 %v922_v6 }
 0x11a   : > { %v4126_v52 = vadd.bf16 %v4096_v15, %v566_v44  ;;  %v5413_v54 = vmul.bf16 1060454197, %v4121_v46  ;;  %v905_v14 = vmul.bf16 %v889_v58, %v665_v49  ;;  %v925_v22 = vmul.bf16 1069105081, %v904_v61 }
 0x11b   : > { %v514_v50 = vpop.f32.mrf.mxu0  ;;  %3489 = vrcp.bf16 %v696_v11  ;;  %v697_v34 = vadd.bf16 1065369472, %v681_v13 }
 0x11c   : > { %v5414_v62 = vmul.bf16 1060454197, %v4126_v52  ;;  %v666_v1 = vand.u32 2147450879, %v5413_v54  ;;  %v928_v36 = vmul.bf16 1069105081, %v905_v14  ;;  %3491 = vpow.bf16 %v925_v22 }
 0x11d   : > { %v516_v55 = vpop.f32.mrf.mxu0  ;;  %3493 = vrcp.bf16 %v697_v34 }
 0x11e   : > { %v567_v59 = vpack.c.bf16 %v516_v55, %v512_v47  ;;  %v667_v24 = vand.u32 2147450879, %v5414_v62  ;;  %v682_v25 = vmul.bf16 1051213480, %v666_v1  ;;  %v890_v26 = vsub.bf16 0, %v666_v1 }
 0x11f   : > { %v518_v60 = vpop.f32.mrf.mxu0  ;;  %3495 = vpow.bf16 %v928_v36 }
 0x120   : > { %v568_v63 = vpack.c.bf16 %v518_v60, %v514_v50  ;;  %v4133_v2 = vadd.bf16 %v4093_v12, %v567_v59  ;;  %v683_v40 = vmul.bf16 1051213480, %v667_v24  ;;  %v698_v47 = vadd.bf16 1065369472, %v682_v25 }
 0x121   : > { %v522_v4 = vpop.f32.mrf.mxu0  ;;  %v906_v48 = vmul.bf16 %v890_v26, %v666_v1  ;;  %v891_v57 = vsub.bf16 0, %v667_v24 }
 0x122   : > { %v4137_v7 = vadd.bf16 %v4096_v15, %v568_v63  ;;  %v3482_v10 = vpop.eup %3481  ;;  %v5406_v16 = vmul.bf16 1060454197, %v4133_v2  ;;  %v699_v60 = vadd.bf16 1065369472, %v683_v40  ;;  %3497 = vrcp.bf16 %v698_v47 }
 0x123   : > { %v524_v18 = vpop.f32.mrf.mxu0  ;;  %v4141_v19 = vmul.bf16 1065369472, %v3482_v10  ;;  %v3484_v33 = vpop.eup %3483  ;;  %v931_v1 = vmul.bf16 1069105081, %v906_v48 }
 0x124   : > { %v5412_v27 = vmul.bf16 1060454197, %v4137_v7  ;;  %v4148_v29 = vand.u32 2147450879, %v5406_v16  ;;  %v4159_v50 = vmul.bf16 1065369472, %v3484_v33  ;;  %3499 = vrcp.bf16 %v699_v60 }
 0x125   : > { %v526_v28 = vpop.f32.mrf.mxu0  ;;  %v743_v32 = vmul.bf16 1065893768, %v4141_v19  ;;  %v4183_v48 = vpop.eup %3485 }
 0x126   : > { %v569_v30 = vpack.c.bf16 %v526_v28, %v522_v4  ;;  %v4153_v38 = vand.u32 2147450879, %v5412_v27  ;;  %v684_v51 = vmul.bf16 1051213480, %v4148_v29  ;;  %v742_v14 = vmul.bf16 1065893768, %v4159_v50 }
 0x127   : > { %v528_v39 = vpop.f32.mrf.mxu0  ;;  %v759_v44 = vadd.bf16 3216687034, %v743_v32  ;;  %v892_v34 = vsub.bf16 0, %v4148_v29 }
 0x128   : > { %v4156_v42 = vadd.bf16 %v4093_v12, %v569_v30  ;;  %v570_v43 = vpack.c.bf16 %v528_v39, %v524_v18  ;;  %v685_v58 = vmul.bf16 1051213480, %v4153_v38  ;;  %v700_v10 = vadd.bf16 1065369472, %v684_v51 }
 0x129   : > { %v532_v49 = vpop.f32.mrf.mxu0  ;;  %v775_v63 = vmul.bf16 %v759_v44, %v4141_v19  ;;  %v907_v18 = vmul.bf16 %v891_v57, %v667_v24  ;;  %v893_v36 = vsub.bf16 0, %v4153_v38  ;;  %v758_v47 = vadd.bf16 3216687034, %v742_v14 }
 0x12a   : > { %v5404_v53 = vmul.bf16 1060454197, %v4156_v42  ;;  %v4164_v55 = vadd.bf16 %v4096_v15, %v570_v43  ;;  %v701_v22 = vadd.bf16 1065369472, %v685_v58  ;;  %3501 = vrcp.bf16 %v700_v10 }
 0x12b   : > { %v534_v59 = vpop.f32.mrf.mxu0  ;;  %v791_v28 = vadd.bf16 1068908470, %v775_v63  ;;  %v934_v60 = vmul.bf16 1069105081, %v907_v18  ;;  %v774_v18 = vmul.bf16 %v758_v47, %v4159_v50 }
 0x12c   : > { %v670_v61 = vand.u32 2147450879, %v5404_v53  ;;  %v5408_v4 = vmul.bf16 1060454197, %v4164_v55  ;;  %3503 = vrcp.bf16 %v701_v22 }
 0x12d   : > { %v536_v6 = vpop.f32.mrf.mxu0  ;;  %v807_v24 = vmul.bf16 %v791_v28, %v4141_v19  ;;  %v790_v0 = vadd.bf16 1068908470, %v774_v18 }
 0x12e   : > { %v686_v11 = vmul.bf16 1051213480, %v670_v61  ;;  %v571_v13 = vpack.c.bf16 %v536_v6, %v532_v49  ;;  %v671_v25 = vand.u32 2147450879, %v5408_v4  ;;  %v894_v44 = vsub.bf16 0, %v670_v61 }
 0x12f   : > { %v538_v26 = vpop.f32.mrf.mxu0  ;;  %v823_v6 = vadd.bf16 3197288082, %v807_v24 }
 0x130   : > { %v702_v30 = vadd.bf16 1065369472, %v686_v11  ;;  %v4177_v32 = vadd.bf16 %v4093_v12, %v571_v13  ;;  %v572_v33 = vpack.c.bf16 %v538_v26, %v534_v59  ;;  %v687_v39 = vmul.bf16 1051213480, %v671_v25  ;;  %v4187_v59 = vpop.eup %3487 }
 0x131   : > { %v542_v40 = vpop.f32.mrf.mxu0  ;;  %v3490_v10 = vpop.eup %3489  ;;  %v908_v11 = vmul.bf16 %v892_v34, %v4148_v29  ;;  %v909_v13 = vmul.bf16 %v893_v36, %v4153_v38  ;;  %v910_v26 = vmul.bf16 %v894_v44, %v670_v61  ;;  %v839_v29 = vmul.bf16 %v823_v6, %v4141_v19 }
 0x132   : > { %v703_v51 = vadd.bf16 1065369472, %v687_v39  ;;  %v5403_v57 = vmul.bf16 1060454197, %v4177_v32  ;;  %3505 = vrcp.bf16 %v702_v30  ;;  %v4190_v63 = vadd.bf16 %v4096_v15, %v572_v33  ;;  %v4198_v30 = vpop.eup %3491 }
 0x133   : > { %v544_v58 = vpop.f32.mrf.mxu0  ;;  %3507 = vpow.bf16 %v931_v1  ;;  %v895_v33 = vsub.bf16 0, %v671_v25  ;;  %v3494_v44 = vpop.eup %3493  ;;  %v940_v49 = vmul.bf16 1069105081, %v909_v13  ;;  %v943_v43 = vmul.bf16 1069105081, %v910_v26 }
 0x134   : > { %v672_v14 = vand.u32 2147450879, %v5403_v57  ;;  %v5405_v28 = vmul.bf16 1060454197, %v4190_v63  ;;  %3509 = vrcp.bf16 %v703_v51  ;;  %v4207_v57 = vpop.eup %3495  ;;  %v4214_v45 = vmul.bf16 1065369472, %v3490_v10 }
 0x135   : > { %v546_v22 = vpop.f32.mrf.mxu0  ;;  %3511 = vpow.bf16 %v934_v60  ;;  %v855_v60 = vadd.bf16 1048723074, %v839_v29  ;;  %v4218_v26 = vmul.bf16 1065369472, %v3494_v44 }
 0x136   : > { %v573_v39 = vpack.c.bf16 %v546_v22, %v542_v40  ;;  %v688_v24 = vmul.bf16 1051213480, %v672_v14  ;;  %v896_v34 = vsub.bf16 0, %v672_v14  ;;  %v673_v38 = vand.u32 2147450879, %v5405_v28  ;;  %v3498_v28 = vpop.eup %3497 }
 0x137   : > { %v548_v1 = vpop.f32.mrf.mxu0  ;;  %v937_v40 = vmul.bf16 1069105081, %v908_v11  ;;  %v3500_v16 = vpop.eup %3499 }
 0x138   : > { %v4204_v36 = vadd.bf16 %v4093_v12, %v573_v39  ;;  %v574_v61 = vpack.c.bf16 %v548_v1, %v544_v58  ;;  %v704_v22 = vadd.bf16 1065369472, %v688_v24  ;;  %v689_v53 = vmul.bf16 1051213480, %v673_v38 }
 0x139   : > { %v552_v51 = vpop.f32.mrf.mxu0  ;;  %v911_v39 = vmul.bf16 %v895_v33, %v671_v25  ;;  %v912_v11 = vmul.bf16 %v896_v34, %v672_v14  ;;  %v897_v47 = vsub.bf16 0, %v673_v38  ;;  %v4220_v25 = vmul.bf16 1065369472, %v3498_v28 }
 0x13a   : > { %v4210_v6 = vadd.bf16 %v4096_v15, %v574_v61  ;;  %v5407_v58 = vmul.bf16 1060454197, %v4204_v36  ;;  %3513 = vrcp.bf16 %v704_v22  ;;  %v705_v13 = vadd.bf16 1065369472, %v689_v53 }
 0x13b   : > { %v554_v1 = vpop.f32.mrf.mxu0  ;;  %3515 = vpow.bf16 %v937_v40  ;;  %v806_v33 = vmul.bf16 %v790_v0, %v4159_v50  ;;  %v946_v14 = vmul.bf16 1069105081, %v911_v39  ;;  %v871_v53 = vmul.bf16 %v855_v60, %v4141_v19  ;;  %v3502_v40 = vpop.eup %3501 }
 0x13c   : > { %v5410_v24 = vmul.bf16 1060454197, %v4210_v6  ;;  %v674_v61 = vand.u32 2147450879, %v5407_v58  ;;  %3517 = vpow.bf16 %v940_v49  ;;  %v949_v22 = vmul.bf16 1069105081, %v912_v11  ;;  %v3504_v44 = vpop.eup %3503 }
 0x13d   : > { %v556_v18 = vpop.f32.mrf.mxu0  ;;  %3519 = vpow.bf16 %v943_v43  ;;  %v913_v58 = vmul.bf16 %v897_v47, %v673_v38  ;;  %v4226_v56 = vmul.bf16 1065369472, %v3500_v16  ;;  %v967_v38 = vmul.bf16 %v4187_v59, %v871_v53 }
 0x13e   : > { %v675_v29 = vand.u32 2147450879, %v5410_v24  ;;  %v575_v10 = vpack.c.bf16 %v556_v18, %v552_v51  ;;  %3521 = vrcp.bf16 %v705_v13  ;;  %v898_v49 = vsub.bf16 0, %v674_v61 }
 0x13f   : > { %v558_v34 = vpop.f32.mrf.mxu0  ;;  %v690_v51 = vmul.bf16 1051213480, %v674_v61  ;;  %v822_v16 = vadd.bf16 3197288082, %v806_v33  ;;  %v4243_v39 = vmul.bf16 1065369472, %v3502_v40  ;;  %3523 = vpow.bf16 %v946_v14 }
 0x140   : > { %v576_v4 = vpack.c.bf16 %v558_v34, %v554_v1  ;;  %v4229_v0 = vadd.bf16 %v4093_v12, %v575_v10  ;;  %v3506_v19 = vpop.eup %3505  ;;  %v899_v12 = vsub.bf16 0, %v675_v29  ;;  %v4246_v23 = vmul.bf16 1065369472, %v3504_v44 }
 0x141   : > { %v4241_v47 = vpop.eup %3507  ;;  %3525 = vpow.bf16 %v949_v22  ;;  %v952_v60 = vmul.bf16 1069105081, %v913_v58  ;;  %v691_v11 = vmul.bf16 1051213480, %v675_v29  ;;  %v4248_v18 = vmul.bf16 1065369472, %v3506_v19 }
 0x142   : > { %v4238_v43 = vadd.bf16 %v4096_v15, %v576_v4  ;;  %v5409_v1 = vmul.bf16 1060454197, %v4229_v0  ;;  %v3510_v13 = vpop.eup %3509  ;;  %v4250_v15 = vmul.bf16 %v898_v49, %v674_v61  ;;  %v706_v33 = vadd.bf16 1065369472, %v690_v51 }
 0x143   : > { %v983_v14 = vsub.bf16 1065369472, %v967_v38  ;;  %v838_v10 = vmul.bf16 %v822_v16, %v4159_v50  ;;  %v745_v34 = vmul.bf16 1065893768, %v4218_v26  ;;  %v4257_v53 = vpop.eup %3511  ;;  %v4259_v58 = vmul.bf16 %v899_v12, %v675_v29 }
 0x144   : > { %v676_v4 = vand.u32 2147450879, %v5409_v1  ;;  %v5411_v59 = vmul.bf16 1060454197, %v4238_v43  ;;  %3527 = vpow.bf16 %v952_v60  ;;  %v4269_v38 = vmul.bf16 1065369472, %v3510_v13 }
 0x145   : > { %v1015_v44 = vsub.bf16 0, %v983_v14  ;;  %v854_v49 = vadd.bf16 1048723074, %v838_v10  ;;  %v761_v19 = vadd.bf16 3216687034, %v745_v34  ;;  %3529 = vrcp.bf16 %v706_v33 }
 0x146   : > { %v692_v40 = vmul.bf16 1051213480, %v676_v4  ;;  %v900_v22 = vsub.bf16 0, %v676_v4  ;;  %v677_v61 = vand.u32 2147450879, %v5411_v59 }
 0x147   : > { %v707_v16 = vadd.bf16 1065369472, %v691_v11  ;;  %v1031_v60 = vsel %vm4233_vm1, %v983_v14, %v1015_v44  ;;  %v870_v10 = vmul.bf16 %v854_v49, %v4159_v50  ;;  %v777_v34 = vmul.bf16 %v761_v19, %v4218_v26 }
 0x148   : > { %v4272_v12 = vmul.bf16 %v900_v22, %v676_v4  ;;  %v3514_v1 = vpop.eup %3513  ;;  %v693_v24 = vmul.bf16 1051213480, %v677_v61  ;;  %v708_v59 = vadd.bf16 1065369472, %v692_v40  ;;  %v901_v27 = vsub.bf16 0, %v677_v61 }
 0x149   : > { %v4278_v20 = vpop.eup %3515  ;;  %v1047_v11 = vadd.bf16 1065369472, %v1031_v60  ;;  %v966_v4 = vmul.bf16 %v4183_v48, %v870_v10  ;;  %v793_v22 = vadd.bf16 1068908470, %v777_v34  ;;  %v744_v28 = vmul.bf16 1065893768, %v4214_v45 }
 0x14a   : > { %v4281_v29 = vpop.eup %3517  ;;  %v4285_v14 = vmul.bf16 1065369472, %v3514_v1  ;;  %3531 = vrcp.bf16 %v707_v16  ;;  %v747_v44 = vmul.bf16 1065893768, %v4226_v56  ;;  %v709_v49 = vadd.bf16 1065369472, %v693_v24 }
 0x14b   : > { %v4289_v33 = vpop.eup %3519  ;;  %v1063_v40 = vmul.bf16 %v1047_v11, %v631_v9  ;;  %v982_v19 = vsub.bf16 1065369472, %v966_v4  ;;  %v809_v60 = vmul.bf16 %v793_v22, %v4218_v26  ;;  %3533 = vrcp.bf16 %v708_v59 }
 0x14c   : > { %v3522_v48 = vpop.eup %3521  ;;  %v760_v10 = vadd.bf16 3216687034, %v744_v28  ;;  %v763_v34 = vadd.bf16 3216687034, %v747_v44  ;;  %v746_v1 = vmul.bf16 1065893768, %v4220_v25  ;;  %v4295_v16 = vmul.bf16 %v901_v27, %v677_v61 }
 0x14d   : > { %1303 = vmatprep.mubr.bf16.mxu1 %v1063_v40  ;;  %v1014_v50 = vsub.bf16 0, %v982_v19  ;;  %v825_v13 = vadd.bf16 3197288082, %v809_v60  ;;  %v749_v54 = vmul.bf16 1065893768, %v4246_v23  ;;  %v4298_v24 = vpop.eup %3523  ;;  %3535 = vrcp.bf16 %v709_v49 }
 0x14e   : > { %v776_v21 = vmul.bf16 %v760_v10, %v4214_v45  ;;  %v779_v9 = vmul.bf16 %v763_v34, %v4226_v56  ;;  %v762_v11 = vadd.bf16 3216687034, %v746_v1  ;;  %v748_v59 = vmul.bf16 1065893768, %v4243_v39 }
 0x14f   : > { %v4303_v4 = vpop.eup %3525  ;;  %v4305_v22 = vmul.bf16 1065369472, %v3522_v48  ;;  %v1030_v27 = vsel %vm4265_vm2, %v982_v19, %v1014_v50  ;;  %v841_v61 = vmul.bf16 %v825_v13, %v4218_v26  ;;  %v765_v28 = vadd.bf16 3216687034, %v749_v54 }
 0x150   : > { %v1046_v44 = vadd.bf16 1065369472, %v1030_v27  ;;  %v792_v40 = vadd.bf16 1068908470, %v776_v21  ;;  %v778_v60 = vmul.bf16 %v762_v11, %v4220_v25  ;;  %v795_v34 = vadd.bf16 1068908470, %v779_v9 }
 0x151   : > { %v857_v10 = vadd.bf16 1048723074, %v841_v61  ;;  %v781_v1 = vmul.bf16 %v765_v28, %v4246_v23  ;;  %v764_v62 = vadd.bf16 3216687034, %v748_v59  ;;  %v751_v50 = vmul.bf16 1065893768, %v4269_v38 }
 0x152   : > { %v1062_v51 = vmul.bf16 %v1046_v44, %v630_v5  ;;  %v808_v54 = vmul.bf16 %v792_v40, %v4214_v45  ;;  %v794_v13 = vadd.bf16 1068908470, %v778_v60  ;;  %v4322_v49 = vpop.eup %3527  ;;  %v811_v21 = vmul.bf16 %v795_v34, %v4226_v56 }
 0x153   : > { %v873_v19 = vmul.bf16 %v857_v10, %v4218_v26  ;;  %v797_v9 = vadd.bf16 1068908470, %v781_v1  ;;  %v780_v41 = vmul.bf16 %v764_v62, %v4243_v39  ;;  %v767_v17 = vadd.bf16 3216687034, %v751_v50  ;;  %v3530_v40 = vpop.eup %3529 }
 0x154   : > { %1304 = vmatmul.mubr.bf16.vlgmr.msra.gmra.mxu1 %v1062_v51  ;;  %v824_v11 = vadd.bf16 3197288082, %v808_v54  ;;  %v810_v59 = vmul.bf16 %v794_v13, %v4220_v25  ;;  %v750_v5 = vmul.bf16 1065893768, %v4248_v18  ;;  %v827_v61 = vadd.bf16 3197288082, %v811_v21 }
 0x155   : > { %v969_v27 = vmul.bf16 %v4207_v57, %v873_v19  ;;  %v813_v28 = vmul.bf16 %v797_v9, %v4246_v23  ;;  %v796_v44 = vadd.bf16 1068908470, %v780_v41  ;;  %v783_v10 = vmul.bf16 %v767_v17, %v4269_v38 }
 0x156   : > { %v840_v26 = vmul.bf16 %v824_v11, %v4214_v45  ;;  %v826_v60 = vadd.bf16 3197288082, %v810_v59  ;;  %v766_v62 = vadd.bf16 3216687034, %v750_v5  ;;  %v843_v51 = vmul.bf16 %v827_v61, %v4226_v56 }
 0x157   : > { %v985_v1 = vsub.bf16 1065369472, %v969_v27  ;;  %v829_v54 = vadd.bf16 3197288082, %v813_v28  ;;  %v812_v19 = vmul.bf16 %v796_v44, %v4243_v39  ;;  %v799_v21 = vadd.bf16 1068908470, %v783_v10 }
 0x158   : > { %v3532_v13 = vpop.eup %3531  ;;  %v856_v50 = vadd.bf16 1048723074, %v840_v26  ;;  %v842_v57 = vmul.bf16 %v826_v60, %v4220_v25  ;;  %v859_v11 = vadd.bf16 1048723074, %v843_v51  ;;  %v782_v17 = vmul.bf16 %v766_v62, %v4248_v18 }
 0x159   : > { %v1017_v41 = vsub.bf16 0, %v985_v1  ;;  %v845_v59 = vmul.bf16 %v829_v54, %v4246_v23  ;;  %v4345_v5 = vpop.eup %3533  ;;  %v5451_v27 = vmul.bf16 1060454197, %v4126_v52  ;;  %v4353_v28 = vmul.bf16 1065369472, %v3530_v40 }
 0x15a   : > { %v872_v37 = vmul.bf16 %v856_v50, %v4214_v45  ;;  %v858_v44 = vadd.bf16 1048723074, %v842_v57  ;;  %v828_v26 = vadd.bf16 3197288082, %v812_v19  ;;  %v5454_v60 = vmul.bf16 1060454197, %v4121_v46 }
 0x15b   : > { %vm4349_vm5 = vcmp.ge.bf16.partialorder %v5451_v27, 0  ;;  %v1033_v62 = vsel %vm4314_vm3, %v985_v1, %v1017_v41  ;;  %v875_v51 = vmul.bf16 %v859_v11, %v4226_v56  ;;  %v861_v54 = vadd.bf16 1048723074, %v845_v59 }
 0x15c   : > { %vm4358_vm6 = vcmp.ge.bf16.partialorder %v5454_v60, 0  ;;  %v815_v27 = vmul.bf16 %v799_v21, %v4269_v38  ;;  %v5457_v40 = vmul.bf16 1060454197, %v4137_v7  ;;  %v1049_v50 = vadd.bf16 1065369472, %v1033_v62  ;;  %v3536_v21 = vpop.eup %3535 }
 0x15d   : > { %v968_v57 = vmul.bf16 %v4198_v30, %v872_v37  ;;  %v874_v19 = vmul.bf16 %v858_v44, %v4220_v25  ;;  %v844_v60 = vmul.bf16 %v828_v26, %v4243_v39  ;;  %v971_v48 = vmul.bf16 %v4257_v53, %v875_v51 }
 0x15e   : > { %vm4368_vm7 = vcmp.ge.bf16.partialorder %v5457_v40, 0  ;;  %v877_v56 = vmul.bf16 %v861_v54, %v4246_v23  ;;  %v831_v1 = vadd.bf16 3197288082, %v815_v27  ;;  %v798_v41 = vadd.bf16 1068908470, %v782_v17 }
 0x15f   : > { %v5460_v11 = vmul.bf16 1056980736, %v4114_v35  ;;  %v984_v40 = vsub.bf16 1065369472, %v968_v57  ;;  %v970_v34 = vmul.bf16 %v4241_v47, %v874_v19  ;;  %v860_v62 = vadd.bf16 1048723074, %v844_v60 }
 0x160   : > { %v987_v8 = vsub.bf16 1065369472, %v971_v48  ;;  %v973_v30 = vmul.bf16 %v4281_v29, %v877_v56  ;;  %v847_v25 = vmul.bf16 %v831_v1, %v4269_v38  ;;  %v814_v37 = vmul.bf16 %v798_v41, %v4248_v18 }
 0x161   : > { %v1065_v59 = vmul.bf16 %v1049_v50, %v5460_v11  ;;  %v1016_v53 = vsub.bf16 0, %v984_v40  ;;  %v986_v23 = vsub.bf16 1065369472, %v970_v34  ;;  %v876_v17 = vmul.bf16 %v860_v62, %v4243_v39 }
 0x162   : > { %v753_v44 = vmul.bf16 1065893768, %v4305_v22  ;;  %v5461_v35 = vmul.bf16 1069105081, %v4250_v15  ;;  %v1019_v26 = vsub.bf16 0, %v987_v8 }
 0x163   : > { %1313 = vmatprep.mubr.bf16.mxu1 %v1065_v59  ;;  %v989_v47 = vsub.bf16 1065369472, %v973_v30  ;;  %v863_v51 = vadd.bf16 1048723074, %v847_v25  ;;  %v1032_v29 = vsel %vm4339_vm4, %v984_v40, %v1016_v53  ;;  %v1018_v54 = vsub.bf16 0, %v986_v23 }
 0x164   : > { %3537 = vpow.bf16 %v5461_v35  ;;  %v972_v27 = vmul.bf16 %v4278_v20, %v876_v17  ;;  %v830_v50 = vadd.bf16 3197288082, %v814_v37  ;;  %v5462_v57 = vmul.bf16 1060454197, %v4164_v55 }
 0x165   : > { %v1048_v39 = vadd.bf16 1065369472, %v1032_v29  ;;  %v1035_v15 = vsel %vm4349_vm5, %v987_v8, %v1019_v26  ;;  %v1021_v19 = vsub.bf16 0, %v989_v47  ;;  %v879_v60 = vmul.bf16 %v863_v51, %v4269_v38 }
 0x166   : > { %vm4392_vm8 = vcmp.ge.bf16.partialorder %v5462_v57, 0  ;;  %v4399_v48 = vmul.bf16 1065369472, %v3532_v13  ;;  %v1051_v9 = vadd.bf16 1065369472, %v1035_v15  ;;  %v1034_v20 = vsel %vm4358_vm6, %v986_v23, %v1018_v54 }
 0x167   : > { %v846_v56 = vmul.bf16 %v830_v50, %v4248_v18  ;;  %v5465_v1 = vmul.bf16 1060454197, %v4133_v2  ;;  %v5468_v61 = vmul.bf16 1056980736, %v4111_v31  ;;  %v1037_v38 = vsel %vm4368_vm7, %v989_v47, %v1021_v19 }
 0x168   : > { %v988_v13 = vsub.bf16 1065369472, %v972_v27  ;;  %v975_v11 = vmul.bf16 %v4298_v24, %v879_v60  ;;  %v4415_v59 = vmul.bf16 1065369472, %v3536_v21  ;;  %v5469_v10 = vmul.bf16 1056980736, %v4126_v52 }
 0x169   : > { %vm4406_vm9 = vcmp.ge.bf16.partialorder %v5465_v1, 0  ;;  %v1064_v8 = vmul.bf16 %v1048_v39, %v5468_v61  ;;  %v1050_v62 = vadd.bf16 1065369472, %v1034_v20  ;;  %v862_v30 = vadd.bf16 1048723074, %v846_v56 }
 0x16a   : > { %v1067_v40 = vmul.bf16 %v1051_v9, %v5469_v10  ;;  %v5470_v25 = vmul.bf16 1069105081, %v4259_v58  ;;  %v991_v37 = vsub.bf16 1065369472, %v975_v11  ;;  %v769_v31 = vadd.bf16 3216687034, %v753_v44 }
 0x16b   : > { %1314 = vmatmul.mubr.bf16.gmra.mxu1 %v1064_v8  ;;  %v752_v53 = vmul.bf16 1065893768, %v4285_v14  ;;  %v4423_v45 = vmul.bf16 1065369472, %v4345_v5  ;;  %v1053_v24 = vadd.bf16 1065369472, %v1037_v38  ;;  %v878_v21 = vmul.bf16 %v862_v30, %v4248_v18 }
 0x16c   : > { %3539 = vpow.bf16 %v5470_v25  ;;  %1323 = vmatprep.mubr.bf16.mxu1 %v1067_v40  ;;  %v755_v52 = vmul.bf16 1065893768, %v4399_v48  ;;  %v1020_v23 = vsub.bf16 0, %v988_v13  ;;  %v1023_v17 = vsub.bf16 0, %v991_v37 }
 0x16d   : > { %v785_v35 = vmul.bf16 %v769_v31, %v4305_v22  ;;  %v768_v58 = vadd.bf16 3216687034, %v752_v53  ;;  %v974_v26 = vmul.bf16 %v4289_v33, %v878_v21  ;;  %v754_v44 = vmul.bf16 1065893768, %v4353_v28 }
 0x16e   : > { %v771_v47 = vadd.bf16 3216687034, %v755_v52  ;;  %v757_v51 = vmul.bf16 1065893768, %v4415_v59  ;;  %v5471_v5 = vmul.bf16 1069105081, %v4295_v16  ;;  %v1039_v33 = vsel %vm4392_vm8, %v991_v37, %v1023_v17 }
 0x16f   : > { %v5472_v29 = vmul.bf16 1056980736, %v4121_v46  ;;  %v801_v54 = vadd.bf16 1068908470, %v785_v35  ;;  %v784_v27 = vmul.bf16 %v768_v58, %v4285_v14  ;;  %v5473_v50 = vmul.bf16 1056980736, %v4137_v7 }
 0x170   : > { %3541 = vpow.bf16 %v5471_v5  ;;  %v787_v39 = vmul.bf16 %v771_v47, %v4399_v48  ;;  %v770_v15 = vadd.bf16 3216687034, %v754_v44  ;;  %v5474_v19 = vmul.bf16 1060454197, %v4156_v42 }
 0x171   : > { %v1066_v18 = vmul.bf16 %v1050_v62, %v5472_v29  ;;  %v1069_v57 = vmul.bf16 %v1053_v24, %v5473_v50  ;;  %v817_v46 = vmul.bf16 %v801_v54, %v4305_v22  ;;  %v800_v60 = vadd.bf16 1068908470, %v784_v27 }
 0x172   : > { %vm4443_vm10 = vcmp.ge.bf16.partialorder %v5474_v19, 0  ;;  %v773_v9 = vadd.bf16 3216687034, %v757_v51  ;;  %v756_v20 = vmul.bf16 1065893768, %v4423_v45  ;;  %v1036_v7 = vsel %vm4406_vm9, %v988_v13, %v1020_v23  ;;  %v3538_v61 = vpop.eup %3537 }
 0x173   : > { %v990_v34 = vsub.bf16 1065369472, %v974_v26  ;;  %v803_v56 = vadd.bf16 1068908470, %v787_v39  ;;  %v786_v1 = vmul.bf16 %v770_v15, %v4353_v28  ;;  %1324 = vmatmul.mubr.bf16.gmra.mxu1 %v1066_v18  ;;  %v833_v8 = vadd.bf16 3197288082, %v817_v46 }
 0x174   : > { %v816_v38 = vmul.bf16 %v800_v60, %v4285_v14  ;;  %v789_v11 = vmul.bf16 %v773_v9, %v4415_v59  ;;  %v772_v10 = vadd.bf16 3216687034, %v756_v20  ;;  %v639_v40 = vmul.bf16 1056980736, %v4164_v55  ;;  %1333 = vmatprep.mubr.bf16.mxu1 %v1069_v57 }
 0x175   : > { %v1055_v62 = vadd.bf16 1065369472, %v1039_v33  ;;  %v819_v30 = vmul.bf16 %v803_v56, %v4399_v48  ;;  %v802_v41 = vadd.bf16 1068908470, %v786_v1  ;;  %v1052_v13 = vadd.bf16 1065369472, %v1036_v7 }
 0x176   : > { %v849_v25 = vmul.bf16 %v833_v8, %v4305_v22  ;;  %v832_v37 = vadd.bf16 3197288082, %v816_v38  ;;  %v805_v31 = vadd.bf16 1068908470, %v789_v11  ;;  %v1022_v53 = vsub.bf16 0, %v990_v34 }
 0x177   : > { %v835_v24 = vadd.bf16 3197288082, %v819_v30  ;;  %v818_v21 = vmul.bf16 %v802_v41, %v4353_v28  ;;  %v788_v52 = vmul.bf16 %v772_v10, %v4423_v45  ;;  %v5477_v23 = vmul.bf16 1069105081, %v4272_v12 }
 0x178   : > { %v865_v55 = vadd.bf16 1048723074, %v849_v25  ;;  %v848_v17 = vmul.bf16 %v832_v37, %v4285_v14  ;;  %v821_v35 = vmul.bf16 %v805_v31, %v4415_v59  ;;  %v1071_v58 = vmul.bf16 %v1055_v62, %v639_v40 }
 0x179   : > { %3543 = vpow.bf16 %v5477_v23  ;;  %v851_v26 = vmul.bf16 %v835_v24, %v4399_v48  ;;  %v834_v47 = vadd.bf16 3197288082, %v818_v21  ;;  %v804_v44 = vadd.bf16 1068908470, %v788_v52 }
 0x17a   : > { %v3540_v51 = vpop.eup %3539  ;;  %v5478_v5 = vmul.bf16 1056980736, %v4133_v2  ;;  %v881_v18 = vmul.bf16 %v865_v55, %v4305_v22  ;;  %v864_v54 = vadd.bf16 1048723074, %v848_v17  ;;  %v837_v27 = vadd.bf16 3197288082, %v821_v35 }
 0x17b   : > { %v1038_v12 = vsel %vm4443_vm10, %v990_v34, %v1022_v53  ;;  %v867_v50 = vadd.bf16 1048723074, %v851_v26  ;;  %v850_v57 = vmul.bf16 %v834_v47, %v4353_v28  ;;  %v820_v33 = vmul.bf16 %v804_v44, %v4423_v45 }
 0x17c   : > { %v1068_v29 = vmul.bf16 %v1052_v13, %v5478_v5  ;;  %v977_v39 = vmul.bf16 %v4322_v49, %v881_v18  ;;  %v880_v15 = vmul.bf16 %v864_v54, %v4285_v14  ;;  %v853_v2 = vmul.bf16 %v837_v27, %v4415_v59  ;;  %v3432_v49 = vld [vmem:[#allocation2 + $0x20] ss:$8 sps:$4 sm:$0xff]  }
 0x17d   : > { %v638_v19 = vmul.bf16 1056980736, %v4156_v42  ;;  %v883_v22 = vmul.bf16 %v867_v50, %v4399_v48  ;;  %v866_v46 = vadd.bf16 1048723074, %v850_v57  ;;  %v836_v16 = vadd.bf16 3197288082, %v820_v33 }
 0x17e   : > { %1334 = vmatmul.mubr.bf16.gmra.mxu1 %v1068_v29  ;;  %v3542_v60 = vpop.eup %3541  ;;  %v1054_v9 = vadd.bf16 1065369472, %v1038_v12  ;;  %v993_v20 = vsub.bf16 1065369472, %v977_v39  ;;  %v976_v7 = vmul.bf16 %v4303_v4, %v880_v15  ;;  %v869_v34 = vadd.bf16 1048723074, %v853_v2 }
 0x17f   : > { %1343 = vmatprep.mubr.bf16.mxu1 %v1071_v58  ;;  %v5479_v56 = vmul.bf16 1060454197, %v4177_v32  ;;  %v979_v14 = vmul.bf16 %v3540_v51, %v883_v22  ;;  %v882_v42 = vmul.bf16 %v866_v46, %v4353_v28  ;;  %v852_v1 = vmul.bf16 %v836_v16, %v4423_v45  ;;  %v3417_v22 = vld [vmem:[#allocation2 + $0x70] ss:$8 sps:$4 sm:$0xff]   ;;  %v3419_v46 = vld [vmem:[#allocation2 + $0x74] ss:$8 sps:$4 sm:$0xff]  }
 0x180   : > { %v641_v48 = vmul.bf16 1056980736, %v4190_v63  ;;  %v1025_v8 = vsub.bf16 0, %v993_v20  ;;  %v992_v38 = vsub.bf16 1065369472, %v976_v7  ;;  %v885_v11 = vmul.bf16 %v869_v34, %v4415_v59  ;;  %2094 = vmatprep.subr.bf16.mxu0 %v3419_v46 }
 0x181   : > { %vm4479_vm11 = vcmp.ge.bf16.partialorder %v5479_v56, 0  ;;  %v5482_v4 = vmul.bf16 1060454197, %v4190_v63  ;;  %v995_v10 = vsub.bf16 1065369472, %v979_v14  ;;  %v978_v40 = vmul.bf16 %v3538_v61, %v882_v42  ;;  %2095 = vmatpush1.bf16.msra.mxu0 %v3417_v22 }
 0x182   : > { %v868_v62 = vadd.bf16 1048723074, %v852_v1  ;;  %v1070_v30 = vmul.bf16 %v1054_v9, %v638_v19  ;;  %v1024_v13 = vsub.bf16 0, %v992_v38  ;;  %v981_v25 = vmul.bf16 %v3542_v60, %v885_v11  ;;  %v3420_v60 = vld [vmem:[#allocation2 + $0x60] ss:$8 sps:$4 sm:$0xff]  }
 0x183   : > { %vm1009_vm12 = vcmp.ge.bf16.partialorder %v5482_v4, 0  ;;  %v1027_v28 = vsub.bf16 0, %v995_v10  ;;  %v994_v31 = vsub.bf16 1065369472, %v978_v40  ;;  %v5483_v24 = vmul.bf16 1060454197, %v4210_v6 }
 0x184   : > { %v1041_v41 = vsel %vm1009_vm12, %v993_v20, %v1025_v8  ;;  %v884_v53 = vmul.bf16 %v868_v62, %v4423_v45  ;;  %v1040_v63 = vsel %vm4479_vm11, %v992_v38, %v1024_v13  ;;  %v997_v59 = vsub.bf16 1065369472, %v981_v25  ;;  %v3423_v9 = vld [vmem:[#allocation2 + $0x50] ss:$8 sps:$4 sm:$0xff]   ;;  %v3428_v20 = vld [vmem:[#allocation2 + $0x44] ss:$8 sps:$4 sm:$0xff]  }
 0x185   : > { %v1057_v37 = vadd.bf16 1065369472, %v1041_v41  ;;  %vm1011_vm13 = vcmp.ge.bf16.partialorder %v5483_v24, 0  ;;  %v1056_v23 = vadd.bf16 1065369472, %v1040_v63  ;;  %v1026_v58 = vsub.bf16 0, %v994_v31 }
 0x186   : > { %1344 = vmatmul.mubr.bf16.gmra.mxu1 %v1070_v30  ;;  %v1043_v61 = vsel %vm1011_vm13, %v995_v10, %v1027_v28  ;;  %v1029_v17 = vsub.bf16 0, %v997_v59  ;;  %v643_v35 = vmul.bf16 1056980736, %v4210_v6  ;;  %v640_v45 = vmul.bf16 1056980736, %v4177_v32 }
 0x187   : > { %v1073_v21 = vmul.bf16 %v1057_v37, %v641_v48  ;;  %v3544_v52 = vpop.eup %3543  ;;  %v1059_v55 = vadd.bf16 1065369472, %v1043_v61  ;;  %v5484_v47 = vmul.bf16 1060454197, %v4238_v43  ;;  %v5485_v51 = vmul.bf16 1060454197, %v4204_v36 }
 0x188   : > { %v980_v26 = vmul.bf16 %v3544_v52, %v884_v53  ;;  %v1072_v5 = vmul.bf16 %v1056_v23, %v640_v45  ;;  %v645_v12 = vmul.bf16 1056980736, %v4238_v43  ;;  %v642_v32 = vmul.bf16 1056980736, %v4204_v36  ;;  %v3422_v43 = vld [vmem:[#allocation2 + $0x64] ss:$8 sps:$4 sm:$0xff]  }
 0x189   : > { %1353 = vmatprep.mubr.bf16.mxu1 %v1073_v21  ;;  %vm1013_vm14 = vcmp.ge.bf16.partialorder %v5484_v47, 0  ;;  %v1075_v44 = vmul.bf16 %v1059_v55, %v643_v35  ;;  %vm1010_vm15 = vcmp.ge.bf16.partialorder %v5485_v51, 0  ;;  %v5486_v33 = vmul.bf16 1060454197, %v4229_v0  ;;  %2096 = vmatprep.subr.bf16.mxu0 %v3422_v43  ;;  %v3425_v36 = vld [vmem:[#allocation2 + $0x54] ss:$8 sps:$4 sm:$0xff]  }
 0x18a   : > { %v1045_v29 = vsel %vm1013_vm14, %v997_v59, %v1029_v17  ;;  %v1042_v18 = vsel %vm1010_vm15, %v994_v31, %v1026_v58  ;;  %v996_v54 = vsub.bf16 1065369472, %v980_v26  ;;  %v644_v19 = vmul.bf16 1056980736, %v4229_v0  ;;  %2097 = vmatpush1.bf16.msra.mxu0 %v3420_v60  ;;  %v3426_v7 = vld [vmem:[#allocation2 + $0x40] ss:$8 sps:$4 sm:$0xff]  }
 0x18b   : > { %v1061_v27 = vadd.bf16 1065369472, %v1045_v29  ;;  %v1058_v6 = vadd.bf16 1065369472, %v1042_v18  ;;  %vm1012_vm0 = vcmp.ge.bf16.partialorder %v5486_v33, 0  ;;  %2098 = vmatprep.subr.bf16.mxu0 %v3425_v36  ;;  %v5487_v35 = vld [vmem:[#allocation12_spill] sm:$0xff] }
 0x18c   : > { %v1028_v50 = vsub.bf16 0, %v996_v54  ;;  %v3431_v34 = vld [vmem:[#allocation2 + $0x34] ss:$8 sps:$4 sm:$0xff]   ;;  %v3429_v0 = vld [vmem:[#allocation2 + $0x30] ss:$8 sps:$4 sm:$0xff]  }
 0x18d   : > { %v1077_v57 = vmul.bf16 %v1061_v27, %v645_v12  ;;  %v1074_v39 = vmul.bf16 %v1058_v6, %v642_v32  ;;  %v3434_v56 = vld [vmem:[#allocation2 + $0x24] ss:$8 sps:$4 sm:$0xff]   ;;  %v3437_v14 = vld [vmem:[#allocation2 + $0x14] ss:$8 sps:$4 sm:$0xff]   ;;  %v3435_v42 = vld [vmem:[#allocation2 + $0x10] ss:$8 sps:$4 sm:$0xff]  }
 0x18e   : > { %1354 = vmatmul.mubr.bf16.gmra.mxu1 %v1072_v5  ;;  %v1044_v15 = vsel %vm1012_vm0, %v996_v54, %v1028_v50  ;;  %2099 = vmatpush1.bf16.msra.mxu0 %v3423_v9  ;;  %v3440_v1 = vld [vmem:[#allocation2 + $0x4] ss:$8 sps:$4 sm:$0xff]   ;;  %v3438_v48 = vld [vmem:[#allocation2] ss:$8 sps:$4 sm:$0xff]   ;;  %v3443_v8 = vld [vmem:[#allocation2 + $0xf4] ss:$8 sps:$4 sm:$0xff]  }
 0x18f   : > { %1363 = vmatprep.mubr.bf16.mxu1 %v1075_v44  ;;  %v1060_v2 = vadd.bf16 1065369472, %v1044_v15  ;;  %2100 = vmatprep.subr.bf16.mxu0 %v3428_v20  ;;  %v3441_v38 = vld [vmem:[#allocation2 + $0xf0] ss:$8 sps:$4 sm:$0xff]   ;;  %v3446_v11 = vld [vmem:[#allocation2 + $0xe4] ss:$8 sps:$4 sm:$0xff]  }
 0x190   : > { %v3444_v4 = vld [vmem:[#allocation2 + $0xe0] ss:$8 sps:$4 sm:$0xff]   ;;  %v3449_v10 = vld [vmem:[#allocation2 + $0xd4] ss:$8 sps:$4 sm:$0xff]   ;;  %v3447_v40 = vld [vmem:[#allocation2 + $0xd0] ss:$8 sps:$4 sm:$0xff]  }
 0x191   : > { %v1076_v16 = vmul.bf16 %v1060_v2, %v644_v19  ;;  %v3452_v62 = vld [vmem:[#allocation2 + $0xc4] ss:$8 sps:$4 sm:$0xff]   ;;  %v3450_v30 = vld [vmem:[#allocation2 + $0xc0] ss:$8 sps:$4 sm:$0xff]   ;;  %v3455_v41 = vld [vmem:[#allocation2 + $0xb4] ss:$8 sps:$4 sm:$0xff]  }
 0x192   : > { %2101 = vmatpush1.bf16.msra.mxu0 %v3426_v7  ;;  %v3453_v13 = vld [vmem:[#allocation2 + $0xb0] ss:$8 sps:$4 sm:$0xff]   ;;  %v3458_v25 = vld [vmem:[#allocation2 + $0xa4] ss:$8 sps:$4 sm:$0xff]   ;;  %v3456_v37 = vld [vmem:[#allocation2 + $0xa0] ss:$8 sps:$4 sm:$0xff]  }
 0x193   : > { %2102 = vmatprep.subr.bf16.mxu0 %v3431_v34  ;;  %v3461_v28 = vld [vmem:[#allocation2 + $0x94] ss:$8 sps:$4 sm:$0xff]   ;;  %v3459_v31 = vld [vmem:[#allocation2 + $0x90] ss:$8 sps:$4 sm:$0xff]   ;;  %v3464_v53 = vld [vmem:[#allocation2 + $0x84] ss:$8 sps:$4 sm:$0xff]  }
 0x194   : > { %v3462_v24 = vld [vmem:[#allocation2 + $0x80] ss:$8 sps:$4 sm:$0xff]  }
 0x195   : > { %v3159_v63 = vld.sshfl [vmem:[%s5396_s4] sm:$0x11 pattern:$0x75316420] }
 0x196   : > { %1364 = vmatmul.mubr.bf16.gmra.mxu1 %v1074_v39  ;;  %2103 = vmatpush1.bf16.msra.mxu0 %v3429_v0  ;;  %v1408_v59 = vcombine.high %v3159_v63, %v3159_v63  ;;  %v1415_v21 = vrot.slane %v3159_v63, %v4086_v3 }
 0x197   : > { %1373 = vmatprep.mubr.bf16.mxu1 %v1077_v57  ;;  %2104 = vmatprep.subr.bf16.mxu0 %v3434_v56 }
 0x198   : > { %v1422_v61 = vrot.slane %v1408_v59, %v4086_v3  ;;  %v1424_v52 = vpack.i.b16 %v1415_v21, %v1415_v21 }
 0x19a   : > { %2105 = vmatpush1.bf16.msra.mxu0 %v3432_v49  ;;  %v1431_v55 = vpack.i.b16 %v1422_v61, %v1422_v61  ;;  %v4511_v58 = vrot.slane %v1424_v52, %v5487_v35 }
 0x19b   : > { %2106 = vmatprep.subr.bf16.mxu0 %v3437_v14 }
 0x19c   : > { %v4514_v47 = vrot.slane %v1431_v55, %v5487_v35 }
 0x19e   : > { %1374 = vmatmul.mubr.bf16.gmra.mxu1 %v1076_v16  ;;  %2107 = vmatpush1.bf16.msra.mxu0 %v3435_v42 }
 0x19f   : > { %2108 = vmatprep.subr.bf16.mxu0 %v3440_v1 }
 0x1a2   : > { %2109 = vmatpush1.bf16.msra.mxu0 %v3438_v48 }
 0x1a3   : > { %2110 = vmatprep.subr.bf16.mxu0 %v3443_v8 }
 0x1a6   : > { %2111 = vmatpush2.bf16.msra.mxu0 %v3441_v38 }
 0x1a7   : > { %2112 = vmatprep.subr.bf16.mxu0 %v3446_v11 }
 0x1aa   : > { %2113 = vmatpush2.bf16.msra.mxu0 %v3444_v4 }
 0x1ab   : > { %2114 = vmatprep.subr.bf16.mxu0 %v3449_v10 }
 0x1ae   : > { %2115 = vmatpush2.bf16.msra.mxu0 %v3447_v40 }
 0x1af   : > { %2116 = vmatprep.subr.bf16.mxu0 %v3452_v62 }
 0x1b2   : > { %2117 = vmatpush2.bf16.msra.mxu0 %v3450_v30 }
 0x1b3   : > { %2118 = vmatprep.subr.bf16.mxu0 %v3455_v41 }
 0x1b6   : > { %2119 = vmatpush2.bf16.msra.mxu0 %v3453_v13 }
 0x1b7   : > { %2120 = vmatprep.subr.bf16.mxu0 %v3458_v25 }
 0x1ba   : > { %2121 = vmatpush2.bf16.msra.mxu0 %v3456_v37 }
 0x1bb   : > { %2122 = vmatprep.subr.bf16.mxu0 %v3461_v28 }
 0x1be   : > { %2123 = vmatpush2.bf16.msra.mxu0 %v3459_v31 }
 0x1bf   : > { %2124 = vmatprep.subr.bf16.mxu0 %v3464_v53 }
 0x1c2   : > { %2125 = vmatpush2.bf16.msra.mxu0 %v3462_v24 }
 0x214   : > { %v1305_v23 = vpop.f32.mrf.mxu1 }
 0x216   : > { %v1307_v17 = vpop.f32.mrf.mxu1 }
 0x218   : > { %v1309_v26 = vpop.f32.mrf.mxu1 }
 0x219   : > { %v1384_v45 = vpack.c.bf16 %v1309_v26, %v1305_v23 }
 0x21a   : > { %v1311_v44 = vpop.f32.mrf.mxu1 }
 0x21b   : > { %v4517_v51 = vadd.bf16 %v4511_v58, %v1384_v45  ;;  %v1385_v5 = vpack.c.bf16 %v1311_v44, %v1307_v17 }
 0x21d   : > { %v1469_v29 = vmul.bf16 1060454197, %v4517_v51  ;;  %v4521_v18 = vadd.bf16 %v4514_v47, %v1385_v5  ;;  %v1453_v55 = vmul.bf16 1056980736, %v4517_v51 }
 0x21f   : > { %v1485_v54 = vand.u32 2147450879, %v1469_v29  ;;  %v1470_v27 = vmul.bf16 1060454197, %v4521_v18  ;;  %v1454_v44 = vmul.bf16 1056980736, %v4521_v18 }
 0x220   : > { %vm4591_vm1 = vcmp.ge.bf16.partialorder %v1469_v29, 0 }
 0x221   : > { %v1501_v6 = vmul.bf16 1051213480, %v1485_v54  ;;  %v1486_v12 = vand.u32 2147450879, %v1470_v27  ;;  %v1709_v19 = vsub.bf16 0, %v1485_v54  ;;  %vm4653_vm2 = vcmp.ge.bf16.partialorder %v1470_v27, 0 }
 0x223   : > { %v1517_v50 = vadd.bf16 1065369472, %v1501_v6  ;;  %v1502_v32 = vmul.bf16 1051213480, %v1486_v12  ;;  %v1725_v36 = vmul.bf16 %v1709_v19, %v1485_v54  ;;  %v1710_v38 = vsub.bf16 0, %v1486_v12 }
 0x225   : > { %3545 = vrcp.bf16 %v1517_v50  ;;  %v1518_v57 = vadd.bf16 1065369472, %v1502_v32  ;;  %v1742_v14 = vmul.bf16 1069105081, %v1725_v36  ;;  %v4553_v31 = vmul.bf16 %v1710_v38, %v1486_v12 }
 0x227   : > { %3547 = vrcp.bf16 %v1518_v57  ;;  %v1745_v32 = vmul.bf16 1069105081, %v4553_v31 }
 0x228   : > { %3549 = vpow.bf16 %v1742_v14 }
 0x22b   : > { %v1315_v33 = vpop.f32.mrf.mxu1 }
 0x22d   : > { %v1317_v39 = vpop.f32.mrf.mxu1 }
 0x22f   : > { %v1319_v15 = vpop.f32.mrf.mxu1 }
 0x230   : > { %v1386_v2 = vpack.c.bf16 %v1319_v15, %v1315_v33 }
 0x231   : > { %v1321_v22 = vpop.f32.mrf.mxu1 }
 0x232   : > { %v4529_v46 = vadd.bf16 %v4511_v58, %v1386_v2  ;;  %v1387_v16 = vpack.c.bf16 %v1321_v22, %v1317_v39 }
 0x233   : > { %v1325_v43 = vpop.f32.mrf.mxu1  ;;  %v3546_v7 = vpop.eup %3545 }
 0x234   : > { %v4532_v60 = vadd.bf16 %v4514_v47, %v1387_v16  ;;  %v1471_v20 = vmul.bf16 1060454197, %v4529_v46  ;;  %v4535_v0 = vmul.bf16 1065369472, %v3546_v7 }
 0x235   : > { %v1327_v9 = vpop.f32.mrf.mxu1  ;;  %v3548_v10 = vpop.eup %3547 }
 0x236   : > { %v1472_v56 = vmul.bf16 1060454197, %v4532_v60  ;;  %v1565_v1 = vmul.bf16 1065893768, %v4535_v0  ;;  %v1487_v48 = vand.u32 2147450879, %v1471_v20 }
 0x237   : > { %v1329_v34 = vpop.f32.mrf.mxu1  ;;  %v4551_v28 = vmul.bf16 1065369472, %v3548_v10  ;;  %vm4740_vm4 = vcmp.ge.bf16.partialorder %v1471_v20, 0 }
 0x238   : > { %v1388_v49 = vpack.c.bf16 %v1329_v34, %v1325_v43  ;;  %v1581_v40 = vadd.bf16 3216687034, %v1565_v1  ;;  %v1488_v62 = vand.u32 2147450879, %v1472_v56  ;;  %v1503_v37 = vmul.bf16 1051213480, %v1487_v48 }
 0x239   : > { %v1331_v42 = vpop.f32.mrf.mxu1  ;;  %v1711_v61 = vsub.bf16 0, %v1487_v48  ;;  %v1566_v12 = vmul.bf16 1065893768, %v4551_v28  ;;  %vm4725_vm3 = vcmp.ge.bf16.partialorder %v1472_v56, 0 }
 0x23a   : > { %v4542_v8 = vadd.bf16 %v4511_v58, %v1388_v49  ;;  %v1389_v11 = vpack.c.bf16 %v1331_v42, %v1327_v9  ;;  %v1597_v25 = vmul.bf16 %v1581_v40, %v4535_v0  ;;  %v1504_v63 = vmul.bf16 1051213480, %v1488_v62 }
 0x23b   : > { %v1519_v26 = vadd.bf16 1065369472, %v1503_v37  ;;  %v1727_v33 = vmul.bf16 %v1711_v61, %v1487_v48  ;;  %v1712_v39 = vsub.bf16 0, %v1488_v62  ;;  %v1582_v34 = vadd.bf16 3216687034, %v1566_v12  ;;  %v3550_v37 = vpop.eup %3549 }
 0x23c   : > { %v1473_v30 = vmul.bf16 1060454197, %v4542_v8  ;;  %v4548_v41 = vadd.bf16 %v4514_v47, %v1389_v11  ;;  %v1613_v24 = vadd.bf16 1068908470, %v1597_v25  ;;  %v1520_v57 = vadd.bf16 1065369472, %v1504_v63 }
 0x23d   : > { %3551 = vrcp.bf16 %v1519_v26  ;;  %v1728_v1 = vmul.bf16 %v1712_v39, %v1488_v62  ;;  %v1748_v40 = vmul.bf16 1069105081, %v1727_v33 }
 0x23e   : > { %v1335_v4 = vpop.f32.mrf.mxu1  ;;  %v1474_v59 = vmul.bf16 1060454197, %v4548_v41  ;;  %v1489_v52 = vand.u32 2147450879, %v1473_v30  ;;  %v1629_v17 = vmul.bf16 %v1613_v24, %v4535_v0  ;;  %3553 = vrcp.bf16 %v1520_v57 }
 0x23f   : > { %vm4770_vm6 = vcmp.ge.bf16.partialorder %v1473_v30, 0 }
 0x240   : > { %v1337_v13 = vpop.f32.mrf.mxu1  ;;  %v1490_v5 = vand.u32 2147450879, %v1474_v59  ;;  %v1645_v50 = vadd.bf16 3197288082, %v1629_v17  ;;  %v1505_v15 = vmul.bf16 1051213480, %v1489_v52 }
 0x241   : > { %v1713_v16 = vsub.bf16 0, %v1489_v52  ;;  %vm4752_vm5 = vcmp.ge.bf16.partialorder %v1474_v59, 0 }
 0x242   : > { %v1339_v53 = vpop.f32.mrf.mxu1  ;;  %v1661_v22 = vmul.bf16 %v1645_v50, %v4535_v0  ;;  %v1506_v9 = vmul.bf16 1051213480, %v1490_v5  ;;  %v1521_v48 = vadd.bf16 1065369472, %v1505_v15 }
 0x243   : > { %v1390_v21 = vpack.c.bf16 %v1339_v53, %v1335_v4  ;;  %v1714_v53 = vsub.bf16 0, %v1490_v5 }
 0x244   : > { %v1341_v23 = vpop.f32.mrf.mxu1  ;;  %v1677_v49 = vadd.bf16 1048723074, %v1661_v22  ;;  %v1522_v31 = vadd.bf16 1065369472, %v1506_v9  ;;  %3555 = vrcp.bf16 %v1521_v48 }
 0x245   : > { %v4561_v45 = vadd.bf16 %v4511_v58, %v1390_v21  ;;  %v1391_v54 = vpack.c.bf16 %v1341_v23, %v1337_v13  ;;  %v1729_v13 = vmul.bf16 %v1713_v16, %v1489_v52  ;;  %v1598_v21 = vmul.bf16 %v1582_v34, %v4551_v28 }
 0x246   : > { %v1345_v6 = vpop.f32.mrf.mxu1  ;;  %v1693_v10 = vmul.bf16 %v1677_v49, %v4535_v0  ;;  %v1751_v0 = vmul.bf16 1069105081, %v1728_v1  ;;  %3557 = vpow.bf16 %v1745_v32  ;;  %v1730_v22 = vmul.bf16 %v1714_v53, %v1490_v5 }
 0x247   : > { %v5425_v2 = vmul.bf16 1060454197, %v4561_v45  ;;  %v4571_v43 = vadd.bf16 %v4514_v47, %v1391_v54  ;;  %v1754_v12 = vmul.bf16 1069105081, %v1729_v13  ;;  %3559 = vrcp.bf16 %v1522_v31 }
 0x248   : > { %v1347_v19 = vpop.f32.mrf.mxu1  ;;  %v1789_v62 = vmul.bf16 %v3550_v37, %v1693_v10  ;;  %3561 = vpow.bf16 %v1748_v40 }
 0x249   : > { %v1491_v42 = vand.u32 2147450879, %v5425_v2  ;;  %v1476_v38 = vmul.bf16 1060454197, %v4571_v43  ;;  %3563 = vpow.bf16 %v1751_v0 }
 0x24a   : > { %v1349_v7 = vpop.f32.mrf.mxu1  ;;  %v1805_v33 = vsub.bf16 1065369472, %v1789_v62  ;;  %3565 = vpow.bf16 %v1754_v12 }
 0x24b   : > { %v1392_v11 = vpack.c.bf16 %v1349_v7, %v1345_v6  ;;  %v1492_v24 = vand.u32 2147450879, %v1476_v38  ;;  %v1507_v61 = vmul.bf16 1051213480, %v1491_v42  ;;  %v1715_v57 = vsub.bf16 0, %v1491_v42  ;;  %v3552_v13 = vpop.eup %3551 }
 0x24c   : > { %v1351_v4 = vpop.f32.mrf.mxu1  ;;  %v1837_v5 = vsub.bf16 0, %v1805_v33  ;;  %v3554_v62 = vpop.eup %3553  ;;  %vm4778_vm7 = vcmp.ge.bf16.partialorder %v1476_v38, 0 }
 0x24d   : > { %v1393_v25 = vpack.c.bf16 %v1351_v4, %v1347_v19  ;;  %v4583_v23 = vadd.bf16 %v4511_v58, %v1392_v11  ;;  %v1508_v26 = vmul.bf16 1051213480, %v1492_v24  ;;  %v1614_v19 = vadd.bf16 1068908470, %v1598_v21 }
 0x24e   : > { %v1355_v63 = vpop.f32.mrf.mxu1  ;;  %v1523_v16 = vadd.bf16 1065369472, %v1507_v61  ;;  %v1716_v34 = vsub.bf16 0, %v1492_v24  ;;  %v1731_v1 = vmul.bf16 %v1715_v57, %v1491_v42  ;;  %v1853_v57 = vsel %vm4591_vm1, %v1805_v33, %v1837_v5 }
 0x24f   : > { %v4586_v17 = vadd.bf16 %v4514_v47, %v1393_v25  ;;  %v5419_v39 = vmul.bf16 1060454197, %v4583_v23  ;;  %v1524_v29 = vadd.bf16 1065369472, %v1508_v26  ;;  %v1630_v40 = vmul.bf16 %v1614_v19, %v4551_v28 }
 0x250   : > { %v1357_v54 = vpop.f32.mrf.mxu1  ;;  %v1757_v25 = vmul.bf16 1069105081, %v1730_v22  ;;  %3567 = vrcp.bf16 %v1523_v16  ;;  %v1732_v42 = vmul.bf16 %v1716_v34, %v1492_v24  ;;  %v1760_v61 = vmul.bf16 1069105081, %v1731_v1 }
 0x251   : > { %v5422_v9 = vmul.bf16 1060454197, %v4586_v17  ;;  %v1493_v32 = vand.u32 2147450879, %v5419_v39  ;;  %3569 = vrcp.bf16 %v1524_v29  ;;  %v1646_v19 = vadd.bf16 3197288082, %v1630_v40 }
 0x252   : > { %v1359_v15 = vpop.f32.mrf.mxu1  ;;  %v1763_v29 = vmul.bf16 1069105081, %v1732_v42  ;;  %v1869_v6 = vadd.bf16 1065369472, %v1853_v57 }
 0x253   : > { %v1394_v7 = vpack.c.bf16 %v1359_v15, %v1355_v63  ;;  %v1494_v48 = vand.u32 2147450879, %v5422_v9  ;;  %v1509_v4 = vmul.bf16 1051213480, %v1493_v32  ;;  %v4614_v15 = vmul.bf16 1065369472, %v3552_v13 }
 0x254   : > { %v1361_v49 = vpop.f32.mrf.mxu1  ;;  %v1717_v24 = vsub.bf16 0, %v1493_v32  ;;  %v4641_v53 = vmul.bf16 %v1869_v6, %v1453_v55 }
 0x255   : > { %v4603_v11 = vadd.bf16 %v4511_v58, %v1394_v7  ;;  %v1510_v37 = vmul.bf16 1051213480, %v1494_v48  ;;  %v1395_v31 = vpack.c.bf16 %v1361_v49, %v1357_v54  ;;  %v1525_v63 = vadd.bf16 1065369472, %v1509_v4  ;;  %v3556_v4 = vpop.eup %3555 }
 0x256   : > { %v1365_v10 = vpop.f32.mrf.mxu1  ;;  %v4618_v7 = vmul.bf16 1065369472, %v3554_v62  ;;  %v1718_v13 = vsub.bf16 0, %v1494_v48  ;;  %v3558_v42 = vpop.eup %3557 }
 0x257   : > { %v5418_v26 = vmul.bf16 1060454197, %v4603_v11  ;;  %v4610_v12 = vadd.bf16 %v4514_v47, %v1395_v31  ;;  %3571 = vrcp.bf16 %v1525_v63  ;;  %v1526_v22 = vadd.bf16 1065369472, %v1510_v37 }
 0x258   : > { %v1367_v21 = vpop.f32.mrf.mxu1  ;;  %3573 = vpow.bf16 %v1757_v25  ;;  %v1662_v31 = vmul.bf16 %v1646_v19, %v4551_v28  ;;  %v1733_v63 = vmul.bf16 %v1717_v24, %v1493_v32  ;;  %v1734_v32 = vmul.bf16 %v1718_v13, %v1494_v48 }
 0x259   : > { %v1495_v16 = vand.u32 2147450879, %v5418_v26  ;;  %v5417_v34 = vmul.bf16 1060454197, %v4610_v12  ;;  %3575 = vpow.bf16 %v1760_v61  ;;  %v3560_v61 = vpop.eup %3559  ;;  %v1568_v50 = vmul.bf16 1065893768, %v4618_v7 }
 0x25a   : > { %v1369_v54 = vpop.f32.mrf.mxu1  ;;  %3577 = vrcp.bf16 %v1526_v22  ;;  %v4634_v26 = vpop.eup %3561  ;;  %v1766_v39 = vmul.bf16 1069105081, %v1733_v63 }
 0x25b   : > { %v1396_v49 = vpack.c.bf16 %v1369_v54, %v1365_v10  ;;  %v1511_v33 = vmul.bf16 1051213480, %v1495_v16  ;;  %v1496_v40 = vand.u32 2147450879, %v5417_v34  ;;  %3579 = vpow.bf16 %v1763_v29  ;;  %v4637_v29 = vpop.eup %3563 }
 0x25c   : > { %v1371_v1 = vpop.f32.mrf.mxu1  ;;  %v4630_v34 = vmul.bf16 1065369472, %v3556_v4  ;;  %v4643_v4 = vmul.bf16 1065369472, %v3560_v61 }
 0x25d   : > { %v1397_v5 = vpack.c.bf16 %v1371_v1, %v1367_v21  ;;  %v4624_v25 = vadd.bf16 %v4511_v58, %v1396_v49  ;;  %v1527_v10 = vadd.bf16 1065369472, %v1511_v33  ;;  %v1719_v21 = vsub.bf16 0, %v1495_v16  ;;  %v4647_v49 = vpop.eup %3565 }
 0x25e   : > { %v1375_v37 = vpop.f32.mrf.mxu1  ;;  %v1512_v57 = vmul.bf16 1051213480, %v1496_v40  ;;  %v1720_v54 = vsub.bf16 0, %v1496_v40  ;;  %v3568_v0 = vpop.eup %3567 }
 0x25f   : > { %v4628_v62 = vadd.bf16 %v4514_v47, %v1397_v5  ;;  %3581 = vrcp.bf16 %v1527_v10  ;;  %v5420_v19 = vmul.bf16 1060454197, %v4624_v25  ;;  %v1678_v5 = vadd.bf16 1048723074, %v1662_v31  ;;  %v3570_v61 = vpop.eup %3569 }
 0x260   : > { %v1377_v1 = vpop.f32.mrf.mxu1  ;;  %v1528_v24 = vadd.bf16 1065369472, %v1512_v57  ;;  %v1735_v48 = vmul.bf16 %v1719_v21, %v1495_v16  ;;  %v1736_v13 = vmul.bf16 %v1720_v54, %v1496_v40  ;;  %v4669_v9 = vmul.bf16 1065369472, %v3570_v61 }
 0x261   : > { %v5421_v22 = vmul.bf16 1060454197, %v4628_v62  ;;  %v1497_v10 = vand.u32 2147450879, %v5420_v19  ;;  %v1769_v19 = vmul.bf16 1069105081, %v1734_v32  ;;  %v1694_v40 = vmul.bf16 %v1678_v5, %v4551_v28 }
 0x262   : > { %v1379_v33 = vpop.f32.mrf.mxu1  ;;  %3583 = vrcp.bf16 %v1528_v24  ;;  %v4667_v32 = vmul.bf16 1065369472, %v3568_v0  ;;  %v1775_v28 = vmul.bf16 1069105081, %v1736_v13 }
 0x263   : > { %v1498_v31 = vand.u32 2147450879, %v5421_v22  ;;  %v1513_v52 = vmul.bf16 1051213480, %v1497_v10  ;;  %v1721_v51 = vsub.bf16 0, %v1497_v10  ;;  %v1398_v55 = vpack.c.bf16 %v1379_v33, %v1375_v37 }
 0x264   : > { %v1381_v57 = vpop.f32.mrf.mxu1  ;;  %v1772_v33 = vmul.bf16 1069105081, %v1735_v48  ;;  %v1790_v27 = vmul.bf16 %v3558_v42, %v1694_v40  ;;  %3585 = vpow.bf16 %v1766_v39  ;;  %v1584_v39 = vadd.bf16 3216687034, %v1568_v50 }
 0x265   : > { %v1399_v6 = vpack.c.bf16 %v1381_v57, %v1377_v1  ;;  %v1514_v16 = vmul.bf16 1051213480, %v1498_v31  ;;  %v1722_v21 = vsub.bf16 0, %v1498_v31  ;;  %v1529_v54 = vadd.bf16 1065369472, %v1513_v52  ;;  %v3572_v1 = vpop.eup %3571 }
 0x266   : > { %v1737_v24 = vmul.bf16 %v1721_v51, %v1497_v10  ;;  %v4659_v22 = vadd.bf16 %v4511_v58, %v1398_v55  ;;  %v4665_v36 = vpop.eup %3573  ;;  %v4671_v52 = vmul.bf16 1065369472, %v3572_v1  ;;  %v1806_v48 = vsub.bf16 1065369472, %v1790_v27 }
 0x267   : > { %v4662_v37 = vadd.bf16 %v4514_v47, %v1399_v6  ;;  %v1738_v57 = vmul.bf16 %v1722_v21, %v1498_v31  ;;  %3587 = vrcp.bf16 %v1529_v54  ;;  %v1530_v58 = vadd.bf16 1065369472, %v1514_v16  ;;  %v4674_v5 = vpop.eup %3575 }
 0x268   : > { %v5423_v47 = vmul.bf16 1060454197, %v4659_v22  ;;  %3589 = vpow.bf16 %v1769_v19  ;;  %v1778_v42 = vmul.bf16 1069105081, %v1737_v24  ;;  %v3578_v13 = vpop.eup %3577  ;;  %v1838_v55 = vsub.bf16 0, %v1806_v48 }
 0x269   : > { %v5424_v10 = vmul.bf16 1060454197, %v4662_v37  ;;  %3591 = vpow.bf16 %v1772_v33  ;;  %v1781_v0 = vmul.bf16 1069105081, %v1738_v57  ;;  %v1567_v6 = vmul.bf16 1065893768, %v4614_v15  ;;  %v4682_v61 = vpop.eup %3579 }
 0x26a   : > { %v1499_v31 = vand.u32 2147450879, %v5423_v47  ;;  %3593 = vpow.bf16 %v1775_v28  ;;  %v1600_v21 = vmul.bf16 %v1584_v39, %v4618_v7  ;;  %v1570_v40 = vmul.bf16 1065893768, %v4643_v4 }
 0x26b   : > { %v1500_v51 = vand.u32 2147450879, %v5424_v10  ;;  %v1854_v50 = vsel %vm4653_vm2, %v1806_v48, %v1838_v55  ;;  %v1583_v33 = vadd.bf16 3216687034, %v1567_v6  ;;  %v4688_v57 = vmul.bf16 1065369472, %v3578_v13 }
 0x26c   : > { %v1515_v19 = vmul.bf16 1051213480, %v1499_v31  ;;  %v1723_v16 = vsub.bf16 0, %v1499_v31  ;;  %3595 = vrcp.bf16 %v1530_v58  ;;  %v1870_v28 = vadd.bf16 1065369472, %v1854_v50 }
 0x26d   : > { %v3582_v54 = vpop.eup %3581  ;;  %v1516_v24 = vmul.bf16 1051213480, %v1500_v51  ;;  %v1724_v1 = vsub.bf16 0, %v1500_v51  ;;  %3597 = vpow.bf16 %v1778_v42  ;;  %v1616_v10 = vadd.bf16 1068908470, %v1600_v21 }
 0x26e   : > { %v4690_v27 = vmul.bf16 %v1723_v16, %v1499_v31  ;;  %v1531_v47 = vadd.bf16 1065369472, %v1515_v19  ;;  %v1599_v39 = vmul.bf16 %v1583_v33, %v4614_v15  ;;  %v4693_v2 = vmul.bf16 1065369472, %v3582_v54 }
 0x26f   : > { %3599 = vpow.bf16 %v1781_v0  ;;  %v1886_v63 = vmul.bf16 %v1870_v28, %v1454_v44  ;;  %v1586_v48 = vadd.bf16 3216687034, %v1570_v40  ;;  %v1532_v55 = vadd.bf16 1065369472, %v1516_v24 }
 0x270   : > { %v3584_v14 = vpop.eup %3583  ;;  %v1784_v13 = vmul.bf16 1069105081, %v4690_v27  ;;  %v4698_v58 = vmul.bf16 %v1724_v1, %v1500_v51  ;;  %v1632_v31 = vmul.bf16 %v1616_v10, %v4618_v7  ;;  %v1615_v6 = vadd.bf16 1068908470, %v1599_v39 }
 0x271   : > { %v4701_v42 = vmul.bf16 1065369472, %v3584_v14  ;;  %2126 = vmatprep.mubr.bf16.mxu0 %v1886_v63  ;;  %v1602_v19 = vmul.bf16 %v1586_v48, %v4643_v4  ;;  %v1569_v16 = vmul.bf16 1065893768, %v4630_v34  ;;  %3601 = vrcp.bf16 %v1531_v47 }
 0x272   : > { %2127 = vmatmul.mubr.bf16.vlgmr.msra.gmra.mxu0 %v4641_v53  ;;  %v1648_v18 = vadd.bf16 3197288082, %v1632_v31  ;;  %v1572_v44 = vmul.bf16 1065893768, %v4669_v9  ;;  %v1571_v0 = vmul.bf16 1065893768, %v4667_v32  ;;  %v1631_v51 = vmul.bf16 %v1615_v6, %v4614_v15  ;;  %v4710_v40 = vpop.eup %3585 }
 0x273   : > { %v1618_v21 = vadd.bf16 1068908470, %v1602_v19  ;;  %v1585_v10 = vadd.bf16 3216687034, %v1569_v16  ;;  %v1574_v14 = vmul.bf16 1065893768, %v4688_v57  ;;  %3603 = vrcp.bf16 %v1532_v55 }
 0x274   : > { %v1664_v54 = vmul.bf16 %v1648_v18, %v4618_v7  ;;  %v1588_v24 = vadd.bf16 3216687034, %v1572_v44  ;;  %v1587_v47 = vadd.bf16 3216687034, %v1571_v0  ;;  %v1647_v50 = vadd.bf16 3197288082, %v1631_v51 }
 0x275   : > { %v3588_v1 = vpop.eup %3587  ;;  %v1634_v33 = vmul.bf16 %v1618_v21, %v4643_v4  ;;  %v1601_v27 = vmul.bf16 %v1585_v10, %v4630_v34  ;;  %v1573_v55 = vmul.bf16 1065893768, %v4671_v52  ;;  %v1590_v44 = vadd.bf16 3216687034, %v1574_v14 }
 0x276   : > { %v4716_v28 = vpop.eup %3589  ;;  %v1680_v39 = vadd.bf16 1048723074, %v1664_v54  ;;  %v1604_v63 = vmul.bf16 %v1588_v24, %v4669_v9  ;;  %v1603_v48 = vmul.bf16 %v1587_v47, %v4667_v32  ;;  %v1663_v19 = vmul.bf16 %v1647_v50, %v4614_v15 }
 0x277   : > { %v4721_v31 = vpop.eup %3591  ;;  %v1650_v16 = vadd.bf16 3197288082, %v1634_v33  ;;  %v1617_v18 = vadd.bf16 1068908470, %v1601_v27  ;;  %v4732_v51 = vmul.bf16 1065369472, %v3588_v1  ;;  %v1606_v53 = vmul.bf16 %v1590_v44, %v4688_v57 }
 0x278   : > { %v4730_v0 = vpop.eup %3593  ;;  %v1696_v21 = vmul.bf16 %v1680_v39, %v4618_v7  ;;  %v1620_v10 = vadd.bf16 1068908470, %v1604_v63  ;;  %v1619_v54 = vadd.bf16 1068908470, %v1603_v48  ;;  %v1679_v24 = vadd.bf16 1048723074, %v1663_v19 }
 0x279   : > { %v1666_v47 = vmul.bf16 %v1650_v16, %v4643_v4  ;;  %v1633_v56 = vmul.bf16 %v1617_v18, %v4630_v34  ;;  %v1589_v33 = vadd.bf16 3216687034, %v1573_v55  ;;  %v1622_v19 = vadd.bf16 1068908470, %v1606_v53 }
 0x27a   : > { %v1792_v14 = vmul.bf16 %v4637_v29, %v1696_v21  ;;  %v1636_v1 = vmul.bf16 %v1620_v10, %v4669_v9  ;;  %v1635_v7 = vmul.bf16 %v1619_v54, %v4667_v32  ;;  %v3596_v27 = vpop.eup %3595  ;;  %v1695_v39 = vmul.bf16 %v1679_v24, %v4614_v15 }
 0x27b   : > { %v1682_v63 = vadd.bf16 1048723074, %v1666_v47  ;;  %v1649_v48 = vadd.bf16 3197288082, %v1633_v56  ;;  %v4748_v16 = vpop.eup %3597  ;;  %3605 = vpow.bf16 %v1784_v13  ;;  %v1638_v10 = vmul.bf16 %v1622_v19, %v4688_v57 }
 0x27c   : > { %v1808_v29 = vsub.bf16 1065369472, %v1792_v14  ;;  %v1652_v18 = vadd.bf16 3197288082, %v1636_v1  ;;  %v1651_v44 = vadd.bf16 3197288082, %v1635_v7  ;;  %v1791_v55 = vmul.bf16 %v4634_v26, %v1695_v39 }
 0x27d   : > { %v4756_v21 = vpop.eup %3599  ;;  %v1698_v15 = vmul.bf16 %v1682_v63, %v4643_v4  ;;  %v1665_v53 = vmul.bf16 %v1649_v48, %v4630_v34  ;;  %v1605_v13 = vmul.bf16 %v1589_v33, %v4671_v52  ;;  %v4765_v47 = vmul.bf16 1065369472, %v3596_v27 }
 0x27e   : > { %v1840_v54 = vsub.bf16 0, %v1808_v29  ;;  %v1668_v59 = vmul.bf16 %v1652_v18, %v4669_v9  ;;  %v1667_v24 = vmul.bf16 %v1651_v44, %v4667_v32  ;;  %v1807_v56 = vsub.bf16 1065369472, %v1791_v55 }
 0x27f   : > { %v1794_v14 = vmul.bf16 %v4665_v36, %v1698_v15  ;;  %v1681_v1 = vadd.bf16 1048723074, %v1665_v53  ;;  %v3602_v26 = vpop.eup %3601  ;;  %v1654_v48 = vadd.bf16 3197288082, %v1638_v10  ;;  %v1621_v55 = vadd.bf16 1068908470, %v1605_v13 }
 0x280   : > { %v1856_v7 = vsel %vm4725_vm3, %v1808_v29, %v1840_v54  ;;  %v1684_v39 = vadd.bf16 1048723074, %v1668_v59  ;;  %v1683_v63 = vadd.bf16 1048723074, %v1667_v24  ;;  %v1839_v27 = vsub.bf16 0, %v1807_v56 }
 0x281   : > { %v1872_v36 = vadd.bf16 1065369472, %v1856_v7  ;;  %v1810_v19 = vsub.bf16 1065369472, %v1794_v14  ;;  %v1697_v30 = vmul.bf16 %v1681_v1, %v4630_v34  ;;  %v3604_v18 = vpop.eup %3603  ;;  %v1670_v29 = vmul.bf16 %v1654_v48, %v4688_v57 }
 0x282   : > { %v1700_v44 = vmul.bf16 %v1684_v39, %v4669_v9  ;;  %v1699_v6 = vmul.bf16 %v1683_v63, %v4667_v32  ;;  %v5502_v15 = vmul.bf16 1060454197, %v4561_v45  ;;  %v5505_v53 = vmul.bf16 1056980736, %v4532_v60 }
 0x283   : > { %v1855_v34 = vsel %vm4740_vm4, %v1807_v56, %v1839_v27  ;;  %v1842_v54 = vsub.bf16 0, %v1810_v19  ;;  %v1793_v9 = vmul.bf16 %v4647_v49, %v1697_v30  ;;  %v1686_v13 = vadd.bf16 1048723074, %v1670_v29 }
 0x284   : > { %vm4788_vm8 = vcmp.ge.bf16.partialorder %v5502_v15, 0  ;;  %v1888_v10 = vmul.bf16 %v1872_v36, %v5505_v53  ;;  %v1871_v59 = vadd.bf16 1065369472, %v1855_v34  ;;  %v1796_v32 = vmul.bf16 %v4682_v61, %v1700_v44 }
 0x285   : > { %v1795_v24 = vmul.bf16 %v4674_v5, %v1699_v6  ;;  %v1858_v14 = vsel %vm4752_vm5, %v1810_v19, %v1842_v54  ;;  %v1809_v1 = vsub.bf16 1065369472, %v1793_v9  ;;  %v1637_v60 = vmul.bf16 %v1621_v55, %v4671_v52 }
 0x286   : > { %2136 = vmatprep.mubr.bf16.mxu0 %v1888_v10  ;;  %v1576_v7 = vmul.bf16 1065893768, %v4701_v42  ;;  %v5506_v50 = vmul.bf16 1060454197, %v4586_v17  ;;  %v5509_v49 = vmul.bf16 1056980736, %v4529_v46  ;;  %v1702_v20 = vmul.bf16 %v1686_v13, %v4688_v57 }
 0x287   : > { %v1874_v5 = vadd.bf16 1065369472, %v1858_v14  ;;  %v1812_v39 = vsub.bf16 1065369472, %v1796_v32  ;;  %v1811_v63 = vsub.bf16 1065369472, %v1795_v24 }
 0x288   : > { %vm4805_vm9 = vcmp.ge.bf16.partialorder %v5506_v50, 0  ;;  %v1887_v61 = vmul.bf16 %v1871_v59, %v5509_v49  ;;  %v1841_v48 = vsub.bf16 0, %v1809_v1  ;;  %v1653_v36 = vadd.bf16 3197288082, %v1637_v60 }
 0x289   : > { %v1592_v27 = vadd.bf16 3216687034, %v1576_v7  ;;  %v5510_v19 = vmul.bf16 1056980736, %v4548_v41  ;;  %v1844_v44 = vsub.bf16 0, %v1812_v39  ;;  %v1843_v6 = vsub.bf16 0, %v1811_v63  ;;  %v4820_v57 = vpop.eup %3605 }
 0x28a   : > { %2137 = vmatmul.mubr.bf16.gmra.mxu0 %v1887_v61  ;;  %v1575_v29 = vmul.bf16 1065893768, %v4693_v2  ;;  %v1857_v46 = vsel %vm4770_vm6, %v1809_v1, %v1841_v48  ;;  %v1798_v55 = vmul.bf16 %v4716_v28, %v1702_v20  ;;  %v1669_v15 = vmul.bf16 %v1653_v36, %v4671_v52 }
 0x28b   : > { %v1890_v30 = vmul.bf16 %v1874_v5, %v5510_v19  ;;  %v1608_v53 = vmul.bf16 %v1592_v27, %v4701_v42  ;;  %v4822_v10 = vmul.bf16 1065369472, %v3602_v26  ;;  %v1873_v41 = vadd.bf16 1065369472, %v1857_v46 }
 0x28c   : > { %v1860_v34 = vsel %vm4778_vm7, %v1812_v39, %v1844_v44  ;;  %v1591_v54 = vadd.bf16 3216687034, %v1575_v29  ;;  %v4826_v9 = vmul.bf16 1065369472, %v3604_v18  ;;  %v5511_v4 = vmul.bf16 1069105081, %v4698_v58 }
 0x28d   : > { %2146 = vmatprep.mubr.bf16.mxu0 %v1890_v30  ;;  %v1876_v28 = vadd.bf16 1065369472, %v1860_v34  ;;  %v1814_v59 = vsub.bf16 1065369472, %v1798_v55  ;;  %v1859_v32 = vsel %vm4788_vm8, %v1811_v63, %v1843_v6  ;;  %v1685_v24 = vadd.bf16 1048723074, %v1669_v15 }
 0x28e   : > { %3607 = vpow.bf16 %v5511_v4  ;;  %v1624_v13 = vadd.bf16 1068908470, %v1608_v53  ;;  %v1607_v26 = vmul.bf16 %v1591_v54, %v4693_v2  ;;  %v5512_v14 = vmul.bf16 1056980736, %v4542_v8 }
 0x28f   : > { %v5513_v33 = vmul.bf16 1056980736, %v4571_v43  ;;  %v1846_v18 = vsub.bf16 0, %v1814_v59  ;;  %v1578_v7 = vmul.bf16 1065893768, %v4765_v47  ;;  %v1701_v58 = vmul.bf16 %v1685_v24, %v4671_v52 }
 0x290   : > { %v1889_v1 = vmul.bf16 %v1873_v41, %v5512_v14  ;;  %v1640_v50 = vmul.bf16 %v1624_v13, %v4701_v42  ;;  %v1623_v49 = vadd.bf16 1068908470, %v1607_v26  ;;  %v1577_v38 = vmul.bf16 1065893768, %v4732_v51 }
 0x291   : > { %v1892_v60 = vmul.bf16 %v1876_v28, %v5513_v33  ;;  %v1862_v61 = vsel %vm4805_vm9, %v1814_v59, %v1846_v18  ;;  %v1594_v5 = vadd.bf16 3216687034, %v1578_v7  ;;  %v1580_v8 = vmul.bf16 1065893768, %v4826_v9 }
 0x292   : > { %v1579_v39 = vmul.bf16 1065893768, %v4822_v10  ;;  %2147 = vmatmul.mubr.bf16.gmra.mxu0 %v1889_v1  ;;  %v1878_v43 = vadd.bf16 1065369472, %v1862_v61  ;;  %v1797_v63 = vmul.bf16 %v4710_v40, %v1701_v58  ;;  %v1656_v48 = vadd.bf16 3197288082, %v1640_v50 }
 0x293   : > { %v1639_v52 = vmul.bf16 %v1623_v49, %v4693_v2  ;;  %2156 = vmatprep.mubr.bf16.mxu0 %v1892_v60  ;;  %v1610_v20 = vmul.bf16 %v1594_v5, %v4765_v47  ;;  %v1593_v36 = vadd.bf16 3216687034, %v1577_v38  ;;  %v1596_v27 = vadd.bf16 3216687034, %v1580_v8 }
 0x294   : > { %v1595_v19 = vadd.bf16 3216687034, %v1579_v39  ;;  %v1875_v56 = vadd.bf16 1065369472, %v1859_v32  ;;  %v1813_v30 = vsub.bf16 1065369472, %v1797_v63  ;;  %v1672_v44 = vmul.bf16 %v1656_v48, %v4701_v42 }
 0x295   : > { %v1655_v6 = vadd.bf16 3197288082, %v1639_v52  ;;  %v1626_v29 = vadd.bf16 1068908470, %v1610_v20  ;;  %v1609_v46 = vmul.bf16 %v1593_v36, %v4732_v51  ;;  %v1612_v55 = vmul.bf16 %v1596_v27, %v4826_v9 }
 0x296   : > { %v1611_v40 = vmul.bf16 %v1595_v19, %v4822_v10  ;;  %v5514_v15 = vmul.bf16 1056980736, %v4586_v17  ;;  %v1845_v41 = vsub.bf16 0, %v1813_v30  ;;  %v1688_v34 = vadd.bf16 1048723074, %v1672_v44 }
 0x297   : > { %v1671_v54 = vmul.bf16 %v1655_v6, %v4693_v2  ;;  %v1642_v4 = vmul.bf16 %v1626_v29, %v4765_v47  ;;  %v1625_v28 = vadd.bf16 1068908470, %v1609_v46  ;;  %v1628_v59 = vadd.bf16 1068908470, %v1612_v55 }
 0x298   : > { %v1894_v53 = vmul.bf16 %v1878_v43, %v5514_v15  ;;  %v1627_v32 = vadd.bf16 1068908470, %v1611_v40  ;;  %v5515_v24 = vmul.bf16 1060454197, %v4583_v23  ;;  %v5516_v13 = vmul.bf16 1056980736, %v4561_v45 }
 0x299   : > { %v1704_v14 = vmul.bf16 %v1688_v34, %v4701_v42  ;;  %v1687_v1 = vadd.bf16 1048723074, %v1671_v54  ;;  %v1658_v33 = vadd.bf16 3197288082, %v1642_v4  ;;  %v1641_v60 = vmul.bf16 %v1625_v28, %v4732_v51 }
 0x29a   : > { %vm1829_vm10 = vcmp.ge.bf16.partialorder %v5515_v24, 0  ;;  %v1891_v26 = vmul.bf16 %v1875_v56, %v5516_v13  ;;  %v1644_v18 = vmul.bf16 %v1628_v59, %v4826_v9  ;;  %v1643_v50 = vmul.bf16 %v1627_v32, %v4822_v10 }
 0x29b   : > { %v1861_v17 = vsel %vm1829_vm10, %v1813_v30, %v1845_v41  ;;  %v1800_v7 = vmul.bf16 %v4730_v0, %v1704_v14  ;;  %v1703_v58 = vmul.bf16 %v1687_v1, %v4693_v2  ;;  %v1461_v45 = vmul.bf16 1056980736, %v4583_v23  ;;  %v3469_v0 = vld [vmem:[#allocation5 + $0x68] sm:$0xff]  }
 0x29c   : > { %2157 = vmatmul.mubr.bf16.gmra.mxu0 %v1891_v26  ;;  %v3608_v49 = vpop.eup %3607  ;;  %v1674_v42 = vmul.bf16 %v1658_v33, %v4765_v47  ;;  %v1657_v38 = vadd.bf16 3197288082, %v1641_v60  ;;  %v1660_v61 = vadd.bf16 3197288082, %v1644_v18  ;;  %v1877_v5 = vadd.bf16 1065369472, %v1861_v17 }
 0x29d   : > { %2166 = vmatprep.mubr.bf16.mxu0 %v1894_v53  ;;  %v1816_v8 = vsub.bf16 1065369472, %v1800_v7  ;;  %v1799_v39 = vmul.bf16 %v4721_v31, %v1703_v58  ;;  %v1659_v43 = vadd.bf16 3197288082, %v1643_v50  ;;  %v5517_v63 = vmul.bf16 1060454197, %v4603_v11 }
 0x29e   : > { %v1690_v2 = vadd.bf16 1048723074, %v1674_v42  ;;  %v1673_v48 = vmul.bf16 %v1657_v38, %v4732_v51  ;;  %v1676_v23 = vmul.bf16 %v1660_v61, %v4826_v9  ;;  %v1464_v52 = vmul.bf16 1056980736, %v4610_v12 }
 0x29f   : > { %vm4871_vm11 = vcmp.ge.bf16.partialorder %v5517_v63, 0  ;;  %v1848_v20 = vsub.bf16 0, %v1816_v8  ;;  %v1815_v36 = vsub.bf16 1065369472, %v1799_v39  ;;  %v1675_v27 = vmul.bf16 %v1659_v43, %v4822_v10  ;;  %v3465_v43 = vld [vmem:[#allocation5 + $0x78] sm:$0xff]  }
 0x2a0   : > { %v5520_v31 = vmul.bf16 1060454197, %v4610_v12  ;;  %v1706_v19 = vmul.bf16 %v1690_v2, %v4765_v47  ;;  %v1689_v56 = vadd.bf16 1048723074, %v1673_v48  ;;  %v1692_v30 = vadd.bf16 1048723074, %v1676_v23  ;;  %3279 = vmatprep.subr.bf16.mxu1 %v3465_v43  ;;  %3215 = vmatprep.subr.bf16.mxu0 %v3465_v43 }
 0x2a1   : > { %v1893_v44 = vmul.bf16 %v1877_v5, %v1461_v45  ;;  %v1847_v29 = vsub.bf16 0, %v1815_v36  ;;  %v1691_v46 = vadd.bf16 1048723074, %v1675_v27  ;;  %v1466_v13 = vmul.bf16 1056980736, %v4628_v62  ;;  %v3466_v63 = vld [vmem:[#allocation5 + $0x38] sm:$0xff]  }
 0x2a2   : > { %vm1832_vm12 = vcmp.ge.bf16.partialorder %v5520_v31, 0  ;;  %v1802_v40 = vmul.bf16 %v4756_v21, %v1706_v19  ;;  %v1705_v15 = vmul.bf16 %v1689_v56, %v4732_v51  ;;  %v1708_v53 = vmul.bf16 %v1692_v30, %v4826_v9  ;;  %3287 = vmatpush3.bf16.msra.mxu1 %v3466_v63  ;;  %3216 = vmatpush3.bf16.msra.mxu0 %v3466_v63  ;;  %v3470_v2 = vld [vmem:[#allocation5 + $0x28] sm:$0xff]   ;;  %v3472_v48 = vld [vmem:[#allocation5 + $0x20] sm:$0xff]   ;;  %v3473_v23 = vld [vmem:[#allocation5 + $0x58] sm:$0xff]  }
 0x2a3   : > { %v1864_v6 = vsel %vm1832_vm12, %v1816_v8, %v1848_v20  ;;  %v1863_v12 = vsel %vm4871_vm11, %v1815_v36, %v1847_v29  ;;  %v1707_v41 = vmul.bf16 %v1691_v46, %v4822_v10  ;;  %v1463_v51 = vmul.bf16 1056980736, %v4603_v11  ;;  %v3475_v20 = vld [vmem:[#allocation5 + $0x50] sm:$0xff]   ;;  %v3477_v27 = vld [vmem:[#allocation5 + $0x48] sm:$0xff]   ;;  %v3479_v19 = vld [vmem:[#allocation5 + $0x40] sm:$0xff]  }
 0x2a4   : > { %v1880_v55 = vadd.bf16 1065369472, %v1864_v6  ;;  %2167 = vmatmul.mubr.bf16.gmra.mxu0 %v1893_v44  ;;  %v1818_v34 = vsub.bf16 1065369472, %v1802_v40  ;;  %v1801_v54 = vmul.bf16 %v4748_v16, %v1705_v15  ;;  %v1879_v4 = vadd.bf16 1065369472, %v1863_v12 }
 0x2a5   : > { %v1804_v28 = vmul.bf16 %v3608_v49, %v1708_v53  ;;  %v1803_v21 = vmul.bf16 %v4820_v57, %v1707_v41  ;;  %v5521_v9 = vmul.bf16 1060454197, %v4628_v62  ;;  %v5522_v14 = vmul.bf16 1060454197, %v4624_v25  ;;  %v3476_v36 = vld [vmem:[#allocation5 + $0x10] sm:$0xff]   ;;  %v3478_v31 = vld [vmem:[#allocation5 + $0x8] sm:$0xff]  }
 0x2a6   : > { %v1896_v47 = vmul.bf16 %v1880_v55, %v1464_v52  ;;  %v1850_v59 = vsub.bf16 0, %v1818_v34  ;;  %v1817_v32 = vsub.bf16 1065369472, %v1801_v54  ;;  %v1895_v16 = vmul.bf16 %v1879_v4, %v1463_v51  ;;  %v3474_v52 = vld [vmem:[#allocation5 + $0x18] sm:$0xff]   ;;  %v3480_v56 = vld [vmem:[#allocation5] sm:$0xff]  }
 0x2a7   : > { %vm1834_vm13 = vcmp.ge.bf16.partialorder %v5521_v9, 0  ;;  %v1820_v24 = vsub.bf16 1065369472, %v1804_v28  ;;  %vm1833_vm14 = vcmp.ge.bf16.partialorder %v5522_v14, 0  ;;  %v5523_v33 = vmul.bf16 1060454197, %v4662_v37 }
 0x2a8   : > { %2176 = vmatprep.mubr.bf16.mxu0 %v1896_v47  ;;  %v1866_v10 = vsel %vm1834_vm13, %v1818_v34, %v1850_v59  ;;  %v1849_v26 = vsub.bf16 0, %v1817_v32  ;;  %v1819_v60 = vsub.bf16 1065369472, %v1803_v21  ;;  %v1468_v62 = vmul.bf16 1056980736, %v4662_v37  ;;  %v3468_v37 = vld [vmem:[#allocation5 + $0x30] sm:$0xff]  }
 0x2a9   : > { %v1882_v1 = vadd.bf16 1065369472, %v1866_v10  ;;  %v1852_v17 = vsub.bf16 0, %v1820_v24  ;;  %vm1836_vm15 = vcmp.ge.bf16.partialorder %v5523_v33, 0  ;;  %v1465_v49 = vmul.bf16 1056980736, %v4624_v25 }
 0x2aa   : > { %v1865_v57 = vsel %vm1833_vm14, %v1817_v32, %v1849_v26  ;;  %v1851_v50 = vsub.bf16 0, %v1819_v60  ;;  %v5524_v42 = vmul.bf16 1060454197, %v4659_v22  ;;  %v1467_v8 = vmul.bf16 1056980736, %v4659_v22  ;;  %v3467_v25 = vld [vmem:[#allocation5 + $0x70] sm:$0xff]  }
 0x2ab   : > { %v1898_v11 = vmul.bf16 %v1882_v1, %v1466_v13  ;;  %v1868_v18 = vsel %vm1836_vm15, %v1820_v24, %v1852_v17  ;;  %v1881_v58 = vadd.bf16 1065369472, %v1865_v57  ;;  %3280 = vmatprep.subr.bf16.mxu1 %v3467_v25  ;;  %3217 = vmatprep.subr.bf16.mxu0 %v3467_v25  ;;  %v3471_v22 = vld [vmem:[#allocation5 + $0x60] sm:$0xff]  }
 0x2ac   : > { %2177 = vmatmul.mubr.bf16.gmra.mxu0 %v1895_v16  ;;  %v1884_v7 = vadd.bf16 1065369472, %v1868_v18  ;;  %vm1835_vm0 = vcmp.ge.bf16.partialorder %v5524_v42, 0  ;;  %3288 = vmatpush3.bf16.msra.mxu1 %v3468_v37 }
 0x2ad   : > { %2186 = vmatprep.mubr.bf16.mxu0 %v1898_v11  ;;  %v1897_v38 = vmul.bf16 %v1881_v58, %v1465_v49  ;;  %v1867_v61 = vsel %vm1835_vm0, %v1819_v60, %v1851_v50  ;;  %3218 = vmatpush3.bf16.msra.mxu0 %v3468_v37  ;;  %v3192_v30 = vld.sshfl [vmem:[%s5398_s6] sm:$0x11 pattern:$0x75316420] }
 0x2ae   : > { %v1900_v45 = vmul.bf16 %v1884_v7, %v1468_v62  ;;  %v1883_v5 = vadd.bf16 1065369472, %v1867_v61  ;;  %3281 = vmatprep.subr.bf16.mxu1 %v3469_v0  ;;  %3219 = vmatprep.subr.bf16.mxu0 %v3469_v0  ;;  %v2231_v44 = vcombine.high %v3192_v30, %v3192_v30  ;;  %v2238_v6 = vrot.slane %v3192_v30, %v4086_v3 }
 0x2b0   : > { %v1899_v39 = vmul.bf16 %v1883_v5, %v1467_v8  ;;  %3289 = vmatpush3.bf16.msra.mxu1 %v3470_v2  ;;  %v2245_v29 = vrot.slane %v2231_v44, %v4086_v3  ;;  %v2247_v46 = vpack.i.b16 %v2238_v6, %v2238_v6 }
 0x2b1   : > { %3220 = vmatpush3.bf16.msra.mxu0 %v3470_v2  ;;  %3282 = vmatprep.subr.bf16.mxu1 %v3471_v22 }
 0x2b2   : > { %3221 = vmatprep.subr.bf16.mxu0 %v3471_v22  ;;  %v2254_v40 = vpack.i.b16 %v2245_v29, %v2245_v29  ;;  %v4909_v53 = vrot.slane %v2247_v46, %v5487_v35 }
 0x2b4   : > { %2187 = vmatmul.mubr.bf16.gmra.mxu0 %v1897_v38  ;;  %3290 = vmatpush3.bf16.msra.mxu1 %v3472_v48  ;;  %v4912_v47 = vrot.slane %v2254_v40, %v5487_v35 }
 0x2b5   : > { %2196 = vmatprep.mubr.bf16.mxu0 %v1900_v45  ;;  %3222 = vmatpush3.bf16.msra.mxu0 %v3472_v48 }
 0x2b6   : > { %3223 = vmatprep.subr.bf16.mxu0 %v3473_v23  ;;  %3283 = vmatprep.subr.bf16.mxu1 %v3473_v23 }
 0x2b8   : > { %3291 = vmatpush3.bf16.msra.mxu1 %v3474_v52 }
 0x2b9   : > { %3224 = vmatpush3.bf16.msra.mxu0 %v3474_v52  ;;  %3284 = vmatprep.subr.bf16.mxu1 %v3475_v20 }
 0x2ba   : > { %3225 = vmatprep.subr.bf16.mxu0 %v3475_v20 }
 0x2bc   : > { %2197 = vmatmul.mubr.bf16.gmra.mxu0 %v1899_v39  ;;  %3292 = vmatpush3.bf16.msra.mxu1 %v3476_v36 }
 0x2bd   : > { %3226 = vmatpush3.bf16.msra.mxu0 %v3476_v36  ;;  %3285 = vmatprep.subr.bf16.mxu1 %v3477_v27 }
 0x2be   : > { %3227 = vmatprep.subr.bf16.mxu0 %v3477_v27 }
 0x2c0   : > { %3293 = vmatpush3.bf16.msra.mxu1 %v3478_v31 }
 0x2c1   : > { %3228 = vmatpush3.bf16.msra.mxu0 %v3478_v31  ;;  %3286 = vmatprep.subr.bf16.mxu1 %v3479_v19 }
 0x2c2   : > { %3229 = vmatprep.subr.bf16.mxu0 %v3479_v19 }
 0x2c4   : > { %3294 = vmatpush3.bf16.msra.mxu1 %v3480_v56 }
 0x2c5   : > { %3230 = vmatpush3.bf16.msra.mxu0 %v3480_v56 }
 0x332   : > { %v2128_v55 = vpop.f32.mrf.mxu0 }
 0x334   : > { %v2130_v15 = vpop.f32.mrf.mxu0 }
 0x336   : > { %v2132_v12 = vpop.f32.mrf.mxu0 }
 0x337   : > { %v2207_v41 = vpack.c.bf16 %v2132_v12, %v2128_v55 }
 0x338   : > { %v2134_v34 = vpop.f32.mrf.mxu0 }
 0x339   : > { %v4915_v54 = vadd.bf16 %v4909_v53, %v2207_v41  ;;  %v2208_v4 = vpack.c.bf16 %v2134_v34, %v2130_v15 }
 0x33b   : > { %v2292_v28 = vmul.bf16 1060454197, %v4915_v54  ;;  %v4919_v3 = vadd.bf16 %v4912_v47, %v2208_v4 }
 0x33d   : > { %v2308_v59 = vand.u32 2147450879, %v2292_v28  ;;  %v2293_v32 = vmul.bf16 1060454197, %v4919_v3  ;;  %vm4987_vm1 = vcmp.ge.bf16.partialorder %v2292_v28, 0 }
 0x33f   : > { %v2324_v21 = vmul.bf16 1051213480, %v2308_v59  ;;  %v2309_v51 = vand.u32 2147450879, %v2293_v32  ;;  %v2532_v14 = vsub.bf16 0, %v2308_v59  ;;  %vm5058_vm2 = vcmp.ge.bf16.partialorder %v2293_v32, 0 }
 0x341   : > { %v2340_v9 = vadd.bf16 1065369472, %v2324_v21  ;;  %v2325_v24 = vmul.bf16 1051213480, %v2309_v51  ;;  %v2548_v60 = vmul.bf16 %v2532_v14, %v2308_v59  ;;  %v2533_v22 = vsub.bf16 0, %v2309_v51 }
 0x343   : > { %3609 = vrcp.bf16 %v2340_v9  ;;  %v2341_v13 = vadd.bf16 1065369472, %v2325_v24  ;;  %v2565_v42 = vmul.bf16 1069105081, %v2548_v60  ;;  %v2549_v30 = vmul.bf16 %v2533_v22, %v2309_v51 }
 0x344   : > { %v2276_v24 = vmul.bf16 1056980736, %v4915_v54 }
 0x345   : > { %3611 = vrcp.bf16 %v2341_v13  ;;  %v2568_v13 = vmul.bf16 1069105081, %v2549_v30 }
 0x346   : > { %3613 = vpow.bf16 %v2565_v42 }
 0x34a   : > { %v2138_v10 = vpop.f32.mrf.mxu0 }
 0x34c   : > { %v2140_v26 = vpop.f32.mrf.mxu0 }
 0x34e   : > { %v2142_v16 = vpop.f32.mrf.mxu0 }
 0x34f   : > { %v2209_v1 = vpack.c.bf16 %v2142_v16, %v2138_v10 }
 0x350   : > { %v2144_v17 = vpop.f32.mrf.mxu0 }
 0x351   : > { %v4927_v33 = vadd.bf16 %v4909_v53, %v2209_v1  ;;  %v2210_v57 = vpack.c.bf16 %v2144_v17, %v2140_v26  ;;  %v3610_v18 = vpop.eup %3609 }
 0x352   : > { %v2148_v11 = vpop.f32.mrf.mxu0  ;;  %v4933_v62 = vmul.bf16 1065369472, %v3610_v18 }
 0x353   : > { %v2294_v7 = vmul.bf16 1060454197, %v4927_v33  ;;  %v4931_v58 = vadd.bf16 %v4912_v47, %v2210_v57  ;;  %v3612_v49 = vpop.eup %3611  ;;  %v2277_v57 = vmul.bf16 1056980736, %v4919_v3 }
 0x354   : > { %v2150_v50 = vpop.f32.mrf.mxu0  ;;  %v2388_v45 = vmul.bf16 1065893768, %v4933_v62  ;;  %v4939_v43 = vmul.bf16 1065369472, %v3612_v49 }
 0x355   : > { %v2295_v38 = vmul.bf16 1060454197, %v4931_v58  ;;  %v2310_v5 = vand.u32 2147450879, %v2294_v7  ;;  %vm5163_vm5 = vcmp.ge.bf16.partialorder %v2294_v7, 0 }
 0x356   : > { %v2152_v61 = vpop.f32.mrf.mxu0  ;;  %v2404_v39 = vadd.bf16 3216687034, %v2388_v45  ;;  %v2389_v31 = vmul.bf16 1065893768, %v4939_v43 }
 0x357   : > { %v2211_v8 = vpack.c.bf16 %v2152_v61, %v2148_v11  ;;  %v4943_v25 = vand.u32 2147450879, %v2295_v38  ;;  %v2326_v23 = vmul.bf16 1051213480, %v2310_v5  ;;  %v2534_v41 = vsub.bf16 0, %v2310_v5 }
 0x358   : > { %v2154_v63 = vpop.f32.mrf.mxu0  ;;  %v2420_v2 = vmul.bf16 %v2404_v39, %v4933_v62  ;;  %v2405_v12 = vadd.bf16 3216687034, %v2389_v31  ;;  %vm5141_vm4 = vcmp.ge.bf16.partialorder %v2295_v38, 0 }
 0x359   : > { %v4946_v37 = vadd.bf16 %v4909_v53, %v2211_v8  ;;  %v2212_v0 = vpack.c.bf16 %v2154_v63, %v2150_v50  ;;  %v2327_v19 = vmul.bf16 1051213480, %v4943_v25  ;;  %v2342_v6 = vadd.bf16 1065369472, %v2326_v23 }
 0x35a   : > { %v2436_v20 = vadd.bf16 1068908470, %v2420_v2  ;;  %v2421_v17 = vmul.bf16 %v2405_v12, %v4939_v43  ;;  %v2550_v60 = vmul.bf16 %v2534_v41, %v2310_v5  ;;  %v2535_v50 = vsub.bf16 0, %v4943_v25 }
 0x35b   : > { %v2296_v52 = vmul.bf16 1060454197, %v4946_v37  ;;  %v4951_v36 = vadd.bf16 %v4912_v47, %v2212_v0  ;;  %v2343_v34 = vadd.bf16 1065369472, %v2327_v19  ;;  %3615 = vrcp.bf16 %v2342_v6  ;;  %v3614_v0 = vpop.eup %3613 }
 0x35c   : > { %v2158_v48 = vpop.f32.mrf.mxu0  ;;  %v2452_v56 = vmul.bf16 %v2436_v20, %v4933_v62  ;;  %v2571_v31 = vmul.bf16 1069105081, %v2550_v60  ;;  %v2551_v19 = vmul.bf16 %v2535_v50, %v4943_v25 }
 0x35d   : > { %v2312_v29 = vand.u32 2147450879, %v2296_v52  ;;  %v2297_v46 = vmul.bf16 1060454197, %v4951_v36  ;;  %3617 = vrcp.bf16 %v2343_v34  ;;  %vm5182_vm7 = vcmp.ge.bf16.partialorder %v2296_v52, 0 }
 0x35e   : > { %v2160_v27 = vpop.f32.mrf.mxu0  ;;  %v2468_v40 = vadd.bf16 3197288082, %v2452_v56  ;;  %3619 = vpow.bf16 %v2568_v13  ;;  %v5548_v7 = vmul.bf16 1056980736, %v4951_v36 }
 0x35f   : > { %v2313_v4 = vand.u32 2147450879, %v2297_v46  ;;  %v2328_v10 = vmul.bf16 1051213480, %v2312_v29  ;;  %v2536_v49 = vsub.bf16 0, %v2312_v29  ;;  %vm5175_vm6 = vcmp.ge.bf16.partialorder %v2297_v46, 0 }
 0x360   : > { %v2162_v44 = vpop.f32.mrf.mxu0  ;;  %v2484_v59 = vmul.bf16 %v2468_v40, %v4933_v62 }
 0x361   : > { %v2213_v55 = vpack.c.bf16 %v2162_v44, %v2158_v48  ;;  %v2329_v11 = vmul.bf16 1051213480, %v2313_v4  ;;  %v2344_v8 = vadd.bf16 1065369472, %v2328_v10  ;;  %v2552_v56 = vmul.bf16 %v2536_v49, %v2312_v29 }
 0x362   : > { %v2164_v15 = vpop.f32.mrf.mxu0  ;;  %v2500_v26 = vadd.bf16 1048723074, %v2484_v59  ;;  %v2537_v6 = vsub.bf16 0, %v2313_v4 }
 0x363   : > { %v4963_v21 = vadd.bf16 %v4909_v53, %v2213_v55  ;;  %v2214_v51 = vpack.c.bf16 %v2164_v15, %v2160_v27  ;;  %v2345_v23 = vadd.bf16 1065369472, %v2329_v11  ;;  %3621 = vrcp.bf16 %v2344_v8 }
 0x364   : > { %v2168_v9 = vpop.f32.mrf.mxu0  ;;  %v2516_v18 = vmul.bf16 %v2500_v26, %v4933_v62  ;;  %v2437_v62 = vadd.bf16 1068908470, %v2421_v17  ;;  %v2577_v26 = vmul.bf16 1069105081, %v2552_v56 }
 0x365   : > { %v2298_v14 = vmul.bf16 1060454197, %v4963_v21  ;;  %v4968_v16 = vadd.bf16 %v4912_v47, %v2214_v51 }
 0x366   : > { %v2170_v1 = vpop.f32.mrf.mxu0  ;;  %v2612_v48 = vmul.bf16 %v3614_v0, %v2516_v18  ;;  %v2453_v25 = vmul.bf16 %v2437_v62, %v4939_v43 }
 0x367   : > { %v2314_v45 = vand.u32 2147450879, %v2298_v14  ;;  %v2299_v39 = vmul.bf16 1060454197, %v4968_v16  ;;  %vm5091_vm3 = vcmp.ge.bf16.partialorder %v2298_v14, 0 }
 0x368   : > { %v2172_v42 = vpop.f32.mrf.mxu0  ;;  %v2628_v29 = vsub.bf16 1065369472, %v2612_v48 }
 0x369   : > { %v2215_v63 = vpack.c.bf16 %v2172_v42, %v2168_v9  ;;  %v2330_v2 = vmul.bf16 1051213480, %v2314_v45  ;;  %v2315_v20 = vand.u32 2147450879, %v2299_v39  ;;  %v2538_v55 = vsub.bf16 0, %v2314_v45  ;;  %v3616_v8 = vpop.eup %3615 }
 0x36a   : > { %v2174_v22 = vpop.f32.mrf.mxu0  ;;  %v2574_v9 = vmul.bf16 1069105081, %v2551_v19  ;;  %vm5196_vm8 = vcmp.ge.bf16.partialorder %v2299_v39, 0 }
 0x36b   : > { %v4982_v27 = vadd.bf16 %v4909_v53, %v2215_v63  ;;  %v2346_v30 = vadd.bf16 1065369472, %v2330_v2  ;;  %v2216_v40 = vpack.c.bf16 %v2174_v22, %v2170_v1  ;;  %v2331_v59 = vmul.bf16 1051213480, %v2315_v20 }
 0x36c   : > { %v2178_v44 = vpop.f32.mrf.mxu0  ;;  %v2553_v1 = vmul.bf16 %v2537_v6, %v2313_v4  ;;  %v2554_v60 = vmul.bf16 %v2538_v55, %v2314_v45  ;;  %v2539_v11 = vsub.bf16 0, %v2315_v20  ;;  %v2660_v63 = vsub.bf16 0, %v2628_v29 }
 0x36d   : > { %3623 = vrcp.bf16 %v2346_v30  ;;  %v5430_v41 = vmul.bf16 1060454197, %v4982_v27  ;;  %v4995_v51 = vadd.bf16 %v4912_v47, %v2216_v40  ;;  %v2347_v0 = vadd.bf16 1065369472, %v2331_v59 }
 0x36e   : > { %v2180_v34 = vpop.f32.mrf.mxu0  ;;  %3625 = vrcp.bf16 %v2345_v23  ;;  %v2469_v22 = vadd.bf16 3197288082, %v2453_v25  ;;  %v2580_v30 = vmul.bf16 1069105081, %v2553_v1  ;;  %v2555_v6 = vmul.bf16 %v2539_v11, %v2315_v20 }
 0x36f   : > { %3627 = vpow.bf16 %v2571_v31  ;;  %v2316_v13 = vand.u32 2147450879, %v5430_v41  ;;  %v2301_v50 = vmul.bf16 1060454197, %v4995_v51  ;;  %v3618_v31 = vpop.eup %3617 }
 0x370   : > { %v2182_v10 = vpop.f32.mrf.mxu0  ;;  %3629 = vpow.bf16 %v2574_v9  ;;  %v2485_v59 = vmul.bf16 %v2469_v22, %v4939_v43  ;;  %v3620_v9 = vpop.eup %3619 }
 0x371   : > { %v2332_v18 = vmul.bf16 1051213480, %v2316_v13  ;;  %v2217_v49 = vpack.c.bf16 %v2182_v10, %v2178_v44  ;;  %v2540_v48 = vsub.bf16 0, %v2316_v13  ;;  %v2317_v4 = vand.u32 2147450879, %v2301_v50 }
 0x372   : > { %v2184_v42 = vpop.f32.mrf.mxu0  ;;  %3631 = vpow.bf16 %v2577_v26  ;;  %v2583_v44 = vmul.bf16 1069105081, %v2554_v60  ;;  %v5015_v10 = vmul.bf16 1065369472, %v3616_v8  ;;  %v5017_v26 = vmul.bf16 1065369472, %v3618_v31 }
 0x373   : > { %v2218_v2 = vpack.c.bf16 %v2184_v42, %v2180_v34  ;;  %v2348_v62 = vadd.bf16 1065369472, %v2332_v18  ;;  %v5006_v19 = vadd.bf16 %v4909_v53, %v2217_v49  ;;  %v2333_v55 = vmul.bf16 1051213480, %v2317_v4 }
 0x374   : > { %v2188_v23 = vpop.f32.mrf.mxu0  ;;  %v2676_v34 = vsel %vm4987_vm1, %v2628_v29, %v2660_v63  ;;  %3633 = vrcp.bf16 %v2347_v0  ;;  %v2556_v18 = vmul.bf16 %v2540_v48, %v2316_v13  ;;  %v2586_v49 = vmul.bf16 1069105081, %v2555_v6  ;;  %v3622_v0 = vpop.eup %3621 }
 0x375   : > { %v5009_v56 = vadd.bf16 %v4912_v47, %v2218_v2  ;;  %v5426_v25 = vmul.bf16 1060454197, %v5006_v19  ;;  %3635 = vrcp.bf16 %v2348_v62  ;;  %v2349_v60 = vadd.bf16 1065369472, %v2333_v55 }
 0x376   : > { %v2190_v40 = vpop.f32.mrf.mxu0  ;;  %v2692_v11 = vadd.bf16 1065369472, %v2676_v34  ;;  %3637 = vpow.bf16 %v2580_v30  ;;  %v2541_v42 = vsub.bf16 0, %v2317_v4  ;;  %v2501_v13 = vadd.bf16 1048723074, %v2485_v59 }
 0x377   : > { %v2318_v20 = vand.u32 2147450879, %v5426_v25  ;;  %v5427_v15 = vmul.bf16 1060454197, %v5009_v56  ;;  %3639 = vpow.bf16 %v2583_v44  ;;  %v2589_v34 = vmul.bf16 1069105081, %v2556_v18 }
 0x378   : > { %v2192_v1 = vpop.f32.mrf.mxu0  ;;  %3641 = vrcp.bf16 %v2349_v60  ;;  %v2557_v25 = vmul.bf16 %v2541_v42, %v2317_v4  ;;  %v2517_v18 = vmul.bf16 %v2501_v13, %v4939_v43  ;;  %v5042_v60 = vmul.bf16 1065369472, %v3622_v0 }
 0x379   : > { %v2219_v29 = vpack.c.bf16 %v2192_v1, %v2188_v23  ;;  %v2334_v8 = vmul.bf16 1051213480, %v2318_v20  ;;  %v2319_v2 = vand.u32 2147450879, %v5427_v15  ;;  %v2542_v48 = vsub.bf16 0, %v2318_v20 }
 0x37a   : > { %v2194_v63 = vpop.f32.mrf.mxu0  ;;  %vm5203_vm9 = vcmp.ge.bf16.partialorder %v2301_v50, 0 }
 0x37b   : > { %v3624_v22 = vpop.eup %3623  ;;  %v5026_v31 = vadd.bf16 %v4909_v53, %v2219_v29  ;;  %v2220_v23 = vpack.c.bf16 %v2194_v63, %v2190_v40  ;;  %v2350_v44 = vadd.bf16 1065369472, %v2334_v8  ;;  %v2335_v15 = vmul.bf16 1051213480, %v2319_v2 }
 0x37c   : > { %v2198_v55 = vpop.f32.mrf.mxu0  ;;  %v3626_v30 = vpop.eup %3625  ;;  %v5028_v6 = vmul.bf16 1065369472, %v3624_v22  ;;  %v5038_v40 = vmul.bf16 %v2692_v11, %v2276_v24  ;;  %v2558_v4 = vmul.bf16 %v2542_v48, %v2318_v20  ;;  %v2592_v11 = vmul.bf16 1069105081, %v2557_v25 }
 0x37d   : > { %v5030_v1 = vpop.eup %3627  ;;  %v5428_v59 = vmul.bf16 1060454197, %v5026_v31  ;;  %v5034_v12 = vadd.bf16 %v4912_v47, %v2220_v23  ;;  %3643 = vrcp.bf16 %v2350_v44  ;;  %v5044_v63 = vmul.bf16 1065369472, %v3626_v30 }
 0x37e   : > { %v2200_v62 = vpop.f32.mrf.mxu0  ;;  %v2394_v29 = vmul.bf16 1065893768, %v5028_v6  ;;  %3645 = vpow.bf16 %v2586_v49  ;;  %v2543_v23 = vsub.bf16 0, %v2319_v2  ;;  %v5049_v24 = vpop.eup %3629  ;;  %v2351_v44 = vadd.bf16 1065369472, %v2335_v15 }
 0x37f   : > { %v2320_v42 = vand.u32 2147450879, %v5428_v59  ;;  %v5429_v54 = vmul.bf16 1060454197, %v5034_v12  ;;  %3647 = vpow.bf16 %v2589_v34  ;;  %v2595_v34 = vmul.bf16 1069105081, %v2558_v4 }
 0x380   : > { %v2202_v8 = vpop.f32.mrf.mxu0  ;;  %v2410_v22 = vadd.bf16 3216687034, %v2394_v29  ;;  %v5051_v13 = vpop.eup %3631  ;;  %v2613_v29 = vmul.bf16 %v3620_v9, %v2517_v18  ;;  %v2391_v59 = vmul.bf16 1065893768, %v5017_v26  ;;  %v2559_v28 = vmul.bf16 %v2543_v23, %v2319_v2 }
 0x381   : > { %v2336_v43 = vmul.bf16 1051213480, %v2320_v42  ;;  %v2321_v48 = vand.u32 2147450879, %v5429_v54  ;;  %v2221_v30 = vpack.c.bf16 %v2202_v8, %v2198_v55  ;;  %3649 = vrcp.bf16 %v2351_v44 }
 0x382   : > { %v2204_v0 = vpop.f32.mrf.mxu0  ;;  %v2426_v20 = vmul.bf16 %v2410_v22, %v5028_v6  ;;  %v3634_v45 = vpop.eup %3633  ;;  %v2544_v9 = vsub.bf16 0, %v2320_v42  ;;  %v2629_v8 = vsub.bf16 1065369472, %v2613_v29 }
 0x383   : > { %v2352_v25 = vadd.bf16 1065369472, %v2336_v43  ;;  %v2222_v15 = vpack.c.bf16 %v2204_v0, %v2200_v62  ;;  %v2337_v22 = vmul.bf16 1051213480, %v2321_v48  ;;  %v5064_v61 = vadd.bf16 %v4909_v53, %v2221_v30  ;;  %v3636_v55 = vpop.eup %3635 }
 0x384   : > { %v2442_v17 = vadd.bf16 1068908470, %v2426_v20  ;;  %v2545_v18 = vsub.bf16 0, %v2321_v48  ;;  %v5071_v43 = vpop.eup %3637  ;;  %v5073_v2 = vmul.bf16 1065369472, %v3634_v45  ;;  %v2560_v30 = vmul.bf16 %v2544_v9, %v2320_v42 }
 0x385   : > { %v5067_v32 = vadd.bf16 %v4912_v47, %v2222_v15  ;;  %3651 = vrcp.bf16 %v2352_v25  ;;  %v5431_v62 = vmul.bf16 1060454197, %v5064_v61  ;;  %v2353_v53 = vadd.bf16 1065369472, %v2337_v22  ;;  %v3640_v44 = vpop.eup %3639 }
 0x386   : > { %v2458_v4 = vmul.bf16 %v2442_v17, %v5028_v6  ;;  %3653 = vpow.bf16 %v2592_v11  ;;  %v2598_v20 = vmul.bf16 1069105081, %v2559_v28  ;;  %v5078_v17 = vmul.bf16 1065369472, %v3636_v55  ;;  %v3642_v29 = vpop.eup %3641 }
 0x387   : > { %v5432_v23 = vmul.bf16 1060454197, %v5067_v32  ;;  %3655 = vpow.bf16 %v2595_v34  ;;  %v2322_v47 = vand.u32 2147450879, %v5431_v62  ;;  %v5080_v25 = vmul.bf16 %v2545_v18, %v2321_v48 }
 0x388   : > { %v2474_v0 = vadd.bf16 3197288082, %v2458_v4  ;;  %v2661_v54 = vsub.bf16 0, %v2629_v8  ;;  %3657 = vrcp.bf16 %v2353_v53  ;;  %v2407_v4 = vadd.bf16 3216687034, %v2391_v59 }
 0x389   : > { %v2323_v45 = vand.u32 2147450879, %v5432_v23  ;;  %v2338_v15 = vmul.bf16 1051213480, %v2322_v47  ;;  %v2546_v22 = vsub.bf16 0, %v2322_v47  ;;  %3659 = vpow.bf16 %v2598_v20 }
 0x38a   : > { %v2490_v11 = vmul.bf16 %v2474_v0, %v5028_v6  ;;  %v2677_v42 = vsel %vm5058_vm2, %v2629_v8, %v2661_v54  ;;  %v5095_v9 = vmul.bf16 1065369472, %v3642_v29  ;;  %v2601_v18 = vmul.bf16 1069105081, %v2560_v30 }
 0x38b   : > { %v2339_v34 = vmul.bf16 1051213480, %v2323_v45  ;;  %v2547_v28 = vsub.bf16 0, %v2323_v45  ;;  %v3644_v41 = vpop.eup %3643  ;;  %v2354_v55 = vadd.bf16 1065369472, %v2338_v15  ;;  %v5085_v5 = vmul.bf16 %v2546_v22, %v2322_v47 }
 0x38c   : > { %v2506_v62 = vadd.bf16 1048723074, %v2490_v11  ;;  %v2693_v53 = vadd.bf16 1065369472, %v2677_v42  ;;  %v5097_v59 = vpop.eup %3645  ;;  %v2423_v54 = vmul.bf16 %v2407_v4, %v5017_v26  ;;  %v5104_v14 = vmul.bf16 1065369472, %v3644_v41 }
 0x38d   : > { %3661 = vrcp.bf16 %v2354_v55  ;;  %v5102_v49 = vpop.eup %3647  ;;  %v2355_v8 = vadd.bf16 1065369472, %v2339_v34  ;;  %v2390_v20 = vmul.bf16 1065893768, %v5015_v10  ;;  %v5110_v15 = vmul.bf16 %v2547_v28, %v2323_v45 }
 0x38e   : > { %v2522_v0 = vmul.bf16 %v2506_v62, %v5028_v6  ;;  %v2709_v29 = vmul.bf16 %v2693_v53, %v2277_v57  ;;  %v2439_v6 = vadd.bf16 1068908470, %v2423_v54  ;;  %3663 = vpow.bf16 %v2601_v18 }
 0x38f   : > { %v2406_v62 = vadd.bf16 3216687034, %v2390_v20  ;;  %v2393_v22 = vmul.bf16 1065893768, %v5044_v63  ;;  %v2392_v41 = vmul.bf16 1065893768, %v5042_v60  ;;  %v3650_v34 = vpop.eup %3649  ;;  %3665 = vrcp.bf16 %v2355_v8 }
 0x390   : > { %v2618_v30 = vmul.bf16 %v3640_v44, %v2522_v0  ;;  %2885 = vmatprep.mubr.bf16.mxu0 %v2709_v29  ;;  %v2455_v3 = vmul.bf16 %v2439_v6, %v5017_v26  ;;  %v2395_v57 = vmul.bf16 1065893768, %v5073_v2  ;;  %v2397_v44 = vmul.bf16 1065893768, %v5095_v9 }
 0x391   : > { %2886 = vmatmul.mubr.bf16.vlgmr.msra.gmra.mxu0 %v5038_v40  ;;  %v2422_v45 = vmul.bf16 %v2406_v62, %v5015_v10  ;;  %v2409_v28 = vadd.bf16 3216687034, %v2393_v22  ;;  %v2408_v55 = vadd.bf16 3216687034, %v2392_v41  ;;  %v2396_v42 = vmul.bf16 1065893768, %v5078_v17 }
 0x392   : > { %v2634_v4 = vsub.bf16 1065369472, %v2618_v30  ;;  %v2471_v54 = vadd.bf16 3197288082, %v2455_v3  ;;  %v2411_v6 = vadd.bf16 3216687034, %v2395_v57 }
 0x393   : > { %v3652_v18 = vpop.eup %3651  ;;  %v2438_v29 = vadd.bf16 1068908470, %v2422_v45  ;;  %v2425_v20 = vmul.bf16 %v2409_v28, %v5044_v63  ;;  %v2424_v30 = vmul.bf16 %v2408_v55, %v5042_v60  ;;  %v2413_v8 = vadd.bf16 3216687034, %v2397_v44 }
 0x394   : > { %v2666_v53 = vsub.bf16 0, %v2634_v4  ;;  %v5121_v40 = vpop.eup %3653  ;;  %v2487_v22 = vmul.bf16 %v2471_v54, %v5017_v26  ;;  %v2412_v41 = vadd.bf16 3216687034, %v2396_v42  ;;  %v5132_v0 = vmul.bf16 1065369472, %v3650_v34 }
 0x395   : > { %v5125_v23 = vpop.eup %3655  ;;  %v5134_v3 = vmul.bf16 1065369472, %v3652_v18  ;;  %v2454_v45 = vmul.bf16 %v2438_v29, %v5015_v10  ;;  %v2441_v28 = vadd.bf16 1068908470, %v2425_v20  ;;  %v2440_v55 = vadd.bf16 1068908470, %v2424_v30 }
 0x396   : > { %v5129_v62 = vsel %vm5091_vm3, %v2634_v4, %v2666_v53  ;;  %v2503_v11 = vadd.bf16 1048723074, %v2487_v22  ;;  %v2427_v57 = vmul.bf16 %v2411_v6, %v5073_v2  ;;  %v2429_v47 = vmul.bf16 %v2413_v8, %v5095_v9  ;;  %v3658_v48 = vpop.eup %3657 }
 0x397   : > { %v2470_v34 = vadd.bf16 3197288082, %v2454_v45  ;;  %v2457_v42 = vmul.bf16 %v2441_v28, %v5044_v63  ;;  %v2428_v18 = vmul.bf16 %v2412_v41, %v5078_v17  ;;  %v2456_v54 = vmul.bf16 %v2440_v55, %v5042_v60  ;;  %v5150_v30 = vpop.eup %3659 }
 0x398   : > { %v2519_v53 = vmul.bf16 %v2503_v11, %v5017_v26  ;;  %v2443_v29 = vadd.bf16 1068908470, %v2427_v57  ;;  %v2445_v20 = vadd.bf16 1068908470, %v2429_v47  ;;  %v2399_v8 = vmul.bf16 1065893768, %v5132_v0 }
 0x399   : > { %v2486_v38 = vmul.bf16 %v2470_v34, %v5015_v10  ;;  %v2473_v6 = vadd.bf16 3197288082, %v2457_v42  ;;  %v2444_v22 = vadd.bf16 1068908470, %v2428_v18  ;;  %v2472_v28 = vadd.bf16 3197288082, %v2456_v54 }
 0x39a   : > { %v2615_v45 = vmul.bf16 %v5049_v24, %v2519_v53  ;;  %v2459_v41 = vmul.bf16 %v2443_v29, %v5073_v2  ;;  %v2461_v26 = vmul.bf16 %v2445_v20, %v5095_v9  ;;  %v5157_v11 = vmul.bf16 1065369472, %v3658_v48 }
 0x39b   : > { %v3662_v44 = vpop.eup %3661  ;;  %v2502_v55 = vadd.bf16 1048723074, %v2486_v38  ;;  %v2489_v47 = vmul.bf16 %v2473_v6, %v5044_v63  ;;  %v2460_v57 = vmul.bf16 %v2444_v22, %v5078_v17  ;;  %v2488_v18 = vmul.bf16 %v2472_v28, %v5042_v60 }
 0x39c   : > { %v5167_v42 = vmul.bf16 1065369472, %v3662_v44  ;;  %v2631_v24 = vsub.bf16 1065369472, %v2615_v45  ;;  %v2475_v53 = vadd.bf16 3197288082, %v2459_v41  ;;  %v5170_v54 = vpop.eup %3663 }
 0x39d   : > { %v2518_v48 = vmul.bf16 %v2502_v55, %v5015_v10  ;;  %v2505_v29 = vadd.bf16 1048723074, %v2489_v47  ;;  %v2477_v20 = vadd.bf16 3197288082, %v2461_v26  ;;  %v2476_v38 = vadd.bf16 3197288082, %v2460_v57  ;;  %v3666_v55 = vpop.eup %3665 }
 0x39e   : > { %v2663_v6 = vsub.bf16 0, %v2631_v24  ;;  %v2504_v44 = vadd.bf16 1048723074, %v2488_v18  ;;  %v2491_v22 = vmul.bf16 %v2475_v53, %v5073_v2  ;;  %v2415_v45 = vadd.bf16 3216687034, %v2399_v8 }
 0x39f   : > { %v2614_v10 = vmul.bf16 %v5030_v1, %v2518_v48  ;;  %v2521_v41 = vmul.bf16 %v2505_v29, %v5044_v63  ;;  %v2493_v46 = vmul.bf16 %v2477_v20, %v5095_v9  ;;  %v2492_v26 = vmul.bf16 %v2476_v38, %v5078_v17 }
 0x3a0   : > { %v2679_v47 = vsel %vm5141_vm4, %v2631_v24, %v2663_v6  ;;  %v2520_v8 = vmul.bf16 %v2504_v44, %v5042_v60  ;;  %v2507_v57 = vadd.bf16 1048723074, %v2491_v22  ;;  %v2431_v52 = vmul.bf16 %v2415_v45, %v5132_v0 }
 0x3a1   : > { %v2695_v1 = vadd.bf16 1065369472, %v2679_v47  ;;  %v2630_v63 = vsub.bf16 1065369472, %v2614_v10  ;;  %v2617_v53 = vmul.bf16 %v5071_v43, %v2521_v41  ;;  %v2509_v48 = vadd.bf16 1048723074, %v2493_v46 }
 0x3a2   : > { %v2616_v60 = vmul.bf16 %v5051_v13, %v2520_v8  ;;  %v2523_v24 = vmul.bf16 %v2507_v57, %v5073_v2  ;;  %v2508_v29 = vadd.bf16 1048723074, %v2492_v26  ;;  %v2447_v39 = vadd.bf16 1068908470, %v2431_v52 }
 0x3a3   : > { %v5543_v20 = vmul.bf16 1056980736, %v4931_v58  ;;  %v2662_v6 = vsub.bf16 0, %v2630_v63  ;;  %v2633_v44 = vsub.bf16 1065369472, %v2617_v53  ;;  %v2525_v43 = vmul.bf16 %v2509_v48, %v5095_v9 }
 0x3a4   : > { %v2632_v22 = vsub.bf16 1065369472, %v2616_v60  ;;  %v2619_v45 = vmul.bf16 %v5097_v59, %v2523_v24  ;;  %v2524_v50 = vmul.bf16 %v2508_v29, %v5078_v17  ;;  %v2463_v10 = vmul.bf16 %v2447_v39, %v5132_v0 }
 0x3a5   : > { %v2711_v38 = vmul.bf16 %v2695_v1, %v5543_v20  ;;  %v5544_v13 = vmul.bf16 1060454197, %v4982_v27  ;;  %v2678_v58 = vsel %vm5163_vm5, %v2630_v63, %v2662_v6  ;;  %v2665_v41 = vsub.bf16 0, %v2633_v44 }
 0x3a6   : > { %v2621_v9 = vmul.bf16 %v5121_v40, %v2525_v43  ;;  %v2398_v46 = vmul.bf16 1065893768, %v5104_v14  ;;  %v2694_v59 = vadd.bf16 1065369472, %v2678_v58  ;;  %v2664_v26 = vsub.bf16 0, %v2632_v22 }
 0x3a7   : > { %vm5217_vm10 = vcmp.ge.bf16.partialorder %v5544_v13, 0  ;;  %2893 = vmatprep.mubr.bf16.mxu0 %v2711_v38  ;;  %v2635_v17 = vsub.bf16 1065369472, %v2619_v45  ;;  %v2620_v47 = vmul.bf16 %v5102_v49, %v2524_v50  ;;  %v2681_v8 = vsel %vm5175_vm6, %v2633_v44, %v2665_v41 }
 0x3a8   : > { %v2637_v57 = vsub.bf16 1065369472, %v2621_v9  ;;  %v2479_v52 = vadd.bf16 3197288082, %v2463_v10  ;;  %v2414_v1 = vadd.bf16 3216687034, %v2398_v46  ;;  %v2680_v40 = vsel %vm5182_vm7, %v2632_v22, %v2664_v26 }
 0x3a9   : > { %v5547_v53 = vmul.bf16 1056980736, %v4927_v33  ;;  %v2697_v63 = vadd.bf16 1065369472, %v2681_v8  ;;  %v2667_v48 = vsub.bf16 0, %v2635_v17 }
 0x3aa   : > { %v5232_v60 = vmul.bf16 1065369472, %v3666_v55  ;;  %v2669_v24 = vsub.bf16 0, %v2637_v57  ;;  %v2636_v29 = vsub.bf16 1065369472, %v2620_v47  ;;  %v2495_v49 = vmul.bf16 %v2479_v52, %v5132_v0 }
 0x3ab   : > { %v2710_v34 = vmul.bf16 %v2694_v59, %v5547_v53  ;;  %v2713_v39 = vmul.bf16 %v2697_v63, %v5548_v7  ;;  %v2683_v20 = vsel %vm5196_vm8, %v2635_v17, %v2667_v48  ;;  %v2430_v33 = vmul.bf16 %v2414_v1, %v5104_v14 }
 0x3ac   : > { %v2401_v38 = vmul.bf16 1065893768, %v5157_v11  ;;  %v2696_v28 = vadd.bf16 1065369472, %v2680_v40  ;;  %v2699_v6 = vadd.bf16 1065369472, %v2683_v20  ;;  %v2685_v55 = vsel %vm5203_vm9, %v2637_v57, %v2669_v24 }
 0x3ad   : > { %2894 = vmatmul.mubr.bf16.gmra.mxu0 %v2710_v34  ;;  %v2668_v44 = vsub.bf16 0, %v2636_v29  ;;  %v5549_v43 = vmul.bf16 1069105081, %v5080_v25  ;;  %v2701_v22 = vadd.bf16 1065369472, %v2685_v55 }
 0x3ae   : > { %2901 = vmatprep.mubr.bf16.mxu0 %v2713_v39  ;;  %v2511_v36 = vadd.bf16 1048723074, %v2495_v49  ;;  %v2446_v45 = vadd.bf16 1068908470, %v2430_v33  ;;  %v5550_v18 = vmul.bf16 1056980736, %v4963_v21 }
 0x3af   : > { %3667 = vpow.bf16 %v5549_v43  ;;  %v5551_v50 = vadd.bf16 1065369472, %v5129_v62  ;;  %v5552_v13 = vmul.bf16 1056980736, %v4968_v16  ;;  %v2417_v41 = vadd.bf16 3216687034, %v2401_v38 }
 0x3b0   : > { %v2400_v4 = vmul.bf16 1065893768, %v5134_v3  ;;  %v5553_v9 = vmul.bf16 1056980736, %v4995_v51  ;;  %v2684_v25 = vsel %vm5217_vm10, %v2636_v29, %v2668_v44  ;;  %v2527_v59 = vmul.bf16 %v2511_v36, %v5132_v0 }
 0x3b1   : > { %v2714_v10 = vmul.bf16 %v5551_v50, %v5550_v18  ;;  %v2715_v58 = vmul.bf16 %v2699_v6, %v5552_v13  ;;  %v2462_v26 = vmul.bf16 %v2446_v45, %v5104_v14  ;;  %v2433_v21 = vmul.bf16 %v2417_v41, %v5157_v11 }
 0x3b2   : > { %v2717_v46 = vmul.bf16 %v2701_v22, %v5553_v9  ;;  %v2416_v62 = vadd.bf16 3216687034, %v2400_v4  ;;  %v2403_v16 = vmul.bf16 1065893768, %v5232_v60  ;;  %v2402_v17 = vmul.bf16 1065893768, %v5167_v42 }
 0x3b3   : > { %2909 = vmatprep.mubr.bf16.mxu1 %v2715_v58  ;;  %v5554_v47 = vmul.bf16 1069105081, %v5085_v5  ;;  %v5555_v51 = vmul.bf16 1056980736, %v4946_v37  ;;  %v2623_v2 = vmul.bf16 %v5150_v30, %v2527_v59  ;;  %v2478_v0 = vadd.bf16 3197288082, %v2462_v26 }
 0x3b4   : > { %2910 = vmatmul.mubr.bf16.vlgmr.msra.gmra.mxu1 %v2714_v10  ;;  %v2449_v57 = vadd.bf16 1068908470, %v2433_v21  ;;  %v2432_v52 = vmul.bf16 %v2416_v62, %v5134_v3  ;;  %v2419_v1 = vadd.bf16 3216687034, %v2403_v16  ;;  %v2418_v53 = vadd.bf16 3216687034, %v2402_v17 }
 0x3b5   : > { %3669 = vpow.bf16 %v5554_v47  ;;  %v2712_v8 = vmul.bf16 %v2696_v28, %v5555_v51  ;;  %2917 = vmatprep.mubr.bf16.mxu1 %v2717_v46  ;;  %v5556_v34 = vmul.bf16 1069105081, %v5110_v15  ;;  %v2700_v63 = vadd.bf16 1065369472, %v2684_v25 }
 0x3b6   : > { %v2639_v5 = vsub.bf16 1065369472, %v2623_v2  ;;  %v2494_v40 = vmul.bf16 %v2478_v0, %v5104_v14  ;;  %v2465_v37 = vmul.bf16 %v2449_v57, %v5157_v11  ;;  %v2448_v48 = vadd.bf16 1068908470, %v2432_v52 }
 0x3b7   : > { %3671 = vpow.bf16 %v5556_v34  ;;  %2902 = vmatmul.mubr.bf16.gmra.mxu0 %v2712_v8  ;;  %v2435_v30 = vmul.bf16 %v2419_v1, %v5232_v60  ;;  %v2434_v24 = vmul.bf16 %v2418_v53, %v5167_v42  ;;  %v2284_v29 = vmul.bf16 1056980736, %v4982_v27 }
 0x3b8   : > { %v5557_v49 = vmul.bf16 1060454197, %v5009_v56  ;;  %v2671_v7 = vsub.bf16 0, %v2639_v5  ;;  %v2510_v15 = vadd.bf16 1048723074, %v2494_v40  ;;  %v2464_v20 = vmul.bf16 %v2448_v48, %v5134_v3 }
 0x3b9   : > { %v2481_v39 = vadd.bf16 3197288082, %v2465_v37  ;;  %v2451_v33 = vadd.bf16 1068908470, %v2435_v30  ;;  %v2450_v38 = vadd.bf16 1068908470, %v2434_v24  ;;  %v2716_v6 = vmul.bf16 %v2700_v63, %v2284_v29 }
 0x3ba   : > { %vm2655_vm11 = vcmp.ge.bf16.partialorder %v5557_v49, 0  ;;  %v2287_v28 = vmul.bf16 1056980736, %v5009_v56  ;;  %v2526_v44 = vmul.bf16 %v2510_v15, %v5104_v14  ;;  %v2480_v27 = vadd.bf16 3197288082, %v2464_v20 }
 0x3bb   : > { %v2687_v55 = vsel %vm2655_vm11, %v2639_v5, %v2671_v7  ;;  %v2497_v22 = vmul.bf16 %v2481_v39, %v5157_v11  ;;  %v2467_v36 = vmul.bf16 %v2451_v33, %v5232_v60  ;;  %v2466_v18 = vmul.bf16 %v2450_v38, %v5167_v42 }
 0x3bc   : > { %v2703_v43 = vadd.bf16 1065369472, %v2687_v55  ;;  %2918 = vmatmul.mubr.bf16.gmra.mxu1 %v2716_v6  ;;  %v2622_v45 = vmul.bf16 %v5125_v23, %v2526_v44  ;;  %v2496_v13 = vmul.bf16 %v2480_v27, %v5134_v3  ;;  %v5558_v23 = vmul.bf16 1060454197, %v5006_v19 }
 0x3bd   : > { %v2513_v10 = vadd.bf16 1048723074, %v2497_v22  ;;  %v2483_v56 = vadd.bf16 3197288082, %v2467_v36  ;;  %v3668_v58 = vpop.eup %3667  ;;  %v2482_v4 = vadd.bf16 3197288082, %v2466_v18 }
 0x3be   : > { %v2719_v50 = vmul.bf16 %v2703_v43, %v2287_v28  ;;  %v2638_v41 = vsub.bf16 1065369472, %v2622_v45  ;;  %v2512_v9 = vadd.bf16 1048723074, %v2496_v13  ;;  %vm2654_vm12 = vcmp.ge.bf16.partialorder %v5558_v23, 0 }
 0x3bf   : > { %v2529_v14 = vmul.bf16 %v2513_v10, %v5157_v11  ;;  %v2499_v46 = vmul.bf16 %v2483_v56, %v5232_v60  ;;  %v2498_v59 = vmul.bf16 %v2482_v4, %v5167_v42  ;;  %v2286_v17 = vmul.bf16 1056980736, %v5006_v19 }
 0x3c0   : > { %2925 = vmatprep.mubr.bf16.mxu1 %v2719_v50  ;;  %v2670_v25 = vsub.bf16 0, %v2638_v41  ;;  %v2528_v21 = vmul.bf16 %v2512_v9, %v5134_v3  ;;  %v5559_v3 = vmul.bf16 1060454197, %v5034_v12  ;;  %v5560_v19 = vmul.bf16 1060454197, %v5026_v31 }
 0x3c1   : > { %v2625_v26 = vmul.bf16 %v3668_v58, %v2529_v14  ;;  %v2515_v62 = vadd.bf16 1048723074, %v2499_v46  ;;  %v2514_v51 = vadd.bf16 1048723074, %v2498_v59  ;;  %v5561_v29 = vmul.bf16 1060454197, %v5067_v32 }
 0x3c2   : > { %v2686_v47 = vsel %vm2654_vm12, %v2638_v41, %v2670_v25  ;;  %v2624_v2 = vmul.bf16 %v5170_v54, %v2528_v21  ;;  %vm2657_vm13 = vcmp.ge.bf16.partialorder %v5559_v3, 0  ;;  %vm2656_vm14 = vcmp.ge.bf16.partialorder %v5560_v19, 0 }
 0x3c3   : > { %v3670_v16 = vpop.eup %3669  ;;  %v2702_v8 = vadd.bf16 1065369472, %v2686_v47  ;;  %v2641_v11 = vsub.bf16 1065369472, %v2625_v26  ;;  %v2531_v0 = vmul.bf16 %v2515_v62, %v5232_v60  ;;  %v2530_v52 = vmul.bf16 %v2514_v51, %v5167_v42 }
 0x3c4   : > { %v2640_v34 = vsub.bf16 1065369472, %v2624_v2  ;;  %v2289_v60 = vmul.bf16 1056980736, %v5034_v12  ;;  %vm2659_vm15 = vcmp.ge.bf16.partialorder %v5561_v29, 0 }
 0x3c5   : > { %v3672_v57 = vpop.eup %3671  ;;  %v2718_v1 = vmul.bf16 %v2702_v8, %v2286_v17  ;;  %v2673_v53 = vsub.bf16 0, %v2641_v11  ;;  %v2626_v5 = vmul.bf16 %v3670_v16, %v2530_v52  ;;  %v2288_v39 = vmul.bf16 1056980736, %v5026_v31 }
 0x3c6   : > { %v2627_v63 = vmul.bf16 %v3672_v57, %v2531_v0  ;;  %v2672_v37 = vsub.bf16 0, %v2640_v34  ;;  %v2291_v33 = vmul.bf16 1056980736, %v5067_v32  ;;  %v5562_v28 = vmul.bf16 1060454197, %v5064_v61 }
 0x3c7   : > { %2926 = vmatmul.mubr.bf16.gmra.mxu1 %v2718_v1  ;;  %v2689_v40 = vsel %vm2657_vm13, %v2641_v11, %v2673_v53  ;;  %v2642_v30 = vsub.bf16 1065369472, %v2626_v5  ;;  %v2290_v43 = vmul.bf16 1056980736, %v5064_v61  ;;  %v2756_v32 = vld [vmem:[%s5400_s8] sm:$0x1] }
 0x3c8   : > { %v2643_v54 = vsub.bf16 1065369472, %v2627_v63  ;;  %v2705_v48 = vadd.bf16 1065369472, %v2689_v40  ;;  %v2688_v42 = vsel %vm2656_vm14, %v2640_v34, %v2672_v37  ;;  %vm2658_vm0 = vcmp.ge.bf16.partialorder %v5562_v28, 0 }
 0x3c9   : > { %v2704_v7 = vadd.bf16 1065369472, %v2688_v42  ;;  %v2674_v15 = vsub.bf16 0, %v2642_v30  ;;  %v2959_v36 = vpack.i.b16 %v2756_v32, %v2756_v32 }
 0x3ca   : > { %v2675_v24 = vsub.bf16 0, %v2643_v54  ;;  %v2721_v49 = vmul.bf16 %v2705_v48, %v2289_v60 }
 0x3cb   : > { %v2720_v12 = vmul.bf16 %v2704_v7, %v2288_v39  ;;  %v2690_v55 = vsel %vm2658_vm0, %v2642_v30, %v2674_v15  ;;  %v5311_v13 = vrot.slane %v2959_v36, %v5487_v35 }
 0x3cc   : > { %v2691_v20 = vsel %vm2659_vm15, %v2643_v54, %v2675_v24  ;;  %2933 = vmatprep.mubr.bf16.mxu1 %v2721_v49  ;;  %v2706_v44 = vadd.bf16 1065369472, %v2690_v55 }
 0x3cd   : > { %v2707_v38 = vadd.bf16 1065369472, %v2691_v20 }
 0x3ce   : > { %v2722_v22 = vmul.bf16 %v2706_v44, %v2290_v43 }
 0x3cf   : > { %v2723_v6 = vmul.bf16 %v2707_v38, %v2291_v33  ;;  %2934 = vmatmul.mubr.bf16.gmra.mxu1 %v2720_v12 }
 0x3d1   : > { %2941 = vmatprep.mubr.bf16.mxu1 %v2723_v6 }
 0x3d7   : > { %2942 = vmatmul.mubr.bf16.gmra.mxu1 %v2722_v22 }
 0x451   : > { %v3231_v31 = vpop.f32.mrf.mxu0 }
 0x453   : > { %v3232_v27 = vpop.f32.mrf.mxu0 }
 0x454   : > { %v3233_v50 = vadd.f32 %v3232_v27, %v3231_v31 }
 0x455   : > { %v3234_v45 = vpop.f32.mrf.mxu0 }
 0x457   : > { %v3235_v18 = vpop.f32.mrf.mxu0 }
 0x458   : > { %v3236_v10 = vadd.f32 %v3235_v18, %v3234_v45 }
 0x45a   : > { %v2950_v61 = vpack.c.bf16 %v3236_v10, %v3233_v50 }
 0x45c   : > { %v2965_v56 = vadd.bf16 %v5311_v13, %v2950_v61 }
 0x45e   : > { %v2973_v58 = vunpack.c.l.bf16 %v2965_v56  ;;  %v2974_v41 = vunpack.c.h.bf16 %v2965_v56 }
 0x460   : > { %2989 = vst [vmem:[%s5316_s17] sm:$0xff] %v2973_v58  ;;  %2990 = vst [vmem:[%s5316_s17 + $0x8] sm:$0xff] %v2974_v41 }
 0x46d   : > { %v3237_v4 = vpop.f32.mrf.mxu0 }
 0x46f   : > { %v3238_v14 = vpop.f32.mrf.mxu0 }
 0x470   : > { %v3239_v35 = vadd.f32 %v3238_v14, %v3237_v4 }
 0x471   : > { %v3240_v9 = vpop.f32.mrf.mxu0 }
 0x473   : > { %v3241_v46 = vpop.f32.mrf.mxu0 }
 0x474   : > { %v3249_v25 = vpop.f32.mrf.mxu1  ;;  %v3242_v59 = vadd.f32 %v3241_v46, %v3240_v9 }
 0x476   : > { %v3250_v26 = vpop.f32.mrf.mxu1  ;;  %v2951_v21 = vpack.c.bf16 %v3242_v59, %v3239_v35 }
 0x477   : > { %v3243_v23 = vpop.f32.mrf.mxu0  ;;  %v3251_v2 = vadd.f32 %v3250_v26, %v3249_v25 }
 0x478   : > { %v3252_v16 = vpop.f32.mrf.mxu1  ;;  %v2966_v17 = vadd.bf16 %v5311_v13, %v2951_v21 }
 0x479   : > { %v3244_v62 = vpop.f32.mrf.mxu0 }
 0x47a   : > { %v3253_v51 = vpop.f32.mrf.mxu1  ;;  %v2975_v8 = vunpack.c.l.bf16 %v2966_v17  ;;  %v2976_v11 = vunpack.c.h.bf16 %v2966_v17  ;;  %v3245_v1 = vadd.f32 %v3244_v62, %v3243_v23 }
 0x47b   : > { %v3246_v47 = vpop.f32.mrf.mxu0  ;;  %v3254_v0 = vadd.f32 %v3253_v51, %v3252_v16 }
 0x47c   : > { %v3255_v52 = vpop.f32.mrf.mxu1  ;;  %2991 = vst [vmem:[%s5316_s17 + $0x10] sm:$0xff] %v2975_v8  ;;  %2992 = vst [vmem:[%s5316_s17 + $0x18] sm:$0xff] %v2976_v11 }
 0x47d   : > { %v3247_v57 = vpop.f32.mrf.mxu0  ;;  %v2953_v34 = vpack.c.bf16 %v3254_v0, %v3251_v2 }
 0x47e   : > { %v3248_v53 = vadd.f32 %v3247_v57, %v3246_v47  ;;  %v3256_v63 = vpop.f32.mrf.mxu1 }
 0x47f   : > { %v2968_v5 = vadd.bf16 %v5311_v13, %v2953_v34  ;;  %v3257_v42 = vadd.f32 %v3256_v63, %v3255_v52 }
 0x480   : > { %v2952_v3 = vpack.c.bf16 %v3248_v53, %v3245_v1  ;;  %v3258_v19 = vpop.f32.mrf.mxu1 }
 0x481   : > { %v2979_v37 = vunpack.c.l.bf16 %v2968_v5  ;;  %v2980_v54 = vunpack.c.h.bf16 %v2968_v5 }
 0x482   : > { %v2967_v40 = vadd.bf16 %v5311_v13, %v2952_v3  ;;  %v3259_v60 = vpop.f32.mrf.mxu1 }
 0x483   : > { %2995 = vst [vmem:[%s5316_s17 + $0x30] sm:$0xff] %v2979_v37  ;;  %2996 = vst [vmem:[%s5316_s17 + $0x38] sm:$0xff] %v2980_v54  ;;  %v3260_v24 = vadd.f32 %v3259_v60, %v3258_v19 }
 0x484   : > { %v2977_v48 = vunpack.c.l.bf16 %v2967_v40  ;;  %v2978_v30 = vunpack.c.h.bf16 %v2967_v40 }
 0x485   : > { %v2954_v29 = vpack.c.bf16 %v3260_v24, %v3257_v42 }
 0x486   : > { %2993 = vst [vmem:[%s5316_s17 + $0x20] sm:$0xff] %v2977_v48  ;;  %2994 = vst [vmem:[%s5316_s17 + $0x28] sm:$0xff] %v2978_v30 }
 0x487   : > { %v2969_v49 = vadd.bf16 %v5311_v13, %v2954_v29  ;;  %v3261_v7 = vpop.f32.mrf.mxu1 }
 0x489   : > { %v2981_v15 = vunpack.c.l.bf16 %v2969_v49  ;;  %v2982_v39 = vunpack.c.h.bf16 %v2969_v49  ;;  %v3262_v20 = vpop.f32.mrf.mxu1 }
 0x48a   : > { %v3263_v28 = vadd.f32 %v3262_v20, %v3261_v7 }
 0x48b   : > { %2997 = vst [vmem:[%s5316_s17 + $0x40] sm:$0xff] %v2981_v15  ;;  %2998 = vst [vmem:[%s5316_s17 + $0x48] sm:$0xff] %v2982_v39  ;;  %v3264_v33 = vpop.f32.mrf.mxu1 }
 0x48d   : > { %v3265_v38 = vpop.f32.mrf.mxu1 }
 0x48e   : > { %v3266_v12 = vadd.f32 %v3265_v38, %v3264_v33 }
 0x48f   : > { %v3267_v6 = vpop.f32.mrf.mxu1 }
 0x490   : > { %v2955_v55 = vpack.c.bf16 %v3266_v12, %v3263_v28 }
 0x491   : > { %v3268_v44 = vpop.f32.mrf.mxu1 }
 0x492   : > { %v2970_v43 = vadd.bf16 %v5311_v13, %v2955_v55  ;;  %v3269_v36 = vadd.f32 %v3268_v44, %v3267_v6 }
 0x493   : > { %v3270_v22 = vpop.f32.mrf.mxu1 }
 0x494   : > { %v2983_v31 = vunpack.c.l.bf16 %v2970_v43  ;;  %v2984_v32 = vunpack.c.h.bf16 %v2970_v43 }
 0x495   : > { %v3271_v27 = vpop.f32.mrf.mxu1 }
 0x496   : > { %2999 = vst [vmem:[%s5316_s17 + $0x50] sm:$0xff] %v2983_v31  ;;  %3000 = vst [vmem:[%s5316_s17 + $0x58] sm:$0xff] %v2984_v32  ;;  %v3272_v45 = vadd.f32 %v3271_v27, %v3270_v22 }
 0x497   : > { %v3273_v18 = vpop.f32.mrf.mxu1 }
 0x498   : > { %v2956_v50 = vpack.c.bf16 %v3272_v45, %v3269_v36 }
 0x499   : > { %v3274_v10 = vpop.f32.mrf.mxu1 }
 0x49a   : > { %v2971_v61 = vadd.bf16 %v5311_v13, %v2956_v50  ;;  %v3275_v14 = vadd.f32 %v3274_v10, %v3273_v18 }
 0x49b   : > { %v3276_v56 = vpop.f32.mrf.mxu1 }
 0x49c   : > { %v2985_v58 = vunpack.c.l.bf16 %v2971_v61  ;;  %v2986_v41 = vunpack.c.h.bf16 %v2971_v61 }
 0x49d   : > { %v3277_v4 = vpop.f32.mrf.mxu1 }
 0x49e   : > { %3001 = vst [vmem:[%s5316_s17 + $0x60] sm:$0xff] %v2985_v58  ;;  %3002 = vst [vmem:[%s5316_s17 + $0x68] sm:$0xff] %v2986_v41  ;;  %v3278_v9 = vadd.f32 %v3277_v4, %v3276_v56 }
 0x4a0   : > { %v2957_v46 = vpack.c.bf16 %v3278_v9, %v3275_v14 }
 0x4a2   : > { %v2972_v25 = vadd.bf16 %v5311_v13, %v2957_v46 }
 0x4a4   : > { %v2987_v35 = vunpack.c.l.bf16 %v2972_v25  ;;  %v2988_v59 = vunpack.c.h.bf16 %v2972_v25 }
 0x4a6   : > { %3003 = vst [vmem:[%s5316_s17 + $0x70] sm:$0xff] %v2987_v35  ;;  %3004 = vst [vmem:[%s5316_s17 + $0x78] sm:$0xff] %v2988_v59 }
 0x4a7   : > { %3738 = shalt.err (!%p3735_p3)
}
 0x4a8   : > { %s3739_s14 = scalar_lea.hbm %s5344_s18, 2048  ;;  %s3743_s17 = scalar_lea.hbm %s5401_s9, 4096 }
 0x4a9   : > { %p3740_p2 = scmp.ne.s32.totalorder %s5344_s18, %s3739_s14  ;;  %p3744_p6 = scmp.lt.s32.totalorder %s5344_s18, %s5401_s9 }
 0x4aa   : > { %p3745_p9 = scmp.lt.s32.totalorder %s3743_s17, %s3739_s14 }
 0x4ab   : > { %p3741_p4 = pnand %p3740_p2, %p3894_p5 }
 0x4ac   : > { %p3746_p12 = por %p3745_p9, %p3744_p6 }
 0x4ad   : > { %p3742_p13 = pneg %p3741_p4 }
 0x4af   : > { %p3747_p10 = pnand %p3746_p12, %p3742_p13 }
 0x4b1   : > { %3750 = shalt.err (!%p3747_p10)
}
 0x4b2   : > { %s3804_s23 = smov 128   ;;  %s3805_s13 = smov 8  }
 0x4b3   : > { %3303 = dma.vmem_to_hbm [thread:$0]  (%p3894_p5), %s5346_s25, 2048, %s5344_s18, %s5352_s21, %s3804_s23, %s3804_s23, %s3805_s13  }
 0x4b4 PF: > { %p3320_p7 = scmp.ge.s32.totalorder %s3793_s12, 2  ;;  %s3034_s24 = sand.u32 1, %s3781_s30  }
 0x4b5   : > { %p5563_p8 = scmp.ne.s32.totalorder %s5435_s20, 0  ;;  %s3035_s26 = scalar_lea.sflag [#allocation4], %s3034_s24 }
 0x4b7   : > { %p3313_p11 = pnand %p3320_p7, %p5563_p8 }
 0x4b9   : > { %p3314_p0 = pneg %p3313_p11 }
 0x4bb   : > { %3776 = dma.done.wait (%p3314_p0), %s3035_s26, 2048  }
 0x4bc   : > { %3778 = vsyncadd (%p3314_p0), %s3035_s26, 4294965248  ;;  %s5564_s28 = sld [smem:[#allocation11_spill]]  ;;  %p21_p1 = scmp.ge.s32.totalorder %s3881_s15, 4  }
 0x4bd   : > { %s5565_s30 = smov %s3785_s10  ;;  %s5566_s10 = smov %s3789_s11 }
 0x4be   : > { %s5568_s12 = smov %s3881_s15  ;;  %23 = sbr.rel (!%p21_p1) target bundleno = 5 (0x5), region = 100 }
 0x4c2   : > { %s5567_s11 = smov %s5564_s28 }
 0x4c3   :  { %3040 = vsyncpa [#allocation3], 1 }
 0x4c4   :  { %3042 = vsyncpa [#allocation3 + $0x1], 1 }
 0x4c5   :  { %3043 = vsyncpa [#allocation6], 1 }
 0x4c6   :  { %3044 = vsyncpa [#allocation4], 1 }
 0x4c7   :  { %3046 = vsyncpa [#allocation4 + $0x1], 1 }

// kernel: tpu_custom_call.1
= control target key start
LH: loop header
LB: loop body
LE: loop exit
PB: predicated region body
PF: predicated region fallthrough
CT: control target
= control target key end

     0   :  { %14 = vsyncpa [#allocation3], 0  ;;  %s5392_s0 = inlined_call_operand.vmem [shape: f32[256,32], index: 0, kind: input, shape index: {}]   ;;  %s5393_s1 = inlined_call_operand.vmem [shape: bf16[32,256], index: 1, kind: input, shape index: {}]   ;;  %s5394_s2 = inlined_call_operand.vmem [shape: bf16[1,256], index: 2, kind: input, shape index: {}]   ;;  %s5395_s3 = inlined_call_operand.vmem [shape: bf16[256,256], index: 3, kind: input, shape index: {}]   ;;  %s5396_s4 = inlined_call_operand.vmem [shape: bf16[1,256], index: 4, kind: input, shape index: {}]   ;;  %s5397_s5 = inlined_call_operand.hbm [shape: bf16[256,256], index: 5, kind: input, shape index: {}]   ;;  %s5398_s6 = inlined_call_operand.vmem [shape: bf16[1,256], index: 6, kind: input, shape index: {}]   ;;  %s5399_s7 = inlined_call_operand.hbm [shape: bf16[256,128], index: 7, kind: input, shape index: {}]   ;;  %s5400_s8 = inlined_call_operand.vmem [shape: bf16[1,128], index: 8, kind: input, shape index: {}]   ;;  %s5401_s9 = inlined_call_operand.hbm [shape: f32[256,128], index: 9, kind: output, shape index: {}]  }
   0x1   :  { %15 = vsyncpa [#allocation6], 0 }
   0x2   :  { %16 = vsyncpa [#allocation4], 0 }
   0x3   :  { %18 = vsyncpa [#allocation4 + $0x1], 0  ;;  %s3856_s30 = smov 0   ;;  %s3858_s10 = smov 0  }
   0x4   :  { %s3860_s11 = smov 0   ;;  %s3862_s12 = smov 0  }
   0x5 LB: > { %s3877_s13 = sadd.s32 4294967295, %s3793_s12   ;;  %s3103_s14 = sadd.s32 4294967294, %s3793_s12   ;;  %s3793_s12 = sphi %s3862_s12, %s5568_s12   ;;  %s3789_s11 = sphi %s3860_s11, %s5567_s11   ;;  %s3785_s10 = sphi %s3858_s10, %s5566_s10   ;;  %s3781_s30 = sphi %s3856_s30, %s5565_s30  }
   0x6   : > { %s3881_s15 = sadd.s32 1, %s3793_s12   ;;  %s225_s16 = sadd.s32 1, %s3789_s11 }
   0x7   : > { %s222_s17 = ssub.s32 %s3793_s12, %s3881_s15  ;;  %p235_p0 = scmp.ne.s32.totalorder %s3789_s11, %s3785_s10 }
   0x8   : > { %p223_p1 = scmp.eq.s32.totalorder %s222_s17, 0  ;;  %p236_p2 = scmp.eq.s32.totalorder %s3877_s13, 1 }
   0x9   : > { %p241_p3 = scmp.ne.s32.totalorder %s3785_s10, %s3781_s30  ;;  %p242_p4 = scmp.eq.s32.totalorder %s3103_s14, 1 }
   0xa   : > { %s3892_s18 = scalar_select %p223_p1, %s3789_s11, %s225_s16  }
   0xb   : > { %p3894_p5 = por %p236_p2, %p235_p0  ;;  %p3898_p6 = por %p242_p4, %p241_p3 }
   0xc   : > { %5433 = sst [smem:[#allocation11_spill]] %s3892_s18  ;;  %p3104_p7 = scmp.ge.s32.totalorder %s3793_s12, 1 }
   0xd   : > { %s5435_s20 = scalar_select %p3898_p6, 1, 0 }
   0xe   : > { %p249_p8 = scmp.lt.s32.totalorder %s3793_s12, 3  ;;  %p5402_p9 = scmp.eq.s32.totalorder %s3877_s13, 0 }
   0xf   : > { %s3795_s22 = smov [#allocation2]   ;;  %s3796_s25 = smov [#allocation5]  }
  0x10   : > { %p3905_p10 = pnand %p3104_p7, %p249_p8  ;;  %s273_s23 = sshll.u32 %s3795_s22, 4  ;;  %s274_s23 = int_to_ptr.vmem [resolvable:$true] %s273_s23 }
  0x11   : > { %s289_s26 = sshll.u32 %s3796_s25, 4  ;;  %s3684_s27 = scalar_lea.vmem %s274_s23, 4096  ;;  %s290_s26 = int_to_ptr.vmem [resolvable:$true] %s289_s26 }
  0x12   : > { %p3305_p11 = pneg %p3905_p10  ;;  %p3685_p0 = scmp.ne.s32.totalorder %s274_s23, %s3684_s27 }
  0x13   : > { %p3692_p3 = scmp.lt.s32.totalorder %s274_s23, %s274_s23  ;;  %p3693_p4 = scmp.lt.s32.totalorder %s3684_s27, %s3684_s27 }
  0x14   : > { %p3913_p12 = pnand %p5402_p9, %p3305_p11 }
  0x15   : > { %p3694_p7 = por %p3693_p4, %p3692_p3 }
  0x16   : > { %p3675_p13 = pneg %p3913_p12 }
  0x18   : > { %p3687_p1 = pnand %p3685_p0, %p3675_p13 }
  0x1a   : > { %p3688_p2 = pneg %p3687_p1 }
  0x1c   : > { %p3695_p8 = pnand %p3694_p7, %p3688_p2 }
  0x1e   : > { %3698 = shalt.err (!%p3695_p8)
}
  0x1f   : > { %s3797_s28 = smov 128   ;;  %s3798_s29 = smov 8  }
  0x20   : > { %3308 = dma.hbm_to_vmem [thread:$0]  (!%p3913_p12), %s5397_s5, 4096, %s274_s23, [#allocation3], %s3797_s28, %s3797_s28, %s3798_s29  }
  0x21   : > { %s3710_s17 = scalar_lea.vmem %s290_s26, 2048  ;;  %p3718_p9 = scmp.lt.s32.totalorder %s290_s26, %s290_s26 }
  0x22   : > { %p3711_p11 = scmp.ne.s32.totalorder %s290_s26, %s3710_s17  ;;  %p3719_p6 = scmp.lt.s32.totalorder %s3710_s17, %s3710_s17 }
  0x24   : > { %p3713_p0 = pnand %p3711_p11, %p3675_p13  ;;  %p3720_p3 = por %p3719_p6, %p3718_p9 }
  0x26   : > { %p3714_p1 = pneg %p3713_p0 }
  0x28   : > { %p3721_p2 = pnand %p3720_p3, %p3714_p1 }
  0x2a   : > { %3724 = shalt.err (!%p3721_p2)
}
  0x2b   : > { %s3799_s22 = smov 64   ;;  %s3800_s25 = smov 4  }
  0x2c   : > { %3311 = dma.hbm_to_vmem [thread:$0]  (!%p3913_p12), %s5399_s7, 2048, %s290_s26, [#allocation6], %s3799_s22, %s3799_s22, %s3800_s25  }
  0x2d   : > { %317 = sbr.rel (%p3905_p10) target bundleno = 1204 (0x4b4), region = 56 }
  0x32   : > { %p5438_p4 = scmp.eq.s32.totalorder %s3877_s13, 0 }
  0x34   : > { %3768 = dma.done.wait (%p5438_p4), [#allocation3], 4096   ;;  %p5439_p13 = pmov %p5438_p4 }
  0x35   : > { %p5440_p6 = pmov %p5438_p4 }
  0x36   : > { %3770 = vsyncadd (%p5439_p13), [#allocation3], 4294963200 }
  0x37   : > { %3772 = dma.done.wait (%p5440_p6), [#allocation6], 2048   ;;  %p5441_p9 = pmov %p5438_p4 }
  0x38   : > { %s3112_s23 = sshll.u32 %s3877_s13, 4  ;;  %v3801_v0 = vmov 0   ;;  %v3363_v1 = vld [vmem:[%s5393_s1 + $0x14] ss:$8 sps:$4 sm:$0xff]   ;;  %v3365_v2 = vld [vmem:[%s5393_s1 + $0x10] ss:$8 sps:$4 sm:$0xff]   ;;  %v589_v63 = vlaneseq }
  0x39   : > { %3774 = vsyncadd (%p5441_p9), [#allocation6], 4294965248  ;;  %480 = vmatprep.mubr.bf16.mxu0 %v3801_v0  ;;  %p358_p12 = scmp.lt.s32.totalorder %s3112_s23, 31  ;;  %460 = vmatprep.subr.bf16.mxu0 %v3363_v1  ;;  %v3366_v3 = vld [vmem:[%s5393_s1 + $0x4] ss:$8 sps:$4 sm:$0xff]   ;;  %vm423_vm0 = vcmask 261120  }
  0x3a   : > { %461 = vmatpush1.bf16.msra.mxu0 %v3365_v2  ;;  %v3368_v4 = vld [vmem:[%s5393_s1] ss:$8 sps:$4 sm:$0xff]   ;;  %v3369_v29 = vld [vmem:[%s5395_s3 + $0x74] ss:$8 sps:$4 sm:$0xff]   ;;  %v3371_v30 = vld [vmem:[%s5395_s3 + $0x70] ss:$8 sps:$4 sm:$0xff]  }
  0x3b   : > { %s5570_s23 = smov (!%p358_p12, %s3112_s23), 31  ;;  %462 = vmatprep.subr.bf16.mxu0 %v3366_v3  ;;  %1271 = vmatprep.subr.bf16.mxu1 %v3369_v29  ;;  %v3372_v31 = vld [vmem:[%s5395_s3 + $0x64] ss:$8 sps:$4 sm:$0xff]   ;;  %v3374_v32 = vld [vmem:[%s5395_s3 + $0x60] ss:$8 sps:$4 sm:$0xff]   ;;  %v590_v1 = vshrl.u32 %v589_v63, 7 }
  0x3c   : > { %s3113_s18 = sshll.u32 %s5570_s23, 3  ;;  %1272 = vmatpush1.bf16.msra.mxu1 %v3371_v30  ;;  %v3375_v33 = vld [vmem:[%s5395_s3 + $0x54] ss:$8 sps:$4 sm:$0xff]   ;;  %v3377_v34 = vld [vmem:[%s5395_s3 + $0x50] ss:$8 sps:$4 sm:$0xff]   ;;  %s354_s16 = sand.u32 1, %s3785_s10  }
  0x3d   : > { %s3952_s29 = scalar_lea.vmem %s5392_s0, %s3113_s18  ;;  %1273 = vmatprep.subr.bf16.mxu1 %v3372_v31  ;;  %v3378_v35 = vld [vmem:[%s5395_s3 + $0x44] ss:$8 sps:$4 sm:$0xff]   ;;  %v3380_v36 = vld [vmem:[%s5395_s3 + $0x40] ss:$8 sps:$4 sm:$0xff]   ;;  %v3381_v37 = vld [vmem:[%s5395_s3 + $0x34] ss:$8 sps:$4 sm:$0xff]  }
  0x3e   : > { %v374_v5 = vld [vmem:[%s3952_s29] sm:$0xff]  ;;  %v375_v6 = vld [vmem:[%s3952_s29 + $0x8] sm:$0xff]  ;;  %463 = vmatpush1.bf16.msra.mxu0 %v3368_v4  ;;  %v376_v8 = vld [vmem:[%s3952_s29 + $0x10] sm:$0xff]  ;;  %v3802_v61 = vmov 1966171168   ;;  %s3214_s22 = sshll.u32 %s3877_s13, 11 }
  0x3f   : > { %v390_v7 = vpack.c.bf16 %v375_v6, %v374_v5  ;;  %v377_v9 = vld [vmem:[%s3952_s29 + $0x18] sm:$0xff]  ;;  %v378_v11 = vld [vmem:[%s3952_s29 + $0x20] sm:$0xff]  ;;  %v379_v12 = vld [vmem:[%s3952_s29 + $0x28] sm:$0xff]  ;;  %v587_v62 = vunpack.c.l.s4 %v3802_v61  ;;  %s5344_s18 = scalar_lea.hbm %s5401_s9, %s3214_s22  ;;  %s5352_s21 = scalar_lea.sflag [#allocation4], %s354_s16 }
  0x40   : > { %v391_v10 = vpack.c.bf16 %v377_v9, %v376_v8  ;;  %v392_v13 = vpack.c.bf16 %v379_v12, %v378_v11  ;;  %v380_v14 = vld [vmem:[%s3952_s29 + $0x30] sm:$0xff]  ;;  %v381_v15 = vld [vmem:[%s3952_s29 + $0x38] sm:$0xff]  ;;  %v382_v17 = vld [vmem:[%s3952_s29 + $0x40] sm:$0xff]  ;;  %1274 = vmatpush1.bf16.msra.mxu1 %v3374_v32  ;;  %v4090_v8 = vsub.s32 0, %v590_v1  ;;  %s3803_s24 = smov [#allocation7]  }
  0x41   : > { %3118 = vmatmul.mubr.msk.bf16.vlgmr.msra.gmra.mxu0 %vm423_vm0, %v390_v7  ;;  %v393_v16 = vpack.c.bf16 %v381_v15, %v380_v14  ;;  %v383_v18 = vld [vmem:[%s3952_s29 + $0x48] sm:$0xff]  ;;  %v384_v20 = vld [vmem:[%s3952_s29 + $0x50] sm:$0xff]  ;;  %v385_v21 = vld [vmem:[%s3952_s29 + $0x58] sm:$0xff]  ;;  %1275 = vmatprep.subr.bf16.mxu1 %v3375_v33  ;;  %s3729_s26 = sshll.u32 %s3803_s24, 4  ;;  %s3730_s26 = int_to_ptr.vmem [resolvable:$false] %s3729_s26 }
  0x42   : > { %490 = vmatprep.mubr.bf16.mxu0 %v3801_v0  ;;  %v394_v19 = vpack.c.bf16 %v383_v18, %v382_v17  ;;  %v395_v22 = vpack.c.bf16 %v385_v21, %v384_v20  ;;  %v386_v23 = vld [vmem:[%s3952_s29 + $0x60] sm:$0xff]  ;;  %v387_v24 = vld [vmem:[%s3952_s29 + $0x68] sm:$0xff]  ;;  %v388_v26 = vld [vmem:[%s3952_s29 + $0x70] sm:$0xff]  ;;  %5442 = vst [vmem:[#allocation12_spill] sm:$0xff] %v4090_v8  ;;  %s3731_s28 = scalar_lea.vmem %s3730_s26, 4096 }
  0x43   : > { %v396_v25 = vpack.c.bf16 %v387_v24, %v386_v23  ;;  %v389_v27 = vld [vmem:[%s3952_s29 + $0x78] sm:$0xff]  ;;  %v3384_v39 = vld [vmem:[%s5395_s3 + $0x24] ss:$8 sps:$4 sm:$0xff]   ;;  %v3386_v40 = vld [vmem:[%s5395_s3 + $0x20] ss:$8 sps:$4 sm:$0xff]   ;;  %s3111_s29 = sshll.u32 %s354_s16, 7 }
  0x44   : > { %v397_v28 = vpack.c.bf16 %v389_v27, %v388_v26  ;;  %1276 = vmatpush1.bf16.msra.mxu1 %v3377_v34  ;;  %v3383_v38 = vld [vmem:[%s5395_s3 + $0x30] ss:$8 sps:$4 sm:$0xff]   ;;  %v3387_v41 = vld [vmem:[%s5395_s3 + $0x14] ss:$8 sps:$4 sm:$0xff]   ;;  %v3390_v43 = vld [vmem:[%s5395_s3 + $0x4] ss:$8 sps:$4 sm:$0xff]  }
  0x45   : > { %1277 = vmatprep.subr.bf16.mxu1 %v3378_v35  ;;  %v3389_v42 = vld [vmem:[%s5395_s3 + $0x10] ss:$8 sps:$4 sm:$0xff]   ;;  %v3392_v44 = vld [vmem:[%s5395_s3] ss:$8 sps:$4 sm:$0xff]   ;;  %v3393_v45 = vld [vmem:[%s5395_s3 + $0xf4] ss:$8 sps:$4 sm:$0xff]  }
  0x46   : > { %v3395_v46 = vld [vmem:[%s5395_s3 + $0xf0] ss:$8 sps:$4 sm:$0xff]   ;;  %v3396_v47 = vld [vmem:[%s5395_s3 + $0xe4] ss:$8 sps:$4 sm:$0xff]   ;;  %v3398_v48 = vld [vmem:[%s5395_s3 + $0xe0] ss:$8 sps:$4 sm:$0xff]  }
  0x47   : > { %v3399_v49 = vld [vmem:[%s5395_s3 + $0xd4] ss:$8 sps:$4 sm:$0xff]   ;;  %v3401_v50 = vld [vmem:[%s5395_s3 + $0xd0] ss:$8 sps:$4 sm:$0xff]   ;;  %v3402_v51 = vld [vmem:[%s5395_s3 + $0xc4] ss:$8 sps:$4 sm:$0xff]  }
  0x48   : > { %1278 = vmatpush1.bf16.msra.mxu1 %v3380_v36  ;;  %v3404_v52 = vld [vmem:[%s5395_s3 + $0xc0] ss:$8 sps:$4 sm:$0xff]   ;;  %v3405_v53 = vld [vmem:[%s5395_s3 + $0xb4] ss:$8 sps:$4 sm:$0xff]   ;;  %v3407_v54 = vld [vmem:[%s5395_s3 + $0xb0] ss:$8 sps:$4 sm:$0xff]  }
  0x49   : > { %3119 = vmatmul.mubr.msk.bf16.gmra.mxu0 %vm423_vm0, %v391_v10  ;;  %1279 = vmatprep.subr.bf16.mxu1 %v3381_v37  ;;  %v3408_v55 = vld [vmem:[%s5395_s3 + $0xa4] ss:$8 sps:$4 sm:$0xff]   ;;  %v3410_v56 = vld [vmem:[%s5395_s3 + $0xa0] ss:$8 sps:$4 sm:$0xff]   ;;  %v3411_v57 = vld [vmem:[%s5395_s3 + $0x94] ss:$8 sps:$4 sm:$0xff]  }
  0x4a   : > { %500 = vmatprep.mubr.bf16.mxu0 %v3801_v0  ;;  %v3413_v58 = vld [vmem:[%s5395_s3 + $0x90] ss:$8 sps:$4 sm:$0xff]   ;;  %v3414_v59 = vld [vmem:[%s5395_s3 + $0x84] ss:$8 sps:$4 sm:$0xff]   ;;  %v3416_v60 = vld [vmem:[%s5395_s3 + $0x80] ss:$8 sps:$4 sm:$0xff]  }
  0x4b   : > { %v3126_v2 = vld.sshfl [vmem:[%s5394_s2] sm:$0x11 pattern:$0x75316420]  ;;  %s5316_s17 = scalar_lea.vmem [#allocation7], %s3111_s29 }
  0x4c   : > { %1280 = vmatpush1.bf16.msra.mxu1 %v3383_v38  ;;  %v585_v4 = vcombine.high %v3126_v2, %v3126_v2  ;;  %s3019_s25 = sshll.u32 %s5316_s17, 4  ;;  %s5346_s25 = int_to_ptr.vmem [resolvable:$true] %s3019_s25 }
  0x4d   : > { %1281 = vmatprep.subr.bf16.mxu1 %v3384_v39  ;;  %s3725_s13 = scalar_lea.vmem %s5346_s25, 2048  ;;  %p3732_p11 = scmp.lt.s32.totalorder %s5346_s25, %s3730_s26 }
  0x4e   : > { %p3726_p10 = scmp.ne.s32.totalorder %s5346_s25, %s3725_s13  ;;  %p3733_p0 = scmp.lt.s32.totalorder %s3731_s28, %s3725_s13 }
  0x50   : > { %1282 = vmatpush1.bf16.msra.mxu1 %v3386_v40  ;;  %p3727_p7 = pnand %p3726_p10, %p3894_p5  ;;  %p3734_p1 = por %p3733_p0, %p3732_p11 }
  0x51   : > { %3120 = vmatmul.mubr.msk.bf16.gmra.mxu0 %vm423_vm0, %v392_v13  ;;  %1283 = vmatprep.subr.bf16.mxu1 %v3387_v41 }
  0x52   : > { %510 = vmatprep.mubr.bf16.mxu0 %v3801_v0  ;;  %p3728_p8 = pneg %p3727_p7 }
  0x54   : > { %1284 = vmatpush1.bf16.msra.mxu1 %v3389_v42  ;;  %p3735_p3 = pnand %p3734_p1, %p3728_p8 }
  0x55   : > { %1285 = vmatprep.subr.bf16.mxu1 %v3390_v43 }
  0x58   : > { %1286 = vmatpush1.bf16.msra.mxu1 %v3392_v44 }
  0x59   : > { %3121 = vmatmul.mubr.msk.bf16.gmra.mxu0 %vm423_vm0, %v393_v16  ;;  %1287 = vmatprep.subr.bf16.mxu1 %v3393_v45 }
  0x5a   : > { %520 = vmatprep.mubr.bf16.mxu0 %v3801_v0 }
  0x5c   : > { %1288 = vmatpush2.bf16.msra.mxu1 %v3395_v46 }
  0x5d   : > { %1289 = vmatprep.subr.bf16.mxu1 %v3396_v47 }
  0x60   : > { %1290 = vmatpush2.bf16.msra.mxu1 %v3398_v48 }
  0x61   : > { %3122 = vmatmul.mubr.msk.bf16.gmra.mxu0 %vm423_vm0, %v394_v19  ;;  %1291 = vmatprep.subr.bf16.mxu1 %v3399_v49 }
  0x62   : > { %530 = vmatprep.mubr.bf16.mxu0 %v3801_v0 }
  0x64   : > { %1292 = vmatpush2.bf16.msra.mxu1 %v3401_v50 }
  0x65   : > { %1293 = vmatprep.subr.bf16.mxu1 %v3402_v51 }
  0x68   : > { %1294 = vmatpush2.bf16.msra.mxu1 %v3404_v52 }
  0x69   : > { %3123 = vmatmul.mubr.msk.bf16.gmra.mxu0 %vm423_vm0, %v395_v22  ;;  %1295 = vmatprep.subr.bf16.mxu1 %v3405_v53 }
  0x6a   : > { %540 = vmatprep.mubr.bf16.mxu0 %v3801_v0 }
  0x6c   : > { %1296 = vmatpush2.bf16.msra.mxu1 %v3407_v54 }
  0x6d   : > { %1297 = vmatprep.subr.bf16.mxu1 %v3408_v55 }
  0x70   : > { %1298 = vmatpush2.bf16.msra.mxu1 %v3410_v56 }
  0x71   : > { %3124 = vmatmul.mubr.msk.bf16.gmra.mxu0 %vm423_vm0, %v396_v25  ;;  %1299 = vmatprep.subr.bf16.mxu1 %v3411_v57 }
  0x72   : > { %550 = vmatprep.mubr.bf16.mxu0 %v3801_v0  ;;  %v588_v0 = vunpack.c.0.s8 %v587_v62 }
  0x74   : > { %1300 = vmatpush2.bf16.msra.mxu1 %v3413_v58  ;;  %v4086_v3 = vsub.s32 %v588_v0, %v590_v1 }
  0x75   : > { %1301 = vmatprep.subr.bf16.mxu1 %v3414_v59 }
  0x76   : > { %v592_v5 = vrot.slane %v3126_v2, %v4086_v3  ;;  %v599_v6 = vrot.slane %v585_v4, %v4086_v3 }
  0x78   : > { %1302 = vmatpush2.bf16.msra.mxu1 %v3416_v60  ;;  %v601_v7 = vpack.i.b16 %v592_v5, %v592_v5  ;;  %v608_v10 = vpack.i.b16 %v599_v6, %v599_v6 }
  0x79   : > { %3125 = vmatmul.mubr.msk.bf16.gmra.mxu0 %vm423_vm0, %v397_v28 }
  0x7a   : > { %v4093_v12 = vrot.slane %v601_v7, %v4090_v8  ;;  %v4096_v15 = vrot.slane %v608_v10, %v4090_v8 }
 0x101   : > { %v482_v9 = vpop.f32.mrf.mxu0 }
 0x103   : > { %v484_v11 = vpop.f32.mrf.mxu0 }
 0x105   : > { %v486_v13 = vpop.f32.mrf.mxu0 }
 0x106   : > { %v561_v14 = vpack.c.bf16 %v486_v13, %v482_v9 }
 0x107   : > { %v488_v16 = vpop.f32.mrf.mxu0 }
 0x108   : > { %v4099_v17 = vadd.bf16 %v4093_v12, %v561_v14  ;;  %v562_v18 = vpack.c.bf16 %v488_v16, %v484_v11 }
 0x109   : > { %v492_v19 = vpop.f32.mrf.mxu0 }
 0x10a   : > { %v646_v20 = vmul.bf16 1060454197, %v4099_v17  ;;  %v4103_v21 = vadd.bf16 %v4096_v15, %v562_v18  ;;  %v630_v5 = vmul.bf16 1056980736, %v4099_v17 }
 0x10b   : > { %v494_v22 = vpop.f32.mrf.mxu0 }
 0x10c   : > { %v647_v23 = vmul.bf16 1060454197, %v4103_v21  ;;  %v662_v24 = vand.u32 2147450879, %v646_v20  ;;  %v631_v9 = vmul.bf16 1056980736, %v4103_v21 }
 0x10d   : > { %v496_v25 = vpop.f32.mrf.mxu0  ;;  %vm4265_vm2 = vcmp.ge.bf16.partialorder %v646_v20, 0 }
 0x10e   : > { %v663_v26 = vand.u32 2147450879, %v647_v23  ;;  %v563_v27 = vpack.c.bf16 %v496_v25, %v492_v19  ;;  %v678_v30 = vmul.bf16 1051213480, %v662_v24  ;;  %v886_v45 = vsub.bf16 0, %v662_v24 }
 0x10f   : > { %v498_v28 = vpop.f32.mrf.mxu0  ;;  %vm4233_vm1 = vcmp.ge.bf16.partialorder %v647_v23, 0 }
 0x110   : > { %v679_v29 = vmul.bf16 1051213480, %v663_v26  ;;  %v4111_v31 = vadd.bf16 %v4093_v12, %v563_v27  ;;  %v564_v32 = vpack.c.bf16 %v498_v28, %v494_v22  ;;  %v694_v38 = vadd.bf16 1065369472, %v678_v30 }
 0x111   : > { %v502_v33 = vpop.f32.mrf.mxu0  ;;  %v887_v48 = vsub.bf16 0, %v663_v26  ;;  %v902_v53 = vmul.bf16 %v886_v45, %v662_v24 }
 0x112   : > { %v695_v34 = vadd.bf16 1065369472, %v679_v29  ;;  %v4114_v35 = vadd.bf16 %v4096_v15, %v564_v32  ;;  %v648_v37 = vmul.bf16 1060454197, %v4111_v31 }
 0x113   : > { %v504_v36 = vpop.f32.mrf.mxu0  ;;  %v903_v56 = vmul.bf16 %v887_v48, %v663_v26  ;;  %v919_v0 = vmul.bf16 1069105081, %v902_v53 }
 0x114   : > { %3481 = vrcp.bf16 %v695_v34  ;;  %v649_v41 = vmul.bf16 1060454197, %v4114_v35  ;;  %v664_v43 = vand.u32 2147450879, %v648_v37  ;;  %vm4339_vm4 = vcmp.ge.bf16.partialorder %v648_v37, 0 }
 0x115   : > { %v506_v39 = vpop.f32.mrf.mxu0  ;;  %3483 = vrcp.bf16 %v694_v38  ;;  %v922_v6 = vmul.bf16 1069105081, %v903_v56 }
 0x116   : > { %v565_v40 = vpack.c.bf16 %v506_v39, %v502_v33  ;;  %v665_v49 = vand.u32 2147450879, %v649_v41  ;;  %v888_v51 = vsub.bf16 0, %v664_v43  ;;  %v680_v57 = vmul.bf16 1051213480, %v664_v43 }
 0x117   : > { %v508_v42 = vpop.f32.mrf.mxu0  ;;  %3485 = vpow.bf16 %v919_v0  ;;  %vm4314_vm3 = vcmp.ge.bf16.partialorder %v649_v41, 0 }
 0x118   : > { %v566_v44 = vpack.c.bf16 %v508_v42, %v504_v36  ;;  %v4121_v46 = vadd.bf16 %v4093_v12, %v565_v40  ;;  %v889_v58 = vsub.bf16 0, %v665_v49  ;;  %v904_v61 = vmul.bf16 %v888_v51, %v664_v43 }
 0x119   : > { %v512_v47 = vpop.f32.mrf.mxu0  ;;  %v696_v11 = vadd.bf16 1065369472, %v680_v57  ;;  %v681_v13 = vmul.bf16 1051213480, %v665_v49  ;;  %3487 = vpow.bf16 %v922_v6 }
 0x11a   : > { %v4126_v52 = vadd.bf16 %v4096_v15, %v566_v44  ;;  %v5413_v54 = vmul.bf16 1060454197, %v4121_v46  ;;  %v905_v14 = vmul.bf16 %v889_v58, %v665_v49  ;;  %v925_v22 = vmul.bf16 1069105081, %v904_v61 }
 0x11b   : > { %v514_v50 = vpop.f32.mrf.mxu0  ;;  %3489 = vrcp.bf16 %v696_v11  ;;  %v697_v34 = vadd.bf16 1065369472, %v681_v13 }
 0x11c   : > { %v5414_v62 = vmul.bf16 1060454197, %v4126_v52  ;;  %v666_v1 = vand.u32 2147450879, %v5413_v54  ;;  %v928_v36 = vmul.bf16 1069105081, %v905_v14  ;;  %3491 = vpow.bf16 %v925_v22 }
 0x11d   : > { %v516_v55 = vpop.f32.mrf.mxu0  ;;  %3493 = vrcp.bf16 %v697_v34 }
 0x11e   : > { %v567_v59 = vpack.c.bf16 %v516_v55, %v512_v47  ;;  %v667_v24 = vand.u32 2147450879, %v5414_v62  ;;  %v682_v25 = vmul.bf16 1051213480, %v666_v1  ;;  %v890_v26 = vsub.bf16 0, %v666_v1 }
 0x11f   : > { %v518_v60 = vpop.f32.mrf.mxu0  ;;  %3495 = vpow.bf16 %v928_v36 }
 0x120   : > { %v568_v63 = vpack.c.bf16 %v518_v60, %v514_v50  ;;  %v4133_v2 = vadd.bf16 %v4093_v12, %v567_v59  ;;  %v683_v40 = vmul.bf16 1051213480, %v667_v24  ;;  %v698_v47 = vadd.bf16 1065369472, %v682_v25 }
 0x121   : > { %v522_v4 = vpop.f32.mrf.mxu0  ;;  %v906_v48 = vmul.bf16 %v890_v26, %v666_v1  ;;  %v891_v57 = vsub.bf16 0, %v667_v24 }
 0x122   : > { %v4137_v7 = vadd.bf16 %v4096_v15, %v568_v63  ;;  %v3482_v10 = vpop.eup %3481  ;;  %v5406_v16 = vmul.bf16 1060454197, %v4133_v2  ;;  %v699_v60 = vadd.bf16 1065369472, %v683_v40  ;;  %3497 = vrcp.bf16 %v698_v47 }
 0x123   : > { %v524_v18 = vpop.f32.mrf.mxu0  ;;  %v4141_v19 = vmul.bf16 1065369472, %v3482_v10  ;;  %v3484_v33 = vpop.eup %3483  ;;  %v931_v1 = vmul.bf16 1069105081, %v906_v48 }
 0x124   : > { %v5412_v27 = vmul.bf16 1060454197, %v4137_v7  ;;  %v4148_v29 = vand.u32 2147450879, %v5406_v16  ;;  %v4159_v50 = vmul.bf16 1065369472, %v3484_v33  ;;  %3499 = vrcp.bf16 %v699_v60 }
 0x125   : > { %v526_v28 = vpop.f32.mrf.mxu0  ;;  %v743_v32 = vmul.bf16 1065893768, %v4141_v19  ;;  %v4183_v48 = vpop.eup %3485 }
 0x126   : > { %v569_v30 = vpack.c.bf16 %v526_v28, %v522_v4  ;;  %v4153_v38 = vand.u32 2147450879, %v5412_v27  ;;  %v684_v51 = vmul.bf16 1051213480, %v4148_v29  ;;  %v742_v14 = vmul.bf16 1065893768, %v4159_v50 }
 0x127   : > { %v528_v39 = vpop.f32.mrf.mxu0  ;;  %v759_v44 = vadd.bf16 3216687034, %v743_v32  ;;  %v892_v34 = vsub.bf16 0, %v4148_v29 }
 0x128   : > { %v4156_v42 = vadd.bf16 %v4093_v12, %v569_v30  ;;  %v570_v43 = vpack.c.bf16 %v528_v39, %v524_v18  ;;  %v685_v58 = vmul.bf16 1051213480, %v4153_v38  ;;  %v700_v10 = vadd.bf16 1065369472, %v684_v51 }
 0x129   : > { %v532_v49 = vpop.f32.mrf.mxu0  ;;  %v775_v63 = vmul.bf16 %v759_v44, %v4141_v19  ;;  %v907_v18 = vmul.bf16 %v891_v57, %v667_v24  ;;  %v893_v36 = vsub.bf16 0, %v4153_v38  ;;  %v758_v47 = vadd.bf16 3216687034, %v742_v14 }
 0x12a   : > { %v5404_v53 = vmul.bf16 1060454197, %v4156_v42  ;;  %v4164_v55 = vadd.bf16 %v4096_v15, %v570_v43  ;;  %v701_v22 = vadd.bf16 1065369472, %v685_v58  ;;  %3501 = vrcp.bf16 %v700_v10 }
 0x12b   : > { %v534_v59 = vpop.f32.mrf.mxu0  ;;  %v791_v28 = vadd.bf16 1068908470, %v775_v63  ;;  %v934_v60 = vmul.bf16 1069105081, %v907_v18  ;;  %v774_v18 = vmul.bf16 %v758_v47, %v4159_v50 }
 0x12c   : > { %v670_v61 = vand.u32 2147450879, %v5404_v53  ;;  %v5408_v4 = vmul.bf16 1060454197, %v4164_v55  ;;  %3503 = vrcp.bf16 %v701_v22 }
 0x12d   : > { %v536_v6 = vpop.f32.mrf.mxu0  ;;  %v807_v24 = vmul.bf16 %v791_v28, %v4141_v19  ;;  %v790_v0 = vadd.bf16 1068908470, %v774_v18 }
 0x12e   : > { %v686_v11 = vmul.bf16 1051213480, %v670_v61  ;;  %v571_v13 = vpack.c.bf16 %v536_v6, %v532_v49  ;;  %v671_v25 = vand.u32 2147450879, %v5408_v4  ;;  %v894_v44 = vsub.bf16 0, %v670_v61 }
 0x12f   : > { %v538_v26 = vpop.f32.mrf.mxu0  ;;  %v823_v6 = vadd.bf16 3197288082, %v807_v24 }
 0x130   : > { %v702_v30 = vadd.bf16 1065369472, %v686_v11  ;;  %v4177_v32 = vadd.bf16 %v4093_v12, %v571_v13  ;;  %v572_v33 = vpack.c.bf16 %v538_v26, %v534_v59  ;;  %v687_v39 = vmul.bf16 1051213480, %v671_v25  ;;  %v4187_v59 = vpop.eup %3487 }
 0x131   : > { %v542_v40 = vpop.f32.mrf.mxu0  ;;  %v3490_v10 = vpop.eup %3489  ;;  %v908_v11 = vmul.bf16 %v892_v34, %v4148_v29  ;;  %v909_v13 = vmul.bf16 %v893_v36, %v4153_v38  ;;  %v910_v26 = vmul.bf16 %v894_v44, %v670_v61  ;;  %v839_v29 = vmul.bf16 %v823_v6, %v4141_v19 }
 0x132   : > { %v703_v51 = vadd.bf16 1065369472, %v687_v39  ;;  %v5403_v57 = vmul.bf16 1060454197, %v4177_v32  ;;  %3505 = vrcp.bf16 %v702_v30  ;;  %v4190_v63 = vadd.bf16 %v4096_v15, %v572_v33  ;;  %v4198_v30 = vpop.eup %3491 }
 0x133   : > { %v544_v58 = vpop.f32.mrf.mxu0  ;;  %3507 = vpow.bf16 %v931_v1  ;;  %v895_v33 = vsub.bf16 0, %v671_v25  ;;  %v3494_v44 = vpop.eup %3493  ;;  %v940_v49 = vmul.bf16 1069105081, %v909_v13  ;;  %v943_v43 = vmul.bf16 1069105081, %v910_v26 }
 0x134   : > { %v672_v14 = vand.u32 2147450879, %v5403_v57  ;;  %v5405_v28 = vmul.bf16 1060454197, %v4190_v63  ;;  %3509 = vrcp.bf16 %v703_v51  ;;  %v4207_v57 = vpop.eup %3495  ;;  %v4214_v45 = vmul.bf16 1065369472, %v3490_v10 }
 0x135   : > { %v546_v22 = vpop.f32.mrf.mxu0  ;;  %3511 = vpow.bf16 %v934_v60  ;;  %v855_v60 = vadd.bf16 1048723074, %v839_v29  ;;  %v4218_v26 = vmul.bf16 1065369472, %v3494_v44 }
 0x136   : > { %v573_v39 = vpack.c.bf16 %v546_v22, %v542_v40  ;;  %v688_v24 = vmul.bf16 1051213480, %v672_v14  ;;  %v896_v34 = vsub.bf16 0, %v672_v14  ;;  %v673_v38 = vand.u32 2147450879, %v5405_v28  ;;  %v3498_v28 = vpop.eup %3497 }
 0x137   : > { %v548_v1 = vpop.f32.mrf.mxu0  ;;  %v937_v40 = vmul.bf16 1069105081, %v908_v11  ;;  %v3500_v16 = vpop.eup %3499 }
 0x138   : > { %v4204_v36 = vadd.bf16 %v4093_v12, %v573_v39  ;;  %v574_v61 = vpack.c.bf16 %v548_v1, %v544_v58  ;;  %v704_v22 = vadd.bf16 1065369472, %v688_v24  ;;  %v689_v53 = vmul.bf16 1051213480, %v673_v38 }
 0x139   : > { %v552_v51 = vpop.f32.mrf.mxu0  ;;  %v911_v39 = vmul.bf16 %v895_v33, %v671_v25  ;;  %v912_v11 = vmul.bf16 %v896_v34, %v672_v14  ;;  %v897_v47 = vsub.bf16 0, %v673_v38  ;;  %v4220_v25 = vmul.bf16 1065369472, %v3498_v28 }
 0x13a   : > { %v4210_v6 = vadd.bf16 %v4096_v15, %v574_v61  ;;  %v5407_v58 = vmul.bf16 1060454197, %v4204_v36  ;;  %3513 = vrcp.bf16 %v704_v22  ;;  %v705_v13 = vadd.bf16 1065369472, %v689_v53 }
 0x13b   : > { %v554_v1 = vpop.f32.mrf.mxu0  ;;  %3515 = vpow.bf16 %v937_v40  ;;  %v806_v33 = vmul.bf16 %v790_v0, %v4159_v50  ;;  %v946_v14 = vmul.bf16 1069105081, %v911_v39  ;;  %v871_v53 = vmul.bf16 %v855_v60, %v4141_v19  ;;  %v3502_v40 = vpop.eup %3501 }
 0x13c   : > { %v5410_v24 = vmul.bf16 1060454197, %v4210_v6  ;;  %v674_v61 = vand.u32 2147450879, %v5407_v58  ;;  %3517 = vpow.bf16 %v940_v49  ;;  %v949_v22 = vmul.bf16 1069105081, %v912_v11  ;;  %v3504_v44 = vpop.eup %3503 }
 0x13d   : > { %v556_v18 = vpop.f32.mrf.mxu0  ;;  %3519 = vpow.bf16 %v943_v43  ;;  %v913_v58 = vmul.bf16 %v897_v47, %v673_v38  ;;  %v4226_v56 = vmul.bf16 1065369472, %v3500_v16  ;;  %v967_v38 = vmul.bf16 %v4187_v59, %v871_v53 }
 0x13e   : > { %v675_v29 = vand.u32 2147450879, %v5410_v24  ;;  %v575_v10 = vpack.c.bf16 %v556_v18, %v552_v51  ;;  %3521 = vrcp.bf16 %v705_v13  ;;  %v898_v49 = vsub.bf16 0, %v674_v61 }
 0x13f   : > { %v558_v34 = vpop.f32.mrf.mxu0  ;;  %v690_v51 = vmul.bf16 1051213480, %v674_v61  ;;  %v822_v16 = vadd.bf16 3197288082, %v806_v33  ;;  %v4243_v39 = vmul.bf16 1065369472, %v3502_v40  ;;  %3523 = vpow.bf16 %v946_v14 }
 0x140   : > { %v576_v4 = vpack.c.bf16 %v558_v34, %v554_v1  ;;  %v4229_v0 = vadd.bf16 %v4093_v12, %v575_v10  ;;  %v3506_v19 = vpop.eup %3505  ;;  %v899_v12 = vsub.bf16 0, %v675_v29  ;;  %v4246_v23 = vmul.bf16 1065369472, %v3504_v44 }
 0x141   : > { %v4241_v47 = vpop.eup %3507  ;;  %3525 = vpow.bf16 %v949_v22  ;;  %v952_v60 = vmul.bf16 1069105081, %v913_v58  ;;  %v691_v11 = vmul.bf16 1051213480, %v675_v29  ;;  %v4248_v18 = vmul.bf16 1065369472, %v3506_v19 }
 0x142   : > { %v4238_v43 = vadd.bf16 %v4096_v15, %v576_v4  ;;  %v5409_v1 = vmul.bf16 1060454197, %v4229_v0  ;;  %v3510_v13 = vpop.eup %3509  ;;  %v4250_v15 = vmul.bf16 %v898_v49, %v674_v61  ;;  %v706_v33 = vadd.bf16 1065369472, %v690_v51 }
 0x143   : > { %v983_v14 = vsub.bf16 1065369472, %v967_v38  ;;  %v838_v10 = vmul.bf16 %v822_v16, %v4159_v50  ;;  %v745_v34 = vmul.bf16 1065893768, %v4218_v26  ;;  %v4257_v53 = vpop.eup %3511  ;;  %v4259_v58 = vmul.bf16 %v899_v12, %v675_v29 }
 0x144   : > { %v676_v4 = vand.u32 2147450879, %v5409_v1  ;;  %v5411_v59 = vmul.bf16 1060454197, %v4238_v43  ;;  %3527 = vpow.bf16 %v952_v60  ;;  %v4269_v38 = vmul.bf16 1065369472, %v3510_v13 }
 0x145   : > { %v1015_v44 = vsub.bf16 0, %v983_v14  ;;  %v854_v49 = vadd.bf16 1048723074, %v838_v10  ;;  %v761_v19 = vadd.bf16 3216687034, %v745_v34  ;;  %3529 = vrcp.bf16 %v706_v33 }
 0x146   : > { %v692_v40 = vmul.bf16 1051213480, %v676_v4  ;;  %v900_v22 = vsub.bf16 0, %v676_v4  ;;  %v677_v61 = vand.u32 2147450879, %v5411_v59 }
 0x147   : > { %v707_v16 = vadd.bf16 1065369472, %v691_v11  ;;  %v1031_v60 = vsel %vm4233_vm1, %v983_v14, %v1015_v44  ;;  %v870_v10 = vmul.bf16 %v854_v49, %v4159_v50  ;;  %v777_v34 = vmul.bf16 %v761_v19, %v4218_v26 }
 0x148   : > { %v4272_v12 = vmul.bf16 %v900_v22, %v676_v4  ;;  %v3514_v1 = vpop.eup %3513  ;;  %v693_v24 = vmul.bf16 1051213480, %v677_v61  ;;  %v708_v59 = vadd.bf16 1065369472, %v692_v40  ;;  %v901_v27 = vsub.bf16 0, %v677_v61 }
 0x149   : > { %v4278_v20 = vpop.eup %3515  ;;  %v1047_v11 = vadd.bf16 1065369472, %v1031_v60  ;;  %v966_v4 = vmul.bf16 %v4183_v48, %v870_v10  ;;  %v793_v22 = vadd.bf16 1068908470, %v777_v34  ;;  %v744_v28 = vmul.bf16 1065893768, %v4214_v45 }
 0x14a   : > { %v4281_v29 = vpop.eup %3517  ;;  %v4285_v14 = vmul.bf16 1065369472, %v3514_v1  ;;  %3531 = vrcp.bf16 %v707_v16  ;;  %v747_v44 = vmul.bf16 1065893768, %v4226_v56  ;;  %v709_v49 = vadd.bf16 1065369472, %v693_v24 }
 0x14b   : > { %v4289_v33 = vpop.eup %3519  ;;  %v1063_v40 = vmul.bf16 %v1047_v11, %v631_v9  ;;  %v982_v19 = vsub.bf16 1065369472, %v966_v4  ;;  %v809_v60 = vmul.bf16 %v793_v22, %v4218_v26  ;;  %3533 = vrcp.bf16 %v708_v59 }
 0x14c   : > { %v3522_v48 = vpop.eup %3521  ;;  %v760_v10 = vadd.bf16 3216687034, %v744_v28  ;;  %v763_v34 = vadd.bf16 3216687034, %v747_v44  ;;  %v746_v1 = vmul.bf16 1065893768, %v4220_v25  ;;  %v4295_v16 = vmul.bf16 %v901_v27, %v677_v61 }
 0x14d   : > { %1303 = vmatprep.mubr.bf16.mxu1 %v1063_v40  ;;  %v1014_v50 = vsub.bf16 0, %v982_v19  ;;  %v825_v13 = vadd.bf16 3197288082, %v809_v60  ;;  %v749_v54 = vmul.bf16 1065893768, %v4246_v23  ;;  %v4298_v24 = vpop.eup %3523  ;;  %3535 = vrcp.bf16 %v709_v49 }
 0x14e   : > { %v776_v21 = vmul.bf16 %v760_v10, %v4214_v45  ;;  %v779_v9 = vmul.bf16 %v763_v34, %v4226_v56  ;;  %v762_v11 = vadd.bf16 3216687034, %v746_v1  ;;  %v748_v59 = vmul.bf16 1065893768, %v4243_v39 }
 0x14f   : > { %v4303_v4 = vpop.eup %3525  ;;  %v4305_v22 = vmul.bf16 1065369472, %v3522_v48  ;;  %v1030_v27 = vsel %vm4265_vm2, %v982_v19, %v1014_v50  ;;  %v841_v61 = vmul.bf16 %v825_v13, %v4218_v26  ;;  %v765_v28 = vadd.bf16 3216687034, %v749_v54 }
 0x150   : > { %v1046_v44 = vadd.bf16 1065369472, %v1030_v27  ;;  %v792_v40 = vadd.bf16 1068908470, %v776_v21  ;;  %v778_v60 = vmul.bf16 %v762_v11, %v4220_v25  ;;  %v795_v34 = vadd.bf16 1068908470, %v779_v9 }
 0x151   : > { %v857_v10 = vadd.bf16 1048723074, %v841_v61  ;;  %v781_v1 = vmul.bf16 %v765_v28, %v4246_v23  ;;  %v764_v62 = vadd.bf16 3216687034, %v748_v59  ;;  %v751_v50 = vmul.bf16 1065893768, %v4269_v38 }
 0x152   : > { %v1062_v51 = vmul.bf16 %v1046_v44, %v630_v5  ;;  %v808_v54 = vmul.bf16 %v792_v40, %v4214_v45  ;;  %v794_v13 = vadd.bf16 1068908470, %v778_v60  ;;  %v4322_v49 = vpop.eup %3527  ;;  %v811_v21 = vmul.bf16 %v795_v34, %v4226_v56 }
 0x153   : > { %v873_v19 = vmul.bf16 %v857_v10, %v4218_v26  ;;  %v797_v9 = vadd.bf16 1068908470, %v781_v1  ;;  %v780_v41 = vmul.bf16 %v764_v62, %v4243_v39  ;;  %v767_v17 = vadd.bf16 3216687034, %v751_v50  ;;  %v3530_v40 = vpop.eup %3529 }
 0x154   : > { %1304 = vmatmul.mubr.bf16.vlgmr.msra.gmra.mxu1 %v1062_v51  ;;  %v824_v11 = vadd.bf16 3197288082, %v808_v54  ;;  %v810_v59 = vmul.bf16 %v794_v13, %v4220_v25  ;;  %v750_v5 = vmul.bf16 1065893768, %v4248_v18  ;;  %v827_v61 = vadd.bf16 3197288082, %v811_v21 }
 0x155   : > { %v969_v27 = vmul.bf16 %v4207_v57, %v873_v19  ;;  %v813_v28 = vmul.bf16 %v797_v9, %v4246_v23  ;;  %v796_v44 = vadd.bf16 1068908470, %v780_v41  ;;  %v783_v10 = vmul.bf16 %v767_v17, %v4269_v38 }
 0x156   : > { %v840_v26 = vmul.bf16 %v824_v11, %v4214_v45  ;;  %v826_v60 = vadd.bf16 3197288082, %v810_v59  ;;  %v766_v62 = vadd.bf16 3216687034, %v750_v5  ;;  %v843_v51 = vmul.bf16 %v827_v61, %v4226_v56 }
 0x157   : > { %v985_v1 = vsub.bf16 1065369472, %v969_v27  ;;  %v829_v54 = vadd.bf16 3197288082, %v813_v28  ;;  %v812_v19 = vmul.bf16 %v796_v44, %v4243_v39  ;;  %v799_v21 = vadd.bf16 1068908470, %v783_v10 }
 0x158   : > { %v3532_v13 = vpop.eup %3531  ;;  %v856_v50 = vadd.bf16 1048723074, %v840_v26  ;;  %v842_v57 = vmul.bf16 %v826_v60, %v4220_v25  ;;  %v859_v11 = vadd.bf16 1048723074, %v843_v51  ;;  %v782_v17 = vmul.bf16 %v766_v62, %v4248_v18 }
 0x159   : > { %v1017_v41 = vsub.bf16 0, %v985_v1  ;;  %v845_v59 = vmul.bf16 %v829_v54, %v4246_v23  ;;  %v4345_v5 = vpop.eup %3533  ;;  %v5451_v27 = vmul.bf16 1060454197, %v4126_v52  ;;  %v4353_v28 = vmul.bf16 1065369472, %v3530_v40 }
 0x15a   : > { %v872_v37 = vmul.bf16 %v856_v50, %v4214_v45  ;;  %v858_v44 = vadd.bf16 1048723074, %v842_v57  ;;  %v828_v26 = vadd.bf16 3197288082, %v812_v19  ;;  %v5454_v60 = vmul.bf16 1060454197, %v4121_v46 }
 0x15b   : > { %vm4349_vm5 = vcmp.ge.bf16.partialorder %v5451_v27, 0  ;;  %v1033_v62 = vsel %vm4314_vm3, %v985_v1, %v1017_v41  ;;  %v875_v51 = vmul.bf16 %v859_v11, %v4226_v56  ;;  %v861_v54 = vadd.bf16 1048723074, %v845_v59 }
 0x15c   : > { %vm4358_vm6 = vcmp.ge.bf16.partialorder %v5454_v60, 0  ;;  %v815_v27 = vmul.bf16 %v799_v21, %v4269_v38  ;;  %v5457_v40 = vmul.bf16 1060454197, %v4137_v7  ;;  %v1049_v50 = vadd.bf16 1065369472, %v1033_v62  ;;  %v3536_v21 = vpop.eup %3535 }
 0x15d   : > { %v968_v57 = vmul.bf16 %v4198_v30, %v872_v37  ;;  %v874_v19 = vmul.bf16 %v858_v44, %v4220_v25  ;;  %v844_v60 = vmul.bf16 %v828_v26, %v4243_v39  ;;  %v971_v48 = vmul.bf16 %v4257_v53, %v875_v51 }
 0x15e   : > { %vm4368_vm7 = vcmp.ge.bf16.partialorder %v5457_v40, 0  ;;  %v877_v56 = vmul.bf16 %v861_v54, %v4246_v23  ;;  %v831_v1 = vadd.bf16 3197288082, %v815_v27  ;;  %v798_v41 = vadd.bf16 1068908470, %v782_v17 }
 0x15f   : > { %v5460_v11 = vmul.bf16 1056980736, %v4114_v35  ;;  %v984_v40 = vsub.bf16 1065369472, %v968_v57  ;;  %v970_v34 = vmul.bf16 %v4241_v47, %v874_v19  ;;  %v860_v62 = vadd.bf16 1048723074, %v844_v60 }
 0x160   : > { %v987_v8 = vsub.bf16 1065369472, %v971_v48  ;;  %v973_v30 = vmul.bf16 %v4281_v29, %v877_v56  ;;  %v847_v25 = vmul.bf16 %v831_v1, %v4269_v38  ;;  %v814_v37 = vmul.bf16 %v798_v41, %v4248_v18 }
 0x161   : > { %v1065_v59 = vmul.bf16 %v1049_v50, %v5460_v11  ;;  %v1016_v53 = vsub.bf16 0, %v984_v40  ;;  %v986_v23 = vsub.bf16 1065369472, %v970_v34  ;;  %v876_v17 = vmul.bf16 %v860_v62, %v4243_v39 }
 0x162   : > { %v753_v44 = vmul.bf16 1065893768, %v4305_v22  ;;  %v5461_v35 = vmul.bf16 1069105081, %v4250_v15  ;;  %v1019_v26 = vsub.bf16 0, %v987_v8 }
 0x163   : > { %1313 = vmatprep.mubr.bf16.mxu1 %v1065_v59  ;;  %v989_v47 = vsub.bf16 1065369472, %v973_v30  ;;  %v863_v51 = vadd.bf16 1048723074, %v847_v25  ;;  %v1032_v29 = vsel %vm4339_vm4, %v984_v40, %v1016_v53  ;;  %v1018_v54 = vsub.bf16 0, %v986_v23 }
 0x164   : > { %3537 = vpow.bf16 %v5461_v35  ;;  %v972_v27 = vmul.bf16 %v4278_v20, %v876_v17  ;;  %v830_v50 = vadd.bf16 3197288082, %v814_v37  ;;  %v5462_v57 = vmul.bf16 1060454197, %v4164_v55 }
 0x165   : > { %v1048_v39 = vadd.bf16 1065369472, %v1032_v29  ;;  %v1035_v15 = vsel %vm4349_vm5, %v987_v8, %v1019_v26  ;;  %v1021_v19 = vsub.bf16 0, %v989_v47  ;;  %v879_v60 = vmul.bf16 %v863_v51, %v4269_v38 }
 0x166   : > { %vm4392_vm8 = vcmp.ge.bf16.partialorder %v5462_v57, 0  ;;  %v4399_v48 = vmul.bf16 1065369472, %v3532_v13  ;;  %v1051_v9 = vadd.bf16 1065369472, %v1035_v15  ;;  %v1034_v20 = vsel %vm4358_vm6, %v986_v23, %v1018_v54 }
 0x167   : > { %v846_v56 = vmul.bf16 %v830_v50, %v4248_v18  ;;  %v5465_v1 = vmul.bf16 1060454197, %v4133_v2  ;;  %v5468_v61 = vmul.bf16 1056980736, %v4111_v31  ;;  %v1037_v38 = vsel %vm4368_vm7, %v989_v47, %v1021_v19 }
 0x168   : > { %v988_v13 = vsub.bf16 1065369472, %v972_v27  ;;  %v975_v11 = vmul.bf16 %v4298_v24, %v879_v60  ;;  %v4415_v59 = vmul.bf16 1065369472, %v3536_v21  ;;  %v5469_v10 = vmul.bf16 1056980736, %v4126_v52 }
 0x169   : > { %vm4406_vm9 = vcmp.ge.bf16.partialorder %v5465_v1, 0  ;;  %v1064_v8 = vmul.bf16 %v1048_v39, %v5468_v61  ;;  %v1050_v62 = vadd.bf16 1065369472, %v1034_v20  ;;  %v862_v30 = vadd.bf16 1048723074, %v846_v56 }
 0x16a   : > { %v1067_v40 = vmul.bf16 %v1051_v9, %v5469_v10  ;;  %v5470_v25 = vmul.bf16 1069105081, %v4259_v58  ;;  %v991_v37 = vsub.bf16 1065369472, %v975_v11  ;;  %v769_v31 = vadd.bf16 3216687034, %v753_v44 }
 0x16b   : > { %1314 = vmatmul.mubr.bf16.gmra.mxu1 %v1064_v8  ;;  %v752_v53 = vmul.bf16 1065893768, %v4285_v14  ;;  %v4423_v45 = vmul.bf16 1065369472, %v4345_v5  ;;  %v1053_v24 = vadd.bf16 1065369472, %v1037_v38  ;;  %v878_v21 = vmul.bf16 %v862_v30, %v4248_v18 }
 0x16c   : > { %3539 = vpow.bf16 %v5470_v25  ;;  %1323 = vmatprep.mubr.bf16.mxu1 %v1067_v40  ;;  %v755_v52 = vmul.bf16 1065893768, %v4399_v48  ;;  %v1020_v23 = vsub.bf16 0, %v988_v13  ;;  %v1023_v17 = vsub.bf16 0, %v991_v37 }
 0x16d   : > { %v785_v35 = vmul.bf16 %v769_v31, %v4305_v22  ;;  %v768_v58 = vadd.bf16 3216687034, %v752_v53  ;;  %v974_v26 = vmul.bf16 %v4289_v33, %v878_v21  ;;  %v754_v44 = vmul.bf16 1065893768, %v4353_v28 }
 0x16e   : > { %v771_v47 = vadd.bf16 3216687034, %v755_v52  ;;  %v757_v51 = vmul.bf16 1065893768, %v4415_v59  ;;  %v5471_v5 = vmul.bf16 1069105081, %v4295_v16  ;;  %v1039_v33 = vsel %vm4392_vm8, %v991_v37, %v1023_v17 }
 0x16f   : > { %v5472_v29 = vmul.bf16 1056980736, %v4121_v46  ;;  %v801_v54 = vadd.bf16 1068908470, %v785_v35  ;;  %v784_v27 = vmul.bf16 %v768_v58, %v4285_v14  ;;  %v5473_v50 = vmul.bf16 1056980736, %v4137_v7 }
 0x170   : > { %3541 = vpow.bf16 %v5471_v5  ;;  %v787_v39 = vmul.bf16 %v771_v47, %v4399_v48  ;;  %v770_v15 = vadd.bf16 3216687034, %v754_v44  ;;  %v5474_v19 = vmul.bf16 1060454197, %v4156_v42 }
 0x171   : > { %v1066_v18 = vmul.bf16 %v1050_v62, %v5472_v29  ;;  %v1069_v57 = vmul.bf16 %v1053_v24, %v5473_v50  ;;  %v817_v46 = vmul.bf16 %v801_v54, %v4305_v22  ;;  %v800_v60 = vadd.bf16 1068908470, %v784_v27 }
 0x172   : > { %vm4443_vm10 = vcmp.ge.bf16.partialorder %v5474_v19, 0  ;;  %v773_v9 = vadd.bf16 3216687034, %v757_v51  ;;  %v756_v20 = vmul.bf16 1065893768, %v4423_v45  ;;  %v1036_v7 = vsel %vm4406_vm9, %v988_v13, %v1020_v23  ;;  %v3538_v61 = vpop.eup %3537 }
 0x173   : > { %v990_v34 = vsub.bf16 1065369472, %v974_v26  ;;  %v803_v56 = vadd.bf16 1068908470, %v787_v39  ;;  %v786_v1 = vmul.bf16 %v770_v15, %v4353_v28  ;;  %1324 = vmatmul.mubr.bf16.gmra.mxu1 %v1066_v18  ;;  %v833_v8 = vadd.bf16 3197288082, %v817_v46 }
 0x174   : > { %v816_v38 = vmul.bf16 %v800_v60, %v4285_v14  ;;  %v789_v11 = vmul.bf16 %v773_v9, %v4415_v59  ;;  %v772_v10 = vadd.bf16 3216687034, %v756_v20  ;;  %v639_v40 = vmul.bf16 1056980736, %v4164_v55  ;;  %1333 = vmatprep.mubr.bf16.mxu1 %v1069_v57 }
 0x175   : > { %v1055_v62 = vadd.bf16 1065369472, %v1039_v33  ;;  %v819_v30 = vmul.bf16 %v803_v56, %v4399_v48  ;;  %v802_v41 = vadd.bf16 1068908470, %v786_v1  ;;  %v1052_v13 = vadd.bf16 1065369472, %v1036_v7 }
 0x176   : > { %v849_v25 = vmul.bf16 %v833_v8, %v4305_v22  ;;  %v832_v37 = vadd.bf16 3197288082, %v816_v38  ;;  %v805_v31 = vadd.bf16 1068908470, %v789_v11  ;;  %v1022_v53 = vsub.bf16 0, %v990_v34 }
 0x177   : > { %v835_v24 = vadd.bf16 3197288082, %v819_v30  ;;  %v818_v21 = vmul.bf16 %v802_v41, %v4353_v28  ;;  %v788_v52 = vmul.bf16 %v772_v10, %v4423_v45  ;;  %v5477_v23 = vmul.bf16 1069105081, %v4272_v12 }
 0x178   : > { %v865_v55 = vadd.bf16 1048723074, %v849_v25  ;;  %v848_v17 = vmul.bf16 %v832_v37, %v4285_v14  ;;  %v821_v35 = vmul.bf16 %v805_v31, %v4415_v59  ;;  %v1071_v58 = vmul.bf16 %v1055_v62, %v639_v40 }
 0x179   : > { %3543 = vpow.bf16 %v5477_v23  ;;  %v851_v26 = vmul.bf16 %v835_v24, %v4399_v48  ;;  %v834_v47 = vadd.bf16 3197288082, %v818_v21  ;;  %v804_v44 = vadd.bf16 1068908470, %v788_v52 }
 0x17a   : > { %v3540_v51 = vpop.eup %3539  ;;  %v5478_v5 = vmul.bf16 1056980736, %v4133_v2  ;;  %v881_v18 = vmul.bf16 %v865_v55, %v4305_v22  ;;  %v864_v54 = vadd.bf16 1048723074, %v848_v17  ;;  %v837_v27 = vadd.bf16 3197288082, %v821_v35 }
 0x17b   : > { %v1038_v12 = vsel %vm4443_vm10, %v990_v34, %v1022_v53  ;;  %v867_v50 = vadd.bf16 1048723074, %v851_v26  ;;  %v850_v57 = vmul.bf16 %v834_v47, %v4353_v28  ;;  %v820_v33 = vmul.bf16 %v804_v44, %v4423_v45 }
 0x17c   : > { %v1068_v29 = vmul.bf16 %v1052_v13, %v5478_v5  ;;  %v977_v39 = vmul.bf16 %v4322_v49, %v881_v18  ;;  %v880_v15 = vmul.bf16 %v864_v54, %v4285_v14  ;;  %v853_v2 = vmul.bf16 %v837_v27, %v4415_v59  ;;  %v3432_v49 = vld [vmem:[#allocation2 + $0x20] ss:$8 sps:$4 sm:$0xff]  }
 0x17d   : > { %v638_v19 = vmul.bf16 1056980736, %v4156_v42  ;;  %v883_v22 = vmul.bf16 %v867_v50, %v4399_v48  ;;  %v866_v46 = vadd.bf16 1048723074, %v850_v57  ;;  %v836_v16 = vadd.bf16 3197288082, %v820_v33 }
 0x17e   : > { %1334 = vmatmul.mubr.bf16.gmra.mxu1 %v1068_v29  ;;  %v3542_v60 = vpop.eup %3541  ;;  %v1054_v9 = vadd.bf16 1065369472, %v1038_v12  ;;  %v993_v20 = vsub.bf16 1065369472, %v977_v39  ;;  %v976_v7 = vmul.bf16 %v4303_v4, %v880_v15  ;;  %v869_v34 = vadd.bf16 1048723074, %v853_v2 }
 0x17f   : > { %1343 = vmatprep.mubr.bf16.mxu1 %v1071_v58  ;;  %v5479_v56 = vmul.bf16 1060454197, %v4177_v32  ;;  %v979_v14 = vmul.bf16 %v3540_v51, %v883_v22  ;;  %v882_v42 = vmul.bf16 %v866_v46, %v4353_v28  ;;  %v852_v1 = vmul.bf16 %v836_v16, %v4423_v45  ;;  %v3417_v22 = vld [vmem:[#allocation2 + $0x70] ss:$8 sps:$4 sm:$0xff]   ;;  %v3419_v46 = vld [vmem:[#allocation2 + $0x74] ss:$8 sps:$4 sm:$0xff]  }
 0x180   : > { %v641_v48 = vmul.bf16 1056980736, %v4190_v63  ;;  %v1025_v8 = vsub.bf16 0, %v993_v20  ;;  %v992_v38 = vsub.bf16 1065369472, %v976_v7  ;;  %v885_v11 = vmul.bf16 %v869_v34, %v4415_v59  ;;  %2094 = vmatprep.subr.bf16.mxu0 %v3419_v46 }
 0x181   : > { %vm4479_vm11 = vcmp.ge.bf16.partialorder %v5479_v56, 0  ;;  %v5482_v4 = vmul.bf16 1060454197, %v4190_v63  ;;  %v995_v10 = vsub.bf16 1065369472, %v979_v14  ;;  %v978_v40 = vmul.bf16 %v3538_v61, %v882_v42  ;;  %2095 = vmatpush1.bf16.msra.mxu0 %v3417_v22 }
 0x182   : > { %v868_v62 = vadd.bf16 1048723074, %v852_v1  ;;  %v1070_v30 = vmul.bf16 %v1054_v9, %v638_v19  ;;  %v1024_v13 = vsub.bf16 0, %v992_v38  ;;  %v981_v25 = vmul.bf16 %v3542_v60, %v885_v11  ;;  %v3420_v60 = vld [vmem:[#allocation2 + $0x60] ss:$8 sps:$4 sm:$0xff]  }
 0x183   : > { %vm1009_vm12 = vcmp.ge.bf16.partialorder %v5482_v4, 0  ;;  %v1027_v28 = vsub.bf16 0, %v995_v10  ;;  %v994_v31 = vsub.bf16 1065369472, %v978_v40  ;;  %v5483_v24 = vmul.bf16 1060454197, %v4210_v6 }
 0x184   : > { %v1041_v41 = vsel %vm1009_vm12, %v993_v20, %v1025_v8  ;;  %v884_v53 = vmul.bf16 %v868_v62, %v4423_v45  ;;  %v1040_v63 = vsel %vm4479_vm11, %v992_v38, %v1024_v13  ;;  %v997_v59 = vsub.bf16 1065369472, %v981_v25  ;;  %v3423_v9 = vld [vmem:[#allocation2 + $0x50] ss:$8 sps:$4 sm:$0xff]   ;;  %v3428_v20 = vld [vmem:[#allocation2 + $0x44] ss:$8 sps:$4 sm:$0xff]  }
 0x185   : > { %v1057_v37 = vadd.bf16 1065369472, %v1041_v41  ;;  %vm1011_vm13 = vcmp.ge.bf16.partialorder %v5483_v24, 0  ;;  %v1056_v23 = vadd.bf16 1065369472, %v1040_v63  ;;  %v1026_v58 = vsub.bf16 0, %v994_v31 }
 0x186   : > { %1344 = vmatmul.mubr.bf16.gmra.mxu1 %v1070_v30  ;;  %v1043_v61 = vsel %vm1011_vm13, %v995_v10, %v1027_v28  ;;  %v1029_v17 = vsub.bf16 0, %v997_v59  ;;  %v643_v35 = vmul.bf16 1056980736, %v4210_v6  ;;  %v640_v45 = vmul.bf16 1056980736, %v4177_v32 }
 0x187   : > { %v1073_v21 = vmul.bf16 %v1057_v37, %v641_v48  ;;  %v3544_v52 = vpop.eup %3543  ;;  %v1059_v55 = vadd.bf16 1065369472, %v1043_v61  ;;  %v5484_v47 = vmul.bf16 1060454197, %v4238_v43  ;;  %v5485_v51 = vmul.bf16 1060454197, %v4204_v36 }
 0x188   : > { %v980_v26 = vmul.bf16 %v3544_v52, %v884_v53  ;;  %v1072_v5 = vmul.bf16 %v1056_v23, %v640_v45  ;;  %v645_v12 = vmul.bf16 1056980736, %v4238_v43  ;;  %v642_v32 = vmul.bf16 1056980736, %v4204_v36  ;;  %v3422_v43 = vld [vmem:[#allocation2 + $0x64] ss:$8 sps:$4 sm:$0xff]  }
 0x189   : > { %1353 = vmatprep.mubr.bf16.mxu1 %v1073_v21  ;;  %vm1013_vm14 = vcmp.ge.bf16.partialorder %v5484_v47, 0  ;;  %v1075_v44 = vmul.bf16 %v1059_v55, %v643_v35  ;;  %vm1010_vm15 = vcmp.ge.bf16.partialorder %v5485_v51, 0  ;;  %v5486_v33 = vmul.bf16 1060454197, %v4229_v0  ;;  %2096 = vmatprep.subr.bf16.mxu0 %v3422_v43  ;;  %v3425_v36 = vld [vmem:[#allocation2 + $0x54] ss:$8 sps:$4 sm:$0xff]  }
 0x18a   : > { %v1045_v29 = vsel %vm1013_vm14, %v997_v59, %v1029_v17  ;;  %v1042_v18 = vsel %vm1010_vm15, %v994_v31, %v1026_v58  ;;  %v996_v54 = vsub.bf16 1065369472, %v980_v26  ;;  %v644_v19 = vmul.bf16 1056980736, %v4229_v0  ;;  %2097 = vmatpush1.bf16.msra.mxu0 %v3420_v60  ;;  %v3426_v7 = vld [vmem:[#allocation2 + $0x40] ss:$8 sps:$4 sm:$0xff]  }
 0x18b   : > { %v1061_v27 = vadd.bf16 1065369472, %v1045_v29  ;;  %v1058_v6 = vadd.bf16 1065369472, %v1042_v18  ;;  %vm1012_vm0 = vcmp.ge.bf16.partialorder %v5486_v33, 0  ;;  %2098 = vmatprep.subr.bf16.mxu0 %v3425_v36  ;;  %v5487_v35 = vld [vmem:[#allocation12_spill] sm:$0xff] }
 0x18c   : > { %v1028_v50 = vsub.bf16 0, %v996_v54  ;;  %v3431_v34 = vld [vmem:[#allocation2 + $0x34] ss:$8 sps:$4 sm:$0xff]   ;;  %v3429_v0 = vld [vmem:[#allocation2 + $0x30] ss:$8 sps:$4 sm:$0xff]  }
 0x18d   : > { %v1077_v57 = vmul.bf16 %v1061_v27, %v645_v12  ;;  %v1074_v39 = vmul.bf16 %v1058_v6, %v642_v32  ;;  %v3434_v56 = vld [vmem:[#allocation2 + $0x24] ss:$8 sps:$4 sm:$0xff]   ;;  %v3437_v14 = vld [vmem:[#allocation2 + $0x14] ss:$8 sps:$4 sm:$0xff]   ;;  %v3435_v42 = vld [vmem:[#allocation2 + $0x10] ss:$8 sps:$4 sm:$0xff]  }
 0x18e   : > { %1354 = vmatmul.mubr.bf16.gmra.mxu1 %v1072_v5  ;;  %v1044_v15 = vsel %vm1012_vm0, %v996_v54, %v1028_v50  ;;  %2099 = vmatpush1.bf16.msra.mxu0 %v3423_v9  ;;  %v3440_v1 = vld [vmem:[#allocation2 + $0x4] ss:$8 sps:$4 sm:$0xff]   ;;  %v3438_v48 = vld [vmem:[#allocation2] ss:$8 sps:$4 sm:$0xff]   ;;  %v3443_v8 = vld [vmem:[#allocation2 + $0xf4] ss:$8 sps:$4 sm:$0xff]  }
 0x18f   : > { %1363 = vmatprep.mubr.bf16.mxu1 %v1075_v44  ;;  %v1060_v2 = vadd.bf16 1065369472, %v1044_v15  ;;  %2100 = vmatprep.subr.bf16.mxu0 %v3428_v20  ;;  %v3441_v38 = vld [vmem:[#allocation2 + $0xf0] ss:$8 sps:$4 sm:$0xff]   ;;  %v3446_v11 = vld [vmem:[#allocation2 + $0xe4] ss:$8 sps:$4 sm:$0xff]  }
 0x190   : > { %v3444_v4 = vld [vmem:[#allocation2 + $0xe0] ss:$8 sps:$4 sm:$0xff]   ;;  %v3449_v10 = vld [vmem:[#allocation2 + $0xd4] ss:$8 sps:$4 sm:$0xff]   ;;  %v3447_v40 = vld [vmem:[#allocation2 + $0xd0] ss:$8 sps:$4 sm:$0xff]  }
 0x191   : > { %v1076_v16 = vmul.bf16 %v1060_v2, %v644_v19  ;;  %v3452_v62 = vld [vmem:[#allocation2 + $0xc4] ss:$8 sps:$4 sm:$0xff]   ;;  %v3450_v30 = vld [vmem:[#allocation2 + $0xc0] ss:$8 sps:$4 sm:$0xff]   ;;  %v3455_v41 = vld [vmem:[#allocation2 + $0xb4] ss:$8 sps:$4 sm:$0xff]  }
 0x192   : > { %2101 = vmatpush1.bf16.msra.mxu0 %v3426_v7  ;;  %v3453_v13 = vld [vmem:[#allocation2 + $0xb0] ss:$8 sps:$4 sm:$0xff]   ;;  %v3458_v25 = vld [vmem:[#allocation2 + $0xa4] ss:$8 sps:$4 sm:$0xff]   ;;  %v3456_v37 = vld [vmem:[#allocation2 + $0xa0] ss:$8 sps:$4 sm:$0xff]  }
 0x193   : > { %2102 = vmatprep.subr.bf16.mxu0 %v3431_v34  ;;  %v3461_v28 = vld [vmem:[#allocation2 + $0x94] ss:$8 sps:$4 sm:$0xff]   ;;  %v3459_v31 = vld [vmem:[#allocation2 + $0x90] ss:$8 sps:$4 sm:$0xff]   ;;  %v3464_v53 = vld [vmem:[#allocation2 + $0x84] ss:$8 sps:$4 sm:$0xff]  }
 0x194   : > { %v3462_v24 = vld [vmem:[#allocation2 + $0x80] ss:$8 sps:$4 sm:$0xff]  }
 0x195   : > { %v3159_v63 = vld.sshfl [vmem:[%s5396_s4] sm:$0x11 pattern:$0x75316420] }
 0x196   : > { %1364 = vmatmul.mubr.bf16.gmra.mxu1 %v1074_v39  ;;  %2103 = vmatpush1.bf16.msra.mxu0 %v3429_v0  ;;  %v1408_v59 = vcombine.high %v3159_v63, %v3159_v63  ;;  %v1415_v21 = vrot.slane %v3159_v63, %v4086_v3 }
 0x197   : > { %1373 = vmatprep.mubr.bf16.mxu1 %v1077_v57  ;;  %2104 = vmatprep.subr.bf16.mxu0 %v3434_v56 }
 0x198   : > { %v1422_v61 = vrot.slane %v1408_v59, %v4086_v3  ;;  %v1424_v52 = vpack.i.b16 %v1415_v21, %v1415_v21 }
 0x19a   : > { %2105 = vmatpush1.bf16.msra.mxu0 %v3432_v49  ;;  %v1431_v55 = vpack.i.b16 %v1422_v61, %v1422_v61  ;;  %v4511_v58 = vrot.slane %v1424_v52, %v5487_v35 }
 0x19b   : > { %2106 = vmatprep.subr.bf16.mxu0 %v3437_v14 }
 0x19c   : > { %v4514_v47 = vrot.slane %v1431_v55, %v5487_v35 }
 0x19e   : > { %1374 = vmatmul.mubr.bf16.gmra.mxu1 %v1076_v16  ;;  %2107 = vmatpush1.bf16.msra.mxu0 %v3435_v42 }
 0x19f   : > { %2108 = vmatprep.subr.bf16.mxu0 %v3440_v1 }
 0x1a2   : > { %2109 = vmatpush1.bf16.msra.mxu0 %v3438_v48 }
 0x1a3   : > { %2110 = vmatprep.subr.bf16.mxu0 %v3443_v8 }
 0x1a6   : > { %2111 = vmatpush2.bf16.msra.mxu0 %v3441_v38 }
 0x1a7   : > { %2112 = vmatprep.subr.bf16.mxu0 %v3446_v11 }
 0x1aa   : > { %2113 = vmatpush2.bf16.msra.mxu0 %v3444_v4 }
 0x1ab   : > { %2114 = vmatprep.subr.bf16.mxu0 %v3449_v10 }
 0x1ae   : > { %2115 = vmatpush2.bf16.msra.mxu0 %v3447_v40 }
 0x1af   : > { %2116 = vmatprep.subr.bf16.mxu0 %v3452_v62 }
 0x1b2   : > { %2117 = vmatpush2.bf16.msra.mxu0 %v3450_v30 }
 0x1b3   : > { %2118 = vmatprep.subr.bf16.mxu0 %v3455_v41 }
 0x1b6   : > { %2119 = vmatpush2.bf16.msra.mxu0 %v3453_v13 }
 0x1b7   : > { %2120 = vmatprep.subr.bf16.mxu0 %v3458_v25 }
 0x1ba   : > { %2121 = vmatpush2.bf16.msra.mxu0 %v3456_v37 }
 0x1bb   : > { %2122 = vmatprep.subr.bf16.mxu0 %v3461_v28 }
 0x1be   : > { %2123 = vmatpush2.bf16.msra.mxu0 %v3459_v31 }
 0x1bf   : > { %2124 = vmatprep.subr.bf16.mxu0 %v3464_v53 }
 0x1c2   : > { %2125 = vmatpush2.bf16.msra.mxu0 %v3462_v24 }
 0x214   : > { %v1305_v23 = vpop.f32.mrf.mxu1 }
 0x216   : > { %v1307_v17 = vpop.f32.mrf.mxu1 }
 0x218   : > { %v1309_v26 = vpop.f32.mrf.mxu1 }
 0x219   : > { %v1384_v45 = vpack.c.bf16 %v1309_v26, %v1305_v23 }
 0x21a   : > { %v1311_v44 = vpop.f32.mrf.mxu1 }
 0x21b   : > { %v4517_v51 = vadd.bf16 %v4511_v58, %v1384_v45  ;;  %v1385_v5 = vpack.c.bf16 %v1311_v44, %v1307_v17 }
 0x21d   : > { %v1469_v29 = vmul.bf16 1060454197, %v4517_v51  ;;  %v4521_v18 = vadd.bf16 %v4514_v47, %v1385_v5  ;;  %v1453_v55 = vmul.bf16 1056980736, %v4517_v51 }
 0x21f   : > { %v1485_v54 = vand.u32 2147450879, %v1469_v29  ;;  %v1470_v27 = vmul.bf16 1060454197, %v4521_v18  ;;  %v1454_v44 = vmul.bf16 1056980736, %v4521_v18 }
 0x220   : > { %vm4591_vm1 = vcmp.ge.bf16.partialorder %v1469_v29, 0 }
 0x221   : > { %v1501_v6 = vmul.bf16 1051213480, %v1485_v54  ;;  %v1486_v12 = vand.u32 2147450879, %v1470_v27  ;;  %v1709_v19 = vsub.bf16 0, %v1485_v54  ;;  %vm4653_vm2 = vcmp.ge.bf16.partialorder %v1470_v27, 0 }
 0x223   : > { %v1517_v50 = vadd.bf16 1065369472, %v1501_v6  ;;  %v1502_v32 = vmul.bf16 1051213480, %v1486_v12  ;;  %v1725_v36 = vmul.bf16 %v1709_v19, %v1485_v54  ;;  %v1710_v38 = vsub.bf16 0, %v1486_v12 }
 0x225   : > { %3545 = vrcp.bf16 %v1517_v50  ;;  %v1518_v57 = vadd.bf16 1065369472, %v1502_v32  ;;  %v1742_v14 = vmul.bf16 1069105081, %v1725_v36  ;;  %v4553_v31 = vmul.bf16 %v1710_v38, %v1486_v12 }
 0x227   : > { %3547 = vrcp.bf16 %v1518_v57  ;;  %v1745_v32 = vmul.bf16 1069105081, %v4553_v31 }
 0x228   : > { %3549 = vpow.bf16 %v1742_v14 }
 0x22b   : > { %v1315_v33 = vpop.f32.mrf.mxu1 }
 0x22d   : > { %v1317_v39 = vpop.f32.mrf.mxu1 }
 0x22f   : > { %v1319_v15 = vpop.f32.mrf.mxu1 }
 0x230   : > { %v1386_v2 = vpack.c.bf16 %v1319_v15, %v1315_v33 }
 0x231   : > { %v1321_v22 = vpop.f32.mrf.mxu1 }
 0x232   : > { %v4529_v46 = vadd.bf16 %v4511_v58, %v1386_v2  ;;  %v1387_v16 = vpack.c.bf16 %v1321_v22, %v1317_v39 }
 0x233   : > { %v1325_v43 = vpop.f32.mrf.mxu1  ;;  %v3546_v7 = vpop.eup %3545 }
 0x234   : > { %v4532_v60 = vadd.bf16 %v4514_v47, %v1387_v16  ;;  %v1471_v20 = vmul.bf16 1060454197, %v4529_v46  ;;  %v4535_v0 = vmul.bf16 1065369472, %v3546_v7 }
 0x235   : > { %v1327_v9 = vpop.f32.mrf.mxu1  ;;  %v3548_v10 = vpop.eup %3547 }
 0x236   : > { %v1472_v56 = vmul.bf16 1060454197, %v4532_v60  ;;  %v1565_v1 = vmul.bf16 1065893768, %v4535_v0  ;;  %v1487_v48 = vand.u32 2147450879, %v1471_v20 }
 0x237   : > { %v1329_v34 = vpop.f32.mrf.mxu1  ;;  %v4551_v28 = vmul.bf16 1065369472, %v3548_v10  ;;  %vm4740_vm4 = vcmp.ge.bf16.partialorder %v1471_v20, 0 }
 0x238   : > { %v1388_v49 = vpack.c.bf16 %v1329_v34, %v1325_v43  ;;  %v1581_v40 = vadd.bf16 3216687034, %v1565_v1  ;;  %v1488_v62 = vand.u32 2147450879, %v1472_v56  ;;  %v1503_v37 = vmul.bf16 1051213480, %v1487_v48 }
 0x239   : > { %v1331_v42 = vpop.f32.mrf.mxu1  ;;  %v1711_v61 = vsub.bf16 0, %v1487_v48  ;;  %v1566_v12 = vmul.bf16 1065893768, %v4551_v28  ;;  %vm4725_vm3 = vcmp.ge.bf16.partialorder %v1472_v56, 0 }
 0x23a   : > { %v4542_v8 = vadd.bf16 %v4511_v58, %v1388_v49  ;;  %v1389_v11 = vpack.c.bf16 %v1331_v42, %v1327_v9  ;;  %v1597_v25 = vmul.bf16 %v1581_v40, %v4535_v0  ;;  %v1504_v63 = vmul.bf16 1051213480, %v1488_v62 }
 0x23b   : > { %v1519_v26 = vadd.bf16 1065369472, %v1503_v37  ;;  %v1727_v33 = vmul.bf16 %v1711_v61, %v1487_v48  ;;  %v1712_v39 = vsub.bf16 0, %v1488_v62  ;;  %v1582_v34 = vadd.bf16 3216687034, %v1566_v12  ;;  %v3550_v37 = vpop.eup %3549 }
 0x23c   : > { %v1473_v30 = vmul.bf16 1060454197, %v4542_v8  ;;  %v4548_v41 = vadd.bf16 %v4514_v47, %v1389_v11  ;;  %v1613_v24 = vadd.bf16 1068908470, %v1597_v25  ;;  %v1520_v57 = vadd.bf16 1065369472, %v1504_v63 }
 0x23d   : > { %3551 = vrcp.bf16 %v1519_v26  ;;  %v1728_v1 = vmul.bf16 %v1712_v39, %v1488_v62  ;;  %v1748_v40 = vmul.bf16 1069105081, %v1727_v33 }
 0x23e   : > { %v1335_v4 = vpop.f32.mrf.mxu1  ;;  %v1474_v59 = vmul.bf16 1060454197, %v4548_v41  ;;  %v1489_v52 = vand.u32 2147450879, %v1473_v30  ;;  %v1629_v17 = vmul.bf16 %v1613_v24, %v4535_v0  ;;  %3553 = vrcp.bf16 %v1520_v57 }
 0x23f   : > { %vm4770_vm6 = vcmp.ge.bf16.partialorder %v1473_v30, 0 }
 0x240   : > { %v1337_v13 = vpop.f32.mrf.mxu1  ;;  %v1490_v5 = vand.u32 2147450879, %v1474_v59  ;;  %v1645_v50 = vadd.bf16 3197288082, %v1629_v17  ;;  %v1505_v15 = vmul.bf16 1051213480, %v1489_v52 }
 0x241   : > { %v1713_v16 = vsub.bf16 0, %v1489_v52  ;;  %vm4752_vm5 = vcmp.ge.bf16.partialorder %v1474_v59, 0 }
 0x242   : > { %v1339_v53 = vpop.f32.mrf.mxu1  ;;  %v1661_v22 = vmul.bf16 %v1645_v50, %v4535_v0  ;;  %v1506_v9 = vmul.bf16 1051213480, %v1490_v5  ;;  %v1521_v48 = vadd.bf16 1065369472, %v1505_v15 }
 0x243   : > { %v1390_v21 = vpack.c.bf16 %v1339_v53, %v1335_v4  ;;  %v1714_v53 = vsub.bf16 0, %v1490_v5 }
 0x244   : > { %v1341_v23 = vpop.f32.mrf.mxu1  ;;  %v1677_v49 = vadd.bf16 1048723074, %v1661_v22  ;;  %v1522_v31 = vadd.bf16 1065369472, %v1506_v9  ;;  %3555 = vrcp.bf16 %v1521_v48 }
 0x245   : > { %v4561_v45 = vadd.bf16 %v4511_v58, %v1390_v21  ;;  %v1391_v54 = vpack.c.bf16 %v1341_v23, %v1337_v13  ;;  %v1729_v13 = vmul.bf16 %v1713_v16, %v1489_v52  ;;  %v1598_v21 = vmul.bf16 %v1582_v34, %v4551_v28 }
 0x246   : > { %v1345_v6 = vpop.f32.mrf.mxu1  ;;  %v1693_v10 = vmul.bf16 %v1677_v49, %v4535_v0  ;;  %v1751_v0 = vmul.bf16 1069105081, %v1728_v1  ;;  %3557 = vpow.bf16 %v1745_v32  ;;  %v1730_v22 = vmul.bf16 %v1714_v53, %v1490_v5 }
 0x247   : > { %v5425_v2 = vmul.bf16 1060454197, %v4561_v45  ;;  %v4571_v43 = vadd.bf16 %v4514_v47, %v1391_v54  ;;  %v1754_v12 = vmul.bf16 1069105081, %v1729_v13  ;;  %3559 = vrcp.bf16 %v1522_v31 }
 0x248   : > { %v1347_v19 = vpop.f32.mrf.mxu1  ;;  %v1789_v62 = vmul.bf16 %v3550_v37, %v1693_v10  ;;  %3561 = vpow.bf16 %v1748_v40 }
 0x249   : > { %v1491_v42 = vand.u32 2147450879, %v5425_v2  ;;  %v1476_v38 = vmul.bf16 1060454197, %v4571_v43  ;;  %3563 = vpow.bf16 %v1751_v0 }
 0x24a   : > { %v1349_v7 = vpop.f32.mrf.mxu1  ;;  %v1805_v33 = vsub.bf16 1065369472, %v1789_v62  ;;  %3565 = vpow.bf16 %v1754_v12 }
 0x24b   : > { %v1392_v11 = vpack.c.bf16 %v1349_v7, %v1345_v6  ;;  %v1492_v24 = vand.u32 2147450879, %v1476_v38  ;;  %v1507_v61 = vmul.bf16 1051213480, %v1491_v42  ;;  %v1715_v57 = vsub.bf16 0, %v1491_v42  ;;  %v3552_v13 = vpop.eup %3551 }
 0x24c   : > { %v1351_v4 = vpop.f32.mrf.mxu1  ;;  %v1837_v5 = vsub.bf16 0, %v1805_v33  ;;  %v3554_v62 = vpop.eup %3553  ;;  %vm4778_vm7 = vcmp.ge.bf16.partialorder %v1476_v38, 0 }
 0x24d   : > { %v1393_v25 = vpack.c.bf16 %v1351_v4, %v1347_v19  ;;  %v4583_v23 = vadd.bf16 %v4511_v58, %v1392_v11  ;;  %v1508_v26 = vmul.bf16 1051213480, %v1492_v24  ;;  %v1614_v19 = vadd.bf16 1068908470, %v1598_v21 }
 0x24e   : > { %v1355_v63 = vpop.f32.mrf.mxu1  ;;  %v1523_v16 = vadd.bf16 1065369472, %v1507_v61  ;;  %v1716_v34 = vsub.bf16 0, %v1492_v24  ;;  %v1731_v1 = vmul.bf16 %v1715_v57, %v1491_v42  ;;  %v1853_v57 = vsel %vm4591_vm1, %v1805_v33, %v1837_v5 }
 0x24f   : > { %v4586_v17 = vadd.bf16 %v4514_v47, %v1393_v25  ;;  %v5419_v39 = vmul.bf16 1060454197, %v4583_v23  ;;  %v1524_v29 = vadd.bf16 1065369472, %v1508_v26  ;;  %v1630_v40 = vmul.bf16 %v1614_v19, %v4551_v28 }
 0x250   : > { %v1357_v54 = vpop.f32.mrf.mxu1  ;;  %v1757_v25 = vmul.bf16 1069105081, %v1730_v22  ;;  %3567 = vrcp.bf16 %v1523_v16  ;;  %v1732_v42 = vmul.bf16 %v1716_v34, %v1492_v24  ;;  %v1760_v61 = vmul.bf16 1069105081, %v1731_v1 }
 0x251   : > { %v5422_v9 = vmul.bf16 1060454197, %v4586_v17  ;;  %v1493_v32 = vand.u32 2147450879, %v5419_v39  ;;  %3569 = vrcp.bf16 %v1524_v29  ;;  %v1646_v19 = vadd.bf16 3197288082, %v1630_v40 }
 0x252   : > { %v1359_v15 = vpop.f32.mrf.mxu1  ;;  %v1763_v29 = vmul.bf16 1069105081, %v1732_v42  ;;  %v1869_v6 = vadd.bf16 1065369472, %v1853_v57 }
 0x253   : > { %v1394_v7 = vpack.c.bf16 %v1359_v15, %v1355_v63  ;;  %v1494_v48 = vand.u32 2147450879, %v5422_v9  ;;  %v1509_v4 = vmul.bf16 1051213480, %v1493_v32  ;;  %v4614_v15 = vmul.bf16 1065369472, %v3552_v13 }
 0x254   : > { %v1361_v49 = vpop.f32.mrf.mxu1  ;;  %v1717_v24 = vsub.bf16 0, %v1493_v32  ;;  %v4641_v53 = vmul.bf16 %v1869_v6, %v1453_v55 }
 0x255   : > { %v4603_v11 = vadd.bf16 %v4511_v58, %v1394_v7  ;;  %v1510_v37 = vmul.bf16 1051213480, %v1494_v48  ;;  %v1395_v31 = vpack.c.bf16 %v1361_v49, %v1357_v54  ;;  %v1525_v63 = vadd.bf16 1065369472, %v1509_v4  ;;  %v3556_v4 = vpop.eup %3555 }
 0x256   : > { %v1365_v10 = vpop.f32.mrf.mxu1  ;;  %v4618_v7 = vmul.bf16 1065369472, %v3554_v62  ;;  %v1718_v13 = vsub.bf16 0, %v1494_v48  ;;  %v3558_v42 = vpop.eup %3557 }
 0x257   : > { %v5418_v26 = vmul.bf16 1060454197, %v4603_v11  ;;  %v4610_v12 = vadd.bf16 %v4514_v47, %v1395_v31  ;;  %3571 = vrcp.bf16 %v1525_v63  ;;  %v1526_v22 = vadd.bf16 1065369472, %v1510_v37 }
 0x258   : > { %v1367_v21 = vpop.f32.mrf.mxu1  ;;  %3573 = vpow.bf16 %v1757_v25  ;;  %v1662_v31 = vmul.bf16 %v1646_v19, %v4551_v28  ;;  %v1733_v63 = vmul.bf16 %v1717_v24, %v1493_v32  ;;  %v1734_v32 = vmul.bf16 %v1718_v13, %v1494_v48 }
 0x259   : > { %v1495_v16 = vand.u32 2147450879, %v5418_v26  ;;  %v5417_v34 = vmul.bf16 1060454197, %v4610_v12  ;;  %3575 = vpow.bf16 %v1760_v61  ;;  %v3560_v61 = vpop.eup %3559  ;;  %v1568_v50 = vmul.bf16 1065893768, %v4618_v7 }
 0x25a   : > { %v1369_v54 = vpop.f32.mrf.mxu1  ;;  %3577 = vrcp.bf16 %v1526_v22  ;;  %v4634_v26 = vpop.eup %3561  ;;  %v1766_v39 = vmul.bf16 1069105081, %v1733_v63 }
 0x25b   : > { %v1396_v49 = vpack.c.bf16 %v1369_v54, %v1365_v10  ;;  %v1511_v33 = vmul.bf16 1051213480, %v1495_v16  ;;  %v1496_v40 = vand.u32 2147450879, %v5417_v34  ;;  %3579 = vpow.bf16 %v1763_v29  ;;  %v4637_v29 = vpop.eup %3563 }
 0x25c   : > { %v1371_v1 = vpop.f32.mrf.mxu1  ;;  %v4630_v34 = vmul.bf16 1065369472, %v3556_v4  ;;  %v4643_v4 = vmul.bf16 1065369472, %v3560_v61 }
 0x25d   : > { %v1397_v5 = vpack.c.bf16 %v1371_v1, %v1367_v21  ;;  %v4624_v25 = vadd.bf16 %v4511_v58, %v1396_v49  ;;  %v1527_v10 = vadd.bf16 1065369472, %v1511_v33  ;;  %v1719_v21 = vsub.bf16 0, %v1495_v16  ;;  %v4647_v49 = vpop.eup %3565 }
 0x25e   : > { %v1375_v37 = vpop.f32.mrf.mxu1  ;;  %v1512_v57 = vmul.bf16 1051213480, %v1496_v40  ;;  %v1720_v54 = vsub.bf16 0, %v1496_v40  ;;  %v3568_v0 = vpop.eup %3567 }
 0x25f   : > { %v4628_v62 = vadd.bf16 %v4514_v47, %v1397_v5  ;;  %3581 = vrcp.bf16 %v1527_v10  ;;  %v5420_v19 = vmul.bf16 1060454197, %v4624_v25  ;;  %v1678_v5 = vadd.bf16 1048723074, %v1662_v31  ;;  %v3570_v61 = vpop.eup %3569 }
 0x260   : > { %v1377_v1 = vpop.f32.mrf.mxu1  ;;  %v1528_v24 = vadd.bf16 1065369472, %v1512_v57  ;;  %v1735_v48 = vmul.bf16 %v1719_v21, %v1495_v16  ;;  %v1736_v13 = vmul.bf16 %v1720_v54, %v1496_v40  ;;  %v4669_v9 = vmul.bf16 1065369472, %v3570_v61 }
 0x261   : > { %v5421_v22 = vmul.bf16 1060454197, %v4628_v62  ;;  %v1497_v10 = vand.u32 2147450879, %v5420_v19  ;;  %v1769_v19 = vmul.bf16 1069105081, %v1734_v32  ;;  %v1694_v40 = vmul.bf16 %v1678_v5, %v4551_v28 }
 0x262   : > { %v1379_v33 = vpop.f32.mrf.mxu1  ;;  %3583 = vrcp.bf16 %v1528_v24  ;;  %v4667_v32 = vmul.bf16 1065369472, %v3568_v0  ;;  %v1775_v28 = vmul.bf16 1069105081, %v1736_v13 }
 0x263   : > { %v1498_v31 = vand.u32 2147450879, %v5421_v22  ;;  %v1513_v52 = vmul.bf16 1051213480, %v1497_v10  ;;  %v1721_v51 = vsub.bf16 0, %v1497_v10  ;;  %v1398_v55 = vpack.c.bf16 %v1379_v33, %v1375_v37 }
 0x264   : > { %v1381_v57 = vpop.f32.mrf.mxu1  ;;  %v1772_v33 = vmul.bf16 1069105081, %v1735_v48  ;;  %v1790_v27 = vmul.bf16 %v3558_v42, %v1694_v40  ;;  %3585 = vpow.bf16 %v1766_v39  ;;  %v1584_v39 = vadd.bf16 3216687034, %v1568_v50 }
 0x265   : > { %v1399_v6 = vpack.c.bf16 %v1381_v57, %v1377_v1  ;;  %v1514_v16 = vmul.bf16 1051213480, %v1498_v31  ;;  %v1722_v21 = vsub.bf16 0, %v1498_v31  ;;  %v1529_v54 = vadd.bf16 1065369472, %v1513_v52  ;;  %v3572_v1 = vpop.eup %3571 }
 0x266   : > { %v1737_v24 = vmul.bf16 %v1721_v51, %v1497_v10  ;;  %v4659_v22 = vadd.bf16 %v4511_v58, %v1398_v55  ;;  %v4665_v36 = vpop.eup %3573  ;;  %v4671_v52 = vmul.bf16 1065369472, %v3572_v1  ;;  %v1806_v48 = vsub.bf16 1065369472, %v1790_v27 }
 0x267   : > { %v4662_v37 = vadd.bf16 %v4514_v47, %v1399_v6  ;;  %v1738_v57 = vmul.bf16 %v1722_v21, %v1498_v31  ;;  %3587 = vrcp.bf16 %v1529_v54  ;;  %v1530_v58 = vadd.bf16 1065369472, %v1514_v16  ;;  %v4674_v5 = vpop.eup %3575 }
 0x268   : > { %v5423_v47 = vmul.bf16 1060454197, %v4659_v22  ;;  %3589 = vpow.bf16 %v1769_v19  ;;  %v1778_v42 = vmul.bf16 1069105081, %v1737_v24  ;;  %v3578_v13 = vpop.eup %3577  ;;  %v1838_v55 = vsub.bf16 0, %v1806_v48 }
 0x269   : > { %v5424_v10 = vmul.bf16 1060454197, %v4662_v37  ;;  %3591 = vpow.bf16 %v1772_v33  ;;  %v1781_v0 = vmul.bf16 1069105081, %v1738_v57  ;;  %v1567_v6 = vmul.bf16 1065893768, %v4614_v15  ;;  %v4682_v61 = vpop.eup %3579 }
 0x26a   : > { %v1499_v31 = vand.u32 2147450879, %v5423_v47  ;;  %3593 = vpow.bf16 %v1775_v28  ;;  %v1600_v21 = vmul.bf16 %v1584_v39, %v4618_v7  ;;  %v1570_v40 = vmul.bf16 1065893768, %v4643_v4 }
 0x26b   : > { %v1500_v51 = vand.u32 2147450879, %v5424_v10  ;;  %v1854_v50 = vsel %vm4653_vm2, %v1806_v48, %v1838_v55  ;;  %v1583_v33 = vadd.bf16 3216687034, %v1567_v6  ;;  %v4688_v57 = vmul.bf16 1065369472, %v3578_v13 }
 0x26c   : > { %v1515_v19 = vmul.bf16 1051213480, %v1499_v31  ;;  %v1723_v16 = vsub.bf16 0, %v1499_v31  ;;  %3595 = vrcp.bf16 %v1530_v58  ;;  %v1870_v28 = vadd.bf16 1065369472, %v1854_v50 }
 0x26d   : > { %v3582_v54 = vpop.eup %3581  ;;  %v1516_v24 = vmul.bf16 1051213480, %v1500_v51  ;;  %v1724_v1 = vsub.bf16 0, %v1500_v51  ;;  %3597 = vpow.bf16 %v1778_v42  ;;  %v1616_v10 = vadd.bf16 1068908470, %v1600_v21 }
 0x26e   : > { %v4690_v27 = vmul.bf16 %v1723_v16, %v1499_v31  ;;  %v1531_v47 = vadd.bf16 1065369472, %v1515_v19  ;;  %v1599_v39 = vmul.bf16 %v1583_v33, %v4614_v15  ;;  %v4693_v2 = vmul.bf16 1065369472, %v3582_v54 }
 0x26f   : > { %3599 = vpow.bf16 %v1781_v0  ;;  %v1886_v63 = vmul.bf16 %v1870_v28, %v1454_v44  ;;  %v1586_v48 = vadd.bf16 3216687034, %v1570_v40  ;;  %v1532_v55 = vadd.bf16 1065369472, %v1516_v24 }
 0x270   : > { %v3584_v14 = vpop.eup %3583  ;;  %v1784_v13 = vmul.bf16 1069105081, %v4690_v27  ;;  %v4698_v58 = vmul.bf16 %v1724_v1, %v1500_v51  ;;  %v1632_v31 = vmul.bf16 %v1616_v10, %v4618_v7  ;;  %v1615_v6 = vadd.bf16 1068908470, %v1599_v39 }
 0x271   : > { %v4701_v42 = vmul.bf16 1065369472, %v3584_v14  ;;  %2126 = vmatprep.mubr.bf16.mxu0 %v1886_v63  ;;  %v1602_v19 = vmul.bf16 %v1586_v48, %v4643_v4  ;;  %v1569_v16 = vmul.bf16 1065893768, %v4630_v34  ;;  %3601 = vrcp.bf16 %v1531_v47 }
 0x272   : > { %2127 = vmatmul.mubr.bf16.vlgmr.msra.gmra.mxu0 %v4641_v53  ;;  %v1648_v18 = vadd.bf16 3197288082, %v1632_v31  ;;  %v1572_v44 = vmul.bf16 1065893768, %v4669_v9  ;;  %v1571_v0 = vmul.bf16 1065893768, %v4667_v32  ;;  %v1631_v51 = vmul.bf16 %v1615_v6, %v4614_v15  ;;  %v4710_v40 = vpop.eup %3585 }
 0x273   : > { %v1618_v21 = vadd.bf16 1068908470, %v1602_v19  ;;  %v1585_v10 = vadd.bf16 3216687034, %v1569_v16  ;;  %v1574_v14 = vmul.bf16 1065893768, %v4688_v57  ;;  %3603 = vrcp.bf16 %v1532_v55 }
 0x274   : > { %v1664_v54 = vmul.bf16 %v1648_v18, %v4618_v7  ;;  %v1588_v24 = vadd.bf16 3216687034, %v1572_v44  ;;  %v1587_v47 = vadd.bf16 3216687034, %v1571_v0  ;;  %v1647_v50 = vadd.bf16 3197288082, %v1631_v51 }
 0x275   : > { %v3588_v1 = vpop.eup %3587  ;;  %v1634_v33 = vmul.bf16 %v1618_v21, %v4643_v4  ;;  %v1601_v27 = vmul.bf16 %v1585_v10, %v4630_v34  ;;  %v1573_v55 = vmul.bf16 1065893768, %v4671_v52  ;;  %v1590_v44 = vadd.bf16 3216687034, %v1574_v14 }
 0x276   : > { %v4716_v28 = vpop.eup %3589  ;;  %v1680_v39 = vadd.bf16 1048723074, %v1664_v54  ;;  %v1604_v63 = vmul.bf16 %v1588_v24, %v4669_v9  ;;  %v1603_v48 = vmul.bf16 %v1587_v47, %v4667_v32  ;;  %v1663_v19 = vmul.bf16 %v1647_v50, %v4614_v15 }
 0x277   : > { %v4721_v31 = vpop.eup %3591  ;;  %v1650_v16 = vadd.bf16 3197288082, %v1634_v33  ;;  %v1617_v18 = vadd.bf16 1068908470, %v1601_v27  ;;  %v4732_v51 = vmul.bf16 1065369472, %v3588_v1  ;;  %v1606_v53 = vmul.bf16 %v1590_v44, %v4688_v57 }
 0x278   : > { %v4730_v0 = vpop.eup %3593  ;;  %v1696_v21 = vmul.bf16 %v1680_v39, %v4618_v7  ;;  %v1620_v10 = vadd.bf16 1068908470, %v1604_v63  ;;  %v1619_v54 = vadd.bf16 1068908470, %v1603_v48  ;;  %v1679_v24 = vadd.bf16 1048723074, %v1663_v19 }
 0x279   : > { %v1666_v47 = vmul.bf16 %v1650_v16, %v4643_v4  ;;  %v1633_v56 = vmul.bf16 %v1617_v18, %v4630_v34  ;;  %v1589_v33 = vadd.bf16 3216687034, %v1573_v55  ;;  %v1622_v19 = vadd.bf16 1068908470, %v1606_v53 }
 0x27a   : > { %v1792_v14 = vmul.bf16 %v4637_v29, %v1696_v21  ;;  %v1636_v1 = vmul.bf16 %v1620_v10, %v4669_v9  ;;  %v1635_v7 = vmul.bf16 %v1619_v54, %v4667_v32  ;;  %v3596_v27 = vpop.eup %3595  ;;  %v1695_v39 = vmul.bf16 %v1679_v24, %v4614_v15 }
 0x27b   : > { %v1682_v63 = vadd.bf16 1048723074, %v1666_v47  ;;  %v1649_v48 = vadd.bf16 3197288082, %v1633_v56  ;;  %v4748_v16 = vpop.eup %3597  ;;  %3605 = vpow.bf16 %v1784_v13  ;;  %v1638_v10 = vmul.bf16 %v1622_v19, %v4688_v57 }
 0x27c   : > { %v1808_v29 = vsub.bf16 1065369472, %v1792_v14  ;;  %v1652_v18 = vadd.bf16 3197288082, %v1636_v1  ;;  %v1651_v44 = vadd.bf16 3197288082, %v1635_v7  ;;  %v1791_v55 = vmul.bf16 %v4634_v26, %v1695_v39 }
 0x27d   : > { %v4756_v21 = vpop.eup %3599  ;;  %v1698_v15 = vmul.bf16 %v1682_v63, %v4643_v4  ;;  %v1665_v53 = vmul.bf16 %v1649_v48, %v4630_v34  ;;  %v1605_v13 = vmul.bf16 %v1589_v33, %v4671_v52  ;;  %v4765_v47 = vmul.bf16 1065369472, %v3596_v27 }
 0x27e   : > { %v1840_v54 = vsub.bf16 0, %v1808_v29  ;;  %v1668_v59 = vmul.bf16 %v1652_v18, %v4669_v9  ;;  %v1667_v24 = vmul.bf16 %v1651_v44, %v4667_v32  ;;  %v1807_v56 = vsub.bf16 1065369472, %v1791_v55 }
 0x27f   : > { %v1794_v14 = vmul.bf16 %v4665_v36, %v1698_v15  ;;  %v1681_v1 = vadd.bf16 1048723074, %v1665_v53  ;;  %v3602_v26 = vpop.eup %3601  ;;  %v1654_v48 = vadd.bf16 3197288082, %v1638_v10  ;;  %v1621_v55 = vadd.bf16 1068908470, %v1605_v13 }
 0x280   : > { %v1856_v7 = vsel %vm4725_vm3, %v1808_v29, %v1840_v54  ;;  %v1684_v39 = vadd.bf16 1048723074, %v1668_v59  ;;  %v1683_v63 = vadd.bf16 1048723074, %v1667_v24  ;;  %v1839_v27 = vsub.bf16 0, %v1807_v56 }
 0x281   : > { %v1872_v36 = vadd.bf16 1065369472, %v1856_v7  ;;  %v1810_v19 = vsub.bf16 1065369472, %v1794_v14  ;;  %v1697_v30 = vmul.bf16 %v1681_v1, %v4630_v34  ;;  %v3604_v18 = vpop.eup %3603  ;;  %v1670_v29 = vmul.bf16 %v1654_v48, %v4688_v57 }
 0x282   : > { %v1700_v44 = vmul.bf16 %v1684_v39, %v4669_v9  ;;  %v1699_v6 = vmul.bf16 %v1683_v63, %v4667_v32  ;;  %v5502_v15 = vmul.bf16 1060454197, %v4561_v45  ;;  %v5505_v53 = vmul.bf16 1056980736, %v4532_v60 }
 0x283   : > { %v1855_v34 = vsel %vm4740_vm4, %v1807_v56, %v1839_v27  ;;  %v1842_v54 = vsub.bf16 0, %v1810_v19  ;;  %v1793_v9 = vmul.bf16 %v4647_v49, %v1697_v30  ;;  %v1686_v13 = vadd.bf16 1048723074, %v1670_v29 }
 0x284   : > { %vm4788_vm8 = vcmp.ge.bf16.partialorder %v5502_v15, 0  ;;  %v1888_v10 = vmul.bf16 %v1872_v36, %v5505_v53  ;;  %v1871_v59 = vadd.bf16 1065369472, %v1855_v34  ;;  %v1796_v32 = vmul.bf16 %v4682_v61, %v1700_v44 }
 0x285   : > { %v1795_v24 = vmul.bf16 %v4674_v5, %v1699_v6  ;;  %v1858_v14 = vsel %vm4752_vm5, %v1810_v19, %v1842_v54  ;;  %v1809_v1 = vsub.bf16 1065369472, %v1793_v9  ;;  %v1637_v60 = vmul.bf16 %v1621_v55, %v4671_v52 }
 0x286   : > { %2136 = vmatprep.mubr.bf16.mxu0 %v1888_v10  ;;  %v1576_v7 = vmul.bf16 1065893768, %v4701_v42  ;;  %v5506_v50 = vmul.bf16 1060454197, %v4586_v17  ;;  %v5509_v49 = vmul.bf16 1056980736, %v4529_v46  ;;  %v1702_v20 = vmul.bf16 %v1686_v13, %v4688_v57 }
 0x287   : > { %v1874_v5 = vadd.bf16 1065369472, %v1858_v14  ;;  %v1812_v39 = vsub.bf16 1065369472, %v1796_v32  ;;  %v1811_v63 = vsub.bf16 1065369472, %v1795_v24 }
 0x288   : > { %vm4805_vm9 = vcmp.ge.bf16.partialorder %v5506_v50, 0  ;;  %v1887_v61 = vmul.bf16 %v1871_v59, %v5509_v49  ;;  %v1841_v48 = vsub.bf16 0, %v1809_v1  ;;  %v1653_v36 = vadd.bf16 3197288082, %v1637_v60 }
 0x289   : > { %v1592_v27 = vadd.bf16 3216687034, %v1576_v7  ;;  %v5510_v19 = vmul.bf16 1056980736, %v4548_v41  ;;  %v1844_v44 = vsub.bf16 0, %v1812_v39  ;;  %v1843_v6 = vsub.bf16 0, %v1811_v63  ;;  %v4820_v57 = vpop.eup %3605 }
 0x28a   : > { %2137 = vmatmul.mubr.bf16.gmra.mxu0 %v1887_v61  ;;  %v1575_v29 = vmul.bf16 1065893768, %v4693_v2  ;;  %v1857_v46 = vsel %vm4770_vm6, %v1809_v1, %v1841_v48  ;;  %v1798_v55 = vmul.bf16 %v4716_v28, %v1702_v20  ;;  %v1669_v15 = vmul.bf16 %v1653_v36, %v4671_v52 }
 0x28b   : > { %v1890_v30 = vmul.bf16 %v1874_v5, %v5510_v19  ;;  %v1608_v53 = vmul.bf16 %v1592_v27, %v4701_v42  ;;  %v4822_v10 = vmul.bf16 1065369472, %v3602_v26  ;;  %v1873_v41 = vadd.bf16 1065369472, %v1857_v46 }
 0x28c   : > { %v1860_v34 = vsel %vm4778_vm7, %v1812_v39, %v1844_v44  ;;  %v1591_v54 = vadd.bf16 3216687034, %v1575_v29  ;;  %v4826_v9 = vmul.bf16 1065369472, %v3604_v18  ;;  %v5511_v4 = vmul.bf16 1069105081, %v4698_v58 }
 0x28d   : > { %2146 = vmatprep.mubr.bf16.mxu0 %v1890_v30  ;;  %v1876_v28 = vadd.bf16 1065369472, %v1860_v34  ;;  %v1814_v59 = vsub.bf16 1065369472, %v1798_v55  ;;  %v1859_v32 = vsel %vm4788_vm8, %v1811_v63, %v1843_v6  ;;  %v1685_v24 = vadd.bf16 1048723074, %v1669_v15 }
 0x28e   : > { %3607 = vpow.bf16 %v5511_v4  ;;  %v1624_v13 = vadd.bf16 1068908470, %v1608_v53  ;;  %v1607_v26 = vmul.bf16 %v1591_v54, %v4693_v2  ;;  %v5512_v14 = vmul.bf16 1056980736, %v4542_v8 }
 0x28f   : > { %v5513_v33 = vmul.bf16 1056980736, %v4571_v43  ;;  %v1846_v18 = vsub.bf16 0, %v1814_v59  ;;  %v1578_v7 = vmul.bf16 1065893768, %v4765_v47  ;;  %v1701_v58 = vmul.bf16 %v1685_v24, %v4671_v52 }
 0x290   : > { %v1889_v1 = vmul.bf16 %v1873_v41, %v5512_v14  ;;  %v1640_v50 = vmul.bf16 %v1624_v13, %v4701_v42  ;;  %v1623_v49 = vadd.bf16 1068908470, %v1607_v26  ;;  %v1577_v38 = vmul.bf16 1065893768, %v4732_v51 }
 0x291   : > { %v1892_v60 = vmul.bf16 %v1876_v28, %v5513_v33  ;;  %v1862_v61 = vsel %vm4805_vm9, %v1814_v59, %v1846_v18  ;;  %v1594_v5 = vadd.bf16 3216687034, %v1578_v7  ;;  %v1580_v8 = vmul.bf16 1065893768, %v4826_v9 }
 0x292   : > { %v1579_v39 = vmul.bf16 1065893768, %v4822_v10  ;;  %2147 = vmatmul.mubr.bf16.gmra.mxu0 %v1889_v1  ;;  %v1878_v43 = vadd.bf16 1065369472, %v1862_v61  ;;  %v1797_v63 = vmul.bf16 %v4710_v40, %v1701_v58  ;;  %v1656_v48 = vadd.bf16 3197288082, %v1640_v50 }
 0x293   : > { %v1639_v52 = vmul.bf16 %v1623_v49, %v4693_v2  ;;  %2156 = vmatprep.mubr.bf16.mxu0 %v1892_v60  ;;  %v1610_v20 = vmul.bf16 %v1594_v5, %v4765_v47  ;;  %v1593_v36 = vadd.bf16 3216687034, %v1577_v38  ;;  %v1596_v27 = vadd.bf16 3216687034, %v1580_v8 }
 0x294   : > { %v1595_v19 = vadd.bf16 3216687034, %v1579_v39  ;;  %v1875_v56 = vadd.bf16 1065369472, %v1859_v32  ;;  %v1813_v30 = vsub.bf16 1065369472, %v1797_v63  ;;  %v1672_v44 = vmul.bf16 %v1656_v48, %v4701_v42 }
 0x295   : > { %v1655_v6 = vadd.bf16 3197288082, %v1639_v52  ;;  %v1626_v29 = vadd.bf16 1068908470, %v1610_v20  ;;  %v1609_v46 = vmul.bf16 %v1593_v36, %v4732_v51  ;;  %v1612_v55 = vmul.bf16 %v1596_v27, %v4826_v9 }
 0x296   : > { %v1611_v40 = vmul.bf16 %v1595_v19, %v4822_v10  ;;  %v5514_v15 = vmul.bf16 1056980736, %v4586_v17  ;;  %v1845_v41 = vsub.bf16 0, %v1813_v30  ;;  %v1688_v34 = vadd.bf16 1048723074, %v1672_v44 }
 0x297   : > { %v1671_v54 = vmul.bf16 %v1655_v6, %v4693_v2  ;;  %v1642_v4 = vmul.bf16 %v1626_v29, %v4765_v47  ;;  %v1625_v28 = vadd.bf16 1068908470, %v1609_v46  ;;  %v1628_v59 = vadd.bf16 1068908470, %v1612_v55 }
 0x298   : > { %v1894_v53 = vmul.bf16 %v1878_v43, %v5514_v15  ;;  %v1627_v32 = vadd.bf16 1068908470, %v1611_v40  ;;  %v5515_v24 = vmul.bf16 1060454197, %v4583_v23  ;;  %v5516_v13 = vmul.bf16 1056980736, %v4561_v45 }
 0x299   : > { %v1704_v14 = vmul.bf16 %v1688_v34, %v4701_v42  ;;  %v1687_v1 = vadd.bf16 1048723074, %v1671_v54  ;;  %v1658_v33 = vadd.bf16 3197288082, %v1642_v4  ;;  %v1641_v60 = vmul.bf16 %v1625_v28, %v4732_v51 }
 0x29a   : > { %vm1829_vm10 = vcmp.ge.bf16.partialorder %v5515_v24, 0  ;;  %v1891_v26 = vmul.bf16 %v1875_v56, %v5516_v13  ;;  %v1644_v18 = vmul.bf16 %v1628_v59, %v4826_v9  ;;  %v1643_v50 = vmul.bf16 %v1627_v32, %v4822_v10 }
 0x29b   : > { %v1861_v17 = vsel %vm1829_vm10, %v1813_v30, %v1845_v41  ;;  %v1800_v7 = vmul.bf16 %v4730_v0, %v1704_v14  ;;  %v1703_v58 = vmul.bf16 %v1687_v1, %v4693_v2  ;;  %v1461_v45 = vmul.bf16 1056980736, %v4583_v23  ;;  %v3469_v0 = vld [vmem:[#allocation5 + $0x68] sm:$0xff]  }
 0x29c   : > { %2157 = vmatmul.mubr.bf16.gmra.mxu0 %v1891_v26  ;;  %v3608_v49 = vpop.eup %3607  ;;  %v1674_v42 = vmul.bf16 %v1658_v33, %v4765_v47  ;;  %v1657_v38 = vadd.bf16 3197288082, %v1641_v60  ;;  %v1660_v61 = vadd.bf16 3197288082, %v1644_v18  ;;  %v1877_v5 = vadd.bf16 1065369472, %v1861_v17 }
 0x29d   : > { %2166 = vmatprep.mubr.bf16.mxu0 %v1894_v53  ;;  %v1816_v8 = vsub.bf16 1065369472, %v1800_v7  ;;  %v1799_v39 = vmul.bf16 %v4721_v31, %v1703_v58  ;;  %v1659_v43 = vadd.bf16 3197288082, %v1643_v50  ;;  %v5517_v63 = vmul.bf16 1060454197, %v4603_v11 }
 0x29e   : > { %v1690_v2 = vadd.bf16 1048723074, %v1674_v42  ;;  %v1673_v48 = vmul.bf16 %v1657_v38, %v4732_v51  ;;  %v1676_v23 = vmul.bf16 %v1660_v61, %v4826_v9  ;;  %v1464_v52 = vmul.bf16 1056980736, %v4610_v12 }
 0x29f   : > { %vm4871_vm11 = vcmp.ge.bf16.partialorder %v5517_v63, 0  ;;  %v1848_v20 = vsub.bf16 0, %v1816_v8  ;;  %v1815_v36 = vsub.bf16 1065369472, %v1799_v39  ;;  %v1675_v27 = vmul.bf16 %v1659_v43, %v4822_v10  ;;  %v3465_v43 = vld [vmem:[#allocation5 + $0x78] sm:$0xff]  }
 0x2a0   : > { %v5520_v31 = vmul.bf16 1060454197, %v4610_v12  ;;  %v1706_v19 = vmul.bf16 %v1690_v2, %v4765_v47  ;;  %v1689_v56 = vadd.bf16 1048723074, %v1673_v48  ;;  %v1692_v30 = vadd.bf16 1048723074, %v1676_v23  ;;  %3279 = vmatprep.subr.bf16.mxu1 %v3465_v43  ;;  %3215 = vmatprep.subr.bf16.mxu0 %v3465_v43 }
 0x2a1   : > { %v1893_v44 = vmul.bf16 %v1877_v5, %v1461_v45  ;;  %v1847_v29 = vsub.bf16 0, %v1815_v36  ;;  %v1691_v46 = vadd.bf16 1048723074, %v1675_v27  ;;  %v1466_v13 = vmul.bf16 1056980736, %v4628_v62  ;;  %v3466_v63 = vld [vmem:[#allocation5 + $0x38] sm:$0xff]  }
 0x2a2   : > { %vm1832_vm12 = vcmp.ge.bf16.partialorder %v5520_v31, 0  ;;  %v1802_v40 = vmul.bf16 %v4756_v21, %v1706_v19  ;;  %v1705_v15 = vmul.bf16 %v1689_v56, %v4732_v51  ;;  %v1708_v53 = vmul.bf16 %v1692_v30, %v4826_v9  ;;  %3287 = vmatpush3.bf16.msra.mxu1 %v3466_v63  ;;  %3216 = vmatpush3.bf16.msra.mxu0 %v3466_v63  ;;  %v3470_v2 = vld [vmem:[#allocation5 + $0x28] sm:$0xff]   ;;  %v3472_v48 = vld [vmem:[#allocation5 + $0x20] sm:$0xff]   ;;  %v3473_v23 = vld [vmem:[#allocation5 + $0x58] sm:$0xff]  }
 0x2a3   : > { %v1864_v6 = vsel %vm1832_vm12, %v1816_v8, %v1848_v20  ;;  %v1863_v12 = vsel %vm4871_vm11, %v1815_v36, %v1847_v29  ;;  %v1707_v41 = vmul.bf16 %v1691_v46, %v4822_v10  ;;  %v1463_v51 = vmul.bf16 1056980736, %v4603_v11  ;;  %v3475_v20 = vld [vmem:[#allocation5 + $0x50] sm:$0xff]   ;;  %v3477_v27 = vld [vmem:[#allocation5 + $0x48] sm:$0xff]   ;;  %v3479_v19 = vld [vmem:[#allocation5 + $0x40] sm:$0xff]  }
 0x2a4   : > { %v1880_v55 = vadd.bf16 1065369472, %v1864_v6  ;;  %2167 = vmatmul.mubr.bf16.gmra.mxu0 %v1893_v44  ;;  %v1818_v34 = vsub.bf16 1065369472, %v1802_v40  ;;  %v1801_v54 = vmul.bf16 %v4748_v16, %v1705_v15  ;;  %v1879_v4 = vadd.bf16 1065369472, %v1863_v12 }
 0x2a5   : > { %v1804_v28 = vmul.bf16 %v3608_v49, %v1708_v53  ;;  %v1803_v21 = vmul.bf16 %v4820_v57, %v1707_v41  ;;  %v5521_v9 = vmul.bf16 1060454197, %v4628_v62  ;;  %v5522_v14 = vmul.bf16 1060454197, %v4624_v25  ;;  %v3476_v36 = vld [vmem:[#allocation5 + $0x10] sm:$0xff]   ;;  %v3478_v31 = vld [vmem:[#allocation5 + $0x8] sm:$0xff]  }
 0x2a6   : > { %v1896_v47 = vmul.bf16 %v1880_v55, %v1464_v52  ;;  %v1850_v59 = vsub.bf16 0, %v1818_v34  ;;  %v1817_v32 = vsub.bf16 1065369472, %v1801_v54  ;;  %v1895_v16 = vmul.bf16 %v1879_v4, %v1463_v51  ;;  %v3474_v52 = vld [vmem:[#allocation5 + $0x18] sm:$0xff]   ;;  %v3480_v56 = vld [vmem:[#allocation5] sm:$0xff]  }
 0x2a7   : > { %vm1834_vm13 = vcmp.ge.bf16.partialorder %v5521_v9, 0  ;;  %v1820_v24 = vsub.bf16 1065369472, %v1804_v28  ;;  %vm1833_vm14 = vcmp.ge.bf16.partialorder %v5522_v14, 0  ;;  %v5523_v33 = vmul.bf16 1060454197, %v4662_v37 }
 0x2a8   : > { %2176 = vmatprep.mubr.bf16.mxu0 %v1896_v47  ;;  %v1866_v10 = vsel %vm1834_vm13, %v1818_v34, %v1850_v59  ;;  %v1849_v26 = vsub.bf16 0, %v1817_v32  ;;  %v1819_v60 = vsub.bf16 1065369472, %v1803_v21  ;;  %v1468_v62 = vmul.bf16 1056980736, %v4662_v37  ;;  %v3468_v37 = vld [vmem:[#allocation5 + $0x30] sm:$0xff]  }
 0x2a9   : > { %v1882_v1 = vadd.bf16 1065369472, %v1866_v10  ;;  %v1852_v17 = vsub.bf16 0, %v1820_v24  ;;  %vm1836_vm15 = vcmp.ge.bf16.partialorder %v5523_v33, 0  ;;  %v1465_v49 = vmul.bf16 1056980736, %v4624_v25 }
 0x2aa   : > { %v1865_v57 = vsel %vm1833_vm14, %v1817_v32, %v1849_v26  ;;  %v1851_v50 = vsub.bf16 0, %v1819_v60  ;;  %v5524_v42 = vmul.bf16 1060454197, %v4659_v22  ;;  %v1467_v8 = vmul.bf16 1056980736, %v4659_v22  ;;  %v3467_v25 = vld [vmem:[#allocation5 + $0x70] sm:$0xff]  }
 0x2ab   : > { %v1898_v11 = vmul.bf16 %v1882_v1, %v1466_v13  ;;  %v1868_v18 = vsel %vm1836_vm15, %v1820_v24, %v1852_v17  ;;  %v1881_v58 = vadd.bf16 1065369472, %v1865_v57  ;;  %3280 = vmatprep.subr.bf16.mxu1 %v3467_v25  ;;  %3217 = vmatprep.subr.bf16.mxu0 %v3467_v25  ;;  %v3471_v22 = vld [vmem:[#allocation5 + $0x60] sm:$0xff]  }
 0x2ac   : > { %2177 = vmatmul.mubr.bf16.gmra.mxu0 %v1895_v16  ;;  %v1884_v7 = vadd.bf16 1065369472, %v1868_v18  ;;  %vm1835_vm0 = vcmp.ge.bf16.partialorder %v5524_v42, 0  ;;  %3288 = vmatpush3.bf16.msra.mxu1 %v3468_v37 }
 0x2ad   : > { %2186 = vmatprep.mubr.bf16.mxu0 %v1898_v11  ;;  %v1897_v38 = vmul.bf16 %v1881_v58, %v1465_v49  ;;  %v1867_v61 = vsel %vm1835_vm0, %v1819_v60, %v1851_v50  ;;  %3218 = vmatpush3.bf16.msra.mxu0 %v3468_v37  ;;  %v3192_v30 = vld.sshfl [vmem:[%s5398_s6] sm:$0x11 pattern:$0x75316420] }
 0x2ae   : > { %v1900_v45 = vmul.bf16 %v1884_v7, %v1468_v62  ;;  %v1883_v5 = vadd.bf16 1065369472, %v1867_v61  ;;  %3281 = vmatprep.subr.bf16.mxu1 %v3469_v0  ;;  %3219 = vmatprep.subr.bf16.mxu0 %v3469_v0  ;;  %v2231_v44 = vcombine.high %v3192_v30, %v3192_v30  ;;  %v2238_v6 = vrot.slane %v3192_v30, %v4086_v3 }
 0x2b0   : > { %v1899_v39 = vmul.bf16 %v1883_v5, %v1467_v8  ;;  %3289 = vmatpush3.bf16.msra.mxu1 %v3470_v2  ;;  %v2245_v29 = vrot.slane %v2231_v44, %v4086_v3  ;;  %v2247_v46 = vpack.i.b16 %v2238_v6, %v2238_v6 }
 0x2b1   : > { %3220 = vmatpush3.bf16.msra.mxu0 %v3470_v2  ;;  %3282 = vmatprep.subr.bf16.mxu1 %v3471_v22 }
 0x2b2   : > { %3221 = vmatprep.subr.bf16.mxu0 %v3471_v22  ;;  %v2254_v40 = vpack.i.b16 %v2245_v29, %v2245_v29  ;;  %v4909_v53 = vrot.slane %v2247_v46, %v5487_v35 }
 0x2b4   : > { %2187 = vmatmul.mubr.bf16.gmra.mxu0 %v1897_v38  ;;  %3290 = vmatpush3.bf16.msra.mxu1 %v3472_v48  ;;  %v4912_v47 = vrot.slane %v2254_v40, %v5487_v35 }
 0x2b5   : > { %2196 = vmatprep.mubr.bf16.mxu0 %v1900_v45  ;;  %3222 = vmatpush3.bf16.msra.mxu0 %v3472_v48 }
 0x2b6   : > { %3223 = vmatprep.subr.bf16.mxu0 %v3473_v23  ;;  %3283 = vmatprep.subr.bf16.mxu1 %v3473_v23 }
 0x2b8   : > { %3291 = vmatpush3.bf16.msra.mxu1 %v3474_v52 }
 0x2b9   : > { %3224 = vmatpush3.bf16.msra.mxu0 %v3474_v52  ;;  %3284 = vmatprep.subr.bf16.mxu1 %v3475_v20 }
 0x2ba   : > { %3225 = vmatprep.subr.bf16.mxu0 %v3475_v20 }
 0x2bc   : > { %2197 = vmatmul.mubr.bf16.gmra.mxu0 %v1899_v39  ;;  %3292 = vmatpush3.bf16.msra.mxu1 %v3476_v36 }
 0x2bd   : > { %3226 = vmatpush3.bf16.msra.mxu0 %v3476_v36  ;;  %3285 = vmatprep.subr.bf16.mxu1 %v3477_v27 }
 0x2be   : > { %3227 = vmatprep.subr.bf16.mxu0 %v3477_v27 }
 0x2c0   : > { %3293 = vmatpush3.bf16.msra.mxu1 %v3478_v31 }
 0x2c1   : > { %3228 = vmatpush3.bf16.msra.mxu0 %v3478_v31  ;;  %3286 = vmatprep.subr.bf16.mxu1 %v3479_v19 }
 0x2c2   : > { %3229 = vmatprep.subr.bf16.mxu0 %v3479_v19 }
 0x2c4   : > { %3294 = vmatpush3.bf16.msra.mxu1 %v3480_v56 }
 0x2c5   : > { %3230 = vmatpush3.bf16.msra.mxu0 %v3480_v56 }
 0x332   : > { %v2128_v55 = vpop.f32.mrf.mxu0 }
 0x334   : > { %v2130_v15 = vpop.f32.mrf.mxu0 }
 0x336   : > { %v2132_v12 = vpop.f32.mrf.mxu0 }
 0x337   : > { %v2207_v41 = vpack.c.bf16 %v2132_v12, %v2128_v55 }
 0x338   : > { %v2134_v34 = vpop.f32.mrf.mxu0 }
 0x339   : > { %v4915_v54 = vadd.bf16 %v4909_v53, %v2207_v41  ;;  %v2208_v4 = vpack.c.bf16 %v2134_v34, %v2130_v15 }
 0x33b   : > { %v2292_v28 = vmul.bf16 1060454197, %v4915_v54  ;;  %v4919_v3 = vadd.bf16 %v4912_v47, %v2208_v4 }
 0x33d   : > { %v2308_v59 = vand.u32 2147450879, %v2292_v28  ;;  %v2293_v32 = vmul.bf16 1060454197, %v4919_v3  ;;  %vm4987_vm1 = vcmp.ge.bf16.partialorder %v2292_v28, 0 }
 0x33f   : > { %v2324_v21 = vmul.bf16 1051213480, %v2308_v59  ;;  %v2309_v51 = vand.u32 2147450879, %v2293_v32  ;;  %v2532_v14 = vsub.bf16 0, %v2308_v59  ;;  %vm5058_vm2 = vcmp.ge.bf16.partialorder %v2293_v32, 0 }
 0x341   : > { %v2340_v9 = vadd.bf16 1065369472, %v2324_v21  ;;  %v2325_v24 = vmul.bf16 1051213480, %v2309_v51  ;;  %v2548_v60 = vmul.bf16 %v2532_v14, %v2308_v59  ;;  %v2533_v22 = vsub.bf16 0, %v2309_v51 }
 0x343   : > { %3609 = vrcp.bf16 %v2340_v9  ;;  %v2341_v13 = vadd.bf16 1065369472, %v2325_v24  ;;  %v2565_v42 = vmul.bf16 1069105081, %v2548_v60  ;;  %v2549_v30 = vmul.bf16 %v2533_v22, %v2309_v51 }
 0x344   : > { %v2276_v24 = vmul.bf16 1056980736, %v4915_v54 }
 0x345   : > { %3611 = vrcp.bf16 %v2341_v13  ;;  %v2568_v13 = vmul.bf16 1069105081, %v2549_v30 }
 0x346   : > { %3613 = vpow.bf16 %v2565_v42 }
 0x34a   : > { %v2138_v10 = vpop.f32.mrf.mxu0 }
 0x34c   : > { %v2140_v26 = vpop.f32.mrf.mxu0 }
 0x34e   : > { %v2142_v16 = vpop.f32.mrf.mxu0 }
 0x34f   : > { %v2209_v1 = vpack.c.bf16 %v2142_v16, %v2138_v10 }
 0x350   : > { %v2144_v17 = vpop.f32.mrf.mxu0 }
 0x351   : > { %v4927_v33 = vadd.bf16 %v4909_v53, %v2209_v1  ;;  %v2210_v57 = vpack.c.bf16 %v2144_v17, %v2140_v26  ;;  %v3610_v18 = vpop.eup %3609 }
 0x352   : > { %v2148_v11 = vpop.f32.mrf.mxu0  ;;  %v4933_v62 = vmul.bf16 1065369472, %v3610_v18 }
 0x353   : > { %v2294_v7 = vmul.bf16 1060454197, %v4927_v33  ;;  %v4931_v58 = vadd.bf16 %v4912_v47, %v2210_v57  ;;  %v3612_v49 = vpop.eup %3611  ;;  %v2277_v57 = vmul.bf16 1056980736, %v4919_v3 }
 0x354   : > { %v2150_v50 = vpop.f32.mrf.mxu0  ;;  %v2388_v45 = vmul.bf16 1065893768, %v4933_v62  ;;  %v4939_v43 = vmul.bf16 1065369472, %v3612_v49 }
 0x355   : > { %v2295_v38 = vmul.bf16 1060454197, %v4931_v58  ;;  %v2310_v5 = vand.u32 2147450879, %v2294_v7  ;;  %vm5163_vm5 = vcmp.ge.bf16.partialorder %v2294_v7, 0 }
 0x356   : > { %v2152_v61 = vpop.f32.mrf.mxu0  ;;  %v2404_v39 = vadd.bf16 3216687034, %v2388_v45  ;;  %v2389_v31 = vmul.bf16 1065893768, %v4939_v43 }
 0x357   : > { %v2211_v8 = vpack.c.bf16 %v2152_v61, %v2148_v11  ;;  %v4943_v25 = vand.u32 2147450879, %v2295_v38  ;;  %v2326_v23 = vmul.bf16 1051213480, %v2310_v5  ;;  %v2534_v41 = vsub.bf16 0, %v2310_v5 }
 0x358   : > { %v2154_v63 = vpop.f32.mrf.mxu0  ;;  %v2420_v2 = vmul.bf16 %v2404_v39, %v4933_v62  ;;  %v2405_v12 = vadd.bf16 3216687034, %v2389_v31  ;;  %vm5141_vm4 = vcmp.ge.bf16.partialorder %v2295_v38, 0 }
 0x359   : > { %v4946_v37 = vadd.bf16 %v4909_v53, %v2211_v8  ;;  %v2212_v0 = vpack.c.bf16 %v2154_v63, %v2150_v50  ;;  %v2327_v19 = vmul.bf16 1051213480, %v4943_v25  ;;  %v2342_v6 = vadd.bf16 1065369472, %v2326_v23 }
 0x35a   : > { %v2436_v20 = vadd.bf16 1068908470, %v2420_v2  ;;  %v2421_v17 = vmul.bf16 %v2405_v12, %v4939_v43  ;;  %v2550_v60 = vmul.bf16 %v2534_v41, %v2310_v5  ;;  %v2535_v50 = vsub.bf16 0, %v4943_v25 }
 0x35b   : > { %v2296_v52 = vmul.bf16 1060454197, %v4946_v37  ;;  %v4951_v36 = vadd.bf16 %v4912_v47, %v2212_v0  ;;  %v2343_v34 = vadd.bf16 1065369472, %v2327_v19  ;;  %3615 = vrcp.bf16 %v2342_v6  ;;  %v3614_v0 = vpop.eup %3613 }
 0x35c   : > { %v2158_v48 = vpop.f32.mrf.mxu0  ;;  %v2452_v56 = vmul.bf16 %v2436_v20, %v4933_v62  ;;  %v2571_v31 = vmul.bf16 1069105081, %v2550_v60  ;;  %v2551_v19 = vmul.bf16 %v2535_v50, %v4943_v25 }
 0x35d   : > { %v2312_v29 = vand.u32 2147450879, %v2296_v52  ;;  %v2297_v46 = vmul.bf16 1060454197, %v4951_v36  ;;  %3617 = vrcp.bf16 %v2343_v34  ;;  %vm5182_vm7 = vcmp.ge.bf16.partialorder %v2296_v52, 0 }
 0x35e   : > { %v2160_v27 = vpop.f32.mrf.mxu0  ;;  %v2468_v40 = vadd.bf16 3197288082, %v2452_v56  ;;  %3619 = vpow.bf16 %v2568_v13  ;;  %v5548_v7 = vmul.bf16 1056980736, %v4951_v36 }
 0x35f   : > { %v2313_v4 = vand.u32 2147450879, %v2297_v46  ;;  %v2328_v10 = vmul.bf16 1051213480, %v2312_v29  ;;  %v2536_v49 = vsub.bf16 0, %v2312_v29  ;;  %vm5175_vm6 = vcmp.ge.bf16.partialorder %v2297_v46, 0 }
 0x360   : > { %v2162_v44 = vpop.f32.mrf.mxu0  ;;  %v2484_v59 = vmul.bf16 %v2468_v40, %v4933_v62 }
 0x361   : > { %v2213_v55 = vpack.c.bf16 %v2162_v44, %v2158_v48  ;;  %v2329_v11 = vmul.bf16 1051213480, %v2313_v4  ;;  %v2344_v8 = vadd.bf16 1065369472, %v2328_v10  ;;  %v2552_v56 = vmul.bf16 %v2536_v49, %v2312_v29 }
 0x362   : > { %v2164_v15 = vpop.f32.mrf.mxu0  ;;  %v2500_v26 = vadd.bf16 1048723074, %v2484_v59  ;;  %v2537_v6 = vsub.bf16 0, %v2313_v4 }
 0x363   : > { %v4963_v21 = vadd.bf16 %v4909_v53, %v2213_v55  ;;  %v2214_v51 = vpack.c.bf16 %v2164_v15, %v2160_v27  ;;  %v2345_v23 = vadd.bf16 1065369472, %v2329_v11  ;;  %3621 = vrcp.bf16 %v2344_v8 }
 0x364   : > { %v2168_v9 = vpop.f32.mrf.mxu0  ;;  %v2516_v18 = vmul.bf16 %v2500_v26, %v4933_v62  ;;  %v2437_v62 = vadd.bf16 1068908470, %v2421_v17  ;;  %v2577_v26 = vmul.bf16 1069105081, %v2552_v56 }
 0x365   : > { %v2298_v14 = vmul.bf16 1060454197, %v4963_v21  ;;  %v4968_v16 = vadd.bf16 %v4912_v47, %v2214_v51 }
 0x366   : > { %v2170_v1 = vpop.f32.mrf.mxu0  ;;  %v2612_v48 = vmul.bf16 %v3614_v0, %v2516_v18  ;;  %v2453_v25 = vmul.bf16 %v2437_v62, %v4939_v43 }
 0x367   : > { %v2314_v45 = vand.u32 2147450879, %v2298_v14  ;;  %v2299_v39 = vmul.bf16 1060454197, %v4968_v16  ;;  %vm5091_vm3 = vcmp.ge.bf16.partialorder %v2298_v14, 0 }
 0x368   : > { %v2172_v42 = vpop.f32.mrf.mxu0  ;;  %v2628_v29 = vsub.bf16 1065369472, %v2612_v48 }
 0x369   : > { %v2215_v63 = vpack.c.bf16 %v2172_v42, %v2168_v9  ;;  %v2330_v2 = vmul.bf16 1051213480, %v2314_v45  ;;  %v2315_v20 = vand.u32 2147450879, %v2299_v39  ;;  %v2538_v55 = vsub.bf16 0, %v2314_v45  ;;  %v3616_v8 = vpop.eup %3615 }
 0x36a   : > { %v2174_v22 = vpop.f32.mrf.mxu0  ;;  %v2574_v9 = vmul.bf16 1069105081, %v2551_v19  ;;  %vm5196_vm8 = vcmp.ge.bf16.partialorder %v2299_v39, 0 }
 0x36b   : > { %v4982_v27 = vadd.bf16 %v4909_v53, %v2215_v63  ;;  %v2346_v30 = vadd.bf16 1065369472, %v2330_v2  ;;  %v2216_v40 = vpack.c.bf16 %v2174_v22, %v2170_v1  ;;  %v2331_v59 = vmul.bf16 1051213480, %v2315_v20 }
 0x36c   : > { %v2178_v44 = vpop.f32.mrf.mxu0  ;;  %v2553_v1 = vmul.bf16 %v2537_v6, %v2313_v4  ;;  %v2554_v60 = vmul.bf16 %v2538_v55, %v2314_v45  ;;  %v2539_v11 = vsub.bf16 0, %v2315_v20  ;;  %v2660_v63 = vsub.bf16 0, %v2628_v29 }
 0x36d   : > { %3623 = vrcp.bf16 %v2346_v30  ;;  %v5430_v41 = vmul.bf16 1060454197, %v4982_v27  ;;  %v4995_v51 = vadd.bf16 %v4912_v47, %v2216_v40  ;;  %v2347_v0 = vadd.bf16 1065369472, %v2331_v59 }
 0x36e   : > { %v2180_v34 = vpop.f32.mrf.mxu0  ;;  %3625 = vrcp.bf16 %v2345_v23  ;;  %v2469_v22 = vadd.bf16 3197288082, %v2453_v25  ;;  %v2580_v30 = vmul.bf16 1069105081, %v2553_v1  ;;  %v2555_v6 = vmul.bf16 %v2539_v11, %v2315_v20 }
 0x36f   : > { %3627 = vpow.bf16 %v2571_v31  ;;  %v2316_v13 = vand.u32 2147450879, %v5430_v41  ;;  %v2301_v50 = vmul.bf16 1060454197, %v4995_v51  ;;  %v3618_v31 = vpop.eup %3617 }
 0x370   : > { %v2182_v10 = vpop.f32.mrf.mxu0  ;;  %3629 = vpow.bf16 %v2574_v9  ;;  %v2485_v59 = vmul.bf16 %v2469_v22, %v4939_v43  ;;  %v3620_v9 = vpop.eup %3619 }
 0x371   : > { %v2332_v18 = vmul.bf16 1051213480, %v2316_v13  ;;  %v2217_v49 = vpack.c.bf16 %v2182_v10, %v2178_v44  ;;  %v2540_v48 = vsub.bf16 0, %v2316_v13  ;;  %v2317_v4 = vand.u32 2147450879, %v2301_v50 }
 0x372   : > { %v2184_v42 = vpop.f32.mrf.mxu0  ;;  %3631 = vpow.bf16 %v2577_v26  ;;  %v2583_v44 = vmul.bf16 1069105081, %v2554_v60  ;;  %v5015_v10 = vmul.bf16 1065369472, %v3616_v8  ;;  %v5017_v26 = vmul.bf16 1065369472, %v3618_v31 }
 0x373   : > { %v2218_v2 = vpack.c.bf16 %v2184_v42, %v2180_v34  ;;  %v2348_v62 = vadd.bf16 1065369472, %v2332_v18  ;;  %v5006_v19 = vadd.bf16 %v4909_v53, %v2217_v49  ;;  %v2333_v55 = vmul.bf16 1051213480, %v2317_v4 }
 0x374   : > { %v2188_v23 = vpop.f32.mrf.mxu0  ;;  %v2676_v34 = vsel %vm4987_vm1, %v2628_v29, %v2660_v63  ;;  %3633 = vrcp.bf16 %v2347_v0  ;;  %v2556_v18 = vmul.bf16 %v2540_v48, %v2316_v13  ;;  %v2586_v49 = vmul.bf16 1069105081, %v2555_v6  ;;  %v3622_v0 = vpop.eup %3621 }
 0x375   : > { %v5009_v56 = vadd.bf16 %v4912_v47, %v2218_v2  ;;  %v5426_v25 = vmul.bf16 1060454197, %v5006_v19  ;;  %3635 = vrcp.bf16 %v2348_v62  ;;  %v2349_v60 = vadd.bf16 1065369472, %v2333_v55 }
 0x376   : > { %v2190_v40 = vpop.f32.mrf.mxu0  ;;  %v2692_v11 = vadd.bf16 1065369472, %v2676_v34  ;;  %3637 = vpow.bf16 %v2580_v30  ;;  %v2541_v42 = vsub.bf16 0, %v2317_v4  ;;  %v2501_v13 = vadd.bf16 1048723074, %v2485_v59 }
 0x377   : > { %v2318_v20 = vand.u32 2147450879, %v5426_v25  ;;  %v5427_v15 = vmul.bf16 1060454197, %v5009_v56  ;;  %3639 = vpow.bf16 %v2583_v44  ;;  %v2589_v34 = vmul.bf16 1069105081, %v2556_v18 }
 0x378   : > { %v2192_v1 = vpop.f32.mrf.mxu0  ;;  %3641 = vrcp.bf16 %v2349_v60  ;;  %v2557_v25 = vmul.bf16 %v2541_v42, %v2317_v4  ;;  %v2517_v18 = vmul.bf16 %v2501_v13, %v4939_v43  ;;  %v5042_v60 = vmul.bf16 1065369472, %v3622_v0 }
 0x379   : > { %v2219_v29 = vpack.c.bf16 %v2192_v1, %v2188_v23  ;;  %v2334_v8 = vmul.bf16 1051213480, %v2318_v20  ;;  %v2319_v2 = vand.u32 2147450879, %v5427_v15  ;;  %v2542_v48 = vsub.bf16 0, %v2318_v20 }
 0x37a   : > { %v2194_v63 = vpop.f32.mrf.mxu0  ;;  %vm5203_vm9 = vcmp.ge.bf16.partialorder %v2301_v50, 0 }
 0x37b   : > { %v3624_v22 = vpop.eup %3623  ;;  %v5026_v31 = vadd.bf16 %v4909_v53, %v2219_v29  ;;  %v2220_v23 = vpack.c.bf16 %v2194_v63, %v2190_v40  ;;  %v2350_v44 = vadd.bf16 1065369472, %v2334_v8  ;;  %v2335_v15 = vmul.bf16 1051213480, %v2319_v2 }
 0x37c   : > { %v2198_v55 = vpop.f32.mrf.mxu0  ;;  %v3626_v30 = vpop.eup %3625  ;;  %v5028_v6 = vmul.bf16 1065369472, %v3624_v22  ;;  %v5038_v40 = vmul.bf16 %v2692_v11, %v2276_v24  ;;  %v2558_v4 = vmul.bf16 %v2542_v48, %v2318_v20  ;;  %v2592_v11 = vmul.bf16 1069105081, %v2557_v25 }
 0x37d   : > { %v5030_v1 = vpop.eup %3627  ;;  %v5428_v59 = vmul.bf16 1060454197, %v5026_v31  ;;  %v5034_v12 = vadd.bf16 %v4912_v47, %v2220_v23  ;;  %3643 = vrcp.bf16 %v2350_v44  ;;  %v5044_v63 = vmul.bf16 1065369472, %v3626_v30 }
 0x37e   : > { %v2200_v62 = vpop.f32.mrf.mxu0  ;;  %v2394_v29 = vmul.bf16 1065893768, %v5028_v6  ;;  %3645 = vpow.bf16 %v2586_v49  ;;  %v2543_v23 = vsub.bf16 0, %v2319_v2  ;;  %v5049_v24 = vpop.eup %3629  ;;  %v2351_v44 = vadd.bf16 1065369472, %v2335_v15 }
 0x37f   : > { %v2320_v42 = vand.u32 2147450879, %v5428_v59  ;;  %v5429_v54 = vmul.bf16 1060454197, %v5034_v12  ;;  %3647 = vpow.bf16 %v2589_v34  ;;  %v2595_v34 = vmul.bf16 1069105081, %v2558_v4 }
 0x380   : > { %v2202_v8 = vpop.f32.mrf.mxu0  ;;  %v2410_v22 = vadd.bf16 3216687034, %v2394_v29  ;;  %v5051_v13 = vpop.eup %3631  ;;  %v2613_v29 = vmul.bf16 %v3620_v9, %v2517_v18  ;;  %v2391_v59 = vmul.bf16 1065893768, %v5017_v26  ;;  %v2559_v28 = vmul.bf16 %v2543_v23, %v2319_v2 }
 0x381   : > { %v2336_v43 = vmul.bf16 1051213480, %v2320_v42  ;;  %v2321_v48 = vand.u32 2147450879, %v5429_v54  ;;  %v2221_v30 = vpack.c.bf16 %v2202_v8, %v2198_v55  ;;  %3649 = vrcp.bf16 %v2351_v44 }
 0x382   : > { %v2204_v0 = vpop.f32.mrf.mxu0  ;;  %v2426_v20 = vmul.bf16 %v2410_v22, %v5028_v6  ;;  %v3634_v45 = vpop.eup %3633  ;;  %v2544_v9 = vsub.bf16 0, %v2320_v42  ;;  %v2629_v8 = vsub.bf16 1065369472, %v2613_v29 }
 0x383   : > { %v2352_v25 = vadd.bf16 1065369472, %v2336_v43  ;;  %v2222_v15 = vpack.c.bf16 %v2204_v0, %v2200_v62  ;;  %v2337_v22 = vmul.bf16 1051213480, %v2321_v48  ;;  %v5064_v61 = vadd.bf16 %v4909_v53, %v2221_v30  ;;  %v3636_v55 = vpop.eup %3635 }
 0x384   : > { %v2442_v17 = vadd.bf16 1068908470, %v2426_v20  ;;  %v2545_v18 = vsub.bf16 0, %v2321_v48  ;;  %v5071_v43 = vpop.eup %3637  ;;  %v5073_v2 = vmul.bf16 1065369472, %v3634_v45  ;;  %v2560_v30 = vmul.bf16 %v2544_v9, %v2320_v42 }
 0x385   : > { %v5067_v32 = vadd.bf16 %v4912_v47, %v2222_v15  ;;  %3651 = vrcp.bf16 %v2352_v25  ;;  %v5431_v62 = vmul.bf16 1060454197, %v5064_v61  ;;  %v2353_v53 = vadd.bf16 1065369472, %v2337_v22  ;;  %v3640_v44 = vpop.eup %3639 }
 0x386   : > { %v2458_v4 = vmul.bf16 %v2442_v17, %v5028_v6  ;;  %3653 = vpow.bf16 %v2592_v11  ;;  %v2598_v20 = vmul.bf16 1069105081, %v2559_v28  ;;  %v5078_v17 = vmul.bf16 1065369472, %v3636_v55  ;;  %v3642_v29 = vpop.eup %3641 }
 0x387   : > { %v5432_v23 = vmul.bf16 1060454197, %v5067_v32  ;;  %3655 = vpow.bf16 %v2595_v34  ;;  %v2322_v47 = vand.u32 2147450879, %v5431_v62  ;;  %v5080_v25 = vmul.bf16 %v2545_v18, %v2321_v48 }
 0x388   : > { %v2474_v0 = vadd.bf16 3197288082, %v2458_v4  ;;  %v2661_v54 = vsub.bf16 0, %v2629_v8  ;;  %3657 = vrcp.bf16 %v2353_v53  ;;  %v2407_v4 = vadd.bf16 3216687034, %v2391_v59 }
 0x389   : > { %v2323_v45 = vand.u32 2147450879, %v5432_v23  ;;  %v2338_v15 = vmul.bf16 1051213480, %v2322_v47  ;;  %v2546_v22 = vsub.bf16 0, %v2322_v47  ;;  %3659 = vpow.bf16 %v2598_v20 }
 0x38a   : > { %v2490_v11 = vmul.bf16 %v2474_v0, %v5028_v6  ;;  %v2677_v42 = vsel %vm5058_vm2, %v2629_v8, %v2661_v54  ;;  %v5095_v9 = vmul.bf16 1065369472, %v3642_v29  ;;  %v2601_v18 = vmul.bf16 1069105081, %v2560_v30 }
 0x38b   : > { %v2339_v34 = vmul.bf16 1051213480, %v2323_v45  ;;  %v2547_v28 = vsub.bf16 0, %v2323_v45  ;;  %v3644_v41 = vpop.eup %3643  ;;  %v2354_v55 = vadd.bf16 1065369472, %v2338_v15  ;;  %v5085_v5 = vmul.bf16 %v2546_v22, %v2322_v47 }
 0x38c   : > { %v2506_v62 = vadd.bf16 1048723074, %v2490_v11  ;;  %v2693_v53 = vadd.bf16 1065369472, %v2677_v42  ;;  %v5097_v59 = vpop.eup %3645  ;;  %v2423_v54 = vmul.bf16 %v2407_v4, %v5017_v26  ;;  %v5104_v14 = vmul.bf16 1065369472, %v3644_v41 }
 0x38d   : > { %3661 = vrcp.bf16 %v2354_v55  ;;  %v5102_v49 = vpop.eup %3647  ;;  %v2355_v8 = vadd.bf16 1065369472, %v2339_v34  ;;  %v2390_v20 = vmul.bf16 1065893768, %v5015_v10  ;;  %v5110_v15 = vmul.bf16 %v2547_v28, %v2323_v45 }
 0x38e   : > { %v2522_v0 = vmul.bf16 %v2506_v62, %v5028_v6  ;;  %v2709_v29 = vmul.bf16 %v2693_v53, %v2277_v57  ;;  %v2439_v6 = vadd.bf16 1068908470, %v2423_v54  ;;  %3663 = vpow.bf16 %v2601_v18 }
 0x38f   : > { %v2406_v62 = vadd.bf16 3216687034, %v2390_v20  ;;  %v2393_v22 = vmul.bf16 1065893768, %v5044_v63  ;;  %v2392_v41 = vmul.bf16 1065893768, %v5042_v60  ;;  %v3650_v34 = vpop.eup %3649  ;;  %3665 = vrcp.bf16 %v2355_v8 }
 0x390   : > { %v2618_v30 = vmul.bf16 %v3640_v44, %v2522_v0  ;;  %2885 = vmatprep.mubr.bf16.mxu0 %v2709_v29  ;;  %v2455_v3 = vmul.bf16 %v2439_v6, %v5017_v26  ;;  %v2395_v57 = vmul.bf16 1065893768, %v5073_v2  ;;  %v2397_v44 = vmul.bf16 1065893768, %v5095_v9 }
 0x391   : > { %2886 = vmatmul.mubr.bf16.vlgmr.msra.gmra.mxu0 %v5038_v40  ;;  %v2422_v45 = vmul.bf16 %v2406_v62, %v5015_v10  ;;  %v2409_v28 = vadd.bf16 3216687034, %v2393_v22  ;;  %v2408_v55 = vadd.bf16 3216687034, %v2392_v41  ;;  %v2396_v42 = vmul.bf16 1065893768, %v5078_v17 }
 0x392   : > { %v2634_v4 = vsub.bf16 1065369472, %v2618_v30  ;;  %v2471_v54 = vadd.bf16 3197288082, %v2455_v3  ;;  %v2411_v6 = vadd.bf16 3216687034, %v2395_v57 }
 0x393   : > { %v3652_v18 = vpop.eup %3651  ;;  %v2438_v29 = vadd.bf16 1068908470, %v2422_v45  ;;  %v2425_v20 = vmul.bf16 %v2409_v28, %v5044_v63  ;;  %v2424_v30 = vmul.bf16 %v2408_v55, %v5042_v60  ;;  %v2413_v8 = vadd.bf16 3216687034, %v2397_v44 }
 0x394   : > { %v2666_v53 = vsub.bf16 0, %v2634_v4  ;;  %v5121_v40 = vpop.eup %3653  ;;  %v2487_v22 = vmul.bf16 %v2471_v54, %v5017_v26  ;;  %v2412_v41 = vadd.bf16 3216687034, %v2396_v42  ;;  %v5132_v0 = vmul.bf16 1065369472, %v3650_v34 }
 0x395   : > { %v5125_v23 = vpop.eup %3655  ;;  %v5134_v3 = vmul.bf16 1065369472, %v3652_v18  ;;  %v2454_v45 = vmul.bf16 %v2438_v29, %v5015_v10  ;;  %v2441_v28 = vadd.bf16 1068908470, %v2425_v20  ;;  %v2440_v55 = vadd.bf16 1068908470, %v2424_v30 }
 0x396   : > { %v5129_v62 = vsel %vm5091_vm3, %v2634_v4, %v2666_v53  ;;  %v2503_v11 = vadd.bf16 1048723074, %v2487_v22  ;;  %v2427_v57 = vmul.bf16 %v2411_v6, %v5073_v2  ;;  %v2429_v47 = vmul.bf16 %v2413_v8, %v5095_v9  ;;  %v3658_v48 = vpop.eup %3657 }
 0x397   : > { %v2470_v34 = vadd.bf16 3197288082, %v2454_v45  ;;  %v2457_v42 = vmul.bf16 %v2441_v28, %v5044_v63  ;;  %v2428_v18 = vmul.bf16 %v2412_v41, %v5078_v17  ;;  %v2456_v54 = vmul.bf16 %v2440_v55, %v5042_v60  ;;  %v5150_v30 = vpop.eup %3659 }
 0x398   : > { %v2519_v53 = vmul.bf16 %v2503_v11, %v5017_v26  ;;  %v2443_v29 = vadd.bf16 1068908470, %v2427_v57  ;;  %v2445_v20 = vadd.bf16 1068908470, %v2429_v47  ;;  %v2399_v8 = vmul.bf16 1065893768, %v5132_v0 }
 0x399   : > { %v2486_v38 = vmul.bf16 %v2470_v34, %v5015_v10  ;;  %v2473_v6 = vadd.bf16 3197288082, %v2457_v42  ;;  %v2444_v22 = vadd.bf16 1068908470, %v2428_v18  ;;  %v2472_v28 = vadd.bf16 3197288082, %v2456_v54 }
 0x39a   : > { %v2615_v45 = vmul.bf16 %v5049_v24, %v2519_v53  ;;  %v2459_v41 = vmul.bf16 %v2443_v29, %v5073_v2  ;;  %v2461_v26 = vmul.bf16 %v2445_v20, %v5095_v9  ;;  %v5157_v11 = vmul.bf16 1065369472, %v3658_v48 }
 0x39b   : > { %v3662_v44 = vpop.eup %3661  ;;  %v2502_v55 = vadd.bf16 1048723074, %v2486_v38  ;;  %v2489_v47 = vmul.bf16 %v2473_v6, %v5044_v63  ;;  %v2460_v57 = vmul.bf16 %v2444_v22, %v5078_v17  ;;  %v2488_v18 = vmul.bf16 %v2472_v28, %v5042_v60 }
 0x39c   : > { %v5167_v42 = vmul.bf16 1065369472, %v3662_v44  ;;  %v2631_v24 = vsub.bf16 1065369472, %v2615_v45  ;;  %v2475_v53 = vadd.bf16 3197288082, %v2459_v41  ;;  %v5170_v54 = vpop.eup %3663 }
 0x39d   : > { %v2518_v48 = vmul.bf16 %v2502_v55, %v5015_v10  ;;  %v2505_v29 = vadd.bf16 1048723074, %v2489_v47  ;;  %v2477_v20 = vadd.bf16 3197288082, %v2461_v26  ;;  %v2476_v38 = vadd.bf16 3197288082, %v2460_v57  ;;  %v3666_v55 = vpop.eup %3665 }
 0x39e   : > { %v2663_v6 = vsub.bf16 0, %v2631_v24  ;;  %v2504_v44 = vadd.bf16 1048723074, %v2488_v18  ;;  %v2491_v22 = vmul.bf16 %v2475_v53, %v5073_v2  ;;  %v2415_v45 = vadd.bf16 3216687034, %v2399_v8 }
 0x39f   : > { %v2614_v10 = vmul.bf16 %v5030_v1, %v2518_v48  ;;  %v2521_v41 = vmul.bf16 %v2505_v29, %v5044_v63  ;;  %v2493_v46 = vmul.bf16 %v2477_v20, %v5095_v9  ;;  %v2492_v26 = vmul.bf16 %v2476_v38, %v5078_v17 }
 0x3a0   : > { %v2679_v47 = vsel %vm5141_vm4, %v2631_v24, %v2663_v6  ;;  %v2520_v8 = vmul.bf16 %v2504_v44, %v5042_v60  ;;  %v2507_v57 = vadd.bf16 1048723074, %v2491_v22  ;;  %v2431_v52 = vmul.bf16 %v2415_v45, %v5132_v0 }
 0x3a1   : > { %v2695_v1 = vadd.bf16 1065369472, %v2679_v47  ;;  %v2630_v63 = vsub.bf16 1065369472, %v2614_v10  ;;  %v2617_v53 = vmul.bf16 %v5071_v43, %v2521_v41  ;;  %v2509_v48 = vadd.bf16 1048723074, %v2493_v46 }
 0x3a2   : > { %v2616_v60 = vmul.bf16 %v5051_v13, %v2520_v8  ;;  %v2523_v24 = vmul.bf16 %v2507_v57, %v5073_v2  ;;  %v2508_v29 = vadd.bf16 1048723074, %v2492_v26  ;;  %v2447_v39 = vadd.bf16 1068908470, %v2431_v52 }
 0x3a3   : > { %v5543_v20 = vmul.bf16 1056980736, %v4931_v58  ;;  %v2662_v6 = vsub.bf16 0, %v2630_v63  ;;  %v2633_v44 = vsub.bf16 1065369472, %v2617_v53  ;;  %v2525_v43 = vmul.bf16 %v2509_v48, %v5095_v9 }
 0x3a4   : > { %v2632_v22 = vsub.bf16 1065369472, %v2616_v60  ;;  %v2619_v45 = vmul.bf16 %v5097_v59, %v2523_v24  ;;  %v2524_v50 = vmul.bf16 %v2508_v29, %v5078_v17  ;;  %v2463_v10 = vmul.bf16 %v2447_v39, %v5132_v0 }
 0x3a5   : > { %v2711_v38 = vmul.bf16 %v2695_v1, %v5543_v20  ;;  %v5544_v13 = vmul.bf16 1060454197, %v4982_v27  ;;  %v2678_v58 = vsel %vm5163_vm5, %v2630_v63, %v2662_v6  ;;  %v2665_v41 = vsub.bf16 0, %v2633_v44 }
 0x3a6   : > { %v2621_v9 = vmul.bf16 %v5121_v40, %v2525_v43  ;;  %v2398_v46 = vmul.bf16 1065893768, %v5104_v14  ;;  %v2694_v59 = vadd.bf16 1065369472, %v2678_v58  ;;  %v2664_v26 = vsub.bf16 0, %v2632_v22 }
 0x3a7   : > { %vm5217_vm10 = vcmp.ge.bf16.partialorder %v5544_v13, 0  ;;  %2893 = vmatprep.mubr.bf16.mxu0 %v2711_v38  ;;  %v2635_v17 = vsub.bf16 1065369472, %v2619_v45  ;;  %v2620_v47 = vmul.bf16 %v5102_v49, %v2524_v50  ;;  %v2681_v8 = vsel %vm5175_vm6, %v2633_v44, %v2665_v41 }
 0x3a8   : > { %v2637_v57 = vsub.bf16 1065369472, %v2621_v9  ;;  %v2479_v52 = vadd.bf16 3197288082, %v2463_v10  ;;  %v2414_v1 = vadd.bf16 3216687034, %v2398_v46  ;;  %v2680_v40 = vsel %vm5182_vm7, %v2632_v22, %v2664_v26 }
 0x3a9   : > { %v5547_v53 = vmul.bf16 1056980736, %v4927_v33  ;;  %v2697_v63 = vadd.bf16 1065369472, %v2681_v8  ;;  %v2667_v48 = vsub.bf16 0, %v2635_v17 }
 0x3aa   : > { %v5232_v60 = vmul.bf16 1065369472, %v3666_v55  ;;  %v2669_v24 = vsub.bf16 0, %v2637_v57  ;;  %v2636_v29 = vsub.bf16 1065369472, %v2620_v47  ;;  %v2495_v49 = vmul.bf16 %v2479_v52, %v5132_v0 }
 0x3ab   : > { %v2710_v34 = vmul.bf16 %v2694_v59, %v5547_v53  ;;  %v2713_v39 = vmul.bf16 %v2697_v63, %v5548_v7  ;;  %v2683_v20 = vsel %vm5196_vm8, %v2635_v17, %v2667_v48  ;;  %v2430_v33 = vmul.bf16 %v2414_v1, %v5104_v14 }
 0x3ac   : > { %v2401_v38 = vmul.bf16 1065893768, %v5157_v11  ;;  %v2696_v28 = vadd.bf16 1065369472, %v2680_v40  ;;  %v2699_v6 = vadd.bf16 1065369472, %v2683_v20  ;;  %v2685_v55 = vsel %vm5203_vm9, %v2637_v57, %v2669_v24 }
 0x3ad   : > { %2894 = vmatmul.mubr.bf16.gmra.mxu0 %v2710_v34  ;;  %v2668_v44 = vsub.bf16 0, %v2636_v29  ;;  %v5549_v43 = vmul.bf16 1069105081, %v5080_v25  ;;  %v2701_v22 = vadd.bf16 1065369472, %v2685_v55 }
 0x3ae   : > { %2901 = vmatprep.mubr.bf16.mxu0 %v2713_v39  ;;  %v2511_v36 = vadd.bf16 1048723074, %v2495_v49  ;;  %v2446_v45 = vadd.bf16 1068908470, %v2430_v33  ;;  %v5550_v18 = vmul.bf16 1056980736, %v4963_v21 }
 0x3af   : > { %3667 = vpow.bf16 %v5549_v43  ;;  %v5551_v50 = vadd.bf16 1065369472, %v5129_v62  ;;  %v5552_v13 = vmul.bf16 1056980736, %v4968_v16  ;;  %v2417_v41 = vadd.bf16 3216687034, %v2401_v38 }
 0x3b0   : > { %v2400_v4 = vmul.bf16 1065893768, %v5134_v3  ;;  %v5553_v9 = vmul.bf16 1056980736, %v4995_v51  ;;  %v2684_v25 = vsel %vm5217_vm10, %v2636_v29, %v2668_v44  ;;  %v2527_v59 = vmul.bf16 %v2511_v36, %v5132_v0 }
 0x3b1   : > { %v2714_v10 = vmul.bf16 %v5551_v50, %v5550_v18  ;;  %v2715_v58 = vmul.bf16 %v2699_v6, %v5552_v13  ;;  %v2462_v26 = vmul.bf16 %v2446_v45, %v5104_v14  ;;  %v2433_v21 = vmul.bf16 %v2417_v41, %v5157_v11 }
 0x3b2   : > { %v2717_v46 = vmul.bf16 %v2701_v22, %v5553_v9  ;;  %v2416_v62 = vadd.bf16 3216687034, %v2400_v4  ;;  %v2403_v16 = vmul.bf16 1065893768, %v5232_v60  ;;  %v2402_v17 = vmul.bf16 1065893768, %v5167_v42 }
 0x3b3   : > { %2909 = vmatprep.mubr.bf16.mxu1 %v2715_v58  ;;  %v5554_v47 = vmul.bf16 1069105081, %v5085_v5  ;;  %v5555_v51 = vmul.bf16 1056980736, %v4946_v37  ;;  %v2623_v2 = vmul.bf16 %v5150_v30, %v2527_v59  ;;  %v2478_v0 = vadd.bf16 3197288082, %v2462_v26 }
 0x3b4   : > { %2910 = vmatmul.mubr.bf16.vlgmr.msra.gmra.mxu1 %v2714_v10  ;;  %v2449_v57 = vadd.bf16 1068908470, %v2433_v21  ;;  %v2432_v52 = vmul.bf16 %v2416_v62, %v5134_v3  ;;  %v2419_v1 = vadd.bf16 3216687034, %v2403_v16  ;;  %v2418_v53 = vadd.bf16 3216687034, %v2402_v17 }
 0x3b5   : > { %3669 = vpow.bf16 %v5554_v47  ;;  %v2712_v8 = vmul.bf16 %v2696_v28, %v5555_v51  ;;  %2917 = vmatprep.mubr.bf16.mxu1 %v2717_v46  ;;  %v5556_v34 = vmul.bf16 1069105081, %v5110_v15  ;;  %v2700_v63 = vadd.bf16 1065369472, %v2684_v25 }
 0x3b6   : > { %v2639_v5 = vsub.bf16 1065369472, %v2623_v2  ;;  %v2494_v40 = vmul.bf16 %v2478_v0, %v5104_v14  ;;  %v2465_v37 = vmul.bf16 %v2449_v57, %v5157_v11  ;;  %v2448_v48 = vadd.bf16 1068908470, %v2432_v52 }
 0x3b7   : > { %3671 = vpow.bf16 %v5556_v34  ;;  %2902 = vmatmul.mubr.bf16.gmra.mxu0 %v2712_v8  ;;  %v2435_v30 = vmul.bf16 %v2419_v1, %v5232_v60  ;;  %v2434_v24 = vmul.bf16 %v2418_v53, %v5167_v42  ;;  %v2284_v29 = vmul.bf16 1056980736, %v4982_v27 }
 0x3b8   : > { %v5557_v49 = vmul.bf16 1060454197, %v5009_v56  ;;  %v2671_v7 = vsub.bf16 0, %v2639_v5  ;;  %v2510_v15 = vadd.bf16 1048723074, %v2494_v40  ;;  %v2464_v20 = vmul.bf16 %v2448_v48, %v5134_v3 }
 0x3b9   : > { %v2481_v39 = vadd.bf16 3197288082, %v2465_v37  ;;  %v2451_v33 = vadd.bf16 1068908470, %v2435_v30  ;;  %v2450_v38 = vadd.bf16 1068908470, %v2434_v24  ;;  %v2716_v6 = vmul.bf16 %v2700_v63, %v2284_v29 }
 0x3ba   : > { %vm2655_vm11 = vcmp.ge.bf16.partialorder %v5557_v49, 0  ;;  %v2287_v28 = vmul.bf16 1056980736, %v5009_v56  ;;  %v2526_v44 = vmul.bf16 %v2510_v15, %v5104_v14  ;;  %v2480_v27 = vadd.bf16 3197288082, %v2464_v20 }
 0x3bb   : > { %v2687_v55 = vsel %vm2655_vm11, %v2639_v5, %v2671_v7  ;;  %v2497_v22 = vmul.bf16 %v2481_v39, %v5157_v11  ;;  %v2467_v36 = vmul.bf16 %v2451_v33, %v5232_v60  ;;  %v2466_v18 = vmul.bf16 %v2450_v38, %v5167_v42 }
 0x3bc   : > { %v2703_v43 = vadd.bf16 1065369472, %v2687_v55  ;;  %2918 = vmatmul.mubr.bf16.gmra.mxu1 %v2716_v6  ;;  %v2622_v45 = vmul.bf16 %v5125_v23, %v2526_v44  ;;  %v2496_v13 = vmul.bf16 %v2480_v27, %v5134_v3  ;;  %v5558_v23 = vmul.bf16 1060454197, %v5006_v19 }
 0x3bd   : > { %v2513_v10 = vadd.bf16 1048723074, %v2497_v22  ;;  %v2483_v56 = vadd.bf16 3197288082, %v2467_v36  ;;  %v3668_v58 = vpop.eup %3667  ;;  %v2482_v4 = vadd.bf16 3197288082, %v2466_v18 }
 0x3be   : > { %v2719_v50 = vmul.bf16 %v2703_v43, %v2287_v28  ;;  %v2638_v41 = vsub.bf16 1065369472, %v2622_v45  ;;  %v2512_v9 = vadd.bf16 1048723074, %v2496_v13  ;;  %vm2654_vm12 = vcmp.ge.bf16.partialorder %v5558_v23, 0 }
 0x3bf   : > { %v2529_v14 = vmul.bf16 %v2513_v10, %v5157_v11  ;;  %v2499_v46 = vmul.bf16 %v2483_v56, %v5232_v60  ;;  %v2498_v59 = vmul.bf16 %v2482_v4, %v5167_v42  ;;  %v2286_v17 = vmul.bf16 1056980736, %v5006_v19 }
 0x3c0   : > { %2925 = vmatprep.mubr.bf16.mxu1 %v2719_v50  ;;  %v2670_v25 = vsub.bf16 0, %v2638_v41  ;;  %v2528_v21 = vmul.bf16 %v2512_v9, %v5134_v3  ;;  %v5559_v3 = vmul.bf16 1060454197, %v5034_v12  ;;  %v5560_v19 = vmul.bf16 1060454197, %v5026_v31 }
 0x3c1   : > { %v2625_v26 = vmul.bf16 %v3668_v58, %v2529_v14  ;;  %v2515_v62 = vadd.bf16 1048723074, %v2499_v46  ;;  %v2514_v51 = vadd.bf16 1048723074, %v2498_v59  ;;  %v5561_v29 = vmul.bf16 1060454197, %v5067_v32 }
 0x3c2   : > { %v2686_v47 = vsel %vm2654_vm12, %v2638_v41, %v2670_v25  ;;  %v2624_v2 = vmul.bf16 %v5170_v54, %v2528_v21  ;;  %vm2657_vm13 = vcmp.ge.bf16.partialorder %v5559_v3, 0  ;;  %vm2656_vm14 = vcmp.ge.bf16.partialorder %v5560_v19, 0 }
 0x3c3   : > { %v3670_v16 = vpop.eup %3669  ;;  %v2702_v8 = vadd.bf16 1065369472, %v2686_v47  ;;  %v2641_v11 = vsub.bf16 1065369472, %v2625_v26  ;;  %v2531_v0 = vmul.bf16 %v2515_v62, %v5232_v60  ;;  %v2530_v52 = vmul.bf16 %v2514_v51, %v5167_v42 }
 0x3c4   : > { %v2640_v34 = vsub.bf16 1065369472, %v2624_v2  ;;  %v2289_v60 = vmul.bf16 1056980736, %v5034_v12  ;;  %vm2659_vm15 = vcmp.ge.bf16.partialorder %v5561_v29, 0 }
 0x3c5   : > { %v3672_v57 = vpop.eup %3671  ;;  %v2718_v1 = vmul.bf16 %v2702_v8, %v2286_v17  ;;  %v2673_v53 = vsub.bf16 0, %v2641_v11  ;;  %v2626_v5 = vmul.bf16 %v3670_v16, %v2530_v52  ;;  %v2288_v39 = vmul.bf16 1056980736, %v5026_v31 }
 0x3c6   : > { %v2627_v63 = vmul.bf16 %v3672_v57, %v2531_v0  ;;  %v2672_v37 = vsub.bf16 0, %v2640_v34  ;;  %v2291_v33 = vmul.bf16 1056980736, %v5067_v32  ;;  %v5562_v28 = vmul.bf16 1060454197, %v5064_v61 }
 0x3c7   : > { %2926 = vmatmul.mubr.bf16.gmra.mxu1 %v2718_v1  ;;  %v2689_v40 = vsel %vm2657_vm13, %v2641_v11, %v2673_v53  ;;  %v2642_v30 = vsub.bf16 1065369472, %v2626_v5  ;;  %v2290_v43 = vmul.bf16 1056980736, %v5064_v61  ;;  %v2756_v32 = vld [vmem:[%s5400_s8] sm:$0x1] }
 0x3c8   : > { %v2643_v54 = vsub.bf16 1065369472, %v2627_v63  ;;  %v2705_v48 = vadd.bf16 1065369472, %v2689_v40  ;;  %v2688_v42 = vsel %vm2656_vm14, %v2640_v34, %v2672_v37  ;;  %vm2658_vm0 = vcmp.ge.bf16.partialorder %v5562_v28, 0 }
 0x3c9   : > { %v2704_v7 = vadd.bf16 1065369472, %v2688_v42  ;;  %v2674_v15 = vsub.bf16 0, %v2642_v30  ;;  %v2959_v36 = vpack.i.b16 %v2756_v32, %v2756_v32 }
 0x3ca   : > { %v2675_v24 = vsub.bf16 0, %v2643_v54  ;;  %v2721_v49 = vmul.bf16 %v2705_v48, %v2289_v60 }
 0x3cb   : > { %v2720_v12 = vmul.bf16 %v2704_v7, %v2288_v39  ;;  %v2690_v55 = vsel %vm2658_vm0, %v2642_v30, %v2674_v15  ;;  %v5311_v13 = vrot.slane %v2959_v36, %v5487_v35 }
 0x3cc   : > { %v2691_v20 = vsel %vm2659_vm15, %v2643_v54, %v2675_v24  ;;  %2933 = vmatprep.mubr.bf16.mxu1 %v2721_v49  ;;  %v2706_v44 = vadd.bf16 1065369472, %v2690_v55 }
 0x3cd   : > { %v2707_v38 = vadd.bf16 1065369472, %v2691_v20 }
 0x3ce   : > { %v2722_v22 = vmul.bf16 %v2706_v44, %v2290_v43 }
 0x3cf   : > { %v2723_v6 = vmul.bf16 %v2707_v38, %v2291_v33  ;;  %2934 = vmatmul.mubr.bf16.gmra.mxu1 %v2720_v12 }
 0x3d1   : > { %2941 = vmatprep.mubr.bf16.mxu1 %v2723_v6 }
 0x3d7   : > { %2942 = vmatmul.mubr.bf16.gmra.mxu1 %v2722_v22 }
 0x451   : > { %v3231_v31 = vpop.f32.mrf.mxu0 }
 0x453   : > { %v3232_v27 = vpop.f32.mrf.mxu0 }
 0x454   : > { %v3233_v50 = vadd.f32 %v3232_v27, %v3231_v31 }
 0x455   : > { %v3234_v45 = vpop.f32.mrf.mxu0 }
 0x457   : > { %v3235_v18 = vpop.f32.mrf.mxu0 }
 0x458   : > { %v3236_v10 = vadd.f32 %v3235_v18, %v3234_v45 }
 0x45a   : > { %v2950_v61 = vpack.c.bf16 %v3236_v10, %v3233_v50 }
 0x45c   : > { %v2965_v56 = vadd.bf16 %v5311_v13, %v2950_v61 }
 0x45e   : > { %v2973_v58 = vunpack.c.l.bf16 %v2965_v56  ;;  %v2974_v41 = vunpack.c.h.bf16 %v2965_v56 }
 0x460   : > { %2989 = vst [vmem:[%s5316_s17] sm:$0xff] %v2973_v58  ;;  %2990 = vst [vmem:[%s5316_s17 + $0x8] sm:$0xff] %v2974_v41 }
 0x46d   : > { %v3237_v4 = vpop.f32.mrf.mxu0 }
 0x46f   : > { %v3238_v14 = vpop.f32.mrf.mxu0 }
 0x470   : > { %v3239_v35 = vadd.f32 %v3238_v14, %v3237_v4 }
 0x471   : > { %v3240_v9 = vpop.f32.mrf.mxu0 }
 0x473   : > { %v3241_v46 = vpop.f32.mrf.mxu0 }
 0x474   : > { %v3249_v25 = vpop.f32.mrf.mxu1  ;;  %v3242_v59 = vadd.f32 %v3241_v46, %v3240_v9 }
 0x476   : > { %v3250_v26 = vpop.f32.mrf.mxu1  ;;  %v2951_v21 = vpack.c.bf16 %v3242_v59, %v3239_v35 }
 0x477   : > { %v3243_v23 = vpop.f32.mrf.mxu0  ;;  %v3251_v2 = vadd.f32 %v3250_v26, %v3249_v25 }
 0x478   : > { %v3252_v16 = vpop.f32.mrf.mxu1  ;;  %v2966_v17 = vadd.bf16 %v5311_v13, %v2951_v21 }
 0x479   : > { %v3244_v62 = vpop.f32.mrf.mxu0 }
 0x47a   : > { %v3253_v51 = vpop.f32.mrf.mxu1  ;;  %v2975_v8 = vunpack.c.l.bf16 %v2966_v17  ;;  %v2976_v11 = vunpack.c.h.bf16 %v2966_v17  ;;  %v3245_v1 = vadd.f32 %v3244_v62, %v3243_v23 }
 0x47b   : > { %v3246_v47 = vpop.f32.mrf.mxu0  ;;  %v3254_v0 = vadd.f32 %v3253_v51, %v3252_v16 }
 0x47c   : > { %v3255_v52 = vpop.f32.mrf.mxu1  ;;  %2991 = vst [vmem:[%s5316_s17 + $0x10] sm:$0xff] %v2975_v8  ;;  %2992 = vst [vmem:[%s5316_s17 + $0x18] sm:$0xff] %v2976_v11 }
 0x47d   : > { %v3247_v57 = vpop.f32.mrf.mxu0  ;;  %v2953_v34 = vpack.c.bf16 %v3254_v0, %v3251_v2 }
 0x47e   : > { %v3248_v53 = vadd.f32 %v3247_v57, %v3246_v47  ;;  %v3256_v63 = vpop.f32.mrf.mxu1 }
 0x47f   : > { %v2968_v5 = vadd.bf16 %v5311_v13, %v2953_v34  ;;  %v3257_v42 = vadd.f32 %v3256_v63, %v3255_v52 }
 0x480   : > { %v2952_v3 = vpack.c.bf16 %v3248_v53, %v3245_v1  ;;  %v3258_v19 = vpop.f32.mrf.mxu1 }
 0x481   : > { %v2979_v37 = vunpack.c.l.bf16 %v2968_v5  ;;  %v2980_v54 = vunpack.c.h.bf16 %v2968_v5 }
 0x482   : > { %v2967_v40 = vadd.bf16 %v5311_v13, %v2952_v3  ;;  %v3259_v60 = vpop.f32.mrf.mxu1 }
 0x483   : > { %2995 = vst [vmem:[%s5316_s17 + $0x30] sm:$0xff] %v2979_v37  ;;  %2996 = vst [vmem:[%s5316_s17 + $0x38] sm:$0xff] %v2980_v54  ;;  %v3260_v24 = vadd.f32 %v3259_v60, %v3258_v19 }
 0x484   : > { %v2977_v48 = vunpack.c.l.bf16 %v2967_v40  ;;  %v2978_v30 = vunpack.c.h.bf16 %v2967_v40 }
 0x485   : > { %v2954_v29 = vpack.c.bf16 %v3260_v24, %v3257_v42 }
 0x486   : > { %2993 = vst [vmem:[%s5316_s17 + $0x20] sm:$0xff] %v2977_v48  ;;  %2994 = vst [vmem:[%s5316_s17 + $0x28] sm:$0xff] %v2978_v30 }
 0x487   : > { %v2969_v49 = vadd.bf16 %v5311_v13, %v2954_v29  ;;  %v3261_v7 = vpop.f32.mrf.mxu1 }
 0x489   : > { %v2981_v15 = vunpack.c.l.bf16 %v2969_v49  ;;  %v2982_v39 = vunpack.c.h.bf16 %v2969_v49  ;;  %v3262_v20 = vpop.f32.mrf.mxu1 }
 0x48a   : > { %v3263_v28 = vadd.f32 %v3262_v20, %v3261_v7 }
 0x48b   : > { %2997 = vst [vmem:[%s5316_s17 + $0x40] sm:$0xff] %v2981_v15  ;;  %2998 = vst [vmem:[%s5316_s17 + $0x48] sm:$0xff] %v2982_v39  ;;  %v3264_v33 = vpop.f32.mrf.mxu1 }
 0x48d   : > { %v3265_v38 = vpop.f32.mrf.mxu1 }
 0x48e   : > { %v3266_v12 = vadd.f32 %v3265_v38, %v3264_v33 }
 0x48f   : > { %v3267_v6 = vpop.f32.mrf.mxu1 }
 0x490   : > { %v2955_v55 = vpack.c.bf16 %v3266_v12, %v3263_v28 }
 0x491   : > { %v3268_v44 = vpop.f32.mrf.mxu1 }
 0x492   : > { %v2970_v43 = vadd.bf16 %v5311_v13, %v2955_v55  ;;  %v3269_v36 = vadd.f32 %v3268_v44, %v3267_v6 }
 0x493   : > { %v3270_v22 = vpop.f32.mrf.mxu1 }
 0x494   : > { %v2983_v31 = vunpack.c.l.bf16 %v2970_v43  ;;  %v2984_v32 = vunpack.c.h.bf16 %v2970_v43 }
 0x495   : > { %v3271_v27 = vpop.f32.mrf.mxu1 }
 0x496   : > { %2999 = vst [vmem:[%s5316_s17 + $0x50] sm:$0xff] %v2983_v31  ;;  %3000 = vst [vmem:[%s5316_s17 + $0x58] sm:$0xff] %v2984_v32  ;;  %v3272_v45 = vadd.f32 %v3271_v27, %v3270_v22 }
 0x497   : > { %v3273_v18 = vpop.f32.mrf.mxu1 }
 0x498   : > { %v2956_v50 = vpack.c.bf16 %v3272_v45, %v3269_v36 }
 0x499   : > { %v3274_v10 = vpop.f32.mrf.mxu1 }
 0x49a   : > { %v2971_v61 = vadd.bf16 %v5311_v13, %v2956_v50  ;;  %v3275_v14 = vadd.f32 %v3274_v10, %v3273_v18 }
 0x49b   : > { %v3276_v56 = vpop.f32.mrf.mxu1 }
 0x49c   : > { %v2985_v58 = vunpack.c.l.bf16 %v2971_v61  ;;  %v2986_v41 = vunpack.c.h.bf16 %v2971_v61 }
 0x49d   : > { %v3277_v4 = vpop.f32.mrf.mxu1 }
 0x49e   : > { %3001 = vst [vmem:[%s5316_s17 + $0x60] sm:$0xff] %v2985_v58  ;;  %3002 = vst [vmem:[%s5316_s17 + $0x68] sm:$0xff] %v2986_v41  ;;  %v3278_v9 = vadd.f32 %v3277_v4, %v3276_v56 }
 0x4a0   : > { %v2957_v46 = vpack.c.bf16 %v3278_v9, %v3275_v14 }
 0x4a2   : > { %v2972_v25 = vadd.bf16 %v5311_v13, %v2957_v46 }
 0x4a4   : > { %v2987_v35 = vunpack.c.l.bf16 %v2972_v25  ;;  %v2988_v59 = vunpack.c.h.bf16 %v2972_v25 }
 0x4a6   : > { %3003 = vst [vmem:[%s5316_s17 + $0x70] sm:$0xff] %v2987_v35  ;;  %3004 = vst [vmem:[%s5316_s17 + $0x78] sm:$0xff] %v2988_v59 }
 0x4a7   : > { %3738 = shalt.err (!%p3735_p3)
}
 0x4a8   : > { %s3739_s14 = scalar_lea.hbm %s5344_s18, 2048  ;;  %s3743_s17 = scalar_lea.hbm %s5401_s9, 4096 }
 0x4a9   : > { %p3740_p2 = scmp.ne.s32.totalorder %s5344_s18, %s3739_s14  ;;  %p3744_p6 = scmp.lt.s32.totalorder %s5344_s18, %s5401_s9 }
 0x4aa   : > { %p3745_p9 = scmp.lt.s32.totalorder %s3743_s17, %s3739_s14 }
 0x4ab   : > { %p3741_p4 = pnand %p3740_p2, %p3894_p5 }
 0x4ac   : > { %p3746_p12 = por %p3745_p9, %p3744_p6 }
 0x4ad   : > { %p3742_p13 = pneg %p3741_p4 }
 0x4af   : > { %p3747_p10 = pnand %p3746_p12, %p3742_p13 }
 0x4b1   : > { %3750 = shalt.err (!%p3747_p10)
}
 0x4b2   : > { %s3804_s23 = smov 128   ;;  %s3805_s13 = smov 8  }
 0x4b3   : > { %3303 = dma.vmem_to_hbm [thread:$0]  (%p3894_p5), %s5346_s25, 2048, %s5344_s18, %s5352_s21, %s3804_s23, %s3804_s23, %s3805_s13  }
 0x4b4 PF: > { %p3320_p7 = scmp.ge.s32.totalorder %s3793_s12, 2  ;;  %s3034_s24 = sand.u32 1, %s3781_s30  }
 0x4b5   : > { %p5563_p8 = scmp.ne.s32.totalorder %s5435_s20, 0  ;;  %s3035_s26 = scalar_lea.sflag [#allocation4], %s3034_s24 }
 0x4b7   : > { %p3313_p11 = pnand %p3320_p7, %p5563_p8 }
 0x4b9   : > { %p3314_p0 = pneg %p3313_p11 }
 0x4bb   : > { %3776 = dma.done.wait (%p3314_p0), %s3035_s26, 2048  }
 0x4bc   : > { %3778 = vsyncadd (%p3314_p0), %s3035_s26, 4294965248  ;;  %s5564_s28 = sld [smem:[#allocation11_spill]]  ;;  %p21_p1 = scmp.ge.s32.totalorder %s3881_s15, 4  }
 0x4bd   : > { %s5565_s30 = smov %s3785_s10  ;;  %s5566_s10 = smov %s3789_s11 }
 0x4be   : > { %s5568_s12 = smov %s3881_s15  ;;  %23 = sbr.rel (!%p21_p1) target bundleno = 5 (0x5), region = 100 }
 0x4c2   : > { %s5567_s11 = smov %s5564_s28 }
 0x4c3   :  { %3040 = vsyncpa [#allocation3], 1 }
 0x4c4   :  { %3042 = vsyncpa [#allocation3 + $0x1], 1 }
 0x4c5   :  { %3043 = vsyncpa [#allocation6], 1 }
 0x4c6   :  { %3044 = vsyncpa [#allocation4], 1 }
 0x4c7   :  { %3046 = vsyncpa [#allocation4 + $0x1], 1 }

</bundles_post_ra>
